<compile_context>
chip_gen: v7x
topology: tpu7x:2x2x1
jax: 0.10.0
libtpu: 0.0.40
codegen_flags: <defaults>
</compile_context>

<pallas_src>
import functools
import numpy as np

import jax
import jax.numpy as jnp
from jax.experimental import pallas as pl
from jax.experimental.pallas import tpu as pltpu

PRIMITIVES = ['none', 'skip_connect', '3d_conv_1x1', '2_1d_conv_3x3',
              '3d_conv_3x3', 'dil_conv_3x3', 'sep_conv_3x3']

_EPS = 1e-5      # BatchNorm3d default eps
_GROUPS = 4      # approx_channel_shuffle groups (hard-coded in the reference forward)

_VMEM = pl.BlockSpec(memory_space=pltpu.MemorySpace.VMEM)
_SMEM = pl.BlockSpec(memory_space=pltpu.MemorySpace.SMEM)


# ----------------------------------------------------------------------------
# Fused Pallas kernels (whole activation resident in VMEM, single invocation)
# ----------------------------------------------------------------------------
def _bn_train(y):
    """Training-mode BatchNorm3d(affine=False): per-channel stats over the position axis."""
    mean = jnp.mean(y, axis=0, keepdims=True)
    yc = y - mean
    var = jnp.mean(yc * yc, axis=0, keepdims=True)      # centred -> numerically safe
    return yc * jax.lax.rsqrt(var + _EPS)               # rsqrt on the EUP


def _preprocess_kernel(x_ref, w_ref, o_ref):
    """ReLUConvBN(C_in, C, k=1): fused ReLU -> 1x1x1 conv (MXU, bf16) -> BN."""
    r = jnp.maximum(x_ref[...], 0.0)
    y = jnp.dot(r.astype(jnp.bfloat16), w_ref[...], preferred_element_type=jnp.float32)
    o_ref[...] = _bn_train(y)


def _edge_a_kernel(col_ref, w_ref, scal_ref, o_ref, *, cq):
    """Stage A of one MixedOp edge.

    col_ref : (P, 54*cq) raw shared taps of xtemp: [27 taps dil=1 | 27 taps dil=2].
    w_ref   : (54*cq, 5*cq) packed bf16 weights, output columns:
              [0:cq) 3d_conv_3x3 | [cq:2cq) 3d_conv_1x1 | [2cq:3cq) (2+1)d spatial conv |
              [3cq:4cq) sep_conv dw1@pw1 | [4cq:5cq) dil_conv dw(dil2)@pw.
    scal_ref: SMEM [alpha_skip, alpha_1x1, alpha_3x3, alpha_dil].
    o_ref   : (P, 3*cq) = [partial sum | (2+1)d intermediate | sep stage-1 ReLU output].
    """
    col = col_ref[...]
    x_center = col[:, 13 * cq:14 * cq]                   # raw xtemp (identity / skip path)
    r = jnp.maximum(col, 0.0)                            # ReLU precedes every conv
    y = jnp.dot(r.astype(jnp.bfloat16), w_ref[...], preferred_element_type=jnp.float32)
    z = _bn_train(y)                                     # per-column BN for all packed convs
    a_skip = scal_ref[0]
    a_c11 = scal_ref[1]
    a_c33 = scal_ref[2]
    a_dil = scal_ref[3]
    partial = (a_skip * x_center
               + a_c33 * z[:, 0 * cq:1 * cq]
               + a_c11 * z[:, 1 * cq:2 * cq]
               + a_dil * z[:, 4 * cq:5 * cq])
    y21_mid = y[:, 2 * cq:3 * cq]                        # (2+1)d spatial conv output (no BN yet)
    sep_mid = jnp.maximum(z[:, 3 * cq:4 * cq], 0.0)      # sep stage-1 BN + ReLU
    o_ref[...] = jnp.concatenate([partial, y21_mid, sep_mid], axis=1)


def _edge_b_kernel(col_ref, part_ref, w_ref, scal_ref, o_ref, *, cq):
    """Stage B of one MixedOp edge.

    col_ref : (P, 30*cq) = [3 temporal taps of the (2+1)d intermediate | 27 taps of sep stage-1].
    w_ref   : (30*cq, 2*cq) packed bf16 weights: [(2+1)d temporal conv | sep dw2@pw2].
    scal_ref: SMEM [alpha_21d, alpha_sep, beta_edge].
    o_ref   : (P, cq) = beta * temp1  (alpha-weighted sum over all primitives).
    """
    y = jnp.dot(col_ref[...].astype(jnp.bfloat16), w_ref[...],
                preferred_element_type=jnp.float32)
    z = _bn_train(y)
    a_21d = scal_ref[0]
    a_sep = scal_ref[1]
    beta = scal_ref[2]
    o_ref[...] = beta * (part_ref[...]
                         + a_21d * z[:, 0 * cq:1 * cq]
                         + a_sep * z[:, 1 * cq:2 * cq])


def _call_preprocess(x_flat, w):
    P = x_flat.shape[0]
    C = w.shape[1]
    return pl.pallas_call(
        _preprocess_kernel,
        out_shape=jax.ShapeDtypeStruct((P, C), jnp.float32),
        in_specs=[_VMEM, _VMEM],
        out_specs=_VMEM,
    )(x_flat, w)


def _call_edge_a(colA, wA, scalA, cq):
    P = colA.shape[0]
    return pl.pallas_call(
        functools.partial(_edge_a_kernel, cq=cq),
        out_shape=jax.ShapeDtypeStruct((P, 3 * cq), jnp.float32),
        in_specs=[_VMEM, _VMEM, _SMEM],
        out_specs=_VMEM,
    )(colA, wA, scalA)


def _call_edge_b(colB, partial, wB, scalB, cq):
    P = colB.shape[0]
    return pl.pallas_call(
        functools.partial(_edge_b_kernel, cq=cq),
        out_shape=jax.ShapeDtypeStruct((P, cq), jnp.float32),
        in_specs=[_VMEM, _VMEM, _VMEM, _SMEM],
        out_specs=_VMEM,
    )(colB, partial, wB, scalB)


# ----------------------------------------------------------------------------
# JAX glue: channel shuffle, tap extraction, cell wiring
# ----------------------------------------------------------------------------
def _taps_flat(x, kd, kh, kw, dil=1):
    """im2col: (N,D,H,W,C) -> (N*D*H*W, kd*kh*kw*C), tap-major / channel-minor columns."""
    N, D, H, W, C = x.shape
    pd, ph, pw = dil * (kd // 2), dil * (kh // 2), dil * (kw // 2)
    xp = jnp.pad(x, ((0, 0), (pd, pd), (ph, ph), (pw, pw), (0, 0)))
    pats = []
    for a in range(kd):
        for b in range(kh):
            for c in range(kw):
                pats.append(xp[:, a * dil:a * dil + D,
                               b * dil:b * dil + H,
                               c * dil:c * dil + W, :])
    col = jnp.concatenate(pats, axis=-1)
    return col.reshape(N * D * H * W, len(pats) * C)


def _shuffle_perm(C, groups):
    # approx_channel_shuffle: shuffled[c] = x[(c % groups) * (C // groups) + c // groups]
    return np.arange(C).reshape(groups, C // groups).T.reshape(-1)


def _prepare_state(h, cq):
    """Channel shuffle + partial-channel split + tap extraction, shared across edges."""
    C = h.shape[-1]
    perm = _shuffle_perm(C, _GROUPS)
    shuffled = h[..., perm]
    xtemp = shuffled[..., :cq]          # the C/4 channels the primitives operate on
    xtemp2 = shuffled[..., cq:]         # untouched 3C/4 channels
    col1 = _taps_flat(xtemp, 3, 3, 3, dil=1)   # shared by 3x3x3 / sep dw1 / (2+1)d / 1x1 / skip
    col2 = _taps_flat(xtemp, 3, 3, 3, dil=2)   # dil_conv depthwise taps
    colA = jnp.concatenate([col1, col2], axis=-1)
    return colA, xtemp2


def _edge_forward(colA, xtemp2, ew, alpha_e, beta_e, cq, dims):
    N, D, H, W = dims
    scalA = jnp.stack([alpha_e[1], alpha_e[2], alpha_e[4], alpha_e[5]]).astype(jnp.float32)
    outA = _call_edge_a(colA, ew['wA'], scalA, cq)
    partial = outA[:, :cq]
    y21_mid = outA[:, cq:2 * cq].reshape(N, D, H, W, cq)
    sep_mid = outA[:, 2 * cq:].reshape(N, D, H, W, cq)
    colB = jnp.concatenate([_taps_flat(y21_mid, 3, 1, 1, dil=1),
                            _taps_flat(sep_mid, 3, 3, 3, dil=1)], axis=-1)
    scalB = jnp.stack([alpha_e[3], alpha_e[6], beta_e]).astype(jnp.float32)
    temp1 = _call_edge_b(colB, partial, ew['wB'], scalB, cq).reshape(N, D, H, W, cq)
    # MixedOp output = cat([temp1, xtemp2], channel); beta already folded onto temp1 in-kernel.
    return jnp.concatenate([temp1, beta_e * xtemp2], axis=-1)


def cell_pcdarts_forward(params, s, alphas, betas, *, nodes, multiplier):
    N, D, H, W, _ = s.shape
    C = params['pre_w'].shape[1]
    cq = C // _GROUPS
    P = N * D * H * W
    s0 = _call_preprocess(s.reshape(P, -1), params['pre_w']).reshape(N, D, H, W, C)
    states = [s0]
    prep_cache = {}                     # shuffle + taps computed once per state
    offset = 0
    for _ in range(nodes):
        contribs = []
        for j, h in enumerate(states):
            e = offset + j
            if j not in prep_cache:
                prep_cache[j] = _prepare_state(h, cq)
            colA, xtemp2 = prep_cache[j]
            contribs.append(_edge_forward(colA, xtemp2, params['edges'][e],
                                          alphas[e], betas[e], cq, (N, D, H, W)))
        offset += len(states)
        states.append(sum(contribs))
    return jnp.concatenate(states[-multiplier:], axis=-1)   # torch.cat(dim=1) == channel concat


# ----------------------------------------------------------------------------
# Parameter construction (random weights; packed into the fused matmul layout)
# ----------------------------------------------------------------------------
def _dw_as_matrix(dw, cq):
    """Depthwise (T, cq) taps -> (T*cq, cq) block-sparse matrix matching the tap-major columns."""
    T = dw.shape[0]
    m = np.zeros((T * cq, cq), np.float32)
    for t in range(T):
        m[t * cq:(t + 1) * cq, :] = np.diag(dw[t])
    return m


def init_params(seed, C_in, C, nodes):
    rng = np.random.default_rng(seed)
    cq = C // _GROUPS

    def w(shape, scale=0.1):
        return (rng.standard_normal(shape) * scale).astype(np.float32)

    params = {'pre_w': jnp.asarray(w((C_in, C)), jnp.bfloat16), 'edges': []}
    n_edges = nodes * (nodes + 1) // 2          # edges actually used by the reference forward
    for _ in range(n_edges):
        w33 = w((27 * cq, cq))                  # 3d_conv_3x3
        w11 = w((cq, cq))                       # 3d_conv_1x1
        wsp = w((9 * cq, cq))                   # 2_1d conv, spatial (1,3,3) part
        wtm = w((3 * cq, cq))                   # 2_1d conv, temporal (3,1,1) part
        dwd, pwd = w((27, cq)), w((cq, cq))     # dil_conv: dw (dil=2) + pw
        dw1, pw1 = w((27, cq)), w((cq, cq))     # sep_conv stage 1
        dw2, pw2 = w((27, cq)), w((cq, cq))     # sep_conv stage 2

        # Stage-A packed weight: single (54*cq, 5*cq) matmul on the shared taps.
        wA = np.zeros((54 * cq, 5 * cq), np.float32)
        wA[:27 * cq, 0 * cq:1 * cq] = w33                            # 3x3x3 conv
        wA[13 * cq:14 * cq, 1 * cq:2 * cq] = w11                     # 1x1x1 conv (centre tap)
        wA[9 * cq:18 * cq, 2 * cq:3 * cq] = wsp                      # (2+1)d spatial conv
        wA[:27 * cq, 3 * cq:4 * cq] = _dw_as_matrix(dw1, cq) @ pw1   # sep dw1 composed with pw1
        wA[27 * cq:, 4 * cq:5 * cq] = _dw_as_matrix(dwd, cq) @ pwd   # dil dw (dil=2) composed w/ pw

        # Stage-B packed weight: single (30*cq, 2*cq) matmul on the intermediate taps.
        wB = np.zeros((30 * cq, 2 * cq), np.float32)
        wB[:3 * cq, 0 * cq:1 * cq] = wtm                             # (2+1)d temporal conv
        wB[3 * cq:, 1 * cq:2 * cq] = _dw_as_matrix(dw2, cq) @ pw2    # sep dw2 composed with pw2

        params['edges'].append({'wA': jnp.asarray(wA, jnp.bfloat16),
                                'wB': jnp.asarray(wB, jnp.bfloat16)})
    return params


if __name__ == "__main__":
    nodes, multiplier = 2, 2
    N, D, H, W = 2, 4, 8, 8
    C_in, C = 6, 16                     # C must be divisible by 4 (partial-channel split)

    key = jax.random.PRNGKey(0)
    k_s, k_a, k_b = jax.random.split(key, 3)
    s = jax.random.normal(k_s, (N, D, H, W, C_in), jnp.float32)

    n_edges = nodes * (nodes + 1) // 2
    alphas = jax.nn.softmax(
        jax.random.normal(k_a, (n_edges, len(PRIMITIVES)), jnp.float32), axis=-1)
    betas = jax.nn.softmax(
        jax.random.normal(k_b, (n_edges,), jnp.float32), axis=-1)

    params = init_params(0, C_in, C, nodes)

    fwd = jax.jit(functools.partial(cell_pcdarts_forward,
                                    nodes=nodes, multiplier=multiplier))
    out = jax.block_until_ready(fwd(params, s, alphas, betas))

    assert out.shape == (N, D, H, W, multiplier * C), out.shape
    assert bool(jnp.all(jnp.isfinite(out)))
    print("KERNEL_OK")
</pallas_src>

<mosaic_0001>
module attributes {stable_mosaic.version = 11 : i64} {
  func.func @_preprocess_kernel(%arg0: memref<512x6xf32, #tpu.memory_space<vmem>>, %arg1: memref<6x16xbf16, #tpu.memory_space<vmem>>, %arg2: memref<512x16xf32, #tpu.memory_space<vmem>>) attributes {dimension_semantics = [], scalar_prefetch = 0 : i64, scratch_operands = 0 : i64, tpu.core_type = #tpu.core_type<tc>} {
    %c0 = arith.constant 0 : index
    %c0_0 = arith.constant 0 : index
    %0 = vector.load %arg0[%c0, %c0_0] : memref<512x6xf32, #tpu.memory_space<vmem>>, vector<512x6xf32>
    %cst = arith.constant 0.000000e+00 : f32
    %1 = vector.broadcast %cst : f32 to vector<512x6xf32>
    %2 = arith.maximumf %0, %1 : vector<512x6xf32>
    %3 = arith.truncf %2 : vector<512x6xf32> to vector<512x6xbf16>
    %c0_1 = arith.constant 0 : index
    %c0_2 = arith.constant 0 : index
    %4 = vector.load %arg1[%c0_1, %c0_2] : memref<6x16xbf16, #tpu.memory_space<vmem>>, vector<6x16xbf16>
    %cst_3 = arith.constant dense<0.000000e+00> : vector<512x16xf32>
    %5 = tpu.matmul %3, %4, %cst_3 {dimension_numbers = #tpu.dot_dimension_numbers<[1], [0], [0], [1], [0, 0, 1, 1], [], []>} : vector<512x6xbf16>, vector<6x16xbf16>, vector<512x16xf32> -> vector<512x16xf32>
    %cst_4 = arith.constant dense<0.000000e+00> : vector<16xf32>
    %6 = vector.multi_reduction <add>, %5, %cst_4 [0] : vector<512x16xf32> to vector<16xf32>
    %7 = vector.shape_cast %6 : vector<16xf32> to vector<1x16xf32>
    %cst_5 = arith.constant 5.120000e+02 : f32
    %8 = vector.broadcast %cst_5 : f32 to vector<1x16xf32>
    %9 = arith.divf %7, %8 : vector<1x16xf32>
    %10 = vector.broadcast %9 : vector<1x16xf32> to vector<512x16xf32>
    %11 = arith.subf %5, %10 : vector<512x16xf32>
    %12 = arith.mulf %11, %11 : vector<512x16xf32>
    %cst_6 = arith.constant dense<0.000000e+00> : vector<16xf32>
    %13 = vector.multi_reduction <add>, %12, %cst_6 [0] : vector<512x16xf32> to vector<16xf32>
    %14 = vector.shape_cast %13 : vector<16xf32> to vector<1x16xf32>
    %cst_7 = arith.constant 5.120000e+02 : f32
    %15 = vector.broadcast %cst_7 : f32 to vector<1x16xf32>
    %16 = arith.divf %14, %15 : vector<1x16xf32>
    %cst_8 = arith.constant 9.99999974E-6 : f32
    %17 = vector.broadcast %cst_8 : f32 to vector<1x16xf32>
    %18 = arith.addf %16, %17 : vector<1x16xf32>
    %19 = math.rsqrt %18 : vector<1x16xf32>
    %20 = vector.broadcast %19 : vector<1x16xf32> to vector<512x16xf32>
    %21 = arith.mulf %11, %20 : vector<512x16xf32>
    %c0_9 = arith.constant 0 : index
    %c0_10 = arith.constant 0 : index
    %22 = vector.load %arg2[%c0_9, %c0_10] : memref<512x16xf32, #tpu.memory_space<vmem>>, vector<512x16xf32>
    tpu.vector_store %arg2[%c0_9, %c0_10], %21 {strides = array<i32>} : memref<512x16xf32, #tpu.memory_space<vmem>>, vector<512x16xf32>,
    return
  }
}

module attributes {stable_mosaic.version = 11 : i64} {
  func.func @_edge_a_kernel(%arg0: memref<512x216xf32, #tpu.memory_space<vmem>>, %arg1: memref<216x20xbf16, #tpu.memory_space<vmem>>, %arg2: memref<4xf32, #tpu.memory_space<smem>>, %arg3: memref<512x12xf32, #tpu.memory_space<vmem>>) attributes {dimension_semantics = [], scalar_prefetch = 0 : i64, scratch_operands = 0 : i64, tpu.core_type = #tpu.core_type<tc>} {
    %c0 = arith.constant 0 : index
    %c0_0 = arith.constant 0 : index
    %0 = vector.load %arg0[%c0, %c0_0] : memref<512x216xf32, #tpu.memory_space<vmem>>, vector<512x216xf32>
    %1 = vector.extract_strided_slice %0 {offsets = [0, 52], sizes = [512, 4], strides = [1, 1]} : vector<512x216xf32> to vector<512x4xf32>
    %cst = arith.constant 0.000000e+00 : f32
    %2 = vector.broadcast %cst : f32 to vector<512x216xf32>
    %3 = arith.maximumf %0, %2 : vector<512x216xf32>
    %4 = arith.truncf %3 : vector<512x216xf32> to vector<512x216xbf16>
    %c0_1 = arith.constant 0 : index
    %c0_2 = arith.constant 0 : index
    %5 = vector.load %arg1[%c0_1, %c0_2] : memref<216x20xbf16, #tpu.memory_space<vmem>>, vector<216x20xbf16>
    %cst_3 = arith.constant dense<0.000000e+00> : vector<512x20xf32>
    %6 = tpu.matmul %4, %5, %cst_3 {dimension_numbers = #tpu.dot_dimension_numbers<[1], [0], [0], [1], [0, 0, 1, 1], [], []>} : vector<512x216xbf16>, vector<216x20xbf16>, vector<512x20xf32> -> vector<512x20xf32>
    %cst_4 = arith.constant dense<0.000000e+00> : vector<20xf32>
    %7 = vector.multi_reduction <add>, %6, %cst_4 [0] : vector<512x20xf32> to vector<20xf32>
    %8 = vector.shape_cast %7 : vector<20xf32> to vector<1x20xf32>
    %cst_5 = arith.constant 5.120000e+02 : f32
    %9 = vector.broadcast %cst_5 : f32 to vector<1x20xf32>
    %10 = arith.divf %8, %9 : vector<1x20xf32>
    %11 = vector.broadcast %10 : vector<1x20xf32> to vector<512x20xf32>
    %12 = arith.subf %6, %11 : vector<512x20xf32>
    %13 = arith.mulf %12, %12 : vector<512x20xf32>
    %cst_6 = arith.constant dense<0.000000e+00> : vector<20xf32>
    %14 = vector.multi_reduction <add>, %13, %cst_6 [0] : vector<512x20xf32> to vector<20xf32>
    %15 = vector.shape_cast %14 : vector<20xf32> to vector<1x20xf32>
    %cst_7 = arith.constant 5.120000e+02 : f32
    %16 = vector.broadcast %cst_7 : f32 to vector<1x20xf32>
    %17 = arith.divf %15, %16 : vector<1x20xf32>
    %cst_8 = arith.constant 9.99999974E-6 : f32
    %18 = vector.broadcast %cst_8 : f32 to vector<1x20xf32>
    %19 = arith.addf %17, %18 : vector<1x20xf32>
    %20 = math.rsqrt %19 : vector<1x20xf32>
    %21 = vector.broadcast %20 : vector<1x20xf32> to vector<512x20xf32>
    %22 = arith.mulf %12, %21 : vector<512x20xf32>
    %c0_9 = arith.constant 0 : index
    %23 = memref.load %arg2[%c0_9] : memref<4xf32, #tpu.memory_space<smem>>
    %c1 = arith.constant 1 : index
    %24 = memref.load %arg2[%c1] : memref<4xf32, #tpu.memory_space<smem>>
    %c2 = arith.constant 2 : index
    %25 = memref.load %arg2[%c2] : memref<4xf32, #tpu.memory_space<smem>>
    %c3 = arith.constant 3 : index
    %26 = memref.load %arg2[%c3] : memref<4xf32, #tpu.memory_space<smem>>
    %27 = vector.broadcast %23 : f32 to vector<512x4xf32>
    %28 = arith.mulf %27, %1 : vector<512x4xf32>
    %29 = vector.extract_strided_slice %22 {offsets = [0, 0], sizes = [512, 4], strides = [1, 1]} : vector<512x20xf32> to vector<512x4xf32>
    %30 = vector.broadcast %25 : f32 to vector<512x4xf32>
    %31 = arith.mulf %30, %29 : vector<512x4xf32>
    %32 = arith.addf %28, %31 : vector<512x4xf32>
    %33 = vector.extract_strided_slice %22 {offsets = [0, 4], sizes = [512, 4], strides = [1, 1]} : vector<512x20xf32> to vector<512x4xf32>
    %34 = vector.broadcast %24 : f32 to vector<512x4xf32>
    %35 = arith.mulf %34, %33 : vector<512x4xf32>
    %36 = arith.addf %32, %35 : vector<512x4xf32>
    %37 = vector.extract_strided_slice %22 {offsets = [0, 16], sizes = [512, 4], strides = [1, 1]} : vector<512x20xf32> to vector<512x4xf32>
    %38 = vector.broadcast %26 : f32 to vector<512x4xf32>
    %39 = arith.mulf %38, %37 : vector<512x4xf32>
    %40 = arith.addf %36, %39 : vector<512x4xf32>
    %41 = vector.extract_strided_slice %6 {offsets = [0, 8], sizes = [512, 4], strides = [1, 1]} : vector<512x20xf32> to vector<512x4xf32>
    %42 = vector.extract_strided_slice %22 {offsets = [0, 12], sizes = [512, 4], strides = [1, 1]} : vector<512x20xf32> to vector<512x4xf32>
    %cst_10 = arith.constant 0.000000e+00 : f32
    %43 = vector.broadcast %cst_10 : f32 to vector<512x4xf32>
    %44 = arith.maximumf %42, %43 : vector<512x4xf32>
    %45 = tpu.concatenate %40, %41, %44 in 1 : vector<512x4xf32>, vector<512x4xf32>, vector<512x4xf32> -> vector<512x12xf32>
    %c0_11 = arith.constant 0 : index
    %c0_12 = arith.constant 0 : index
    %46 = vector.load %arg3[%c0_11, %c0_12] : memref<512x12xf32, #tpu.memory_space<vmem>>, vector<512x12xf32>
    tpu.vector_store %arg3[%c0_11, %c0_12], %45 {strides = array<i32>} : memref<512x12xf32, #tpu.memory_space<vmem>>, vector<512x12xf32>,
    return
  }
}

module attributes {stable_mosaic.version = 11 : i64} {
  func.func @_edge_b_kernel(%arg0: memref<512x120xf32, #tpu.memory_space<vmem>>, %arg1: memref<512x4xf32, #tpu.memory_space<vmem>>, %arg2: memref<120x8xbf16, #tpu.memory_space<vmem>>, %arg3: memref<3xf32, #tpu.memory_space<smem>>, %arg4: memref<512x4xf32, #tpu.memory_space<vmem>>) attributes {dimension_semantics = [], scalar_prefetch = 0 : i64, scratch_operands = 0 : i64, tpu.core_type = #tpu.core_type<tc>} {
    %c0 = arith.constant 0 : index
    %c0_0 = arith.constant 0 : index
    %0 = vector.load %arg0[%c0, %c0_0] : memref<512x120xf32, #tpu.memory_space<vmem>>, vector<512x120xf32>
    %1 = arith.truncf %0 : vector<512x120xf32> to vector<512x120xbf16>
    %c0_1 = arith.constant 0 : index
    %c0_2 = arith.constant 0 : index
    %2 = vector.load %arg2[%c0_1, %c0_2] : memref<120x8xbf16, #tpu.memory_space<vmem>>, vector<120x8xbf16>
    %cst = arith.constant dense<0.000000e+00> : vector<512x8xf32>
    %3 = tpu.matmul %1, %2, %cst {dimension_numbers = #tpu.dot_dimension_numbers<[1], [0], [0], [1], [0, 0, 1, 1], [], []>} : vector<512x120xbf16>, vector<120x8xbf16>, vector<512x8xf32> -> vector<512x8xf32>
    %cst_3 = arith.constant dense<0.000000e+00> : vector<8xf32>
    %4 = vector.multi_reduction <add>, %3, %cst_3 [0] : vector<512x8xf32> to vector<8xf32>
    %5 = vector.shape_cast %4 : vector<8xf32> to vector<1x8xf32>
    %cst_4 = arith.constant 5.120000e+02 : f32
    %6 = vector.broadcast %cst_4 : f32 to vector<1x8xf32>
    %7 = arith.divf %5, %6 : vector<1x8xf32>
    %8 = vector.broadcast %7 : vector<1x8xf32> to vector<512x8xf32>
    %9 = arith.subf %3, %8 : vector<512x8xf32>
    %10 = arith.mulf %9, %9 : vector<512x8xf32>
    %cst_5 = arith.constant dense<0.000000e+00> : vector<8xf32>
    %11 = vector.multi_reduction <add>, %10, %cst_5 [0] : vector<512x8xf32> to vector<8xf32>
    %12 = vector.shape_cast %11 : vector<8xf32> to vector<1x8xf32>
    %cst_6 = arith.constant 5.120000e+02 : f32
    %13 = vector.broadcast %cst_6 : f32 to vector<1x8xf32>
    %14 = arith.divf %12, %13 : vector<1x8xf32>
    %cst_7 = arith.constant 9.99999974E-6 : f32
    %15 = vector.broadcast %cst_7 : f32 to vector<1x8xf32>
    %16 = arith.addf %14, %15 : vector<1x8xf32>
    %17 = math.rsqrt %16 : vector<1x8xf32>
    %18 = vector.broadcast %17 : vector<1x8xf32> to vector<512x8xf32>
    %19 = arith.mulf %9, %18 : vector<512x8xf32>
    %c0_8 = arith.constant 0 : index
    %20 = memref.load %arg3[%c0_8] : memref<3xf32, #tpu.memory_space<smem>>
    %c1 = arith.constant 1 : index
    %21 = memref.load %arg3[%c1] : memref<3xf32, #tpu.memory_space<smem>>
    %c2 = arith.constant 2 : index
    %22 = memref.load %arg3[%c2] : memref<3xf32, #tpu.memory_space<smem>>
    %c0_9 = arith.constant 0 : index
    %c0_10 = arith.constant 0 : index
    %23 = vector.load %arg1[%c0_9, %c0_10] : memref<512x4xf32, #tpu.memory_space<vmem>>, vector<512x4xf32>
    %24 = vector.extract_strided_slice %19 {offsets = [0, 0], sizes = [512, 4], strides = [1, 1]} : vector<512x8xf32> to vector<512x4xf32>
    %25 = vector.broadcast %20 : f32 to vector<512x4xf32>
    %26 = arith.mulf %25, %24 : vector<512x4xf32>
    %27 = arith.addf %23, %26 : vector<512x4xf32>
    %28 = vector.extract_strided_slice %19 {offsets = [0, 4], sizes = [512, 4], strides = [1, 1]} : vector<512x8xf32> to vector<512x4xf32>
    %29 = vector.broadcast %21 : f32 to vector<512x4xf32>
    %30 = arith.mulf %29, %28 : vector<512x4xf32>
    %31 = arith.addf %27, %30 : vector<512x4xf32>
    %32 = vector.broadcast %22 : f32 to vector<512x4xf32>
    %33 = arith.mulf %32, %31 : vector<512x4xf32>
    %c0_11 = arith.constant 0 : index
    %c0_12 = arith.constant 0 : index
    %34 = vector.load %arg4[%c0_11, %c0_12] : memref<512x4xf32, #tpu.memory_space<vmem>>, vector<512x4xf32>
    tpu.vector_store %arg4[%c0_11, %c0_12], %33 {strides = array<i32>} : memref<512x4xf32, #tpu.memory_space<vmem>>, vector<512x4xf32>,
    return
  }
}

</mosaic_0001>

<bundles_post_ra>
// kernel: cell_pcdarts_forward.7
= control target key start
LH: loop header
LB: loop body
LE: loop exit
PB: predicated region body
PF: predicated region fallthrough
CT: control target
= control target key end

     0   :  { %vm270_vm0 = vcmask 1042432   ;;  %vm173_vm1 = vcmask 48128   ;;  %vm563_vm2 = vcmask 130048   ;;  %s2566_s1 = inlined_call_operand.vmem [shape: bf16[6,16], index: 1, kind: input, shape index: {}]   ;;  %s2567_s0 = inlined_call_operand.vmem [shape: f32[512,6], index: 0, kind: input, shape index: {}]   ;;  %s2568_s2 = inlined_call_operand.vmem [shape: f32[512,16], index: 2, kind: output, shape index: {}]  }
   0x1   :  { %v172_v0 = vld [vmem:[%s2566_s1] sm:$0x7]  ;;  %v13_v2 = vld [vmem:[%s2567_s0 + $0x8] sm:$0xff]  ;;  %v14_v6 = vld [vmem:[%s2567_s0 + $0x10] sm:$0xff] }
   0x2   :  { %v12_v1 = vld [vmem:[%s2567_s0] sm:$0xff]  ;;  %1228 = vmatprep.subr.msk.bf16.mxu0 %vm270_vm0, %v172_v0  ;;  %v272_v3 = vsel %vm270_vm0, %v172_v0, 0  ;;  %v77_v5 = vmax.f32 %v13_v2, 0.0  ;;  %v15_v7 = vld [vmem:[%s2567_s0 + $0x18] sm:$0xff]  ;;  %1229 = vmatprep.subr.msk.bf16.mxu1 %vm270_vm0, %v172_v0  ;;  %v78_v9 = vmax.f32 %v14_v6, 0.0  ;;  %v17_v11 = vld [vmem:[%s2567_s0 + $0x28] sm:$0xff] }
   0x3   :  { %v76_v4 = vmax.f32 %v12_v1, 0.0  ;;  %v16_v8 = vld [vmem:[%s2567_s0 + $0x20] sm:$0xff]  ;;  %1161 = vmatpush3.bf16.msra.mxu0 %v272_v3  ;;  %v79_v10 = vmax.f32 %v15_v7, 0.0  ;;  %1227 = vmatpush3.bf16.msra.mxu1 %v272_v3  ;;  %v81_v14 = vmax.f32 %v17_v11, 0.0  ;;  %v18_v15 = vld [vmem:[%s2567_s0 + $0x30] sm:$0xff]  ;;  %v19_v16 = vld [vmem:[%s2567_s0 + $0x38] sm:$0xff] }
   0x4   :  { %v80_v12 = vmax.f32 %v16_v8, 0.0  ;;  %v20_v18 = vld [vmem:[%s2567_s0 + $0x40] sm:$0xff]  ;;  %v21_v19 = vld [vmem:[%s2567_s0 + $0x48] sm:$0xff]  ;;  %v82_v21 = vmax.f32 %v18_v15, 0.0  ;;  %v83_v22 = vmax.f32 %v19_v16, 0.0  ;;  %v22_v25 = vld [vmem:[%s2567_s0 + $0x50] sm:$0xff] }
   0x5   :  { %v140_v13 = vpack.c.bf16 %v77_v5, %v76_v4  ;;  %v141_v17 = vpack.c.bf16 %v79_v10, %v78_v9  ;;  %v84_v23 = vmax.f32 %v20_v18, 0.0  ;;  %v85_v24 = vmax.f32 %v21_v19, 0.0  ;;  %v23_v27 = vld [vmem:[%s2567_s0 + $0x58] sm:$0xff]  ;;  %v24_v28 = vld [vmem:[%s2567_s0 + $0x60] sm:$0xff]  ;;  %v25_v29 = vld [vmem:[%s2567_s0 + $0x68] sm:$0xff] }
   0x6   :  { %v142_v20 = vpack.c.bf16 %v81_v14, %v80_v12  ;;  %v143_v26 = vpack.c.bf16 %v83_v22, %v82_v21  ;;  %v44_v31 = vld [vmem:[%s2567_s0 + $0x100] sm:$0xff]  ;;  %v45_v32 = vld [vmem:[%s2567_s0 + $0x108] sm:$0xff]  ;;  %v46_v33 = vld [vmem:[%s2567_s0 + $0x110] sm:$0xff]  ;;  %v86_v40 = vmax.f32 %v22_v25, 0.0  ;;  %v87_v41 = vmax.f32 %v23_v27, 0.0 }
   0x7   :  { %1162 = vmatprep.mubr.msk.bf16.mxu0 %vm173_vm1, %v140_v13  ;;  %v144_v30 = vpack.c.bf16 %v85_v24, %v84_v23  ;;  %v47_v34 = vld [vmem:[%s2567_s0 + $0x118] sm:$0xff]  ;;  %v48_v35 = vld [vmem:[%s2567_s0 + $0x120] sm:$0xff]  ;;  %v49_v36 = vld [vmem:[%s2567_s0 + $0x128] sm:$0xff]  ;;  %v108_v37 = vmax.f32 %v44_v31, 0.0  ;;  %v109_v38 = vmax.f32 %v45_v32, 0.0  ;;  %v110_v39 = vmax.f32 %v46_v33, 0.0 }
   0x8   :  { %1163 = vmatmul.mubr.msk.bf16.vlgmr.msra.gmra.mrb[0].mxu0 %vm173_vm1, %v141_v17  ;;  %v111_v42 = vmax.f32 %v47_v34, 0.0  ;;  %v112_v43 = vmax.f32 %v48_v35, 0.0  ;;  %v88_v44 = vmax.f32 %v24_v28, 0.0  ;;  %v89_v45 = vmax.f32 %v25_v29, 0.0  ;;  %v50_v48 = vld [vmem:[%s2567_s0 + $0x130] sm:$0xff]  ;;  %v51_v49 = vld [vmem:[%s2567_s0 + $0x138] sm:$0xff] }
   0x9   :  { %1166 = vmatprep.mubr.msk.bf16.mxu0 %vm173_vm1, %v142_v20  ;;  %v156_v46 = vpack.c.bf16 %v109_v38, %v108_v37  ;;  %v113_v47 = vmax.f32 %v49_v36, 0.0  ;;  %v52_v51 = vld [vmem:[%s2567_s0 + $0x140] sm:$0xff]  ;;  %v53_v52 = vld [vmem:[%s2567_s0 + $0x148] sm:$0xff]  ;;  %v145_v54 = vpack.c.bf16 %v87_v41, %v86_v40  ;;  %v114_v55 = vmax.f32 %v50_v48, 0.0  ;;  %v26_v58 = vld [vmem:[%s2567_s0 + $0x70] sm:$0xff] }
   0xa   :  { %v157_v50 = vpack.c.bf16 %v111_v42, %v110_v39  ;;  %v115_v56 = vmax.f32 %v51_v49, 0.0  ;;  %v146_v57 = vpack.c.bf16 %v89_v45, %v88_v44  ;;  %v27_v59 = vld [vmem:[%s2567_s0 + $0x78] sm:$0xff]  ;;  %v116_v60 = vmax.f32 %v52_v51, 0.0  ;;  %v28_v62 = vld [vmem:[%s2567_s0 + $0x80] sm:$0xff]  ;;  %v29_v63 = vld [vmem:[%s2567_s0 + $0x88] sm:$0xff] }
   0xb   :  { %1194 = vmatprep.mubr.msk.bf16.mxu1 %vm173_vm1, %v156_v46  ;;  %v158_v53 = vpack.c.bf16 %v113_v47, %v112_v43  ;;  %v117_v61 = vmax.f32 %v53_v52, 0.0  ;;  %v90_v0 = vmax.f32 %v26_v58, 0.0  ;;  %v91_v1 = vmax.f32 %v27_v59, 0.0  ;;  %v54_v6 = vld [vmem:[%s2567_s0 + $0x150] sm:$0xff]  ;;  %v55_v7 = vld [vmem:[%s2567_s0 + $0x158] sm:$0xff]  ;;  %v56_v8 = vld [vmem:[%s2567_s0 + $0x160] sm:$0xff] }
   0xc   :  { %1195 = vmatmul.mubr.msk.bf16.vlgmr.msra.gmra.mrb[0].mxu1 %vm173_vm1, %v157_v50  ;;  %v159_v2 = vpack.c.bf16 %v115_v56, %v114_v55  ;;  %v92_v3 = vmax.f32 %v28_v62, 0.0  ;;  %v93_v4 = vmax.f32 %v29_v63, 0.0  ;;  %v57_v9 = vld [vmem:[%s2567_s0 + $0x168] sm:$0xff]  ;;  %v118_v11 = vmax.f32 %v54_v6, 0.0  ;;  %v30_v14 = vld [vmem:[%s2567_s0 + $0x90] sm:$0xff]  ;;  %v31_v15 = vld [vmem:[%s2567_s0 + $0x98] sm:$0xff] }
   0xd   :  { %1198 = vmatprep.mubr.msk.bf16.mxu1 %vm173_vm1, %v158_v53  ;;  %v160_v5 = vpack.c.bf16 %v117_v61, %v116_v60  ;;  %v147_v10 = vpack.c.bf16 %v91_v1, %v90_v0  ;;  %v119_v12 = vmax.f32 %v55_v7, 0.0  ;;  %v120_v16 = vmax.f32 %v56_v8, 0.0  ;;  %v32_v18 = vld [vmem:[%s2567_s0 + $0xa0] sm:$0xff]  ;;  %v33_v19 = vld [vmem:[%s2567_s0 + $0xa8] sm:$0xff]  ;;  %v59_v27 = vld [vmem:[%s2567_s0 + $0x178] sm:$0xff] }
   0xe   :  { %v148_v13 = vpack.c.bf16 %v93_v4, %v92_v3  ;;  %v121_v17 = vmax.f32 %v57_v9, 0.0  ;;  %v94_v20 = vmax.f32 %v30_v14, 0.0  ;;  %v95_v21 = vmax.f32 %v31_v15, 0.0  ;;  %v60_v28 = vld [vmem:[%s2567_s0 + $0x180] sm:$0xff]  ;;  %v61_v29 = vld [vmem:[%s2567_s0 + $0x188] sm:$0xff]  ;;  %v34_v34 = vld [vmem:[%s2567_s0 + $0xb0] sm:$0xff] }
   0xf   :  { %v161_v22 = vpack.c.bf16 %v119_v12, %v118_v11  ;;  %v96_v23 = vmax.f32 %v32_v18, 0.0  ;;  %v97_v24 = vmax.f32 %v33_v19, 0.0  ;;  %v123_v32 = vmax.f32 %v59_v27, 0.0  ;;  %v35_v35 = vld [vmem:[%s2567_s0 + $0xb8] sm:$0xff]  ;;  %v36_v38 = vld [vmem:[%s2567_s0 + $0xc0] sm:$0xff]  ;;  %v37_v39 = vld [vmem:[%s2567_s0 + $0xc8] sm:$0xff] }
  0x10   :  { %1167 = vmatmul.mubr.msk.bf16.gmra.mrb[4].mxu0 %vm173_vm1, %v143_v26  ;;  %v162_v25 = vpack.c.bf16 %v121_v17, %v120_v16  ;;  %v58_v26 = vld [vmem:[%s2567_s0 + $0x170] sm:$0xff]  ;;  %v124_v36 = vmax.f32 %v60_v28, 0.0  ;;  %v125_v37 = vmax.f32 %v61_v29, 0.0  ;;  %v98_v40 = vmax.f32 %v34_v34, 0.0  ;;  %v63_v47 = vld [vmem:[%s2567_s0 + $0x198] sm:$0xff]  ;;  %v64_v48 = vld [vmem:[%s2567_s0 + $0x1a0] sm:$0xff] }
  0x11   :  { %1170 = vmatprep.mubr.msk.bf16.mxu0 %vm173_vm1, %v144_v30  ;;  %v149_v30 = vpack.c.bf16 %v95_v21, %v94_v20  ;;  %v122_v31 = vmax.f32 %v58_v26, 0.0  ;;  %v150_v33 = vpack.c.bf16 %v97_v24, %v96_v23  ;;  %v99_v41 = vmax.f32 %v35_v35, 0.0  ;;  %v62_v46 = vld [vmem:[%s2567_s0 + $0x190] sm:$0xff]  ;;  %v65_v49 = vld [vmem:[%s2567_s0 + $0x1a8] sm:$0xff]  ;;  %v39_v55 = vld [vmem:[%s2567_s0 + $0xd8] sm:$0xff] }
  0x12   :  { %v100_v43 = vmax.f32 %v36_v38, 0.0  ;;  %v101_v44 = vmax.f32 %v37_v39, 0.0  ;;  %v164_v45 = vpack.c.bf16 %v125_v37, %v124_v36  ;;  %v126_v51 = vmax.f32 %v62_v46, 0.0  ;;  %v40_v58 = vld [vmem:[%s2567_s0 + $0xe0] sm:$0xff]  ;;  %v41_v59 = vld [vmem:[%s2567_s0 + $0xe8] sm:$0xff]  ;;  %v67_v3 = vld [vmem:[%s2567_s0 + $0x1b8] sm:$0xff] }
  0x13   :  { %v163_v42 = vpack.c.bf16 %v123_v32, %v122_v31  ;;  %v151_v50 = vpack.c.bf16 %v99_v41, %v98_v40  ;;  %v127_v52 = vmax.f32 %v63_v47, 0.0  ;;  %v128_v56 = vmax.f32 %v64_v48, 0.0  ;;  %v68_v4 = vld [vmem:[%s2567_s0 + $0x1c0] sm:$0xff]  ;;  %v43_v11 = vld [vmem:[%s2567_s0 + $0xf8] sm:$0xff]  ;;  %v70_v18 = vld [vmem:[%s2567_s0 + $0x1d0] sm:$0xff] }
  0x14   :  { %1199 = vmatmul.mubr.msk.bf16.gmra.mrb[4].mxu1 %vm173_vm1, %v159_v2  ;;  %v152_v53 = vpack.c.bf16 %v101_v44, %v100_v43  ;;  %v103_v61 = vmax.f32 %v39_v55, 0.0  ;;  %v104_v63 = vmax.f32 %v40_v58, 0.0  ;;  %v105_v0 = vmax.f32 %v41_v59, 0.0  ;;  %v66_v2 = vld [vmem:[%s2567_s0 + $0x1b0] sm:$0xff]  ;;  %v71_v19 = vld [vmem:[%s2567_s0 + $0x1d8] sm:$0xff]  ;;  %v72_v20 = vld [vmem:[%s2567_s0 + $0x1e0] sm:$0xff] }
  0x15   :  { %1202 = vmatprep.mubr.msk.bf16.mxu1 %vm173_vm1, %v160_v5  ;;  %v165_v62 = vpack.c.bf16 %v127_v52, %v126_v51  ;;  %v69_v5 = vld [vmem:[%s2567_s0 + $0x1c8] sm:$0xff]  ;;  %v130_v7 = vmax.f32 %v66_v2, 0.0  ;;  %v131_v8 = vmax.f32 %v67_v3, 0.0  ;;  %v132_v12 = vmax.f32 %v68_v4, 0.0  ;;  %v74_v29 = vld [vmem:[%s2567_s0 + $0x1f0] sm:$0xff] }
  0x16   :  { %v154_v9 = vpack.c.bf16 %v105_v0, %v104_v63  ;;  %v107_v15 = vmax.f32 %v43_v11, 0.0  ;;  %v73_v21 = vld [vmem:[%s2567_s0 + $0x1e8] sm:$0xff]  ;;  %v134_v23 = vmax.f32 %v70_v18, 0.0  ;;  %v135_v24 = vmax.f32 %v71_v19, 0.0 }
  0x17   :  { %v167_v16 = vpack.c.bf16 %v131_v8, %v130_v7  ;;  %v137_v26 = vmax.f32 %v73_v21, 0.0  ;;  %v138_v31 = vmax.f32 %v74_v29, 0.0 }
  0x18   :  { %1171 = vmatmul.mubr.msk.bf16.gmra.mrb[8].mxu0 %vm173_vm1, %v145_v54  ;;  %v38_v54 = vld [vmem:[%s2567_s0 + $0xd0] sm:$0xff]  ;;  %v169_v27 = vpack.c.bf16 %v135_v24, %v134_v23 }
  0x19   :  { %1174 = vmatprep.mubr.msk.bf16.mxu0 %vm173_vm1, %v146_v57  ;;  %v129_v57 = vmax.f32 %v65_v49, 0.0  ;;  %v102_v60 = vmax.f32 %v38_v54, 0.0 }
  0x1b   :  { %v166_v1 = vpack.c.bf16 %v129_v57, %v128_v56  ;;  %v153_v6 = vpack.c.bf16 %v103_v61, %v102_v60 }
  0x1c   :  { %1203 = vmatmul.mubr.msk.bf16.gmra.mrb[8].mxu1 %vm173_vm1, %v161_v22 }
  0x1d   :  { %1206 = vmatprep.mubr.msk.bf16.mxu1 %vm173_vm1, %v162_v25  ;;  %v136_v25 = vmax.f32 %v72_v20, 0.0 }
  0x1f   :  { %v170_v28 = vpack.c.bf16 %v137_v26, %v136_v25 }
  0x20   :  { %1175 = vmatmul.mubr.msk.bf16.gmra.mrb[12].mxu0 %vm173_vm1, %v147_v10  ;;  %v42_v10 = vld [vmem:[%s2567_s0 + $0xf0] sm:$0xff] }
  0x21   :  { %1178 = vmatprep.mubr.msk.bf16.mxu0 %vm173_vm1, %v148_v13  ;;  %v133_v13 = vmax.f32 %v69_v5, 0.0  ;;  %v106_v14 = vmax.f32 %v42_v10, 0.0 }
  0x23   :  { %v168_v17 = vpack.c.bf16 %v133_v13, %v132_v12  ;;  %v155_v22 = vpack.c.bf16 %v107_v15, %v106_v14 }
  0x24   :  { %1207 = vmatmul.mubr.msk.bf16.gmra.mrb[12].mxu1 %vm173_vm1, %v163_v42 }
  0x25   :  { %1210 = vmatprep.mubr.msk.bf16.mxu1 %vm173_vm1, %v164_v45 }
  0x28   :  { %1179 = vmatmul.mubr.msk.bf16.gmra.mrb[16].mxu0 %vm173_vm1, %v149_v30  ;;  %v75_v30 = vld [vmem:[%s2567_s0 + $0x1f8] sm:$0xff] }
  0x29   :  { %1182 = vmatprep.mubr.msk.bf16.mxu0 %vm173_vm1, %v150_v33  ;;  %v139_v32 = vmax.f32 %v75_v30, 0.0 }
  0x2b   :  { %v171_v33 = vpack.c.bf16 %v139_v32, %v138_v31 }
  0x2c   :  { %1211 = vmatmul.mubr.msk.bf16.gmra.mrb[16].mxu1 %vm173_vm1, %v165_v62 }
  0x2d   :  { %1214 = vmatprep.mubr.msk.bf16.mxu1 %vm173_vm1, %v166_v1 }
  0x30   :  { %1183 = vmatmul.mubr.msk.bf16.gmra.mrb[20].mxu0 %vm173_vm1, %v151_v50 }
  0x31   :  { %1186 = vmatprep.mubr.msk.bf16.mxu0 %vm173_vm1, %v152_v53 }
  0x34   :  { %1215 = vmatmul.mubr.msk.bf16.gmra.mrb[20].mxu1 %vm173_vm1, %v167_v16 }
  0x35   :  { %1218 = vmatprep.mubr.msk.bf16.mxu1 %vm173_vm1, %v168_v17 }
  0x38   :  { %1187 = vmatmul.mubr.msk.bf16.gmra.mrb[24].mxu0 %vm173_vm1, %v153_v6 }
  0x39   :  { %1190 = vmatprep.mubr.msk.bf16.mxu0 %vm173_vm1, %v154_v9 }
  0x3c   :  { %1219 = vmatmul.mubr.msk.bf16.gmra.mrb[24].mxu1 %vm173_vm1, %v169_v27 }
  0x3d   :  { %1222 = vmatprep.mubr.msk.bf16.mxu1 %vm173_vm1, %v170_v28 }
  0x40   :  { %1191 = vmatmul.mubr.msk.bf16.gmra.mrb[28].mxu0 %vm173_vm1, %v155_v22 }
  0x44   :  { %1223 = vmatmul.mubr.msk.bf16.gmra.mrb[28].mxu1 %vm173_vm1, %v171_v33 }
  0xdb   :  { %v1474_v34 = vpop.f32.mrb[0].mxu0 }
  0xdc   :  { %v1476_v35 = vpop.f32.mrb[1].mxu0  ;;  %v567_v41 = vsel %vm563_vm2, %v1474_v34, 0.0 }
  0xdd   :  { %v1478_v36 = vpop.f32.mrb[2].mxu0  ;;  %v564_v38 = vsel %vm563_vm2, %v1476_v35, 0.0 }
  0xde   :  { %v1480_v37 = vpop.f32.mrb[3].mxu0  ;;  %v569_v43 = vsel %vm563_vm2, %v1478_v36, 0.0 }
  0xdf   :  { %v565_v39 = vsel %vm563_vm2, %v1480_v37, 0.0  ;;  %v1502_v52 = vpop.f32.mrb[0].mxu1 }
  0xe0   :  { %v566_v40 = vadd.f32 %v565_v39, %v564_v38  ;;  %2610 = vst [vmem:[#allocation2_spill] sm:$0xff] %v1502_v52  ;;  %v1504_v54 = vpop.f32.mrb[1].mxu1 }
  0xe1   :  { %2611 = vst [vmem:[#allocation3_spill] sm:$0xff] %v1504_v54  ;;  %v1508_v56 = vpop.f32.mrb[2].mxu1 }
  0xe2   :  { %v568_v42 = vadd.f32 %v567_v41, %v566_v40  ;;  %2612 = vst [vmem:[#allocation4_spill] sm:$0xff] %v1508_v56  ;;  %v1510_v58 = vpop.f32.mrb[3].mxu1 }
  0xe3   :  { %v1490_v44 = vpop.f32.mrb[4].mxu0  ;;  %2613 = vst [vmem:[#allocation5_spill] sm:$0xff] %v1510_v58 }
  0xe4   :  { %v1492_v45 = vpop.f32.mrb[5].mxu0  ;;  %v570_v46 = vadd.f32 %v569_v43, %v568_v42  ;;  %v575_v55 = vsel %vm563_vm2, %v1490_v44, 0.0 }
  0xe5   :  { %v571_v47 = vsel %vm563_vm2, %v1492_v45, 0.0  ;;  %v1496_v48 = vpop.f32.mrb[6].mxu0 }
  0xe6   :  { %v572_v49 = vadd.f32 %v571_v47, %v570_v46  ;;  %v1498_v50 = vpop.f32.mrb[7].mxu0  ;;  %v577_v59 = vsel %vm563_vm2, %v1496_v48, 0.0 }
  0xe7   :  { %v573_v51 = vsel %vm563_vm2, %v1498_v50, 0.0  ;;  %v1526_v4 = vpop.f32.mrb[4].mxu1 }
  0xe8   :  { %v574_v53 = vadd.f32 %v573_v51, %v572_v49  ;;  %v1528_v6 = vpop.f32.mrb[5].mxu1 }
  0xe9   :  { %v1532_v8 = vpop.f32.mrb[6].mxu1 }
  0xea   :  { %v576_v57 = vadd.f32 %v575_v55, %v574_v53  ;;  %v1534_v10 = vpop.f32.mrb[7].mxu1 }
  0xeb   :  { %v1514_v60 = vpop.f32.mrb[8].mxu0 }
  0xec   :  { %v1516_v61 = vpop.f32.mrb[9].mxu0  ;;  %v578_v62 = vadd.f32 %v577_v59, %v576_v57  ;;  %v583_v7 = vsel %vm563_vm2, %v1514_v60, 0.0 }
  0xed   :  { %v579_v63 = vsel %vm563_vm2, %v1516_v61, 0.0  ;;  %v1520_v0 = vpop.f32.mrb[10].mxu0 }
  0xee   :  { %v580_v1 = vadd.f32 %v579_v63, %v578_v62  ;;  %v1522_v2 = vpop.f32.mrb[11].mxu0  ;;  %v585_v11 = vsel %vm563_vm2, %v1520_v0, 0.0 }
  0xef   :  { %v581_v3 = vsel %vm563_vm2, %v1522_v2, 0.0  ;;  %v1550_v20 = vpop.f32.mrb[8].mxu1 }
  0xf0   :  { %v582_v5 = vadd.f32 %v581_v3, %v580_v1  ;;  %v1552_v22 = vpop.f32.mrb[9].mxu1 }
  0xf1   :  { %v1556_v24 = vpop.f32.mrb[10].mxu1 }
  0xf2   :  { %v584_v9 = vadd.f32 %v583_v7, %v582_v5  ;;  %v1558_v26 = vpop.f32.mrb[11].mxu1 }
  0xf3   :  { %v1538_v12 = vpop.f32.mrb[12].mxu0 }
  0xf4   :  { %v1540_v13 = vpop.f32.mrb[13].mxu0  ;;  %v586_v14 = vadd.f32 %v585_v11, %v584_v9  ;;  %v591_v23 = vsel %vm563_vm2, %v1538_v12, 0.0 }
  0xf5   :  { %v587_v15 = vsel %vm563_vm2, %v1540_v13, 0.0  ;;  %v1544_v16 = vpop.f32.mrb[14].mxu0 }
  0xf6   :  { %v588_v17 = vadd.f32 %v587_v15, %v586_v14  ;;  %v1546_v18 = vpop.f32.mrb[15].mxu0  ;;  %v593_v27 = vsel %vm563_vm2, %v1544_v16, 0.0 }
  0xf7   :  { %v589_v19 = vsel %vm563_vm2, %v1546_v18, 0.0  ;;  %v1574_v40 = vpop.f32.mrb[12].mxu1 }
  0xf8   :  { %v590_v21 = vadd.f32 %v589_v19, %v588_v17  ;;  %v1576_v42 = vpop.f32.mrb[13].mxu1 }
  0xf9   :  { %v1580_v46 = vpop.f32.mrb[14].mxu1 }
  0xfa   :  { %v592_v25 = vadd.f32 %v591_v23, %v590_v21  ;;  %v1582_v49 = vpop.f32.mrb[15].mxu1 }
  0xfb   :  { %v1562_v28 = vpop.f32.mrb[16].mxu0 }
  0xfc   :  { %v1564_v29 = vpop.f32.mrb[17].mxu0  ;;  %v594_v30 = vadd.f32 %v593_v27, %v592_v25  ;;  %v599_v43 = vsel %vm563_vm2, %v1562_v28, 0.0 }
  0xfd   :  { %v595_v31 = vsel %vm563_vm2, %v1564_v29, 0.0  ;;  %v1568_v32 = vpop.f32.mrb[18].mxu0 }
  0xfe   :  { %v596_v33 = vadd.f32 %v595_v31, %v594_v30  ;;  %v1570_v38 = vpop.f32.mrb[19].mxu0  ;;  %v601_v51 = vsel %vm563_vm2, %v1568_v32, 0.0 }
  0xff   :  { %v597_v39 = vsel %vm563_vm2, %v1570_v38, 0.0  ;;  %v1598_v5 = vpop.f32.mrb[16].mxu1 }
 0x100   :  { %v598_v41 = vadd.f32 %v597_v39, %v596_v33  ;;  %v1600_v9 = vpop.f32.mrb[17].mxu1 }
 0x101   :  { %v1604_v14 = vpop.f32.mrb[18].mxu1 }
 0x102   :  { %v600_v47 = vadd.f32 %v599_v43, %v598_v41  ;;  %v1606_v17 = vpop.f32.mrb[19].mxu1 }
 0x103   :  { %v1586_v53 = vpop.f32.mrb[20].mxu0 }
 0x104   :  { %v1588_v55 = vpop.f32.mrb[21].mxu0  ;;  %v602_v57 = vadd.f32 %v601_v51, %v600_v47  ;;  %v607_v11 = vsel %vm563_vm2, %v1586_v53, 0.0 }
 0x105   :  { %v603_v59 = vsel %vm563_vm2, %v1588_v55, 0.0  ;;  %v1592_v62 = vpop.f32.mrb[22].mxu0 }
 0x106   :  { %2614 = vst [vmem:[#allocation6_spill] sm:$0xff] %v1592_v62  ;;  %v604_v63 = vadd.f32 %v603_v59, %v602_v57  ;;  %v1594_v1 = vpop.f32.mrb[23].mxu0  ;;  %v609_v19 = vsel %vm563_vm2, %v1592_v62, 0.0 }
 0x107   :  { %v605_v3 = vsel %vm563_vm2, %v1594_v1, 0.0  ;;  %v1622_v41 = vpop.f32.mrb[20].mxu1 }
 0x108   :  { %v606_v7 = vadd.f32 %v605_v3, %v604_v63  ;;  %v1624_v47 = vpop.f32.mrb[21].mxu1 }
 0x109   :  { %v1628_v57 = vpop.f32.mrb[22].mxu1 }
 0x10a   :  { %v608_v15 = vadd.f32 %v607_v11, %v606_v7  ;;  %v1630_v63 = vpop.f32.mrb[23].mxu1 }
 0x10b   :  { %v1610_v21 = vpop.f32.mrb[24].mxu0 }
 0x10c   :  { %2615 = vst [vmem:[#allocation7_spill] sm:$0xff] %v1610_v21  ;;  %v1612_v23 = vpop.f32.mrb[25].mxu0  ;;  %v610_v25 = vadd.f32 %v609_v19, %v608_v15  ;;  %v615_v51 = vsel %vm563_vm2, %v1610_v21, 0.0 }
 0x10d   :  { %2616 = vst [vmem:[#allocation8_spill] sm:$0xff] %v1612_v23  ;;  %v611_v27 = vsel %vm563_vm2, %v1612_v23, 0.0  ;;  %v1616_v30 = vpop.f32.mrb[26].mxu0 }
 0x10e   :  { %2617 = vst [vmem:[#allocation9_spill] sm:$0xff] %v1616_v30  ;;  %v612_v31 = vadd.f32 %v611_v27, %v610_v25  ;;  %v1618_v33 = vpop.f32.mrb[27].mxu0  ;;  %v617_v3 = vsel %vm563_vm2, %v1616_v30, 0.0 }
 0x10f   :  { %2618 = vst [vmem:[#allocation10_spill] sm:$0xff] %v1618_v33  ;;  %v613_v39 = vsel %vm563_vm2, %v1618_v33, 0.0 }
 0x110   :  { %v614_v43 = vadd.f32 %v613_v39, %v612_v31 }
 0x112   :  { %v616_v59 = vadd.f32 %v615_v51, %v614_v43  ;;  %v1646_v43 = vpop.f32.mrb[24].mxu1 }
 0x113   :  { %v1634_v7 = vpop.f32.mrb[28].mxu0  ;;  %2623 = vst [vmem:[#allocation15_spill] sm:$0xff] %v1646_v43  ;;  %v1648_v30 = vpop.f32.mrb[25].mxu1 }
 0x114   :  { %2619 = vst [vmem:[#allocation11_spill] sm:$0xff] %v1634_v7  ;;  %v1636_v11 = vpop.f32.mrb[29].mxu0  ;;  %v618_v15 = vadd.f32 %v617_v3, %v616_v59  ;;  %v623_v21 = vsel %vm563_vm2, %v1634_v7, 0.0  ;;  %v1652_v59 = vpop.f32.mrb[26].mxu1 }
 0x115   :  { %2620 = vst [vmem:[#allocation12_spill] sm:$0xff] %v1636_v11  ;;  %v619_v19 = vsel %vm563_vm2, %v1636_v11, 0.0  ;;  %v1640_v25 = vpop.f32.mrb[30].mxu0  ;;  %2624 = vst [vmem:[#allocation16_spill] sm:$0xff] %v1652_v59  ;;  %v1654_v11 = vpop.f32.mrb[27].mxu1 }
 0x116   :  { %2621 = vst [vmem:[#allocation13_spill] sm:$0xff] %v1640_v25  ;;  %v620_v27 = vadd.f32 %v619_v19, %v618_v15  ;;  %v1642_v31 = vpop.f32.mrb[31].mxu0  ;;  %2625 = vst [vmem:[#allocation17_spill] sm:$0xff] %v1654_v11  ;;  %v625_v15 = vsel %vm563_vm2, %v1640_v25, 0.0  ;;  %v627_v19 = vsel %vm563_vm2, %v1504_v54, 0.0 }
 0x117   :  { %2622 = vst [vmem:[#allocation14_spill] sm:$0xff] %v1642_v31  ;;  %v621_v39 = vsel %vm563_vm2, %v1642_v31, 0.0 }
 0x118   :  { %v622_v51 = vadd.f32 %v621_v39, %v620_v27  ;;  %v629_v27 = vsel %vm563_vm2, %v1510_v58, 0.0  ;;  %v1662_v39 = vpop.f32.mrb[28].mxu1 }
 0x119   :  { %v1664_v7 = vpop.f32.mrb[29].mxu1 }
 0x11a   :  { %v624_v3 = vadd.f32 %v623_v21, %v622_v51  ;;  %2626 = vst [vmem:[#allocation18_spill] sm:$0xff] %v1664_v7  ;;  %v631_v21 = vsel %vm563_vm2, %v1502_v52, 0.0  ;;  %v1668_v51 = vpop.f32.mrb[30].mxu1  ;;  %v639_v52 = vsel %vm563_vm2, %v1526_v4, 0.0 }
 0x11b   :  { %v1670_v25 = vpop.f32.mrb[31].mxu1 }
 0x11c   :  { %v626_v31 = vadd.f32 %v625_v15, %v624_v3  ;;  %v633_v3 = vsel %vm563_vm2, %v1508_v56, 0.0 }
 0x11e   :  { %v628_v33 = vadd.f32 %v627_v19, %v626_v31  ;;  %v635_v31 = vsel %vm563_vm2, %v1528_v6, 0.0 }
 0x120   :  { %v630_v23 = vadd.f32 %v629_v27, %v628_v33  ;;  %v637_v33 = vsel %vm563_vm2, %v1534_v10, 0.0 }
 0x122   :  { %v632_v62 = vadd.f32 %v631_v21, %v630_v23  ;;  %v641_v23 = vsel %vm563_vm2, %v1532_v8, 0.0  ;;  %v643_v21 = vsel %vm563_vm2, %v1552_v22, 0.0 }
 0x124   :  { %v634_v15 = vadd.f32 %v633_v3, %v632_v62  ;;  %v645_v62 = vsel %vm563_vm2, %v1558_v26, 0.0 }
 0x126   :  { %v636_v19 = vadd.f32 %v635_v31, %v634_v15  ;;  %v647_v31 = vsel %vm563_vm2, %v1550_v20, 0.0 }
 0x128   :  { %v638_v27 = vadd.f32 %v637_v33, %v636_v19  ;;  %v649_v19 = vsel %vm563_vm2, %v1556_v24, 0.0 }
 0x12a   :  { %v640_v58 = vadd.f32 %v639_v52, %v638_v27  ;;  %v651_v52 = vsel %vm563_vm2, %v1576_v42, 0.0 }
 0x12c   :  { %v642_v56 = vadd.f32 %v641_v23, %v640_v58  ;;  %v653_v58 = vsel %vm563_vm2, %v1582_v49, 0.0  ;;  %v655_v23 = vsel %vm563_vm2, %v1574_v40, 0.0 }
 0x12e   :  { %v644_v54 = vadd.f32 %v643_v21, %v642_v56  ;;  %v657_v21 = vsel %vm563_vm2, %v1580_v46, 0.0 }
 0x130   :  { %v646_v3 = vadd.f32 %v645_v62, %v644_v54  ;;  %v659_v62 = vsel %vm563_vm2, %v1600_v9, 0.0 }
 0x132   :  { %v648_v15 = vadd.f32 %v647_v31, %v646_v3 }
 0x134   :  { %v650_v33 = vadd.f32 %v649_v19, %v648_v15  ;;  %v661_v15 = vsel %vm563_vm2, %v1606_v17, 0.0 }
 0x136   :  { %v652_v27 = vadd.f32 %v651_v52, %v650_v33  ;;  %v663_v52 = vsel %vm563_vm2, %v1598_v5, 0.0 }
 0x138   :  { %v654_v56 = vadd.f32 %v653_v58, %v652_v27  ;;  %v665_v27 = vsel %vm563_vm2, %v1604_v14, 0.0  ;;  %v667_v58 = vsel %vm563_vm2, %v1624_v47, 0.0 }
 0x13a   :  { %v656_v54 = vadd.f32 %v655_v23, %v654_v56 }
 0x13c   :  { %v658_v3 = vadd.f32 %v657_v21, %v656_v54  ;;  %v669_v54 = vsel %vm563_vm2, %v1630_v63, 0.0 }
 0x13e   :  { %v660_v31 = vadd.f32 %v659_v62, %v658_v3  ;;  %v671_v62 = vsel %vm563_vm2, %v1622_v41, 0.0 }
 0x140   :  { %v662_v19 = vadd.f32 %v661_v15, %v660_v31  ;;  %v673_v31 = vsel %vm563_vm2, %v1628_v57, 0.0  ;;  %v675_v15 = vsel %vm563_vm2, %v1648_v30, 0.0 }
 0x142   :  { %v664_v33 = vadd.f32 %v663_v52, %v662_v19 }
 0x144   :  { %v666_v56 = vadd.f32 %v665_v27, %v664_v33  ;;  %v677_v33 = vsel %vm563_vm2, %v1654_v11, 0.0 }
 0x146   :  { %v668_v23 = vadd.f32 %v667_v58, %v666_v56  ;;  %v679_v58 = vsel %vm563_vm2, %v1646_v43, 0.0 }
 0x148   :  { %v670_v21 = vadd.f32 %v669_v54, %v668_v23  ;;  %v681_v23 = vsel %vm563_vm2, %v1652_v59, 0.0  ;;  %v683_v54 = vsel %vm563_vm2, %v1664_v7, 0.0 }
 0x14a   :  { %v672_v3 = vadd.f32 %v671_v62, %v670_v21 }
 0x14c   :  { %v674_v19 = vadd.f32 %v673_v31, %v672_v3  ;;  %v685_v3 = vsel %vm563_vm2, %v1670_v25, 0.0 }
 0x14e   :  { %v676_v52 = vadd.f32 %v675_v15, %v674_v19  ;;  %v687_v15 = vsel %vm563_vm2, %v1662_v39, 0.0 }
 0x150   :  { %v678_v27 = vadd.f32 %v677_v33, %v676_v52  ;;  %v689_v52 = vsel %vm563_vm2, %v1668_v51, 0.0 }
 0x152   :  { %v680_v56 = vadd.f32 %v679_v58, %v678_v27 }
 0x154   :  { %v682_v21 = vadd.f32 %v681_v23, %v680_v56 }
 0x156   :  { %v684_v62 = vadd.f32 %v683_v54, %v682_v21 }
 0x158   :  { %v686_v31 = vadd.f32 %v685_v3, %v684_v62  ;;  %v2635_v3 = vld [vmem:[#allocation7_spill] sm:$0xff] }
 0x15a   :  { %v688_v19 = vadd.f32 %v687_v15, %v686_v31  ;;  %v2637_v31 = vld [vmem:[#allocation9_spill] sm:$0xff]  ;;  %v2638_v15 = vld [vmem:[#allocation12_spill] sm:$0xff] }
 0x15c   :  { %v690_v33 = vadd.f32 %v689_v52, %v688_v19  ;;  %v2640_v52 = vld [vmem:[#allocation14_spill] sm:$0xff] }
 0x15e   :  { %v691_v27 = vrot.slane %v690_v33, 4 }
 0x160   :  { %v692_v58 = vadd.f32 %v691_v27, %v690_v33  ;;  %v2642_v27 = vld [vmem:[#allocation11_spill] sm:$0xff] }
 0x162   :  { %v693_v59 = vrot.slane %v692_v58, 2 }
 0x164   :  { %v694_v43 = vadd.f32 %v693_v59, %v692_v58  ;;  %v2633_v59 = vld [vmem:[#allocation10_spill] sm:$0xff] }
 0x166   :  { %v695_v11 = vrot.slane %v694_v43, 1 }
 0x168   :  { %v696_v7 = vadd.f32 %v695_v11, %v694_v43  ;;  %v2631_v11 = vld [vmem:[#allocation6_spill] sm:$0xff]  ;;  %v2632_v43 = vld [vmem:[#allocation8_spill] sm:$0xff] }
 0x16a   :  { %v1730_v56 = vmul.f32 0.001953125, %v696_v7 }
 0x16c   :  { %v1734_v23 = vsub.f32 %v1476_v35, %v1730_v56  ;;  %v1738_v54 = vsub.f32 %v1480_v37, %v1730_v56  ;;  %v1742_v21 = vsub.f32 %v1474_v34, %v1730_v56  ;;  %v1746_v62 = vsub.f32 %v1478_v36, %v1730_v56 }
 0x16d   :  { %v1750_v7 = vsub.f32 %v1492_v45, %v1730_v56  ;;  %v1754_v35 = vsub.f32 %v1498_v50, %v1730_v56  ;;  %v1758_v37 = vsub.f32 %v1490_v44, %v1730_v56  ;;  %v1762_v34 = vsub.f32 %v1496_v48, %v1730_v56 }
 0x16e   :  { %2627 = vst [vmem:[#allocation19_spill] sm:$0xff] %v1734_v23  ;;  %2628 = vst [vmem:[#allocation20_spill] sm:$0xff] %v1738_v54  ;;  %v1766_v36 = vsub.f32 %v1516_v61, %v1730_v56  ;;  %v1770_v45 = vsub.f32 %v1522_v2, %v1730_v56  ;;  %v1774_v50 = vsub.f32 %v1514_v60, %v1730_v56 }
 0x16f   :  { %2629 = vst [vmem:[#allocation21_spill] sm:$0xff] %v1742_v21  ;;  %2630 = vst [vmem:[#allocation22_spill] sm:$0xff] %v1746_v62  ;;  %v1778_v44 = vsub.f32 %v1520_v0, %v1730_v56  ;;  %v1782_v48 = vsub.f32 %v1540_v13, %v1730_v56  ;;  %v1786_v61 = vsub.f32 %v1546_v18, %v1730_v56 }
 0x170   :  { %v1790_v2 = vsub.f32 %v1538_v12, %v1730_v56  ;;  %v1794_v60 = vsub.f32 %v1544_v16, %v1730_v56  ;;  %v1798_v0 = vsub.f32 %v1564_v29, %v1730_v56  ;;  %v1802_v13 = vsub.f32 %v1570_v38, %v1730_v56 }
 0x171   :  { %v1806_v18 = vsub.f32 %v1562_v28, %v1730_v56  ;;  %v1810_v12 = vsub.f32 %v1568_v32, %v1730_v56  ;;  %v1814_v16 = vsub.f32 %v1588_v55, %v1730_v56  ;;  %v1818_v29 = vsub.f32 %v1594_v1, %v1730_v56 }
 0x172   :  { %v1822_v38 = vsub.f32 %v1586_v53, %v1730_v56  ;;  %v1826_v28 = vsub.f32 %v2631_v11, %v1730_v56  ;;  %v1830_v32 = vsub.f32 %v2632_v43, %v1730_v56  ;;  %v1834_v55 = vsub.f32 %v2633_v59, %v1730_v56  ;;  %v2643_v11 = vld [vmem:[#allocation13_spill] sm:$0xff]  ;;  %v2644_v59 = vld [vmem:[#allocation3_spill] sm:$0xff] }
 0x173   :  { %v1838_v1 = vsub.f32 %v2635_v3, %v1730_v56  ;;  %v1842_v53 = vsub.f32 %v2637_v31, %v1730_v56  ;;  %v1846_v19 = vsub.f32 %v2638_v15, %v1730_v56  ;;  %v1850_v33 = vsub.f32 %v2640_v52, %v1730_v56  ;;  %v2645_v31 = vld [vmem:[#allocation5_spill] sm:$0xff] }
 0x174   :  { %2634 = vst [vmem:[#allocation6_spill] sm:$0xff] %v1834_v55  ;;  %v1854_v58 = vsub.f32 %v2642_v27, %v1730_v56  ;;  %v1858_v43 = vsub.f32 %v2643_v11, %v1730_v56  ;;  %v1862_v3 = vsub.f32 %v2644_v59, %v1730_v56  ;;  %v1866_v15 = vsub.f32 %v2645_v31, %v1730_v56 }
 0x175   :  { %2636 = vst [vmem:[#allocation8_spill] sm:$0xff] %v1838_v1  ;;  %2639 = vst [vmem:[#allocation10_spill] sm:$0xff] %v1846_v19  ;;  %v2646_v19 = vld [vmem:[#allocation2_spill] sm:$0xff]  ;;  %v1878_v11 = vsub.f32 %v1528_v6, %v1730_v56  ;;  %v1882_v59 = vsub.f32 %v1534_v10, %v1730_v56  ;;  %v1886_v31 = vsub.f32 %v1526_v4, %v1730_v56 }
 0x176   :  { %2641 = vst [vmem:[#allocation7_spill] sm:$0xff] %v1850_v33  ;;  %v1870_v52 = vsub.f32 %v2646_v19, %v1730_v56  ;;  %v2647_v33 = vld [vmem:[#allocation4_spill] sm:$0xff]  ;;  %v1890_v19 = vsub.f32 %v1532_v8, %v1730_v56  ;;  %v1898_v6 = vsub.f32 %v1558_v26, %v1730_v56  ;;  %v1902_v10 = vsub.f32 %v1550_v20, %v1730_v56 }
 0x177   :  { %v1874_v27 = vsub.f32 %v2647_v33, %v1730_v56  ;;  %v1894_v33 = vsub.f32 %v1552_v22, %v1730_v56  ;;  %v1906_v4 = vsub.f32 %v1556_v24, %v1730_v56  ;;  %v1910_v8 = vsub.f32 %v1576_v42, %v1730_v56 }
 0x178   :  { %v1914_v22 = vsub.f32 %v1582_v49, %v1730_v56  ;;  %v1918_v26 = vsub.f32 %v1574_v40, %v1730_v56  ;;  %v1922_v20 = vsub.f32 %v1580_v46, %v1730_v56  ;;  %v1926_v24 = vsub.f32 %v1600_v9, %v1730_v56 }
 0x179   :  { %v1930_v42 = vsub.f32 %v1606_v17, %v1730_v56  ;;  %v1934_v49 = vsub.f32 %v1598_v5, %v1730_v56  ;;  %v1938_v40 = vsub.f32 %v1604_v14, %v1730_v56  ;;  %v1942_v46 = vsub.f32 %v1624_v47, %v1730_v56 }
 0x17a   :  { %2648 = vst [vmem:[#allocation9_spill] sm:$0xff] %v1926_v24  ;;  %v1946_v9 = vsub.f32 %v1630_v63, %v1730_v56  ;;  %v1950_v17 = vsub.f32 %v1622_v41, %v1730_v56  ;;  %v1954_v5 = vsub.f32 %v1628_v57, %v1730_v56  ;;  %v1958_v14 = vsub.f32 %v1648_v30, %v1730_v56 }
 0x17b   :  { %2649 = vst [vmem:[#allocation12_spill] sm:$0xff] %v1930_v42  ;;  %2650 = vst [vmem:[#allocation14_spill] sm:$0xff] %v1934_v49  ;;  %v1978_v30 = vsub.f32 %v1670_v25, %v1730_v56  ;;  %v766_v25 = vmul.f32 %v1746_v62, %v1746_v62  ;;  %v769_v62 = vmul.f32 %v1758_v37, %v1758_v37 }
 0x17c   :  { %2651 = vst [vmem:[#allocation11_spill] sm:$0xff] %v1938_v40  ;;  %2652 = vst [vmem:[#allocation13_spill] sm:$0xff] %v1942_v46  ;;  %v2657_v40 = vld [vmem:[#allocation17_spill] sm:$0xff]  ;;  %v2659_v46 = vld [vmem:[#allocation15_spill] sm:$0xff] }
 0x17d   :  { %2653 = vst [vmem:[#allocation3_spill] sm:$0xff] %v1946_v9  ;;  %2654 = vst [vmem:[#allocation5_spill] sm:$0xff] %v1950_v17  ;;  %v1962_v47 = vsub.f32 %v2657_v40, %v1730_v56  ;;  %v1966_v63 = vsub.f32 %v2659_v46, %v1730_v56  ;;  %v2661_v9 = vld [vmem:[#allocation16_spill] sm:$0xff]  ;;  %v2663_v17 = vld [vmem:[#allocation18_spill] sm:$0xff]  ;;  %v1982_v40 = vsub.f32 %v1662_v39, %v1730_v56 }
 0x17e   :  { %2655 = vst [vmem:[#allocation2_spill] sm:$0xff] %v1954_v5  ;;  %2656 = vst [vmem:[#allocation4_spill] sm:$0xff] %v1958_v14  ;;  %v1970_v41 = vsub.f32 %v2661_v9, %v1730_v56  ;;  %v1974_v57 = vsub.f32 %v2663_v17, %v1730_v56  ;;  %v1986_v46 = vsub.f32 %v1668_v51, %v1730_v56 }
 0x17f   :  { %2658 = vst [vmem:[#allocation17_spill] sm:$0xff] %v1962_v47  ;;  %2660 = vst [vmem:[#allocation15_spill] sm:$0xff] %v1966_v63  ;;  %v763_v9 = vmul.f32 %v1734_v23, %v1734_v23  ;;  %v765_v17 = vmul.f32 %v1742_v21, %v1742_v21  ;;  %v767_v51 = vmul.f32 %v1750_v7, %v1750_v7 }
 0x180   :  { %2662 = vst [vmem:[#allocation16_spill] sm:$0xff] %v1970_v41  ;;  %2664 = vst [vmem:[#allocation18_spill] sm:$0xff] %v1974_v57  ;;  %v764_v41 = vmul.f32 %v1738_v54, %v1738_v54  ;;  %v768_v54 = vmul.f32 %v1754_v35, %v1754_v35 }
 0x181   :  { %2665 = vst [vmem:[#allocation23_spill] sm:$0xff] %v1978_v30  ;;  %2666 = vst [vmem:[#allocation24_spill] sm:$0xff] %v1982_v40  ;;  %v827_v30 = vsel %vm563_vm2, %v763_v9, 0.0  ;;  %v830_v56 = vsel %vm563_vm2, %v765_v17, 0.0  ;;  %v834_v9 = vsel %vm563_vm2, %v767_v51, 0.0  ;;  %v838_v17 = vsel %vm563_vm2, %v769_v62, 0.0 }
 0x182   :  { %2667 = vst [vmem:[#allocation25_spill] sm:$0xff] %v1986_v46  ;;  %v828_v39 = vsel %vm563_vm2, %v764_v41, 0.0  ;;  %v832_v46 = vsel %vm563_vm2, %v766_v25, 0.0  ;;  %v770_v41 = vmul.f32 %v1762_v34, %v1762_v34  ;;  %v775_v62 = vmul.f32 %v1782_v48, %v1782_v48 }
 0x183   :  { %v829_v40 = vadd.f32 %v828_v39, %v827_v30  ;;  %v836_v30 = vsel %vm563_vm2, %v768_v54, 0.0  ;;  %v774_v54 = vmul.f32 %v1778_v44, %v1778_v44 }
 0x185   :  { %v831_v23 = vadd.f32 %v830_v56, %v829_v40  ;;  %v771_v40 = vmul.f32 %v1766_v36, %v1766_v36 }
 0x187   :  { %v833_v21 = vadd.f32 %v832_v46, %v831_v23  ;;  %v772_v23 = vmul.f32 %v1770_v45, %v1770_v45  ;;  %v840_v46 = vsel %vm563_vm2, %v770_v41, 0.0  ;;  %v842_v51 = vsel %vm563_vm2, %v771_v40, 0.0 }
 0x188   :  { %v776_v41 = vmul.f32 %v1786_v61, %v1786_v61  ;;  %v777_v40 = vmul.f32 %v1790_v2, %v1790_v2 }
 0x189   :  { %v835_v57 = vadd.f32 %v834_v9, %v833_v21  ;;  %v773_v21 = vmul.f32 %v1774_v50, %v1774_v50 }
 0x18b   :  { %v837_v39 = vadd.f32 %v836_v30, %v835_v57  ;;  %v844_v57 = vsel %vm563_vm2, %v772_v23, 0.0  ;;  %v778_v23 = vmul.f32 %v1794_v60, %v1794_v60 }
 0x18d   :  { %v839_v56 = vadd.f32 %v838_v17, %v837_v39  ;;  %v846_v39 = vsel %vm563_vm2, %v773_v21, 0.0  ;;  %v779_v21 = vmul.f32 %v1798_v0, %v1798_v0 }
 0x18f   :  { %v841_v25 = vadd.f32 %v840_v46, %v839_v56  ;;  %v848_v56 = vsel %vm563_vm2, %v774_v54, 0.0  ;;  %v780_v54 = vmul.f32 %v1802_v13, %v1802_v13 }
 0x191   :  { %v843_v9 = vadd.f32 %v842_v51, %v841_v25  ;;  %v850_v25 = vsel %vm563_vm2, %v775_v62, 0.0  ;;  %v781_v62 = vmul.f32 %v1806_v18, %v1806_v18 }
 0x193   :  { %v845_v30 = vadd.f32 %v844_v57, %v843_v9  ;;  %v852_v9 = vsel %vm563_vm2, %v776_v41, 0.0  ;;  %v782_v41 = vmul.f32 %v1810_v12, %v1810_v12 }
 0x195   :  { %v847_v17 = vadd.f32 %v846_v39, %v845_v30  ;;  %v854_v30 = vsel %vm563_vm2, %v777_v40, 0.0  ;;  %v783_v40 = vmul.f32 %v1814_v16, %v1814_v16 }
 0x197   :  { %v849_v46 = vadd.f32 %v848_v56, %v847_v17  ;;  %v856_v17 = vsel %vm563_vm2, %v778_v23, 0.0  ;;  %v784_v23 = vmul.f32 %v1818_v29, %v1818_v29 }
 0x199   :  { %v851_v51 = vadd.f32 %v850_v25, %v849_v46  ;;  %v858_v46 = vsel %vm563_vm2, %v779_v21, 0.0  ;;  %v785_v21 = vmul.f32 %v1822_v38, %v1822_v38 }
 0x19b   :  { %v853_v57 = vadd.f32 %v852_v9, %v851_v51  ;;  %v860_v51 = vsel %vm563_vm2, %v780_v54, 0.0  ;;  %v786_v54 = vmul.f32 %v1826_v28, %v1826_v28 }
 0x19d   :  { %v855_v39 = vadd.f32 %v854_v30, %v853_v57  ;;  %v862_v57 = vsel %vm563_vm2, %v781_v62, 0.0  ;;  %v787_v62 = vmul.f32 %v1830_v32, %v1830_v32 }
 0x19f   :  { %v857_v56 = vadd.f32 %v856_v17, %v855_v39  ;;  %v864_v39 = vsel %vm563_vm2, %v782_v41, 0.0  ;;  %v788_v41 = vmul.f32 %v1834_v55, %v1834_v55 }
 0x1a1   :  { %v859_v25 = vadd.f32 %v858_v46, %v857_v56  ;;  %v866_v56 = vsel %vm563_vm2, %v783_v40, 0.0  ;;  %v789_v40 = vmul.f32 %v1838_v1, %v1838_v1 }
 0x1a3   :  { %v861_v9 = vadd.f32 %v860_v51, %v859_v25  ;;  %v868_v25 = vsel %vm563_vm2, %v784_v23, 0.0  ;;  %v790_v23 = vmul.f32 %v1842_v53, %v1842_v53 }
 0x1a5   :  { %v863_v30 = vadd.f32 %v862_v57, %v861_v9  ;;  %v870_v9 = vsel %vm563_vm2, %v785_v21, 0.0  ;;  %v2668_v21 = vld [vmem:[#allocation10_spill] sm:$0xff] }
 0x1a7   :  { %v865_v17 = vadd.f32 %v864_v39, %v863_v30  ;;  %v872_v30 = vsel %vm563_vm2, %v786_v54, 0.0  ;;  %v2669_v54 = vld [vmem:[#allocation7_spill] sm:$0xff] }
 0x1a9   :  { %v867_v46 = vadd.f32 %v866_v56, %v865_v17  ;;  %v874_v17 = vsel %vm563_vm2, %v787_v62, 0.0  ;;  %v793_v62 = vmul.f32 %v1854_v58, %v1854_v58 }
 0x1ab   :  { %v869_v51 = vadd.f32 %v868_v25, %v867_v46  ;;  %v876_v46 = vsel %vm563_vm2, %v788_v41, 0.0  ;;  %v794_v41 = vmul.f32 %v1858_v43, %v1858_v43 }
 0x1ad   :  { %v871_v57 = vadd.f32 %v870_v9, %v869_v51  ;;  %v791_v51 = vmul.f32 %v2668_v21, %v2668_v21  ;;  %v878_v9 = vsel %vm563_vm2, %v789_v40, 0.0  ;;  %v795_v40 = vmul.f32 %v1862_v3, %v1862_v3 }
 0x1af   :  { %v873_v39 = vadd.f32 %v872_v30, %v871_v57  ;;  %v792_v57 = vmul.f32 %v2669_v54, %v2669_v54  ;;  %v880_v30 = vsel %vm563_vm2, %v790_v23, 0.0  ;;  %v888_v23 = vsel %vm563_vm2, %v794_v41, 0.0 }
 0x1b0   :  { %v800_v41 = vmul.f32 %v1882_v59, %v1882_v59 }
 0x1b1   :  { %v875_v56 = vadd.f32 %v874_v17, %v873_v39  ;;  %v882_v39 = vsel %vm563_vm2, %v791_v51, 0.0  ;;  %v890_v51 = vsel %vm563_vm2, %v795_v40, 0.0  ;;  %v801_v40 = vmul.f32 %v1886_v31, %v1886_v31 }
 0x1b3   :  { %v877_v25 = vadd.f32 %v876_v46, %v875_v56  ;;  %v884_v56 = vsel %vm563_vm2, %v792_v57, 0.0  ;;  %v798_v57 = vmul.f32 %v1874_v27, %v1874_v27 }
 0x1b5   :  { %v879_v55 = vadd.f32 %v878_v9, %v877_v25  ;;  %v886_v25 = vsel %vm563_vm2, %v793_v62, 0.0  ;;  %v799_v62 = vmul.f32 %v1878_v11, %v1878_v11 }
 0x1b7   :  { %v881_v1 = vadd.f32 %v880_v30, %v879_v55  ;;  %v796_v55 = vmul.f32 %v1866_v15, %v1866_v15 }
 0x1b9   :  { %v883_v17 = vadd.f32 %v882_v39, %v881_v1  ;;  %v797_v1 = vmul.f32 %v1870_v52, %v1870_v52 }
 0x1bb   :  { %v885_v46 = vadd.f32 %v884_v56, %v883_v17  ;;  %v892_v17 = vsel %vm563_vm2, %v796_v55, 0.0  ;;  %v802_v55 = vmul.f32 %v1890_v19, %v1890_v19 }
 0x1bd   :  { %v887_v9 = vadd.f32 %v886_v25, %v885_v46  ;;  %v894_v46 = vsel %vm563_vm2, %v797_v1, 0.0  ;;  %v803_v1 = vmul.f32 %v1894_v33, %v1894_v33 }
 0x1bf   :  { %v889_v30 = vadd.f32 %v888_v23, %v887_v9  ;;  %v896_v9 = vsel %vm563_vm2, %v798_v57, 0.0  ;;  %v804_v57 = vmul.f32 %v1898_v6, %v1898_v6 }
 0x1c1   :  { %v891_v39 = vadd.f32 %v890_v51, %v889_v30  ;;  %v898_v30 = vsel %vm563_vm2, %v799_v62, 0.0  ;;  %v805_v62 = vmul.f32 %v1902_v10, %v1902_v10 }
 0x1c3   :  { %v893_v56 = vadd.f32 %v892_v17, %v891_v39  ;;  %v900_v39 = vsel %vm563_vm2, %v800_v41, 0.0  ;;  %v806_v41 = vmul.f32 %v1906_v4, %v1906_v4 }
 0x1c5   :  { %v895_v25 = vadd.f32 %v894_v46, %v893_v56  ;;  %v902_v56 = vsel %vm563_vm2, %v801_v40, 0.0  ;;  %v807_v40 = vmul.f32 %v1910_v8, %v1910_v8 }
 0x1c7   :  { %v897_v23 = vadd.f32 %v896_v9, %v895_v25  ;;  %v904_v25 = vsel %vm563_vm2, %v802_v55, 0.0  ;;  %v808_v55 = vmul.f32 %v1914_v22, %v1914_v22 }
 0x1c9   :  { %v899_v51 = vadd.f32 %v898_v30, %v897_v23  ;;  %v906_v23 = vsel %vm563_vm2, %v803_v1, 0.0  ;;  %v809_v1 = vmul.f32 %v1918_v26, %v1918_v26 }
 0x1cb   :  { %v901_v17 = vadd.f32 %v900_v39, %v899_v51  ;;  %v908_v51 = vsel %vm563_vm2, %v804_v57, 0.0  ;;  %v810_v57 = vmul.f32 %v1922_v20, %v1922_v20 }
 0x1cd   :  { %v903_v46 = vadd.f32 %v902_v56, %v901_v17  ;;  %v910_v17 = vsel %vm563_vm2, %v805_v62, 0.0  ;;  %v811_v62 = vmul.f32 %v1926_v24, %v1926_v24 }
 0x1cf   :  { %v905_v9 = vadd.f32 %v904_v25, %v903_v46  ;;  %v912_v46 = vsel %vm563_vm2, %v806_v41, 0.0  ;;  %v812_v41 = vmul.f32 %v1930_v42, %v1930_v42 }
 0x1d1   :  { %v907_v30 = vadd.f32 %v906_v23, %v905_v9  ;;  %v914_v9 = vsel %vm563_vm2, %v807_v40, 0.0  ;;  %v813_v40 = vmul.f32 %v1934_v49, %v1934_v49 }
 0x1d3   :  { %v909_v39 = vadd.f32 %v908_v51, %v907_v30  ;;  %v916_v30 = vsel %vm563_vm2, %v808_v55, 0.0  ;;  %v2670_v55 = vld [vmem:[#allocation11_spill] sm:$0xff] }
 0x1d5   :  { %v911_v56 = vadd.f32 %v910_v17, %v909_v39  ;;  %v918_v39 = vsel %vm563_vm2, %v809_v1, 0.0  ;;  %v2671_v1 = vld [vmem:[#allocation13_spill] sm:$0xff] }
 0x1d7   :  { %v913_v25 = vadd.f32 %v912_v46, %v911_v56  ;;  %v920_v56 = vsel %vm563_vm2, %v810_v57, 0.0  ;;  %v2672_v57 = vld [vmem:[#allocation3_spill] sm:$0xff] }
 0x1d9   :  { %v915_v23 = vadd.f32 %v914_v9, %v913_v25  ;;  %v922_v25 = vsel %vm563_vm2, %v811_v62, 0.0  ;;  %v2673_v62 = vld [vmem:[#allocation5_spill] sm:$0xff] }
 0x1db   :  { %v917_v51 = vadd.f32 %v916_v30, %v915_v23  ;;  %v814_v23 = vmul.f32 %v2670_v55, %v2670_v55  ;;  %v924_v30 = vsel %vm563_vm2, %v812_v41, 0.0  ;;  %v818_v41 = vmul.f32 %v1954_v5, %v1954_v5 }
 0x1dd   :  { %v919_v17 = vadd.f32 %v918_v39, %v917_v51  ;;  %v815_v51 = vmul.f32 %v2671_v1, %v2671_v1  ;;  %v926_v39 = vsel %vm563_vm2, %v813_v40, 0.0 }
 0x1df   :  { %v921_v46 = vadd.f32 %v920_v56, %v919_v17  ;;  %v816_v17 = vmul.f32 %v2672_v57, %v2672_v57  ;;  %v928_v56 = vsel %vm563_vm2, %v814_v23, 0.0  ;;  %v936_v23 = vsel %vm563_vm2, %v818_v41, 0.0  ;;  %v2676_v41 = vld [vmem:[#allocation23_spill] sm:$0xff] }
 0x1e1   :  { %v923_v9 = vadd.f32 %v922_v25, %v921_v46  ;;  %v817_v46 = vmul.f32 %v2673_v62, %v2673_v62  ;;  %v930_v25 = vsel %vm563_vm2, %v815_v51, 0.0 }
 0x1e3   :  { %v925_v24 = vadd.f32 %v924_v30, %v923_v9  ;;  %v932_v9 = vsel %vm563_vm2, %v816_v17, 0.0  ;;  %v934_v40 = vsel %vm563_vm2, %v817_v46, 0.0  ;;  %v2674_v17 = vld [vmem:[#allocation16_spill] sm:$0xff]  ;;  %v2675_v46 = vld [vmem:[#allocation18_spill] sm:$0xff] }
 0x1e5   :  { %v927_v42 = vadd.f32 %v926_v39, %v925_v24  ;;  %v819_v24 = vmul.f32 %v1958_v14, %v1958_v14 }
 0x1e7   :  { %v929_v49 = vadd.f32 %v928_v56, %v927_v42  ;;  %v820_v42 = vmul.f32 %v1962_v47, %v1962_v47  ;;  %v938_v51 = vsel %vm563_vm2, %v819_v24, 0.0  ;;  %v2677_v24 = vld [vmem:[#allocation24_spill] sm:$0xff] }
 0x1e9   :  { %v931_v55 = vadd.f32 %v930_v25, %v929_v49  ;;  %v821_v49 = vmul.f32 %v1966_v63, %v1966_v63 }
 0x1eb   :  { %v933_v30 = vadd.f32 %v932_v9, %v931_v55  ;;  %v822_v55 = vmul.f32 %v2674_v17, %v2674_v17  ;;  %v940_v9 = vsel %vm563_vm2, %v820_v42, 0.0  ;;  %v2678_v42 = vld [vmem:[#allocation25_spill] sm:$0xff] }
 0x1ed   :  { %v935_v39 = vadd.f32 %v934_v40, %v933_v30  ;;  %v823_v30 = vmul.f32 %v2675_v46, %v2675_v46  ;;  %v942_v40 = vsel %vm563_vm2, %v821_v49, 0.0 }
 0x1ef   :  { %v937_v56 = vadd.f32 %v936_v23, %v935_v39  ;;  %v824_v39 = vmul.f32 %v2676_v41, %v2676_v41  ;;  %v944_v23 = vsel %vm563_vm2, %v822_v55, 0.0 }
 0x1f1   :  { %v939_v25 = vadd.f32 %v938_v51, %v937_v56  ;;  %v825_v56 = vmul.f32 %v2677_v24, %v2677_v24  ;;  %v946_v51 = vsel %vm563_vm2, %v823_v30, 0.0 }
 0x1f3   :  { %v941_v14 = vadd.f32 %v940_v9, %v939_v25  ;;  %v826_v25 = vmul.f32 %v2678_v42, %v2678_v42  ;;  %v948_v9 = vsel %vm563_vm2, %v824_v39, 0.0  ;;  %v2679_v42 = vld [vmem:[#allocation19_spill] sm:$0xff]  ;;  %v2680_v39 = vld [vmem:[#allocation20_spill] sm:$0xff] }
 0x1f5   :  { %v943_v47 = vadd.f32 %v942_v40, %v941_v14  ;;  %v950_v14 = vsel %vm563_vm2, %v825_v56, 0.0  ;;  %v952_v40 = vsel %vm563_vm2, %v826_v25, 0.0  ;;  %v2681_v56 = vld [vmem:[#allocation21_spill] sm:$0xff] }
 0x1f7   :  { %v945_v63 = vadd.f32 %v944_v23, %v943_v47 }
 0x1f9   :  { %v947_v17 = vadd.f32 %v946_v51, %v945_v63 }
 0x1fb   :  { %v949_v46 = vadd.f32 %v948_v9, %v947_v17  ;;  %v2682_v9 = vld [vmem:[#allocation22_spill] sm:$0xff] }
 0x1fd   :  { %v951_v49 = vadd.f32 %v950_v14, %v949_v46 }
 0x1ff   :  { %v953_v41 = vadd.f32 %v952_v40, %v951_v49 }
 0x201   :  { %v954_v55 = vrot.slane %v953_v41, 4 }
 0x203   :  { %v955_v47 = vadd.f32 %v954_v55, %v953_v41 }
 0x205   :  { %v956_v23 = vrot.slane %v955_v47, 2 }
 0x207   :  { %v957_v5 = vadd.f32 %v956_v23, %v955_v47  ;;  %v2687_v47 = vld [vmem:[#allocation14_spill] sm:$0xff] }
 0x209   :  { %v958_v24 = vrot.slane %v957_v5, 1 }
 0x20b   :  { %v959_v62 = vadd.f32 %v958_v24, %v957_v5 }
 0x20d   :  { %v960_v30 = vmul.f32 0.001953125, %v959_v62 }
 0x20f   :  { %v961_v63 = vadd.f32 1e-05, %v960_v30  ;;  %v2688_v30 = vld [vmem:[#allocation11_spill] sm:$0xff] }
 0x211   :  { %1230 = vrsqrt.f32 %v961_v63 }
 0x21b   :  { %v2180_v51 = vpop.eup %1230 }
 0x21c   :  { %v963_v17 = vmul.f32 %v2180_v51, %v2679_v42  ;;  %v964_v46 = vmul.f32 %v2180_v51, %v2680_v39  ;;  %v965_v25 = vmul.f32 %v2180_v51, %v2681_v56  ;;  %v966_v41 = vmul.f32 %v2180_v51, %v2682_v9 }
 0x21d   :  { %v967_v5 = vmul.f32 %v2180_v51, %v1750_v7  ;;  %v968_v62 = vmul.f32 %v2180_v51, %v1754_v35  ;;  %v969_v24 = vmul.f32 %v2180_v51, %v1758_v37  ;;  %v970_v42 = vmul.f32 %v2180_v51, %v1762_v34 }
 0x21e   :  { %v971_v14 = vmul.f32 %v2180_v51, %v1766_v36  ;;  %v972_v49 = vmul.f32 %v2180_v51, %v1770_v45  ;;  %v973_v40 = vmul.f32 %v2180_v51, %v1774_v50  ;;  %v974_v7 = vmul.f32 %v2180_v51, %v1778_v44  ;;  %1027 = vst.msk [vmem:[%s2568_s2] sm:$0xff] %vm563_vm2, %v963_v17 }
 0x21f   :  { %1028 = vst.msk [vmem:[%s2568_s2 + $0x8] sm:$0xff] %vm563_vm2, %v964_v46  ;;  %1029 = vst.msk [vmem:[%s2568_s2 + $0x10] sm:$0xff] %vm563_vm2, %v965_v25  ;;  %v975_v35 = vmul.f32 %v2180_v51, %v1782_v48  ;;  %v976_v37 = vmul.f32 %v2180_v51, %v1786_v61  ;;  %v977_v34 = vmul.f32 %v2180_v51, %v1790_v2  ;;  %v2689_v46 = vld [vmem:[#allocation5_spill] sm:$0xff]  ;;  %v2690_v25 = vld [vmem:[#allocation2_spill] sm:$0xff] }
 0x220   :  { %1030 = vst.msk [vmem:[%s2568_s2 + $0x18] sm:$0xff] %vm563_vm2, %v966_v41  ;;  %v978_v36 = vmul.f32 %v2180_v51, %v1794_v60  ;;  %1031 = vst.msk [vmem:[%s2568_s2 + $0x20] sm:$0xff] %vm563_vm2, %v967_v5  ;;  %v979_v45 = vmul.f32 %v2180_v51, %v1798_v0  ;;  %v980_v50 = vmul.f32 %v2180_v51, %v1802_v13  ;;  %v2692_v41 = vld [vmem:[#allocation17_spill] sm:$0xff] }
 0x221   :  { %1032 = vst.msk [vmem:[%s2568_s2 + $0x28] sm:$0xff] %vm563_vm2, %v968_v62  ;;  %1033 = vst.msk [vmem:[%s2568_s2 + $0x30] sm:$0xff] %vm563_vm2, %v969_v24  ;;  %v981_v44 = vmul.f32 %v2180_v51, %v1806_v18  ;;  %v982_v48 = vmul.f32 %v2180_v51, %v1810_v12  ;;  %v983_v61 = vmul.f32 %v2180_v51, %v1814_v16  ;;  %v2683_v18 = vld [vmem:[#allocation6_spill] sm:$0xff]  ;;  %v2684_v16 = vld [vmem:[#allocation8_spill] sm:$0xff] }
 0x222   :  { %1034 = vst.msk [vmem:[%s2568_s2 + $0x38] sm:$0xff] %vm563_vm2, %v970_v42  ;;  %1035 = vst.msk [vmem:[%s2568_s2 + $0x40] sm:$0xff] %vm563_vm2, %v971_v14  ;;  %v984_v2 = vmul.f32 %v2180_v51, %v1818_v29  ;;  %v985_v60 = vmul.f32 %v2180_v51, %v1822_v38  ;;  %v986_v0 = vmul.f32 %v2180_v51, %v1826_v28  ;;  %v2693_v62 = vld [vmem:[#allocation15_spill] sm:$0xff]  ;;  %v2694_v42 = vld [vmem:[#allocation16_spill] sm:$0xff] }
 0x223   :  { %1036 = vst.msk [vmem:[%s2568_s2 + $0x48] sm:$0xff] %vm563_vm2, %v972_v49  ;;  %1037 = vst.msk [vmem:[%s2568_s2 + $0x50] sm:$0xff] %vm563_vm2, %v973_v40  ;;  %v987_v13 = vmul.f32 %v2180_v51, %v1830_v32  ;;  %v988_v12 = vmul.f32 %v2180_v51, %v2683_v18  ;;  %v989_v29 = vmul.f32 %v2180_v51, %v2684_v16  ;;  %v2695_v49 = vld [vmem:[#allocation18_spill] sm:$0xff] }
 0x224   :  { %1038 = vst.msk [vmem:[%s2568_s2 + $0x58] sm:$0xff] %vm563_vm2, %v974_v7  ;;  %1039 = vst.msk [vmem:[%s2568_s2 + $0x60] sm:$0xff] %vm563_vm2, %v975_v35  ;;  %v990_v38 = vmul.f32 %v2180_v51, %v1842_v53  ;;  %v991_v28 = vmul.f32 %v2180_v51, %v2668_v21  ;;  %v992_v32 = vmul.f32 %v2180_v51, %v2669_v54  ;;  %v2696_v7 = vld [vmem:[#allocation23_spill] sm:$0xff] }
 0x225   :  { %1040 = vst.msk [vmem:[%s2568_s2 + $0x68] sm:$0xff] %vm563_vm2, %v976_v37  ;;  %1041 = vst.msk [vmem:[%s2568_s2 + $0x70] sm:$0xff] %vm563_vm2, %v977_v34  ;;  %v993_v53 = vmul.f32 %v2180_v51, %v1854_v58  ;;  %v994_v55 = vmul.f32 %v2180_v51, %v1858_v43  ;;  %v995_v58 = vmul.f32 %v2180_v51, %v1862_v3  ;;  %v2697_v37 = vld [vmem:[#allocation24_spill] sm:$0xff] }
 0x226   :  { %1042 = vst.msk [vmem:[%s2568_s2 + $0x78] sm:$0xff] %vm563_vm2, %v978_v36  ;;  %1043 = vst.msk [vmem:[%s2568_s2 + $0x80] sm:$0xff] %vm563_vm2, %v979_v45  ;;  %v996_v43 = vmul.f32 %v2180_v51, %v1866_v15  ;;  %v997_v21 = vmul.f32 %v2180_v51, %v1870_v52  ;;  %v998_v54 = vmul.f32 %v2180_v51, %v1874_v27  ;;  %v2698_v36 = vld [vmem:[#allocation25_spill] sm:$0xff] }
 0x227   :  { %1044 = vst.msk [vmem:[%s2568_s2 + $0x88] sm:$0xff] %vm563_vm2, %v980_v50  ;;  %1045 = vst.msk [vmem:[%s2568_s2 + $0x90] sm:$0xff] %vm563_vm2, %v981_v44  ;;  %v999_v3 = vmul.f32 %v2180_v51, %v1878_v11  ;;  %v1000_v15 = vmul.f32 %v2180_v51, %v1882_v59  ;;  %v1001_v52 = vmul.f32 %v2180_v51, %v1886_v31 }
 0x228   :  { %1046 = vst.msk [vmem:[%s2568_s2 + $0x98] sm:$0xff] %vm563_vm2, %v982_v48  ;;  %1047 = vst.msk [vmem:[%s2568_s2 + $0xa0] sm:$0xff] %vm563_vm2, %v983_v61  ;;  %v1002_v27 = vmul.f32 %v2180_v51, %v1890_v19  ;;  %v1003_v11 = vmul.f32 %v2180_v51, %v1894_v33  ;;  %v1004_v59 = vmul.f32 %v2180_v51, %v1898_v6 }
 0x229   :  { %1048 = vst.msk [vmem:[%s2568_s2 + $0xa8] sm:$0xff] %vm563_vm2, %v984_v2  ;;  %1049 = vst.msk [vmem:[%s2568_s2 + $0xb0] sm:$0xff] %vm563_vm2, %v985_v60  ;;  %v1005_v31 = vmul.f32 %v2180_v51, %v1902_v10  ;;  %v1006_v19 = vmul.f32 %v2180_v51, %v1906_v4  ;;  %v1007_v33 = vmul.f32 %v2180_v51, %v1910_v8  ;;  %v2685_v8 = vld [vmem:[#allocation9_spill] sm:$0xff] }
 0x22a   :  { %1050 = vst.msk [vmem:[%s2568_s2 + $0xb8] sm:$0xff] %vm563_vm2, %v986_v0  ;;  %1051 = vst.msk [vmem:[%s2568_s2 + $0xc0] sm:$0xff] %vm563_vm2, %v987_v13  ;;  %v1008_v6 = vmul.f32 %v2180_v51, %v1914_v22  ;;  %v1009_v10 = vmul.f32 %v2180_v51, %v1918_v26  ;;  %v1010_v4 = vmul.f32 %v2180_v51, %v1922_v20  ;;  %v2686_v26 = vld [vmem:[#allocation12_spill] sm:$0xff] }
 0x22b   :  { %1052 = vst.msk [vmem:[%s2568_s2 + $0xc8] sm:$0xff] %vm563_vm2, %v988_v12  ;;  %1053 = vst.msk [vmem:[%s2568_s2 + $0xd0] sm:$0xff] %vm563_vm2, %v989_v29  ;;  %v1011_v22 = vmul.f32 %v2180_v51, %v2685_v8  ;;  %v1012_v20 = vmul.f32 %v2180_v51, %v2686_v26  ;;  %v1013_v23 = vmul.f32 %v2180_v51, %v2687_v47 }
 0x22c   :  { %1054 = vst.msk [vmem:[%s2568_s2 + $0xd8] sm:$0xff] %vm563_vm2, %v990_v38  ;;  %1055 = vst.msk [vmem:[%s2568_s2 + $0xe0] sm:$0xff] %vm563_vm2, %v991_v28  ;;  %v1014_v63 = vmul.f32 %v2180_v51, %v2688_v30  ;;  %v1015_v17 = vmul.f32 %v2180_v51, %v2671_v1  ;;  %v1016_v39 = vmul.f32 %v2180_v51, %v2672_v57  ;;  %v2691_v1 = vld [vmem:[#allocation4_spill] sm:$0xff] }
 0x22d   :  { %1056 = vst.msk [vmem:[%s2568_s2 + $0xe8] sm:$0xff] %vm563_vm2, %v992_v32  ;;  %1057 = vst.msk [vmem:[%s2568_s2 + $0xf0] sm:$0xff] %vm563_vm2, %v993_v53  ;;  %v1017_v56 = vmul.f32 %v2180_v51, %v2689_v46  ;;  %v1018_v9 = vmul.f32 %v2180_v51, %v2690_v25  ;;  %v1019_v57 = vmul.f32 %v2180_v51, %v2691_v1 }
 0x22e   :  { %1058 = vst.msk [vmem:[%s2568_s2 + $0xf8] sm:$0xff] %vm563_vm2, %v994_v55  ;;  %1059 = vst.msk [vmem:[%s2568_s2 + $0x100] sm:$0xff] %vm563_vm2, %v995_v58  ;;  %v1020_v5 = vmul.f32 %v2180_v51, %v2692_v41  ;;  %v1021_v24 = vmul.f32 %v2180_v51, %v2693_v62  ;;  %v1022_v14 = vmul.f32 %v2180_v51, %v2694_v42 }
 0x22f   :  { %1060 = vst.msk [vmem:[%s2568_s2 + $0x108] sm:$0xff] %vm563_vm2, %v996_v43  ;;  %1061 = vst.msk [vmem:[%s2568_s2 + $0x110] sm:$0xff] %vm563_vm2, %v997_v21  ;;  %v1023_v40 = vmul.f32 %v2180_v51, %v2695_v49  ;;  %v1024_v35 = vmul.f32 %v2180_v51, %v2696_v7  ;;  %v1025_v34 = vmul.f32 %v2180_v51, %v2697_v37 }
 0x230   :  { %1062 = vst.msk [vmem:[%s2568_s2 + $0x118] sm:$0xff] %vm563_vm2, %v998_v54  ;;  %1063 = vst.msk [vmem:[%s2568_s2 + $0x120] sm:$0xff] %vm563_vm2, %v999_v3  ;;  %v1026_v45 = vmul.f32 %v2180_v51, %v2698_v36 }
 0x231   :  { %1064 = vst.msk [vmem:[%s2568_s2 + $0x128] sm:$0xff] %vm563_vm2, %v1000_v15  ;;  %1065 = vst.msk [vmem:[%s2568_s2 + $0x130] sm:$0xff] %vm563_vm2, %v1001_v52 }
 0x232   :  { %1066 = vst.msk [vmem:[%s2568_s2 + $0x138] sm:$0xff] %vm563_vm2, %v1002_v27  ;;  %1067 = vst.msk [vmem:[%s2568_s2 + $0x140] sm:$0xff] %vm563_vm2, %v1003_v11 }
 0x233   :  { %1068 = vst.msk [vmem:[%s2568_s2 + $0x148] sm:$0xff] %vm563_vm2, %v1004_v59  ;;  %1069 = vst.msk [vmem:[%s2568_s2 + $0x150] sm:$0xff] %vm563_vm2, %v1005_v31 }
 0x234   :  { %1070 = vst.msk [vmem:[%s2568_s2 + $0x158] sm:$0xff] %vm563_vm2, %v1006_v19  ;;  %1071 = vst.msk [vmem:[%s2568_s2 + $0x160] sm:$0xff] %vm563_vm2, %v1007_v33 }
 0x235   :  { %1072 = vst.msk [vmem:[%s2568_s2 + $0x168] sm:$0xff] %vm563_vm2, %v1008_v6  ;;  %1073 = vst.msk [vmem:[%s2568_s2 + $0x170] sm:$0xff] %vm563_vm2, %v1009_v10 }
 0x236   :  { %1074 = vst.msk [vmem:[%s2568_s2 + $0x178] sm:$0xff] %vm563_vm2, %v1010_v4  ;;  %1075 = vst.msk [vmem:[%s2568_s2 + $0x180] sm:$0xff] %vm563_vm2, %v1011_v22 }
 0x237   :  { %1076 = vst.msk [vmem:[%s2568_s2 + $0x188] sm:$0xff] %vm563_vm2, %v1012_v20  ;;  %1077 = vst.msk [vmem:[%s2568_s2 + $0x190] sm:$0xff] %vm563_vm2, %v1013_v23 }
 0x238   :  { %1078 = vst.msk [vmem:[%s2568_s2 + $0x198] sm:$0xff] %vm563_vm2, %v1014_v63  ;;  %1079 = vst.msk [vmem:[%s2568_s2 + $0x1a0] sm:$0xff] %vm563_vm2, %v1015_v17 }
 0x239   :  { %1080 = vst.msk [vmem:[%s2568_s2 + $0x1a8] sm:$0xff] %vm563_vm2, %v1016_v39  ;;  %1081 = vst.msk [vmem:[%s2568_s2 + $0x1b0] sm:$0xff] %vm563_vm2, %v1017_v56 }
 0x23a   :  { %1082 = vst.msk [vmem:[%s2568_s2 + $0x1b8] sm:$0xff] %vm563_vm2, %v1018_v9  ;;  %1083 = vst.msk [vmem:[%s2568_s2 + $0x1c0] sm:$0xff] %vm563_vm2, %v1019_v57 }
 0x23b   :  { %1084 = vst.msk [vmem:[%s2568_s2 + $0x1c8] sm:$0xff] %vm563_vm2, %v1020_v5  ;;  %1085 = vst.msk [vmem:[%s2568_s2 + $0x1d0] sm:$0xff] %vm563_vm2, %v1021_v24 }
 0x23c   :  { %1086 = vst.msk [vmem:[%s2568_s2 + $0x1d8] sm:$0xff] %vm563_vm2, %v1022_v14  ;;  %1087 = vst.msk [vmem:[%s2568_s2 + $0x1e0] sm:$0xff] %vm563_vm2, %v1023_v40 }
 0x23d   :  { %1088 = vst.msk [vmem:[%s2568_s2 + $0x1e8] sm:$0xff] %vm563_vm2, %v1024_v35  ;;  %1089 = vst.msk [vmem:[%s2568_s2 + $0x1f0] sm:$0xff] %vm563_vm2, %v1025_v34 }
 0x23e   :  { %1090 = vst.msk [vmem:[%s2568_s2 + $0x1f8] sm:$0xff] %vm563_vm2, %v1026_v45 }

// kernel: cell_pcdarts_forward.10
= control target key start
LH: loop header
LB: loop body
LE: loop exit
PB: predicated region body
PF: predicated region fallthrough
CT: control target
= control target key end

     0   :  { %8 = vsyncpa [#allocation3], 0  ;;  %s8004_s0 = inlined_call_operand.vmem [shape: f32[512,216], index: 0, kind: input, shape index: {}]   ;;  %s8005_s1 = inlined_call_operand.vmem [shape: bf16[216,20], index: 1, kind: input, shape index: {}]   ;;  %s8006_s2 = inlined_call_operand.vmem [shape: f32[4], index: 2, kind: input, shape index: {}]   ;;  %s8007_s3 = inlined_call_operand.vmem [shape: f32[512,12], index: 3, kind: output, shape index: {}]  }
   0x1   :  { %s19_s14 = sshll.u32 %s8006_s2, 4  ;;  %s20_s14 = int_to_ptr.vmem [resolvable:$true] %s19_s14 }
   0x2   :  { %s3730_s15 = scalar_lea.vmem %s20_s14, 16  ;;  %p3735_p1 = scmp.lt.s32.totalorder %s20_s14, %s20_s14 }
   0x3   :  { %p3731_p0 = scmp.ne.s32.totalorder %s20_s14, %s3730_s15  ;;  %p3736_p2 = scmp.lt.s32.totalorder %s3730_s15, %s3730_s15 }
   0x5   :  { %p3737_p3 = por %p3736_p2, %p3735_p1 }
   0x7   :  { %p3738_p4 = pnand %p3737_p3, %p3731_p0 }
   0x9   :  { %3741 = shalt.err (!%p3738_p4)
}
   0xa   :  { %s3744_s16 = smov [#allocation2]  }
   0xb   :  { %22 = dma.vmem_to_smem %s20_s14, 16, %s3744_s16, [#allocation3]  }
   0xc   :  { %3742 = dma.done.wait [#allocation3], 16  }
   0xd   :  { %3743 = vsyncadd [#allocation3], 4294967280 }
   0xe   :  { %26 = sfence }
   0xf   :  { %v3650_v0 = vld [vmem:[%s8005_s1] sm:$0xff]   ;;  %v3745_v1 = vmov 0   ;;  %v3651_v2 = vld [vmem:[%s8005_s1 + $0x8] sm:$0xff]   ;;  %v3652_v3 = vld [vmem:[%s8005_s1 + $0x10] sm:$0xff]   ;;  %vm456_vm0 = vcmask 719872   ;;  %vm553_vm1 = vcmask 1043456  }
  0x10   :  { %557 = vmatprep.subr.bf16.mxu0 %v3745_v1  ;;  %3615 = vmatprep.subr.bf16.mxu1 %v3745_v1  ;;  %v3653_v4 = vld [vmem:[%s8005_s1 + $0x18] sm:$0xff]   ;;  %v29_v5 = vld [vmem:[%s8004_s0 + $0x8] sm:$0xff]  ;;  %v3654_v6 = vld [vmem:[%s8005_s1 + $0x20] sm:$0xff]   ;;  %vm846_vm2 = vcmask 162816   ;;  %s3746_s12 = smov 124   ;;  %s3613_s13 = sld [smem:[#allocation2 + $0x2]] }
  0x11   :  { %558 = vmatpush1.bf16.msra.mxu0 %v3650_v0  ;;  %3629 = vmatpush1.bf16.msra.mxu1 %v3650_v0  ;;  %v31_v7 = vld [vmem:[%s8004_s0 + $0x18] sm:$0xff]  ;;  %v157_v8 = vmax.f32 %v29_v5, 0.0  ;;  %v93_v10 = vld [vmem:[%s8004_s0 + $0x208] sm:$0xff]  ;;  %v3656_v17 = vld [vmem:[%s8005_s1 + $0x30] sm:$0xff]   ;;  %s3747_s14 = smov 52   ;;  %s3612_s15 = sld [smem:[#allocation2 + $0x1]] }
  0x12   :  { %559 = vmatprep.subr.bf16.mxu0 %v3745_v1  ;;  %3616 = vmatprep.subr.bf16.mxu1 %v3745_v1  ;;  %v159_v9 = vmax.f32 %v31_v7, 0.0  ;;  %v95_v11 = vld [vmem:[%s8004_s0 + $0x218] sm:$0xff]  ;;  %v221_v12 = vmax.f32 %v93_v10, 0.0  ;;  %v3655_v15 = vld [vmem:[%s8005_s1 + $0x28] sm:$0xff]   ;;  %v3658_v19 = vld [vmem:[%s8005_s1 + $0x40] sm:$0xff]   ;;  %s3614_s16 = sld [smem:[#allocation2 + $0x3]] }
  0x13   :  { %v223_v13 = vmax.f32 %v95_v11, 0.0  ;;  %v3657_v18 = vld [vmem:[%s8005_s1 + $0x38] sm:$0xff]   ;;  %v3659_v20 = vld [vmem:[%s8005_s1 + $0x48] sm:$0xff]   ;;  %v3660_v21 = vld [vmem:[%s8005_s1 + $0x50] sm:$0xff]   ;;  %s3748_s17 = smov 48   ;;  %s3749_s18 = smov 36  }
  0x14   :  { %v285_v14 = vpack.c.bf16 %v159_v9, %v157_v8  ;;  %v3661_v22 = vld [vmem:[%s8005_s1 + $0x58] sm:$0xff]   ;;  %v3662_v23 = vld [vmem:[%s8005_s1 + $0x60] sm:$0xff]   ;;  %v3663_v24 = vld [vmem:[%s8005_s1 + $0x68] ss:$0 sps:$4 sm:$0xff]   ;;  %s1310_s2 = sld [smem:[#allocation2]]  ;;  %s3750_s4 = smov 76  }
  0x15   :  { %560 = vmatpush1.bf16.msra.mxu0 %v3651_v2  ;;  %3630 = vmatpush1.bf16.msra.mxu1 %v3651_v2  ;;  %v317_v16 = vpack.c.bf16 %v223_v13, %v221_v12  ;;  %v28_v25 = vld [vmem:[%s8004_s0] sm:$0xff]  ;;  %v30_v26 = vld [vmem:[%s8004_s0 + $0x10] sm:$0xff]  ;;  %v33_v29 = vld [vmem:[%s8004_s0 + $0x28] sm:$0xff]  ;;  %v555_v41 = vsel %vm553_vm1, %v3663_v24, 0  ;;  %vm3366_vm3 = vcmask 31744   ;;  %vm3431_vm4 = vcmask 64512  }
  0x16   :  { %561 = vmatprep.subr.bf16.mxu0 %v3745_v1  ;;  %3617 = vmatprep.subr.bf16.mxu1 %v3745_v1  ;;  %v92_v27 = vld [vmem:[%s8004_s0 + $0x200] sm:$0xff]  ;;  %v94_v28 = vld [vmem:[%s8004_s0 + $0x210] sm:$0xff]  ;;  %v35_v30 = vld [vmem:[%s8004_s0 + $0x38] sm:$0xff]  ;;  %v156_v33 = vmax.f32 %v28_v25, 0.0  ;;  %v158_v34 = vmax.f32 %v30_v26, 0.0  ;;  %v161_v37 = vmax.f32 %v33_v29, 0.0 }
  0x17   :  { %3580 = vmatprep.mubr.msk.bf16.mxu0 %vm456_vm0, %v285_v14  ;;  %3596 = vmatprep.mubr.msk.bf16.mxu1 %vm456_vm0, %v317_v16  ;;  %v97_v31 = vld [vmem:[%s8004_s0 + $0x228] sm:$0xff]  ;;  %v99_v32 = vld [vmem:[%s8004_s0 + $0x238] sm:$0xff]  ;;  %v220_v35 = vmax.f32 %v92_v27, 0.0  ;;  %v222_v36 = vmax.f32 %v94_v28, 0.0  ;;  %v163_v38 = vmax.f32 %v35_v30, 0.0  ;;  %v32_v44 = vld [vmem:[%s8004_s0 + $0x20] sm:$0xff] }
  0x18   :  { %v225_v39 = vmax.f32 %v97_v31, 0.0  ;;  %v227_v40 = vmax.f32 %v99_v32, 0.0  ;;  %v284_v42 = vpack.c.bf16 %v158_v34, %v156_v33  ;;  %v34_v45 = vld [vmem:[%s8004_s0 + $0x30] sm:$0xff]  ;;  %v96_v48 = vld [vmem:[%s8004_s0 + $0x220] sm:$0xff]  ;;  %v37_v50 = vld [vmem:[%s8004_s0 + $0x48] sm:$0xff]  ;;  %v160_v54 = vmax.f32 %v32_v44, 0.0 }
  0x19   :  { %562 = vmatpush1.bf16.msra.mxu0 %v3652_v3  ;;  %3631 = vmatpush1.bf16.msra.mxu1 %v3652_v3  ;;  %v316_v43 = vpack.c.bf16 %v222_v36, %v220_v35  ;;  %v287_v46 = vpack.c.bf16 %v163_v38, %v161_v37  ;;  %v98_v49 = vld [vmem:[%s8004_s0 + $0x230] sm:$0xff]  ;;  %v39_v51 = vld [vmem:[%s8004_s0 + $0x58] sm:$0xff]  ;;  %v101_v52 = vld [vmem:[%s8004_s0 + $0x248] sm:$0xff]  ;;  %v162_v55 = vmax.f32 %v34_v45, 0.0  ;;  %v224_v56 = vmax.f32 %v96_v48, 0.0 }
  0x1a   :  { %563 = vmatprep.subr.bf16.mxu0 %v3745_v1  ;;  %3618 = vmatprep.subr.bf16.mxu1 %v3745_v1  ;;  %v319_v47 = vpack.c.bf16 %v227_v40, %v225_v39  ;;  %v103_v53 = vld [vmem:[%s8004_s0 + $0x258] sm:$0xff]  ;;  %v226_v57 = vmax.f32 %v98_v49, 0.0  ;;  %v165_v58 = vmax.f32 %v37_v50, 0.0  ;;  %v167_v59 = vmax.f32 %v39_v51, 0.0  ;;  %v36_v0 = vld [vmem:[%s8004_s0 + $0x40] sm:$0xff]  ;;  %v102_v5 = vld [vmem:[%s8004_s0 + $0x250] sm:$0xff] }
  0x1b   :  { %v229_v60 = vmax.f32 %v101_v52, 0.0  ;;  %v231_v61 = vmax.f32 %v103_v53, 0.0  ;;  %v286_v62 = vpack.c.bf16 %v162_v55, %v160_v54  ;;  %v43_v7 = vld [vmem:[%s8004_s0 + $0x78] sm:$0xff]  ;;  %v105_v8 = vld [vmem:[%s8004_s0 + $0x268] sm:$0xff]  ;;  %v164_v10 = vmax.f32 %v36_v0, 0.0  ;;  %v104_v24 = vld [vmem:[%s8004_s0 + $0x260] sm:$0xff] }
  0x1c   :  { %v318_v63 = vpack.c.bf16 %v226_v57, %v224_v56  ;;  %v289_v2 = vpack.c.bf16 %v167_v59, %v165_v58  ;;  %v107_v9 = vld [vmem:[%s8004_s0 + $0x278] sm:$0xff]  ;;  %v230_v13 = vmax.f32 %v102_v5, 0.0  ;;  %v233_v16 = vmax.f32 %v105_v8, 0.0  ;;  %v106_v25 = vld [vmem:[%s8004_s0 + $0x270] sm:$0xff]  ;;  %v45_v26 = vld [vmem:[%s8004_s0 + $0x88] sm:$0xff] }
  0x1d   :  { %564 = vmatpush1.bf16.msra.mxu0 %v3653_v4  ;;  %3632 = vmatpush1.bf16.msra.mxu1 %v3653_v4  ;;  %v321_v3 = vpack.c.bf16 %v231_v61, %v229_v60  ;;  %v100_v4 = vld [vmem:[%s8004_s0 + $0x240] sm:$0xff]  ;;  %v47_v27 = vld [vmem:[%s8004_s0 + $0x98] sm:$0xff]  ;;  %v109_v28 = vld [vmem:[%s8004_s0 + $0x288] sm:$0xff]  ;;  %v232_v32 = vmax.f32 %v104_v24, 0.0  ;;  %v234_v33 = vmax.f32 %v106_v25, 0.0  ;;  %v173_v34 = vmax.f32 %v45_v26, 0.0 }
  0x1e   :  { %565 = vmatprep.subr.bf16.mxu0 %v3745_v1  ;;  %3619 = vmatprep.subr.bf16.mxu1 %v3745_v1  ;;  %v228_v12 = vmax.f32 %v100_v4, 0.0  ;;  %v111_v29 = vld [vmem:[%s8004_s0 + $0x298] sm:$0xff]  ;;  %v175_v35 = vmax.f32 %v47_v27, 0.0  ;;  %v237_v36 = vmax.f32 %v109_v28, 0.0  ;;  %v44_v40 = vld [vmem:[%s8004_s0 + $0x80] sm:$0xff]  ;;  %v110_v45 = vld [vmem:[%s8004_s0 + $0x290] sm:$0xff] }
  0x1f   :  { %v239_v37 = vmax.f32 %v111_v29, 0.0  ;;  %v322_v39 = vpack.c.bf16 %v234_v33, %v232_v32  ;;  %v108_v44 = vld [vmem:[%s8004_s0 + $0x280] sm:$0xff]  ;;  %v113_v48 = vld [vmem:[%s8004_s0 + $0x2a8] sm:$0xff]  ;;  %v115_v49 = vld [vmem:[%s8004_s0 + $0x2b8] sm:$0xff]  ;;  %v172_v50 = vmax.f32 %v44_v40, 0.0  ;;  %v238_v53 = vmax.f32 %v110_v45, 0.0 }
  0x20   :  { %v236_v52 = vmax.f32 %v108_v44, 0.0  ;;  %v241_v56 = vmax.f32 %v113_v48, 0.0  ;;  %v243_v57 = vmax.f32 %v115_v49, 0.0  ;;  %v48_v60 = vld [vmem:[%s8004_s0 + $0xa0] sm:$0xff]  ;;  %v50_v61 = vld [vmem:[%s8004_s0 + $0xb0] sm:$0xff]  ;;  %v117_v4 = vld [vmem:[%s8004_s0 + $0x2c8] sm:$0xff] }
  0x21   :  { %566 = vmatpush1.bf16.msra.mxu0 %v3654_v6  ;;  %3633 = vmatpush1.bf16.msra.mxu1 %v3654_v6  ;;  %v41_v6 = vld [vmem:[%s8004_s0 + $0x68] sm:$0xff]  ;;  %v112_v0 = vld [vmem:[%s8004_s0 + $0x2a0] sm:$0xff]  ;;  %v119_v5 = vld [vmem:[%s8004_s0 + $0x2d8] sm:$0xff]  ;;  %vm3496_vm5 = vcmask 97280  }
  0x22   :  { %567 = vmatprep.subr.bf16.mxu0 %v3745_v1  ;;  %3620 = vmatprep.subr.bf16.mxu1 %v3745_v1  ;;  %v169_v14 = vmax.f32 %v41_v6, 0.0  ;;  %v324_v59 = vpack.c.bf16 %v238_v53, %v236_v52  ;;  %v176_v6 = vmax.f32 %v48_v60, 0.0  ;;  %v240_v8 = vmax.f32 %v112_v0, 0.0  ;;  %v121_v24 = vld [vmem:[%s8004_s0 + $0x2e8] sm:$0xff]  ;;  %v123_v25 = vld [vmem:[%s8004_s0 + $0x2f8] sm:$0xff]  ;;  %v120_v40 = vld [vmem:[%s8004_s0 + $0x2e0] sm:$0xff] }
  0x23   :  { %v249_v32 = vmax.f32 %v121_v24, 0.0  ;;  %v251_v33 = vmax.f32 %v123_v25, 0.0  ;;  %v125_v44 = vld [vmem:[%s8004_s0 + $0x308] sm:$0xff]  ;;  %v127_v45 = vld [vmem:[%s8004_s0 + $0x318] sm:$0xff]  ;;  %v248_v48 = vmax.f32 %v120_v40, 0.0  ;;  %v124_v60 = vld [vmem:[%s8004_s0 + $0x300] sm:$0xff] }
  0x24   :  { %v253_v52 = vmax.f32 %v125_v44, 0.0  ;;  %v255_v53 = vmax.f32 %v127_v45, 0.0  ;;  %v129_v0 = vld [vmem:[%s8004_s0 + $0x328] sm:$0xff] }
  0x25   :  { %568 = vmatpush1.bf16.msra.mxu0 %v3655_v15  ;;  %3634 = vmatpush1.bf16.msra.mxu1 %v3655_v15  ;;  %v171_v15 = vmax.f32 %v43_v7, 0.0  ;;  %v178_v7 = vmax.f32 %v50_v61, 0.0  ;;  %v126_v61 = vld [vmem:[%s8004_s0 + $0x310] sm:$0xff]  ;;  %v137_v40 = vld [vmem:[%s8004_s0 + $0x368] sm:$0xff] }
  0x26   :  { %569 = vmatprep.subr.bf16.mxu0 %v3745_v1  ;;  %3621 = vmatprep.subr.bf16.mxu1 %v3745_v1 }
  0x29   :  { %570 = vmatpush1.bf16.msra.mxu0 %v3656_v17  ;;  %3635 = vmatpush1.bf16.msra.mxu1 %v3656_v17  ;;  %v235_v17 = vmax.f32 %v107_v9, 0.0 }
  0x2a   :  { %571 = vmatprep.subr.bf16.mxu0 %v3745_v1  ;;  %3622 = vmatprep.subr.bf16.mxu1 %v3745_v1 }
  0x2d   :  { %572 = vmatpush1.bf16.msra.mxu0 %v3657_v18  ;;  %3636 = vmatpush1.bf16.msra.mxu1 %v3657_v18 }
  0x2e   :  { %573 = vmatprep.subr.bf16.mxu0 %v3745_v1  ;;  %3623 = vmatprep.subr.bf16.mxu1 %v3745_v1 }
  0x31   :  { %574 = vmatpush1.bf16.msra.mxu0 %v3658_v19  ;;  %3637 = vmatpush1.bf16.msra.mxu1 %v3658_v19  ;;  %v320_v19 = vpack.c.bf16 %v230_v13, %v228_v12  ;;  %v245_v12 = vmax.f32 %v117_v4, 0.0  ;;  %v247_v13 = vmax.f32 %v119_v5, 0.0  ;;  %v252_v4 = vmax.f32 %v124_v60, 0.0  ;;  %v141_v60 = vld [vmem:[%s8004_s0 + $0x388] sm:$0xff] }
  0x32   :  { %575 = vmatprep.subr.bf16.mxu0 %v3745_v1  ;;  %3624 = vmatprep.subr.bf16.mxu1 %v3745_v1  ;;  %v254_v5 = vmax.f32 %v126_v61, 0.0  ;;  %v143_v61 = vld [vmem:[%s8004_s0 + $0x398] sm:$0xff] }
  0x35   :  { %576 = vmatpush1.bf16.msra.mxu0 %v3659_v20  ;;  %3638 = vmatpush1.bf16.msra.mxu1 %v3659_v20  ;;  %v40_v20 = vld [vmem:[%s8004_s0 + $0x60] sm:$0xff] }
  0x36   :  { %577 = vmatprep.subr.bf16.mxu0 %v3745_v1  ;;  %3625 = vmatprep.subr.bf16.mxu1 %v3745_v1  ;;  %v168_v30 = vmax.f32 %v40_v20, 0.0  ;;  %v116_v20 = vld [vmem:[%s8004_s0 + $0x2c0] sm:$0xff] }
  0x37   :  { %v244_v28 = vmax.f32 %v116_v20, 0.0  ;;  %v133_v20 = vld [vmem:[%s8004_s0 + $0x348] sm:$0xff] }
  0x39   :  { %578 = vmatpush1.bf16.msra.mxu0 %v3660_v21  ;;  %3639 = vmatpush1.bf16.msra.mxu1 %v3660_v21  ;;  %v42_v21 = vld [vmem:[%s8004_s0 + $0x70] sm:$0xff] }
  0x3a   :  { %579 = vmatprep.subr.bf16.mxu0 %v3745_v1  ;;  %3626 = vmatprep.subr.bf16.mxu1 %v3745_v1  ;;  %v170_v31 = vmax.f32 %v42_v21, 0.0  ;;  %v118_v21 = vld [vmem:[%s8004_s0 + $0x2d0] sm:$0xff] }
  0x3b   :  { %v246_v29 = vmax.f32 %v118_v21, 0.0  ;;  %v135_v21 = vld [vmem:[%s8004_s0 + $0x358] sm:$0xff] }
  0x3c   :  { %v290_v38 = vpack.c.bf16 %v170_v31, %v168_v30 }
  0x3d   :  { %580 = vmatpush1.bf16.msra.mxu0 %v3661_v22  ;;  %3640 = vmatpush1.bf16.msra.mxu1 %v3661_v22  ;;  %v291_v22 = vpack.c.bf16 %v171_v15, %v169_v14  ;;  %v294_v14 = vpack.c.bf16 %v178_v7, %v176_v6 }
  0x3e   :  { %581 = vmatprep.subr.bf16.mxu0 %v3745_v1  ;;  %3627 = vmatprep.subr.bf16.mxu1 %v3745_v1 }
  0x41   :  { %582 = vmatpush1.bf16.msra.mxu0 %v3662_v23  ;;  %3641 = vmatpush1.bf16.msra.mxu1 %v3662_v23  ;;  %v323_v23 = vpack.c.bf16 %v235_v17, %v233_v16  ;;  %v52_v16 = vld [vmem:[%s8004_s0 + $0xc0] sm:$0xff]  ;;  %v54_v17 = vld [vmem:[%s8004_s0 + $0xd0] sm:$0xff] }
  0x42   :  { %583 = vmatprep.subr.bf16.mxu0 %v3745_v1  ;;  %3628 = vmatprep.subr.bf16.mxu1 %v3745_v1  ;;  %v38_v1 = vld [vmem:[%s8004_s0 + $0x50] sm:$0xff]  ;;  %v180_v26 = vmax.f32 %v52_v16, 0.0  ;;  %v182_v27 = vmax.f32 %v54_v17, 0.0  ;;  %v128_v16 = vld [vmem:[%s8004_s0 + $0x320] sm:$0xff] }
  0x43   :  { %v166_v11 = vmax.f32 %v38_v1, 0.0  ;;  %v114_v1 = vld [vmem:[%s8004_s0 + $0x2b0] sm:$0xff]  ;;  %v256_v24 = vmax.f32 %v128_v16, 0.0  ;;  %v145_v16 = vld [vmem:[%s8004_s0 + $0x3a8] sm:$0xff] }
  0x44   :  { %v242_v9 = vmax.f32 %v114_v1, 0.0  ;;  %v131_v1 = vld [vmem:[%s8004_s0 + $0x338] sm:$0xff]  ;;  %v130_v17 = vld [vmem:[%s8004_s0 + $0x330] sm:$0xff] }
  0x45   :  { %584 = vmatpush1.bf16.msra.mxu0 %v555_v41  ;;  %3642 = vmatpush1.bf16.msra.mxu1 %v555_v41  ;;  %v288_v18 = vpack.c.bf16 %v166_v11, %v164_v10  ;;  %v46_v41 = vld [vmem:[%s8004_s0 + $0x90] sm:$0xff]  ;;  %v258_v25 = vmax.f32 %v130_v17, 0.0  ;;  %v147_v17 = vld [vmem:[%s8004_s0 + $0x3b8] sm:$0xff] }
  0x46   :  { %v174_v51 = vmax.f32 %v46_v41, 0.0  ;;  %v326_v15 = vpack.c.bf16 %v242_v9, %v240_v8  ;;  %v122_v41 = vld [vmem:[%s8004_s0 + $0x2f0] sm:$0xff]  ;;  %v257_v8 = vmax.f32 %v129_v0, 0.0  ;;  %v259_v9 = vmax.f32 %v131_v1, 0.0 }
  0x47   :  { %v250_v49 = vmax.f32 %v122_v41, 0.0  ;;  %v139_v41 = vld [vmem:[%s8004_s0 + $0x378] sm:$0xff] }
  0x48   :  { %590 = vmatmul.mubr.bf16.vlgmr.msra.gmra.mrb[0].mxu0 %v284_v42  ;;  %718 = vmatmul.mubr.bf16.vlgmr.msra.gmra.mrb[0].mxu1 %v316_v43  ;;  %v293_v42 = vpack.c.bf16 %v175_v35, %v173_v34  ;;  %v325_v43 = vpack.c.bf16 %v239_v37, %v237_v36  ;;  %v292_v58 = vpack.c.bf16 %v174_v51, %v172_v50  ;;  %v56_v36 = vld [vmem:[%s8004_s0 + $0xe0] sm:$0xff]  ;;  %v58_v37 = vld [vmem:[%s8004_s0 + $0xf0] sm:$0xff] }
  0x49   :  { %3581 = vmatprep.mubr.msk.bf16.mxu0 %vm456_vm0, %v287_v46  ;;  %3597 = vmatprep.mubr.msk.bf16.mxu1 %vm456_vm0, %v319_v47  ;;  %v49_v46 = vld [vmem:[%s8004_s0 + $0xa8] sm:$0xff]  ;;  %v51_v47 = vld [vmem:[%s8004_s0 + $0xb8] sm:$0xff]  ;;  %v296_v34 = vpack.c.bf16 %v182_v27, %v180_v26  ;;  %v328_v35 = vpack.c.bf16 %v246_v29, %v244_v28  ;;  %v261_v28 = vmax.f32 %v133_v20, 0.0  ;;  %v263_v29 = vmax.f32 %v135_v21, 0.0 }
  0x4a   :  { %v177_v54 = vmax.f32 %v49_v46, 0.0  ;;  %v179_v55 = vmax.f32 %v51_v47, 0.0  ;;  %v184_v46 = vmax.f32 %v56_v36, 0.0  ;;  %v186_v47 = vmax.f32 %v58_v37, 0.0  ;;  %v132_v36 = vld [vmem:[%s8004_s0 + $0x340] sm:$0xff]  ;;  %v134_v37 = vld [vmem:[%s8004_s0 + $0x350] sm:$0xff] }
  0x4b   :  { %v260_v44 = vmax.f32 %v132_v36, 0.0  ;;  %v262_v45 = vmax.f32 %v134_v37, 0.0  ;;  %v149_v36 = vld [vmem:[%s8004_s0 + $0x3c8] sm:$0xff]  ;;  %v151_v37 = vld [vmem:[%s8004_s0 + $0x3d8] sm:$0xff] }
  0x50   :  { %598 = vmatmul.mubr.bf16.gmra.mrb[4].mxu0 %v286_v62  ;;  %726 = vmatmul.mubr.bf16.gmra.mrb[4].mxu1 %v318_v63  ;;  %v295_v62 = vpack.c.bf16 %v179_v55, %v177_v54  ;;  %v327_v63 = vpack.c.bf16 %v243_v57, %v241_v56  ;;  %v298_v54 = vpack.c.bf16 %v186_v47, %v184_v46  ;;  %v60_v56 = vld [vmem:[%s8004_s0 + $0x100] sm:$0xff]  ;;  %v62_v57 = vld [vmem:[%s8004_s0 + $0x110] sm:$0xff] }
  0x51   :  { %3582 = vmatprep.mubr.msk.bf16.mxu0 %vm456_vm0, %v289_v2  ;;  %3598 = vmatprep.mubr.msk.bf16.mxu1 %vm456_vm0, %v321_v3  ;;  %v53_v2 = vld [vmem:[%s8004_s0 + $0xc8] sm:$0xff]  ;;  %v55_v3 = vld [vmem:[%s8004_s0 + $0xd8] sm:$0xff]  ;;  %v330_v55 = vpack.c.bf16 %v250_v49, %v248_v48  ;;  %v265_v48 = vmax.f32 %v137_v40, 0.0  ;;  %v267_v49 = vmax.f32 %v139_v41, 0.0 }
  0x52   :  { %v181_v10 = vmax.f32 %v53_v2, 0.0  ;;  %v183_v11 = vmax.f32 %v55_v3, 0.0  ;;  %v188_v2 = vmax.f32 %v60_v56, 0.0  ;;  %v190_v3 = vmax.f32 %v62_v57, 0.0  ;;  %v136_v56 = vld [vmem:[%s8004_s0 + $0x360] sm:$0xff]  ;;  %v138_v57 = vld [vmem:[%s8004_s0 + $0x370] sm:$0xff] }
  0x53   :  { %v264_v0 = vmax.f32 %v136_v56, 0.0  ;;  %v266_v1 = vmax.f32 %v138_v57, 0.0  ;;  %v153_v56 = vld [vmem:[%s8004_s0 + $0x3e8] sm:$0xff]  ;;  %v155_v57 = vld [vmem:[%s8004_s0 + $0x3f8] sm:$0xff] }
  0x58   :  { %606 = vmatmul.mubr.bf16.gmra.mrb[8].mxu0 %v288_v18  ;;  %734 = vmatmul.mubr.bf16.gmra.mrb[8].mxu1 %v320_v19  ;;  %v297_v18 = vpack.c.bf16 %v183_v11, %v181_v10  ;;  %v329_v19 = vpack.c.bf16 %v247_v13, %v245_v12  ;;  %v300_v10 = vpack.c.bf16 %v190_v3, %v188_v2  ;;  %v64_v12 = vld [vmem:[%s8004_s0 + $0x120] sm:$0xff]  ;;  %v66_v13 = vld [vmem:[%s8004_s0 + $0x130] sm:$0xff] }
  0x59   :  { %3583 = vmatprep.mubr.msk.bf16.mxu0 %vm456_vm0, %v291_v22  ;;  %3599 = vmatprep.mubr.msk.bf16.mxu1 %vm456_vm0, %v323_v23  ;;  %v57_v22 = vld [vmem:[%s8004_s0 + $0xe8] sm:$0xff]  ;;  %v59_v23 = vld [vmem:[%s8004_s0 + $0xf8] sm:$0xff]  ;;  %v332_v11 = vpack.c.bf16 %v254_v5, %v252_v4  ;;  %v269_v4 = vmax.f32 %v141_v60, 0.0  ;;  %v271_v5 = vmax.f32 %v143_v61, 0.0 }
  0x5a   :  { %v185_v30 = vmax.f32 %v57_v22, 0.0  ;;  %v187_v31 = vmax.f32 %v59_v23, 0.0  ;;  %v192_v22 = vmax.f32 %v64_v12, 0.0  ;;  %v194_v23 = vmax.f32 %v66_v13, 0.0  ;;  %v140_v12 = vld [vmem:[%s8004_s0 + $0x380] sm:$0xff]  ;;  %v142_v13 = vld [vmem:[%s8004_s0 + $0x390] sm:$0xff] }
  0x5b   :  { %v268_v20 = vmax.f32 %v140_v12, 0.0  ;;  %v270_v21 = vmax.f32 %v142_v13, 0.0 }
  0x60   :  { %614 = vmatmul.mubr.bf16.gmra.mrb[12].mxu0 %v290_v38  ;;  %742 = vmatmul.mubr.bf16.gmra.mrb[12].mxu1 %v322_v39  ;;  %v299_v38 = vpack.c.bf16 %v187_v31, %v185_v30  ;;  %v331_v39 = vpack.c.bf16 %v251_v33, %v249_v32  ;;  %v302_v30 = vpack.c.bf16 %v194_v23, %v192_v22  ;;  %v68_v32 = vld [vmem:[%s8004_s0 + $0x140] sm:$0xff]  ;;  %v70_v33 = vld [vmem:[%s8004_s0 + $0x150] sm:$0xff] }
  0x61   :  { %3584 = vmatprep.mubr.msk.bf16.mxu0 %vm456_vm0, %v293_v42  ;;  %3600 = vmatprep.mubr.msk.bf16.mxu1 %vm456_vm0, %v325_v43  ;;  %v61_v42 = vld [vmem:[%s8004_s0 + $0x108] sm:$0xff]  ;;  %v63_v43 = vld [vmem:[%s8004_s0 + $0x118] sm:$0xff]  ;;  %v334_v31 = vpack.c.bf16 %v258_v25, %v256_v24  ;;  %v273_v24 = vmax.f32 %v145_v16, 0.0  ;;  %v275_v25 = vmax.f32 %v147_v17, 0.0 }
  0x62   :  { %v189_v50 = vmax.f32 %v61_v42, 0.0  ;;  %v191_v51 = vmax.f32 %v63_v43, 0.0  ;;  %v196_v42 = vmax.f32 %v68_v32, 0.0  ;;  %v198_v43 = vmax.f32 %v70_v33, 0.0  ;;  %v144_v32 = vld [vmem:[%s8004_s0 + $0x3a0] sm:$0xff]  ;;  %v146_v33 = vld [vmem:[%s8004_s0 + $0x3b0] sm:$0xff] }
  0x63   :  { %v272_v40 = vmax.f32 %v144_v32, 0.0  ;;  %v274_v41 = vmax.f32 %v146_v33, 0.0 }
  0x68   :  { %622 = vmatmul.mubr.bf16.gmra.mrb[16].mxu0 %v292_v58  ;;  %750 = vmatmul.mubr.bf16.gmra.mrb[16].mxu1 %v324_v59  ;;  %v301_v58 = vpack.c.bf16 %v191_v51, %v189_v50  ;;  %v333_v59 = vpack.c.bf16 %v255_v53, %v253_v52  ;;  %v304_v50 = vpack.c.bf16 %v198_v43, %v196_v42  ;;  %v72_v52 = vld [vmem:[%s8004_s0 + $0x160] sm:$0xff]  ;;  %v74_v53 = vld [vmem:[%s8004_s0 + $0x170] sm:$0xff] }
  0x69   :  { %3585 = vmatprep.mubr.msk.bf16.mxu0 %vm456_vm0, %v295_v62  ;;  %3601 = vmatprep.mubr.msk.bf16.mxu1 %vm456_vm0, %v327_v63  ;;  %v65_v62 = vld [vmem:[%s8004_s0 + $0x128] sm:$0xff]  ;;  %v67_v63 = vld [vmem:[%s8004_s0 + $0x138] sm:$0xff]  ;;  %v336_v51 = vpack.c.bf16 %v262_v45, %v260_v44  ;;  %v277_v44 = vmax.f32 %v149_v36, 0.0  ;;  %v279_v45 = vmax.f32 %v151_v37, 0.0 }
  0x6a   :  { %v193_v6 = vmax.f32 %v65_v62, 0.0  ;;  %v195_v7 = vmax.f32 %v67_v63, 0.0  ;;  %v200_v62 = vmax.f32 %v72_v52, 0.0  ;;  %v202_v63 = vmax.f32 %v74_v53, 0.0  ;;  %v148_v52 = vld [vmem:[%s8004_s0 + $0x3c0] sm:$0xff]  ;;  %v150_v53 = vld [vmem:[%s8004_s0 + $0x3d0] sm:$0xff] }
  0x6b   :  { %v276_v60 = vmax.f32 %v148_v52, 0.0  ;;  %v278_v61 = vmax.f32 %v150_v53, 0.0 }
  0x70   :  { %630 = vmatmul.mubr.bf16.gmra.mrb[20].mxu0 %v294_v14  ;;  %758 = vmatmul.mubr.bf16.gmra.mrb[20].mxu1 %v326_v15  ;;  %v303_v14 = vpack.c.bf16 %v195_v7, %v193_v6  ;;  %v335_v15 = vpack.c.bf16 %v259_v9, %v257_v8  ;;  %v306_v6 = vpack.c.bf16 %v202_v63, %v200_v62  ;;  %v76_v8 = vld [vmem:[%s8004_s0 + $0x180] sm:$0xff]  ;;  %v78_v9 = vld [vmem:[%s8004_s0 + $0x190] sm:$0xff] }
  0x71   :  { %3586 = vmatprep.mubr.msk.bf16.mxu0 %vm456_vm0, %v297_v18  ;;  %3602 = vmatprep.mubr.msk.bf16.mxu1 %vm456_vm0, %v329_v19  ;;  %v69_v18 = vld [vmem:[%s8004_s0 + $0x148] sm:$0xff]  ;;  %v71_v19 = vld [vmem:[%s8004_s0 + $0x158] sm:$0xff]  ;;  %v338_v7 = vpack.c.bf16 %v266_v1, %v264_v0  ;;  %v281_v0 = vmax.f32 %v153_v56, 0.0  ;;  %v283_v1 = vmax.f32 %v155_v57, 0.0 }
  0x72   :  { %v197_v26 = vmax.f32 %v69_v18, 0.0  ;;  %v199_v27 = vmax.f32 %v71_v19, 0.0  ;;  %v204_v18 = vmax.f32 %v76_v8, 0.0  ;;  %v206_v19 = vmax.f32 %v78_v9, 0.0  ;;  %v152_v8 = vld [vmem:[%s8004_s0 + $0x3e0] sm:$0xff]  ;;  %v154_v9 = vld [vmem:[%s8004_s0 + $0x3f0] sm:$0xff] }
  0x73   :  { %v280_v12 = vmax.f32 %v152_v8, 0.0  ;;  %v282_v13 = vmax.f32 %v154_v9, 0.0 }
  0x78   :  { %638 = vmatmul.mubr.bf16.gmra.mrb[24].mxu0 %v296_v34  ;;  %766 = vmatmul.mubr.bf16.gmra.mrb[24].mxu1 %v328_v35  ;;  %v305_v34 = vpack.c.bf16 %v199_v27, %v197_v26  ;;  %v337_v35 = vpack.c.bf16 %v263_v29, %v261_v28  ;;  %v308_v26 = vpack.c.bf16 %v206_v19, %v204_v18  ;;  %v80_v28 = vld [vmem:[%s8004_s0 + $0x1a0] sm:$0xff]  ;;  %v82_v29 = vld [vmem:[%s8004_s0 + $0x1b0] sm:$0xff] }
  0x79   :  { %3587 = vmatprep.mubr.msk.bf16.mxu0 %vm456_vm0, %v299_v38  ;;  %3603 = vmatprep.mubr.msk.bf16.mxu1 %vm456_vm0, %v331_v39  ;;  %v73_v38 = vld [vmem:[%s8004_s0 + $0x168] sm:$0xff]  ;;  %v75_v39 = vld [vmem:[%s8004_s0 + $0x178] sm:$0xff]  ;;  %v340_v27 = vpack.c.bf16 %v270_v21, %v268_v20 }
  0x7a   :  { %v201_v46 = vmax.f32 %v73_v38, 0.0  ;;  %v203_v47 = vmax.f32 %v75_v39, 0.0  ;;  %v208_v38 = vmax.f32 %v80_v28, 0.0  ;;  %v210_v39 = vmax.f32 %v82_v29, 0.0 }
  0x80   :  { %646 = vmatmul.mubr.bf16.gmra.mrb[28].mxu0 %v298_v54  ;;  %774 = vmatmul.mubr.bf16.gmra.mrb[28].mxu1 %v330_v55  ;;  %v307_v54 = vpack.c.bf16 %v203_v47, %v201_v46  ;;  %v339_v55 = vpack.c.bf16 %v267_v49, %v265_v48  ;;  %v310_v46 = vpack.c.bf16 %v210_v39, %v208_v38  ;;  %v84_v48 = vld [vmem:[%s8004_s0 + $0x1c0] sm:$0xff]  ;;  %v86_v49 = vld [vmem:[%s8004_s0 + $0x1d0] sm:$0xff] }
  0x81   :  { %3588 = vmatprep.mubr.msk.bf16.mxu0 %vm456_vm0, %v301_v58  ;;  %3604 = vmatprep.mubr.msk.bf16.mxu1 %vm456_vm0, %v333_v59  ;;  %v77_v58 = vld [vmem:[%s8004_s0 + $0x188] sm:$0xff]  ;;  %v79_v59 = vld [vmem:[%s8004_s0 + $0x198] sm:$0xff]  ;;  %v342_v47 = vpack.c.bf16 %v274_v41, %v272_v40 }
  0x82   :  { %v205_v2 = vmax.f32 %v77_v58, 0.0  ;;  %v207_v3 = vmax.f32 %v79_v59, 0.0  ;;  %v212_v58 = vmax.f32 %v84_v48, 0.0  ;;  %v214_v59 = vmax.f32 %v86_v49, 0.0 }
  0x88   :  { %654 = vmatmul.mubr.bf16.gmra.mrb[32].mxu0 %v300_v10  ;;  %782 = vmatmul.mubr.bf16.gmra.mrb[32].mxu1 %v332_v11  ;;  %v309_v10 = vpack.c.bf16 %v207_v3, %v205_v2  ;;  %v341_v11 = vpack.c.bf16 %v271_v5, %v269_v4  ;;  %v312_v2 = vpack.c.bf16 %v214_v59, %v212_v58  ;;  %v88_v4 = vld [vmem:[%s8004_s0 + $0x1e0] sm:$0xff] }
  0x89   :  { %3589 = vmatprep.mubr.msk.bf16.mxu0 %vm456_vm0, %v303_v14  ;;  %3605 = vmatprep.mubr.msk.bf16.mxu1 %vm456_vm0, %v335_v15  ;;  %v81_v14 = vld [vmem:[%s8004_s0 + $0x1a8] sm:$0xff]  ;;  %v83_v15 = vld [vmem:[%s8004_s0 + $0x1b8] sm:$0xff]  ;;  %v344_v3 = vpack.c.bf16 %v278_v61, %v276_v60 }
  0x8a   :  { %v209_v22 = vmax.f32 %v81_v14, 0.0  ;;  %v211_v23 = vmax.f32 %v83_v15, 0.0  ;;  %v346_v15 = vpack.c.bf16 %v282_v13, %v280_v12 }
  0x90   :  { %662 = vmatmul.mubr.bf16.gmra.mrb[36].mxu0 %v302_v30  ;;  %790 = vmatmul.mubr.bf16.gmra.mrb[36].mxu1 %v334_v31  ;;  %v311_v30 = vpack.c.bf16 %v211_v23, %v209_v22  ;;  %v343_v31 = vpack.c.bf16 %v275_v25, %v273_v24 }
  0x91   :  { %3590 = vmatprep.mubr.msk.bf16.mxu0 %vm456_vm0, %v305_v34  ;;  %3606 = vmatprep.mubr.msk.bf16.mxu1 %vm456_vm0, %v337_v35  ;;  %v85_v34 = vld [vmem:[%s8004_s0 + $0x1c8] sm:$0xff]  ;;  %v87_v35 = vld [vmem:[%s8004_s0 + $0x1d8] sm:$0xff] }
  0x92   :  { %v213_v42 = vmax.f32 %v85_v34, 0.0  ;;  %v215_v43 = vmax.f32 %v87_v35, 0.0 }
  0x98   :  { %670 = vmatmul.mubr.bf16.gmra.mrb[40].mxu0 %v304_v50  ;;  %798 = vmatmul.mubr.bf16.gmra.mrb[40].mxu1 %v336_v51  ;;  %v313_v50 = vpack.c.bf16 %v215_v43, %v213_v42  ;;  %v345_v51 = vpack.c.bf16 %v279_v45, %v277_v44 }
  0x99   :  { %3591 = vmatprep.mubr.msk.bf16.mxu0 %vm456_vm0, %v307_v54  ;;  %3607 = vmatprep.mubr.msk.bf16.mxu1 %vm456_vm0, %v339_v55  ;;  %v89_v54 = vld [vmem:[%s8004_s0 + $0x1e8] sm:$0xff]  ;;  %v91_v55 = vld [vmem:[%s8004_s0 + $0x1f8] sm:$0xff] }
  0x9a   :  { %v217_v62 = vmax.f32 %v89_v54, 0.0  ;;  %v219_v63 = vmax.f32 %v91_v55, 0.0 }
  0x9c   :  { %v315_v5 = vpack.c.bf16 %v219_v63, %v217_v62 }
  0xa0   :  { %678 = vmatmul.mubr.bf16.gmra.mrb[44].mxu0 %v306_v6  ;;  %806 = vmatmul.mubr.bf16.gmra.mrb[44].mxu1 %v338_v7  ;;  %v90_v6 = vld [vmem:[%s8004_s0 + $0x1f0] sm:$0xff]  ;;  %v347_v7 = vpack.c.bf16 %v283_v1, %v281_v0 }
  0xa1   :  { %3592 = vmatprep.mubr.msk.bf16.mxu0 %vm456_vm0, %v309_v10  ;;  %3608 = vmatprep.mubr.msk.bf16.mxu1 %vm456_vm0, %v341_v11  ;;  %v216_v10 = vmax.f32 %v88_v4, 0.0  ;;  %v218_v11 = vmax.f32 %v90_v6, 0.0 }
  0xa3   :  { %v314_v14 = vpack.c.bf16 %v218_v11, %v216_v10 }
  0xa8   :  { %686 = vmatmul.mubr.bf16.gmra.mrb[48].mxu0 %v308_v26  ;;  %814 = vmatmul.mubr.bf16.gmra.mrb[48].mxu1 %v340_v27 }
  0xa9   :  { %3593 = vmatprep.mubr.msk.bf16.mxu0 %vm456_vm0, %v311_v30  ;;  %3609 = vmatprep.mubr.msk.bf16.mxu1 %vm456_vm0, %v343_v31 }
  0xb0   :  { %694 = vmatmul.mubr.bf16.gmra.mrb[52].mxu0 %v310_v46  ;;  %822 = vmatmul.mubr.bf16.gmra.mrb[52].mxu1 %v342_v47 }
  0xb1   :  { %3594 = vmatprep.mubr.msk.bf16.mxu0 %vm456_vm0, %v313_v50  ;;  %3610 = vmatprep.mubr.msk.bf16.mxu1 %vm456_vm0, %v345_v51 }
  0xb8   :  { %702 = vmatmul.mubr.bf16.gmra.mrb[56].mxu0 %v312_v2  ;;  %830 = vmatmul.mubr.bf16.gmra.mrb[56].mxu1 %v344_v3 }
  0xb9   :  { %3595 = vmatprep.mubr.msk.bf16.mxu0 %vm456_vm0, %v315_v5  ;;  %3611 = vmatprep.mubr.msk.bf16.mxu1 %vm456_vm0, %v347_v7 }
  0xc0   :  { %710 = vmatmul.mubr.bf16.gmra.mrb[60].mxu0 %v314_v14  ;;  %838 = vmatmul.mubr.bf16.gmra.mrb[60].mxu1 %v346_v15 }
 0x11b   :  { %v4260_v16 = vpop.f32.mrb[0].mxu0  ;;  %v4262_v17 = vpop.f32.mrb[0].mxu1 }
 0x11c   :  { %8131 = vst [vmem:[#allocation5_spill] sm:$0xff] %v4262_v17  ;;  %2918 = vrot.lane.b32.xlu0 %v4260_v16, %s3746_s12  ;;  %v593_v18 = vpop.f32.mrb[1].mxu0  ;;  %v721_v19 = vpop.f32.mrb[1].mxu1  ;;  %v847_v22 = vsel %vm846_vm2, %v4260_v16, 0.0 }
 0x11d   :  { %v4266_v20 = vpop.f32.mrb[2].mxu0  ;;  %v4268_v21 = vpop.f32.mrb[2].mxu1 }
 0x11e   :  { %8132 = vst [vmem:[#allocation6_spill] sm:$0xff] %v4268_v21  ;;  %v848_v23 = vsel %vm846_vm2, %v4266_v20, 0.0  ;;  %2920 = vrot.lane.b32.xlu1 %v4266_v20, %s3746_s12  ;;  %v596_v24 = vpop.f32.mrb[3].mxu0  ;;  %v724_v25 = vpop.f32.mrb[3].mxu1 }
 0x11f   :  { %v849_v26 = vadd.f32 %v848_v23, %v847_v22 }
 0x120   :  { %2982 = vrot.lane.b32.xlu0 %v4262_v17, %s3746_s12 }
 0x122   :  { %2984 = vrot.lane.b32.xlu1 %v4268_v21, %s3746_s12 }
 0x123   :  { %v4280_v27 = vpop.f32.mrb[4].mxu0  ;;  %v4282_v28 = vpop.f32.mrb[4].mxu1 }
 0x124   :  { %v850_v29 = vsel %vm846_vm2, %v4280_v27, 0.0  ;;  %2922 = vrot.lane.b32.xlu0 %v4280_v27, %s3746_s12  ;;  %v601_v30 = vpop.f32.mrb[5].mxu0  ;;  %v729_v31 = vpop.f32.mrb[5].mxu1 }
 0x125   :  { %v851_v32 = vadd.f32 %v850_v29, %v849_v26  ;;  %v4288_v33 = vpop.f32.mrb[6].mxu0  ;;  %v4290_v34 = vpop.f32.mrb[6].mxu1 }
 0x126   :  { %v852_v35 = vsel %vm846_vm2, %v4288_v33, 0.0  ;;  %2924 = vrot.lane.b32.xlu1 %v4288_v33, %s3746_s12  ;;  %v604_v36 = vpop.f32.mrb[7].mxu0  ;;  %v732_v37 = vpop.f32.mrb[7].mxu1 }
 0x127   :  { %v853_v38 = vadd.f32 %v852_v35, %v851_v32 }
 0x128   :  { %2986 = vrot.lane.b32.xlu0 %v4282_v28, %s3746_s12 }
 0x12a   :  { %2988 = vrot.lane.b32.xlu1 %v4290_v34, %s3746_s12 }
 0x12b   :  { %v4300_v39 = vpop.f32.mrb[8].mxu0  ;;  %v4302_v40 = vpop.f32.mrb[8].mxu1 }
 0x12c   :  { %v854_v41 = vsel %vm846_vm2, %v4300_v39, 0.0  ;;  %2926 = vrot.lane.b32.xlu0 %v4300_v39, %s3746_s12  ;;  %v609_v42 = vpop.f32.mrb[9].mxu0  ;;  %v737_v43 = vpop.f32.mrb[9].mxu1 }
 0x12d   :  { %v855_v44 = vadd.f32 %v854_v41, %v853_v38  ;;  %v4308_v45 = vpop.f32.mrb[10].mxu0  ;;  %v4310_v46 = vpop.f32.mrb[10].mxu1 }
 0x12e   :  { %v856_v47 = vsel %vm846_vm2, %v4308_v45, 0.0  ;;  %2928 = vrot.lane.b32.xlu1 %v4308_v45, %s3746_s12  ;;  %v612_v48 = vpop.f32.mrb[11].mxu0  ;;  %v740_v49 = vpop.f32.mrb[11].mxu1 }
 0x12f   :  { %v857_v50 = vadd.f32 %v856_v47, %v855_v44 }
 0x130   :  { %2990 = vrot.lane.b32.xlu0 %v4302_v40, %s3746_s12 }
 0x132   :  { %2992 = vrot.lane.b32.xlu1 %v4310_v46, %s3746_s12 }
 0x133   :  { %v4320_v51 = vpop.f32.mrb[12].mxu0  ;;  %v4322_v52 = vpop.f32.mrb[12].mxu1 }
 0x134   :  { %v858_v53 = vsel %vm846_vm2, %v4320_v51, 0.0  ;;  %2930 = vrot.lane.b32.xlu0 %v4320_v51, %s3746_s12  ;;  %v617_v54 = vpop.f32.mrb[13].mxu0  ;;  %v745_v55 = vpop.f32.mrb[13].mxu1 }
 0x135   :  { %v859_v56 = vadd.f32 %v858_v53, %v857_v50  ;;  %v4328_v57 = vpop.f32.mrb[14].mxu0  ;;  %v4330_v58 = vpop.f32.mrb[14].mxu1 }
 0x136   :  { %v860_v59 = vsel %vm846_vm2, %v4328_v57, 0.0  ;;  %2932 = vrot.lane.b32.xlu1 %v4328_v57, %s3746_s12  ;;  %v620_v60 = vpop.f32.mrb[15].mxu0  ;;  %v748_v61 = vpop.f32.mrb[15].mxu1 }
 0x137   :  { %v861_v62 = vadd.f32 %v860_v59, %v859_v56 }
 0x138   :  { %2994 = vrot.lane.b32.xlu0 %v4322_v52, %s3746_s12 }
 0x13a   :  { %2996 = vrot.lane.b32.xlu1 %v4330_v58, %s3746_s12 }
 0x13b   :  { %v4340_v63 = vpop.f32.mrb[16].mxu0  ;;  %v4342_v0 = vpop.f32.mrb[16].mxu1 }
 0x13c   :  { %v862_v1 = vsel %vm846_vm2, %v4340_v63, 0.0  ;;  %2934 = vrot.lane.b32.xlu0 %v4340_v63, %s3746_s12  ;;  %v625_v2 = vpop.f32.mrb[17].mxu0  ;;  %v753_v3 = vpop.f32.mrb[17].mxu1 }
 0x13d   :  { %v863_v4 = vadd.f32 %v862_v1, %v861_v62  ;;  %v4348_v5 = vpop.f32.mrb[18].mxu0  ;;  %v4350_v6 = vpop.f32.mrb[18].mxu1 }
 0x13e   :  { %v864_v7 = vsel %vm846_vm2, %v4348_v5, 0.0  ;;  %2936 = vrot.lane.b32.xlu1 %v4348_v5, %s3746_s12  ;;  %v628_v8 = vpop.f32.mrb[19].mxu0  ;;  %v756_v9 = vpop.f32.mrb[19].mxu1 }
 0x13f   :  { %v865_v10 = vadd.f32 %v864_v7, %v863_v4 }
 0x140   :  { %2998 = vrot.lane.b32.xlu0 %v4342_v0, %s3746_s12 }
 0x142   :  { %3000 = vrot.lane.b32.xlu1 %v4350_v6, %s3746_s12 }
 0x143   :  { %v4360_v11 = vpop.f32.mrb[20].mxu0  ;;  %v4362_v12 = vpop.f32.mrb[20].mxu1 }
 0x144   :  { %v866_v13 = vsel %vm846_vm2, %v4360_v11, 0.0  ;;  %2938 = vrot.lane.b32.xlu0 %v4360_v11, %s3746_s12  ;;  %v633_v14 = vpop.f32.mrb[21].mxu0  ;;  %v761_v15 = vpop.f32.mrb[21].mxu1 }
 0x145   :  { %v867_v18 = vadd.f32 %v866_v13, %v865_v10  ;;  %v4368_v19 = vpop.f32.mrb[22].mxu0  ;;  %v4370_v22 = vpop.f32.mrb[22].mxu1 }
 0x146   :  { %v868_v23 = vsel %vm846_vm2, %v4368_v19, 0.0  ;;  %2940 = vrot.lane.b32.xlu1 %v4368_v19, %s3746_s12  ;;  %v636_v24 = vpop.f32.mrb[23].mxu0  ;;  %v764_v25 = vpop.f32.mrb[23].mxu1 }
 0x147   :  { %v869_v26 = vadd.f32 %v868_v23, %v867_v18 }
 0x148   :  { %3002 = vrot.lane.b32.xlu0 %v4362_v12, %s3746_s12 }
 0x14a   :  { %3004 = vrot.lane.b32.xlu1 %v4370_v22, %s3746_s12 }
 0x14b   :  { %v4380_v29 = vpop.f32.mrb[24].mxu0  ;;  %v4382_v30 = vpop.f32.mrb[24].mxu1 }
 0x14c   :  { %v870_v31 = vsel %vm846_vm2, %v4380_v29, 0.0  ;;  %2942 = vrot.lane.b32.xlu0 %v4380_v29, %s3746_s12  ;;  %v641_v32 = vpop.f32.mrb[25].mxu0  ;;  %v769_v35 = vpop.f32.mrb[25].mxu1 }
 0x14d   :  { %v871_v36 = vadd.f32 %v870_v31, %v869_v26  ;;  %v4388_v37 = vpop.f32.mrb[26].mxu0  ;;  %v4390_v38 = vpop.f32.mrb[26].mxu1 }
 0x14e   :  { %v872_v41 = vsel %vm846_vm2, %v4388_v37, 0.0  ;;  %2944 = vrot.lane.b32.xlu1 %v4388_v37, %s3746_s12  ;;  %v644_v42 = vpop.f32.mrb[27].mxu0  ;;  %v772_v43 = vpop.f32.mrb[27].mxu1 }
 0x14f   :  { %v873_v44 = vadd.f32 %v872_v41, %v871_v36 }
 0x150   :  { %3006 = vrot.lane.b32.xlu0 %v4382_v30, %s3746_s12 }
 0x152   :  { %3008 = vrot.lane.b32.xlu1 %v4390_v38, %s3746_s12 }
 0x153   :  { %v4400_v47 = vpop.f32.mrb[28].mxu0  ;;  %v4402_v48 = vpop.f32.mrb[28].mxu1 }
 0x154   :  { %v874_v49 = vsel %vm846_vm2, %v4400_v47, 0.0  ;;  %2946 = vrot.lane.b32.xlu0 %v4400_v47, %s3746_s12  ;;  %v649_v50 = vpop.f32.mrb[29].mxu0  ;;  %v777_v53 = vpop.f32.mrb[29].mxu1 }
 0x155   :  { %v875_v54 = vadd.f32 %v874_v49, %v873_v44  ;;  %v4408_v55 = vpop.f32.mrb[30].mxu0  ;;  %v4410_v56 = vpop.f32.mrb[30].mxu1 }
 0x156   :  { %v876_v59 = vsel %vm846_vm2, %v4408_v55, 0.0  ;;  %2948 = vrot.lane.b32.xlu1 %v4408_v55, %s3746_s12  ;;  %v652_v60 = vpop.f32.mrb[31].mxu0  ;;  %v780_v61 = vpop.f32.mrb[31].mxu1 }
 0x157   :  { %v877_v62 = vadd.f32 %v876_v59, %v875_v54 }
 0x158   :  { %3010 = vrot.lane.b32.xlu0 %v4402_v48, %s3746_s12 }
 0x15a   :  { %3012 = vrot.lane.b32.xlu1 %v4410_v56, %s3746_s12 }
 0x15b   :  { %v4420_v1 = vpop.f32.mrb[32].mxu0  ;;  %v4422_v2 = vpop.f32.mrb[32].mxu1 }
 0x15c   :  { %v878_v3 = vsel %vm846_vm2, %v4420_v1, 0.0  ;;  %2950 = vrot.lane.b32.xlu0 %v4420_v1, %s3746_s12  ;;  %v657_v4 = vpop.f32.mrb[33].mxu0  ;;  %v785_v7 = vpop.f32.mrb[33].mxu1 }
 0x15d   :  { %v879_v8 = vadd.f32 %v878_v3, %v877_v62  ;;  %v4428_v9 = vpop.f32.mrb[34].mxu0  ;;  %v4430_v10 = vpop.f32.mrb[34].mxu1 }
 0x15e   :  { %v880_v13 = vsel %vm846_vm2, %v4428_v9, 0.0  ;;  %2952 = vrot.lane.b32.xlu1 %v4428_v9, %s3746_s12  ;;  %v660_v14 = vpop.f32.mrb[35].mxu0  ;;  %v788_v15 = vpop.f32.mrb[35].mxu1 }
 0x15f   :  { %v881_v18 = vadd.f32 %v880_v13, %v879_v8 }
 0x160   :  { %3014 = vrot.lane.b32.xlu0 %v4422_v2, %s3746_s12 }
 0x162   :  { %3016 = vrot.lane.b32.xlu1 %v4430_v10, %s3746_s12 }
 0x163   :  { %v4440_v23 = vpop.f32.mrb[36].mxu0  ;;  %v4442_v24 = vpop.f32.mrb[36].mxu1 }
 0x164   :  { %v882_v25 = vsel %vm846_vm2, %v4440_v23, 0.0  ;;  %2954 = vrot.lane.b32.xlu0 %v4440_v23, %s3746_s12  ;;  %v665_v26 = vpop.f32.mrb[37].mxu0  ;;  %v793_v31 = vpop.f32.mrb[37].mxu1 }
 0x165   :  { %v883_v32 = vadd.f32 %v882_v25, %v881_v18  ;;  %v4448_v35 = vpop.f32.mrb[38].mxu0  ;;  %v4450_v36 = vpop.f32.mrb[38].mxu1 }
 0x166   :  { %v884_v41 = vsel %vm846_vm2, %v4448_v35, 0.0  ;;  %2956 = vrot.lane.b32.xlu1 %v4448_v35, %s3746_s12  ;;  %v668_v42 = vpop.f32.mrb[39].mxu0  ;;  %v796_v43 = vpop.f32.mrb[39].mxu1 }
 0x167   :  { %v885_v44 = vadd.f32 %v884_v41, %v883_v32 }
 0x168   :  { %3018 = vrot.lane.b32.xlu0 %v4442_v24, %s3746_s12 }
 0x16a   :  { %3020 = vrot.lane.b32.xlu1 %v4450_v36, %s3746_s12 }
 0x16b   :  { %v4460_v49 = vpop.f32.mrb[40].mxu0  ;;  %v4462_v50 = vpop.f32.mrb[40].mxu1 }
 0x16c   :  { %8133 = vst [vmem:[#allocation7_spill] sm:$0xff] %v4460_v49  ;;  %v886_v53 = vsel %vm846_vm2, %v4460_v49, 0.0  ;;  %2958 = vrot.lane.b32.xlu0 %v4460_v49, %s3746_s12  ;;  %v673_v54 = vpop.f32.mrb[41].mxu0  ;;  %v801_v59 = vpop.f32.mrb[41].mxu1 }
 0x16d   :  { %v887_v60 = vadd.f32 %v886_v53, %v885_v44  ;;  %v4468_v61 = vpop.f32.mrb[42].mxu0  ;;  %v4470_v62 = vpop.f32.mrb[42].mxu1 }
 0x16e   :  { %8134 = vst [vmem:[#allocation8_spill] sm:$0xff] %v4468_v61  ;;  %v888_v3 = vsel %vm846_vm2, %v4468_v61, 0.0  ;;  %2960 = vrot.lane.b32.xlu1 %v4468_v61, %s3746_s12  ;;  %v676_v4 = vpop.f32.mrb[43].mxu0  ;;  %v804_v7 = vpop.f32.mrb[43].mxu1  ;;  %v910_v61 = vsel %vm846_vm2, %v4262_v17, 0.0 }
 0x16f   :  { %v889_v8 = vadd.f32 %v888_v3, %v887_v60 }
 0x170   :  { %3022 = vrot.lane.b32.xlu0 %v4462_v50, %s3746_s12 }
 0x172   :  { %3024 = vrot.lane.b32.xlu1 %v4470_v62, %s3746_s12 }
 0x173   :  { %v4480_v13 = vpop.f32.mrb[44].mxu0  ;;  %v4482_v14 = vpop.f32.mrb[44].mxu1 }
 0x174   :  { %8135 = vst [vmem:[#allocation9_spill] sm:$0xff] %v4480_v13  ;;  %v890_v15 = vsel %vm846_vm2, %v4480_v13, 0.0  ;;  %2962 = vrot.lane.b32.xlu0 %v4480_v13, %s3746_s12  ;;  %v681_v18 = vpop.f32.mrb[45].mxu0  ;;  %v809_v25 = vpop.f32.mrb[45].mxu1 }
 0x175   :  { %v891_v26 = vadd.f32 %v890_v15, %v889_v8  ;;  %v4488_v31 = vpop.f32.mrb[46].mxu0  ;;  %v4490_v32 = vpop.f32.mrb[46].mxu1 }
 0x176   :  { %8136 = vst [vmem:[#allocation10_spill] sm:$0xff] %v4488_v31  ;;  %v892_v41 = vsel %vm846_vm2, %v4488_v31, 0.0  ;;  %2964 = vrot.lane.b32.xlu1 %v4488_v31, %s3746_s12  ;;  %v684_v42 = vpop.f32.mrb[47].mxu0  ;;  %v812_v43 = vpop.f32.mrb[47].mxu1 }
 0x177   :  { %v893_v44 = vadd.f32 %v892_v41, %v891_v26 }
 0x178   :  { %3026 = vrot.lane.b32.xlu0 %v4482_v14, %s3746_s12 }
 0x17a   :  { %3028 = vrot.lane.b32.xlu1 %v4490_v32, %s3746_s12 }
 0x17b   :  { %v4500_v53 = vpop.f32.mrb[48].mxu0  ;;  %v4502_v54 = vpop.f32.mrb[48].mxu1 }
 0x17c   :  { %8137 = vst [vmem:[#allocation11_spill] sm:$0xff] %v4500_v53  ;;  %v894_v59 = vsel %vm846_vm2, %v4500_v53, 0.0  ;;  %2966 = vrot.lane.b32.xlu0 %v4500_v53, %s3746_s12  ;;  %v689_v60 = vpop.f32.mrb[49].mxu0  ;;  %v817_v3 = vpop.f32.mrb[49].mxu1 }
 0x17d   :  { %v895_v4 = vadd.f32 %v894_v59, %v893_v44  ;;  %v4508_v7 = vpop.f32.mrb[50].mxu0  ;;  %v4510_v8 = vpop.f32.mrb[50].mxu1 }
 0x17e   :  { %8138 = vst [vmem:[#allocation12_spill] sm:$0xff] %v4508_v7  ;;  %8139 = vst [vmem:[#allocation13_spill] sm:$0xff] %v4510_v8  ;;  %v896_v15 = vsel %vm846_vm2, %v4508_v7, 0.0  ;;  %2968 = vrot.lane.b32.xlu1 %v4508_v7, %s3746_s12  ;;  %v692_v18 = vpop.f32.mrb[51].mxu0  ;;  %v820_v25 = vpop.f32.mrb[51].mxu1 }
 0x17f   :  { %v897_v26 = vadd.f32 %v896_v15, %v895_v4 }
 0x180   :  { %3030 = vrot.lane.b32.xlu0 %v4502_v54, %s3746_s12 }
 0x182   :  { %3032 = vrot.lane.b32.xlu1 %v4510_v8, %s3746_s12 }
 0x183   :  { %v4520_v41 = vpop.f32.mrb[52].mxu0  ;;  %v4522_v42 = vpop.f32.mrb[52].mxu1 }
 0x184   :  { %8140 = vst [vmem:[#allocation14_spill] sm:$0xff] %v4520_v41  ;;  %8141 = vst [vmem:[#allocation15_spill] sm:$0xff] %v4522_v42  ;;  %v898_v43 = vsel %vm846_vm2, %v4520_v41, 0.0  ;;  %2970 = vrot.lane.b32.xlu0 %v4520_v41, %s3746_s12  ;;  %v697_v44 = vpop.f32.mrb[53].mxu0  ;;  %v825_v59 = vpop.f32.mrb[53].mxu1 }
 0x185   :  { %v899_v60 = vadd.f32 %v898_v43, %v897_v26  ;;  %v4528_v3 = vpop.f32.mrb[54].mxu0  ;;  %v4530_v4 = vpop.f32.mrb[54].mxu1 }
 0x186   :  { %8142 = vst [vmem:[#allocation16_spill] sm:$0xff] %v4528_v3  ;;  %8143 = vst [vmem:[#allocation17_spill] sm:$0xff] %v4530_v4  ;;  %v900_v15 = vsel %vm846_vm2, %v4528_v3, 0.0  ;;  %2972 = vrot.lane.b32.xlu1 %v4528_v3, %s3746_s12  ;;  %v700_v18 = vpop.f32.mrb[55].mxu0  ;;  %v828_v25 = vpop.f32.mrb[55].mxu1 }
 0x187   :  { %v901_v7 = vadd.f32 %v900_v15, %v899_v60 }
 0x188   :  { %3034 = vrot.lane.b32.xlu0 %v4522_v42, %s3746_s12 }
 0x18a   :  { %3036 = vrot.lane.b32.xlu1 %v4530_v4, %s3746_s12 }
 0x18b   :  { %v4540_v26 = vpop.f32.mrb[56].mxu0  ;;  %v4542_v43 = vpop.f32.mrb[56].mxu1 }
 0x18c   :  { %8144 = vst [vmem:[#allocation18_spill] sm:$0xff] %v4540_v26  ;;  %8145 = vst [vmem:[#allocation19_spill] sm:$0xff] %v4542_v43  ;;  %v902_v44 = vsel %vm846_vm2, %v4540_v26, 0.0  ;;  %2974 = vrot.lane.b32.xlu0 %v4540_v26, %s3746_s12  ;;  %v705_v59 = vpop.f32.mrb[57].mxu0  ;;  %v833_v18 = vpop.f32.mrb[57].mxu1 }
 0x18d   :  { %v903_v25 = vadd.f32 %v902_v44, %v901_v7  ;;  %v4548_v60 = vpop.f32.mrb[58].mxu0  ;;  %v4550_v15 = vpop.f32.mrb[58].mxu1 }
 0x18e   :  { %8146 = vst [vmem:[#allocation20_spill] sm:$0xff] %v4548_v60  ;;  %v904_v3 = vsel %vm846_vm2, %v4548_v60, 0.0  ;;  %2976 = vrot.lane.b32.xlu1 %v4548_v60, %s3746_s12  ;;  %v708_v41 = vpop.f32.mrb[59].mxu0  ;;  %v836_v31 = vpop.f32.mrb[59].mxu1 }
 0x18f   :  { %v905_v53 = vadd.f32 %v904_v3, %v903_v25 }
 0x190   :  { %3038 = vrot.lane.b32.xlu0 %v4542_v43, %s3746_s12 }
 0x192   :  { %3040 = vrot.lane.b32.xlu1 %v4550_v15, %s3746_s12 }
 0x193   :  { %v4560_v7 = vpop.f32.mrb[60].mxu0  ;;  %v4562_v44 = vpop.f32.mrb[60].mxu1 }
 0x194   :  { %v906_v59 = vsel %vm846_vm2, %v4560_v7, 0.0  ;;  %2978 = vrot.lane.b32.xlu0 %v4560_v7, %s3746_s12  ;;  %v713_v18 = vpop.f32.mrb[61].mxu0  ;;  %v841_v31 = vpop.f32.mrb[61].mxu1 }
 0x195   :  { %v907_v41 = vadd.f32 %v906_v59, %v905_v53  ;;  %v4568_v3 = vpop.f32.mrb[62].mxu0  ;;  %v4574_v13 = vpop.f32.mrb[62].mxu1  ;;  %v912_v59 = vsel %vm846_vm2, %v4268_v21, 0.0  ;;  %v916_v31 = vsel %vm846_vm2, %v4290_v34, 0.0  ;;  %v922_v21 = vsel %vm846_vm2, %v4322_v52, 0.0 }
 0x196   :  { %v908_v25 = vsel %vm846_vm2, %v4568_v3, 0.0  ;;  %2980 = vrot.lane.b32.xlu1 %v4568_v3, %s3746_s12  ;;  %v716_v60 = vpop.f32.mrb[63].mxu0  ;;  %v844_v49 = vpop.f32.mrb[63].mxu1 }
 0x197   :  { %v909_v26 = vadd.f32 %v908_v25, %v907_v41  ;;  %v914_v60 = vsel %vm846_vm2, %v4282_v28, 0.0  ;;  %v918_v49 = vsel %vm846_vm2, %v4302_v40, 0.0 }
 0x198   :  { %3042 = vrot.lane.b32.xlu0 %v4562_v44, %s3746_s12 }
 0x199   :  { %v911_v53 = vadd.f32 %v910_v61, %v909_v26  ;;  %v920_v61 = vsel %vm846_vm2, %v4310_v46, 0.0 }
 0x19a   :  { %3044 = vrot.lane.b32.xlu1 %v4574_v13, %s3746_s12 }
 0x19b   :  { %v913_v18 = vadd.f32 %v912_v59, %v911_v53  ;;  %v924_v59 = vsel %vm846_vm2, %v4330_v58, 0.0 }
 0x19d   :  { %v915_v41 = vadd.f32 %v914_v60, %v913_v18  ;;  %v926_v60 = vsel %vm846_vm2, %v4342_v0, 0.0 }
 0x19f   :  { %v917_v25 = vadd.f32 %v916_v31, %v915_v41  ;;  %v928_v31 = vsel %vm846_vm2, %v4350_v6, 0.0 }
 0x1a1   :  { %v919_v17 = vadd.f32 %v918_v49, %v917_v25  ;;  %v930_v49 = vsel %vm846_vm2, %v4362_v12, 0.0 }
 0x1a3   :  { %v921_v26 = vadd.f32 %v920_v61, %v919_v17  ;;  %v932_v61 = vsel %vm846_vm2, %v4370_v22, 0.0 }
 0x1a5   :  { %v923_v53 = vadd.f32 %v922_v21, %v921_v26  ;;  %v934_v26 = vsel %vm846_vm2, %v4382_v30, 0.0 }
 0x1a7   :  { %v925_v18 = vadd.f32 %v924_v59, %v923_v53  ;;  %v936_v59 = vsel %vm846_vm2, %v4390_v38, 0.0 }
 0x1a9   :  { %v927_v41 = vadd.f32 %v926_v60, %v925_v18  ;;  %v938_v60 = vsel %vm846_vm2, %v4402_v48, 0.0 }
 0x1ab   :  { %v929_v25 = vadd.f32 %v928_v31, %v927_v41  ;;  %v940_v31 = vsel %vm846_vm2, %v4410_v56, 0.0 }
 0x1ad   :  { %v931_v17 = vadd.f32 %v930_v49, %v929_v25  ;;  %v942_v49 = vsel %vm846_vm2, %v4422_v2, 0.0 }
 0x1af   :  { %v933_v21 = vadd.f32 %v932_v61, %v931_v17  ;;  %v944_v61 = vsel %vm846_vm2, %v4430_v10, 0.0 }
 0x1b1   :  { %v935_v53 = vadd.f32 %v934_v26, %v933_v21  ;;  %v946_v26 = vsel %vm846_vm2, %v4442_v24, 0.0 }
 0x1b3   :  { %v937_v18 = vadd.f32 %v936_v59, %v935_v53  ;;  %v948_v59 = vsel %vm846_vm2, %v4450_v36, 0.0 }
 0x1b5   :  { %v939_v41 = vadd.f32 %v938_v60, %v937_v18  ;;  %v950_v60 = vsel %vm846_vm2, %v4462_v50, 0.0 }
 0x1b7   :  { %v941_v25 = vadd.f32 %v940_v31, %v939_v41  ;;  %v952_v31 = vsel %vm846_vm2, %v4470_v62, 0.0 }
 0x1b9   :  { %v943_v17 = vadd.f32 %v942_v49, %v941_v25  ;;  %v954_v49 = vsel %vm846_vm2, %v4482_v14, 0.0 }
 0x1bb   :  { %v945_v21 = vadd.f32 %v944_v61, %v943_v17  ;;  %v956_v61 = vsel %vm846_vm2, %v4490_v32, 0.0 }
 0x1bd   :  { %v947_v53 = vadd.f32 %v946_v26, %v945_v21  ;;  %v958_v26 = vsel %vm846_vm2, %v4502_v54, 0.0 }
 0x1bf   :  { %v949_v18 = vadd.f32 %v948_v59, %v947_v53  ;;  %v960_v59 = vsel %vm846_vm2, %v4510_v8, 0.0 }
 0x1c1   :  { %v951_v41 = vadd.f32 %v950_v60, %v949_v18  ;;  %v962_v60 = vsel %vm846_vm2, %v4522_v42, 0.0 }
 0x1c3   :  { %v953_v25 = vadd.f32 %v952_v31, %v951_v41  ;;  %v964_v31 = vsel %vm846_vm2, %v4530_v4, 0.0 }
 0x1c5   :  { %v955_v17 = vadd.f32 %v954_v49, %v953_v25  ;;  %v966_v49 = vsel %vm846_vm2, %v4542_v43, 0.0 }
 0x1c7   :  { %v957_v21 = vadd.f32 %v956_v61, %v955_v17  ;;  %v968_v61 = vsel %vm846_vm2, %v4550_v15, 0.0 }
 0x1c9   :  { %v959_v53 = vadd.f32 %v958_v26, %v957_v21  ;;  %v970_v21 = vsel %vm846_vm2, %v4562_v44, 0.0 }
 0x1cb   :  { %v961_v18 = vadd.f32 %v960_v59, %v959_v53  ;;  %v972_v59 = vsel %vm846_vm2, %v4574_v13, 0.0 }
 0x1cd   :  { %v963_v41 = vadd.f32 %v962_v60, %v961_v18 }
 0x1cf   :  { %v965_v25 = vadd.f32 %v964_v31, %v963_v41 }
 0x1d1   :  { %v967_v17 = vadd.f32 %v966_v49, %v965_v25 }
 0x1d3   :  { %v969_v26 = vadd.f32 %v968_v61, %v967_v17 }
 0x1d5   :  { %v971_v53 = vadd.f32 %v970_v21, %v969_v26  ;;  %v8157_v21 = vld [vmem:[#allocation9_spill] sm:$0xff]  ;;  %v8159_v26 = vld [vmem:[#allocation10_spill] sm:$0xff] }
 0x1d7   :  { %v973_v18 = vadd.f32 %v972_v59, %v971_v53  ;;  %v8161_v53 = vld [vmem:[#allocation11_spill] sm:$0xff]  ;;  %v8163_v59 = vld [vmem:[#allocation12_spill] sm:$0xff] }
 0x1d9   :  { %v974_v60 = vrot.slane %v973_v18, 4 }
 0x1db   :  { %v975_v42 = vadd.f32 %v974_v60, %v973_v18  ;;  %v8165_v60 = vld [vmem:[#allocation14_spill] sm:$0xff] }
 0x1dd   :  { %v976_v4 = vrot.slane %v975_v42, 2 }
 0x1df   :  { %v977_v41 = vadd.f32 %v976_v4, %v975_v42  ;;  %v8153_v42 = vld [vmem:[#allocation7_spill] sm:$0xff]  ;;  %v8155_v4 = vld [vmem:[#allocation8_spill] sm:$0xff] }
 0x1e1   :  { %v978_v31 = vrot.slane %v977_v41, 1 }
 0x1e3   :  { %v979_v8 = vadd.f32 %v978_v31, %v977_v41  ;;  %v8167_v31 = vld [vmem:[#allocation16_spill] sm:$0xff] }
 0x1e5   :  { %v4644_v43 = vmul.f32 0.001953125, %v979_v8 }
 0x1e7   :  { %v4648_v25 = vsub.f32 %v4260_v16, %v4644_v43  ;;  %v4652_v49 = vsub.f32 %v4266_v20, %v4644_v43  ;;  %v4656_v17 = vsub.f32 %v4280_v27, %v4644_v43  ;;  %v4660_v61 = vsub.f32 %v4288_v33, %v4644_v43 }
 0x1e8   :  { %v4664_v8 = vsub.f32 %v4300_v39, %v4644_v43  ;;  %v4668_v16 = vsub.f32 %v4308_v45, %v4644_v43  ;;  %v4672_v20 = vsub.f32 %v4320_v51, %v4644_v43  ;;  %v4676_v27 = vsub.f32 %v4328_v57, %v4644_v43 }
 0x1e9   :  { %8147 = vst [vmem:[#allocation21_spill] sm:$0xff] %v4648_v25  ;;  %8148 = vst [vmem:[#allocation22_spill] sm:$0xff] %v4652_v49  ;;  %v4680_v33 = vsub.f32 %v4340_v63, %v4644_v43  ;;  %v4684_v39 = vsub.f32 %v4348_v5, %v4644_v43  ;;  %v4688_v45 = vsub.f32 %v4360_v11, %v4644_v43 }
 0x1ea   :  { %8149 = vst [vmem:[#allocation23_spill] sm:$0xff] %v4656_v17  ;;  %8150 = vst [vmem:[#allocation24_spill] sm:$0xff] %v4660_v61  ;;  %v4692_v51 = vsub.f32 %v4368_v19, %v4644_v43  ;;  %v4696_v57 = vsub.f32 %v4380_v29, %v4644_v43  ;;  %v4700_v63 = vsub.f32 %v4388_v37, %v4644_v43 }
 0x1eb   :  { %v4704_v5 = vsub.f32 %v4400_v47, %v4644_v43  ;;  %v4708_v11 = vsub.f32 %v4408_v55, %v4644_v43  ;;  %v4712_v19 = vsub.f32 %v4420_v1, %v4644_v43  ;;  %v4716_v29 = vsub.f32 %v4428_v9, %v4644_v43 }
 0x1ec   :  { %v4720_v37 = vsub.f32 %v4440_v23, %v4644_v43  ;;  %v4724_v47 = vsub.f32 %v4448_v35, %v4644_v43  ;;  %v4728_v55 = vsub.f32 %v8153_v42, %v4644_v43  ;;  %v4732_v1 = vsub.f32 %v8155_v4, %v4644_v43  ;;  %v8169_v4 = vld [vmem:[#allocation18_spill] sm:$0xff] }
 0x1ed   :  { %v4736_v9 = vsub.f32 %v8157_v21, %v4644_v43  ;;  %v4740_v23 = vsub.f32 %v8159_v26, %v4644_v43  ;;  %v4744_v35 = vsub.f32 %v8161_v53, %v4644_v43  ;;  %v4748_v18 = vsub.f32 %v8163_v59, %v4644_v43  ;;  %v8171_v26 = vld [vmem:[#allocation20_spill] sm:$0xff] }
 0x1ee   :  { %8151 = vst [vmem:[#allocation25_spill] sm:$0xff] %v4720_v37  ;;  %8152 = vst [vmem:[#allocation26_spill] sm:$0xff] %v4724_v47  ;;  %v4752_v41 = vsub.f32 %v8165_v60, %v4644_v43  ;;  %v4756_v42 = vsub.f32 %v8167_v31, %v4644_v43  ;;  %v4760_v21 = vsub.f32 %v8169_v4, %v4644_v43 }
 0x1ef   :  { %8154 = vst [vmem:[#allocation7_spill] sm:$0xff] %v4728_v55  ;;  %8156 = vst [vmem:[#allocation8_spill] sm:$0xff] %v4732_v1  ;;  %v4764_v53 = vsub.f32 %v8171_v26, %v4644_v43  ;;  %v4768_v59 = vsub.f32 %v4560_v7, %v4644_v43  ;;  %v4772_v60 = vsub.f32 %v4568_v3, %v4644_v43 }
 0x1f0   :  { %8158 = vst [vmem:[#allocation9_spill] sm:$0xff] %v4736_v9  ;;  %8160 = vst [vmem:[#allocation10_spill] sm:$0xff] %v4740_v23  ;;  %v4784_v26 = vsub.f32 %v4282_v28, %v4644_v43  ;;  %v4788_v7 = vsub.f32 %v4290_v34, %v4644_v43  ;;  %v4792_v3 = vsub.f32 %v4302_v40, %v4644_v43 }
 0x1f1   :  { %8162 = vst [vmem:[#allocation11_spill] sm:$0xff] %v4744_v35  ;;  %8164 = vst [vmem:[#allocation12_spill] sm:$0xff] %v4748_v18  ;;  %v4804_v28 = vsub.f32 %v4330_v58, %v4644_v43  ;;  %v4808_v34 = vsub.f32 %v4342_v0, %v4644_v43  ;;  %v4812_v40 = vsub.f32 %v4350_v6, %v4644_v43 }
 0x1f2   :  { %8166 = vst [vmem:[#allocation14_spill] sm:$0xff] %v4752_v41  ;;  %8168 = vst [vmem:[#allocation16_spill] sm:$0xff] %v4756_v42  ;;  %v8175_v41 = vld [vmem:[#allocation5_spill] sm:$0xff]  ;;  %v8176_v42 = vld [vmem:[#allocation6_spill] sm:$0xff]  ;;  %v4824_v58 = vsub.f32 %v4382_v30, %v4644_v43  ;;  %v4828_v0 = vsub.f32 %v4390_v38, %v4644_v43  ;;  %v4832_v6 = vsub.f32 %v4402_v48, %v4644_v43 }
 0x1f3   :  { %8170 = vst [vmem:[#allocation18_spill] sm:$0xff] %v4760_v21  ;;  %8172 = vst [vmem:[#allocation20_spill] sm:$0xff] %v4764_v53  ;;  %v4776_v31 = vsub.f32 %v8175_v41, %v4644_v43  ;;  %v4780_v4 = vsub.f32 %v8176_v42, %v4644_v43  ;;  %v4796_v41 = vsub.f32 %v4310_v46, %v4644_v43 }
 0x1f4   :  { %8173 = vst [vmem:[#allocation27_spill] sm:$0xff] %v4768_v59  ;;  %8174 = vst [vmem:[#allocation28_spill] sm:$0xff] %v4772_v60  ;;  %v4800_v42 = vsub.f32 %v4322_v52, %v4644_v43  ;;  %v4816_v46 = vsub.f32 %v4362_v12, %v4644_v43  ;;  %v4820_v52 = vsub.f32 %v4370_v22, %v4644_v43 }
 0x1f5   :  { %v4836_v12 = vsub.f32 %v4410_v56, %v4644_v43  ;;  %v4840_v22 = vsub.f32 %v4422_v2, %v4644_v43  ;;  %v4844_v30 = vsub.f32 %v4430_v10, %v4644_v43  ;;  %v4848_v38 = vsub.f32 %v4442_v24, %v4644_v43 }
 0x1f6   :  { %v4852_v48 = vsub.f32 %v4450_v36, %v4644_v43  ;;  %v4856_v56 = vsub.f32 %v4462_v50, %v4644_v43  ;;  %v4860_v2 = vsub.f32 %v4470_v62, %v4644_v43  ;;  %v4864_v10 = vsub.f32 %v4482_v14, %v4644_v43 }
 0x1f7   :  { %v4868_v24 = vsub.f32 %v4490_v32, %v4644_v43  ;;  %v4872_v36 = vsub.f32 %v4502_v54, %v4644_v43  ;;  %v4892_v54 = vsub.f32 %v4550_v15, %v4644_v43  ;;  %v1049_v15 = vmul.f32 %v4660_v61, %v4660_v61 }
 0x1f8   :  { %8177 = vst [vmem:[#allocation5_spill] sm:$0xff] %v4852_v48  ;;  %8178 = vst [vmem:[#allocation6_spill] sm:$0xff] %v4856_v56  ;;  %v8181_v48 = vld [vmem:[#allocation13_spill] sm:$0xff]  ;;  %v8182_v56 = vld [vmem:[#allocation15_spill] sm:$0xff]  ;;  %v1052_v61 = vmul.f32 %v4672_v20, %v4672_v20 }
 0x1f9   :  { %8179 = vst [vmem:[#allocation29_spill] sm:$0xff] %v4860_v2  ;;  %8180 = vst [vmem:[#allocation30_spill] sm:$0xff] %v4864_v10  ;;  %v4876_v50 = vsub.f32 %v8181_v48, %v4644_v43  ;;  %v4880_v62 = vsub.f32 %v8182_v56, %v4644_v43  ;;  %v8183_v2 = vld [vmem:[#allocation17_spill] sm:$0xff]  ;;  %v8185_v10 = vld [vmem:[#allocation19_spill] sm:$0xff]  ;;  %v4896_v48 = vsub.f32 %v4562_v44, %v4644_v43 }
 0x1fa   :  { %v4884_v14 = vsub.f32 %v8183_v2, %v4644_v43  ;;  %v4888_v32 = vsub.f32 %v8185_v10, %v4644_v43  ;;  %8187 = vst [vmem:[#allocation17_spill] sm:$0xff] %v4892_v54  ;;  %v4900_v56 = vsub.f32 %v4574_v13, %v4644_v43  ;;  %v1046_v2 = vmul.f32 %v4648_v25, %v4648_v25 }
 0x1fb   :  { %8188 = vst [vmem:[#allocation19_spill] sm:$0xff] %v4896_v48  ;;  %v1048_v10 = vmul.f32 %v4656_v17, %v4656_v17  ;;  %v1050_v13 = vmul.f32 %v4664_v8, %v4664_v8 }
 0x1fc   :  { %8184 = vst [vmem:[#allocation13_spill] sm:$0xff] %v4884_v14  ;;  %8186 = vst [vmem:[#allocation15_spill] sm:$0xff] %v4888_v32  ;;  %v1047_v14 = vmul.f32 %v4652_v49, %v4652_v49  ;;  %v1110_v54 = vsel %vm846_vm2, %v1046_v2, 0.0  ;;  %v1051_v49 = vmul.f32 %v4668_v16, %v4668_v16 }
 0x1fd   :  { %8189 = vst [vmem:[#allocation31_spill] sm:$0xff] %v4900_v56  ;;  %v1113_v43 = vsel %vm846_vm2, %v1048_v10, 0.0  ;;  %v1115_v56 = vsel %vm846_vm2, %v1049_v15, 0.0  ;;  %v1117_v2 = vsel %vm846_vm2, %v1050_v13, 0.0  ;;  %v1121_v10 = vsel %vm846_vm2, %v1052_v61, 0.0 }
 0x1fe   :  { %v1111_v44 = vsel %vm846_vm2, %v1047_v14, 0.0  ;;  %v1053_v14 = vmul.f32 %v4676_v27, %v4676_v27  ;;  %v1058_v61 = vmul.f32 %v4696_v57, %v4696_v57 }
 0x1ff   :  { %v1112_v48 = vadd.f32 %v1111_v44, %v1110_v54  ;;  %v1119_v54 = vsel %vm846_vm2, %v1051_v49, 0.0  ;;  %v1057_v49 = vmul.f32 %v4692_v51, %v4692_v51 }
 0x201   :  { %v1114_v25 = vadd.f32 %v1113_v43, %v1112_v48  ;;  %v1054_v48 = vmul.f32 %v4680_v33, %v4680_v33 }
 0x203   :  { %v1116_v17 = vadd.f32 %v1115_v56, %v1114_v25  ;;  %v1055_v25 = vmul.f32 %v4684_v39, %v4684_v39  ;;  %v1123_v56 = vsel %vm846_vm2, %v1053_v14, 0.0  ;;  %v1125_v13 = vsel %vm846_vm2, %v1054_v48, 0.0 }
 0x204   :  { %v1059_v14 = vmul.f32 %v4700_v63, %v4700_v63  ;;  %v1060_v48 = vmul.f32 %v4704_v5, %v4704_v5 }
 0x205   :  { %v1118_v32 = vadd.f32 %v1117_v2, %v1116_v17  ;;  %v1056_v17 = vmul.f32 %v4688_v45, %v4688_v45 }
 0x207   :  { %v1120_v44 = vadd.f32 %v1119_v54, %v1118_v32  ;;  %v1127_v32 = vsel %vm846_vm2, %v1055_v25, 0.0  ;;  %v1061_v25 = vmul.f32 %v4708_v11, %v4708_v11 }
 0x209   :  { %v1122_v43 = vadd.f32 %v1121_v10, %v1120_v44  ;;  %v1129_v44 = vsel %vm846_vm2, %v1056_v17, 0.0  ;;  %v1062_v17 = vmul.f32 %v4712_v19, %v4712_v19 }
 0x20b   :  { %v1124_v15 = vadd.f32 %v1123_v56, %v1122_v43  ;;  %v1131_v43 = vsel %vm846_vm2, %v1057_v49, 0.0  ;;  %v1063_v49 = vmul.f32 %v4716_v29, %v4716_v29 }
 0x20d   :  { %v1126_v2 = vadd.f32 %v1125_v13, %v1124_v15  ;;  %v1133_v15 = vsel %vm846_vm2, %v1058_v61, 0.0  ;;  %v1064_v61 = vmul.f32 %v4720_v37, %v4720_v37 }
 0x20f   :  { %v1128_v54 = vadd.f32 %v1127_v32, %v1126_v2  ;;  %v1135_v2 = vsel %vm846_vm2, %v1059_v14, 0.0  ;;  %v1065_v14 = vmul.f32 %v4724_v47, %v4724_v47 }
 0x211   :  { %v1130_v10 = vadd.f32 %v1129_v44, %v1128_v54  ;;  %v1137_v54 = vsel %vm846_vm2, %v1060_v48, 0.0  ;;  %v1066_v48 = vmul.f32 %v4728_v55, %v4728_v55 }
 0x213   :  { %v1132_v56 = vadd.f32 %v1131_v43, %v1130_v10  ;;  %v1139_v10 = vsel %vm846_vm2, %v1061_v25, 0.0  ;;  %v1067_v25 = vmul.f32 %v4732_v1, %v4732_v1 }
 0x215   :  { %v1134_v13 = vadd.f32 %v1133_v15, %v1132_v56  ;;  %v1141_v56 = vsel %vm846_vm2, %v1062_v17, 0.0  ;;  %v1068_v17 = vmul.f32 %v4736_v9, %v4736_v9  ;;  %v8208_v9 = vld [vmem:[#allocation31_spill] sm:$0xff] }
 0x217   :  { %v1136_v32 = vadd.f32 %v1135_v2, %v1134_v13  ;;  %v1143_v13 = vsel %vm846_vm2, %v1063_v49, 0.0  ;;  %v1069_v49 = vmul.f32 %v4740_v23, %v4740_v23 }
 0x219   :  { %v1138_v44 = vadd.f32 %v1137_v54, %v1136_v32  ;;  %v1145_v32 = vsel %vm846_vm2, %v1064_v61, 0.0  ;;  %v1070_v61 = vmul.f32 %v4744_v35, %v4744_v35 }
 0x21b   :  { %v1140_v43 = vadd.f32 %v1139_v10, %v1138_v44  ;;  %v1147_v44 = vsel %vm846_vm2, %v1065_v14, 0.0  ;;  %v1071_v14 = vmul.f32 %v4748_v18, %v4748_v18  ;;  %v8207_v18 = vld [vmem:[#allocation19_spill] sm:$0xff] }
 0x21d   :  { %v1142_v15 = vadd.f32 %v1141_v56, %v1140_v43  ;;  %v1149_v43 = vsel %vm846_vm2, %v1066_v48, 0.0  ;;  %v8190_v48 = vld [vmem:[#allocation14_spill] sm:$0xff] }
 0x21f   :  { %v1144_v2 = vadd.f32 %v1143_v13, %v1142_v15  ;;  %v1151_v15 = vsel %vm846_vm2, %v1067_v25, 0.0  ;;  %v8191_v25 = vld [vmem:[#allocation16_spill] sm:$0xff] }
 0x221   :  { %v1146_v54 = vadd.f32 %v1145_v32, %v1144_v2  ;;  %v1153_v2 = vsel %vm846_vm2, %v1068_v17, 0.0  ;;  %v1074_v17 = vmul.f32 %v4760_v21, %v4760_v21  ;;  %v8197_v21 = vld [vmem:[#allocation30_spill] sm:$0xff] }
 0x223   :  { %v1148_v10 = vadd.f32 %v1147_v44, %v1146_v54  ;;  %v1155_v54 = vsel %vm846_vm2, %v1069_v49, 0.0  ;;  %v1075_v49 = vmul.f32 %v4764_v53, %v4764_v53  ;;  %v8202_v53 = vld [vmem:[#allocation13_spill] sm:$0xff] }
 0x225   :  { %v1150_v56 = vadd.f32 %v1149_v43, %v1148_v10  ;;  %v1072_v10 = vmul.f32 %v8190_v48, %v8190_v48  ;;  %v1157_v43 = vsel %vm846_vm2, %v1070_v61, 0.0  ;;  %v1076_v61 = vmul.f32 %v4768_v59, %v4768_v59  ;;  %v8196_v59 = vld [vmem:[#allocation29_spill] sm:$0xff] }
 0x226   :  { %v8206_v48 = vld [vmem:[#allocation17_spill] sm:$0xff] }
 0x227   :  { %v1152_v13 = vadd.f32 %v1151_v15, %v1150_v56  ;;  %v1073_v56 = vmul.f32 %v8191_v25, %v8191_v25  ;;  %v1159_v15 = vsel %vm846_vm2, %v1071_v14, 0.0  ;;  %v1167_v14 = vsel %vm846_vm2, %v1075_v49, 0.0  ;;  %v8203_v25 = vld [vmem:[#allocation15_spill] sm:$0xff] }
 0x228   :  { %v1081_v49 = vmul.f32 %v4788_v7, %v4788_v7 }
 0x229   :  { %v1154_v32 = vadd.f32 %v1153_v2, %v1152_v13  ;;  %v1161_v13 = vsel %vm846_vm2, %v1072_v10, 0.0  ;;  %v1169_v10 = vsel %vm846_vm2, %v1076_v61, 0.0  ;;  %v1082_v61 = vmul.f32 %v4792_v3, %v4792_v3 }
 0x22b   :  { %v1156_v44 = vadd.f32 %v1155_v54, %v1154_v32  ;;  %v1163_v32 = vsel %vm846_vm2, %v1073_v56, 0.0  ;;  %v1079_v56 = vmul.f32 %v4780_v4, %v4780_v4 }
 0x22d   :  { %v1158_v23 = vadd.f32 %v1157_v43, %v1156_v44  ;;  %v1165_v44 = vsel %vm846_vm2, %v1074_v17, 0.0  ;;  %v1080_v17 = vmul.f32 %v4784_v26, %v4784_v26 }
 0x22f   :  { %v1160_v35 = vadd.f32 %v1159_v15, %v1158_v23  ;;  %v1077_v23 = vmul.f32 %v4772_v60, %v4772_v60 }
 0x231   :  { %v1162_v2 = vadd.f32 %v1161_v13, %v1160_v35  ;;  %v1078_v35 = vmul.f32 %v4776_v31, %v4776_v31 }
 0x233   :  { %v1164_v54 = vadd.f32 %v1163_v32, %v1162_v2  ;;  %v1171_v2 = vsel %vm846_vm2, %v1077_v23, 0.0  ;;  %v1083_v23 = vmul.f32 %v4796_v41, %v4796_v41 }
 0x235   :  { %v1166_v43 = vadd.f32 %v1165_v44, %v1164_v54  ;;  %v1173_v54 = vsel %vm846_vm2, %v1078_v35, 0.0  ;;  %v1084_v35 = vmul.f32 %v4800_v42, %v4800_v42 }
 0x237   :  { %v1168_v15 = vadd.f32 %v1167_v14, %v1166_v43  ;;  %v1175_v43 = vsel %vm846_vm2, %v1079_v56, 0.0  ;;  %v1085_v56 = vmul.f32 %v4804_v28, %v4804_v28 }
 0x239   :  { %v1170_v13 = vadd.f32 %v1169_v10, %v1168_v15  ;;  %v1177_v15 = vsel %vm846_vm2, %v1080_v17, 0.0  ;;  %v1086_v17 = vmul.f32 %v4808_v34, %v4808_v34 }
 0x23b   :  { %v1172_v32 = vadd.f32 %v1171_v2, %v1170_v13  ;;  %v1179_v13 = vsel %vm846_vm2, %v1081_v49, 0.0  ;;  %v1087_v49 = vmul.f32 %v4812_v40, %v4812_v40 }
 0x23d   :  { %v1174_v44 = vadd.f32 %v1173_v54, %v1172_v32  ;;  %v1181_v32 = vsel %vm846_vm2, %v1082_v61, 0.0  ;;  %v1088_v61 = vmul.f32 %v4816_v46, %v4816_v46 }
 0x23f   :  { %v1176_v14 = vadd.f32 %v1175_v43, %v1174_v44  ;;  %v1183_v44 = vsel %vm846_vm2, %v1083_v23, 0.0  ;;  %v1089_v23 = vmul.f32 %v4820_v52, %v4820_v52 }
 0x241   :  { %v1178_v10 = vadd.f32 %v1177_v15, %v1176_v14  ;;  %v1185_v14 = vsel %vm846_vm2, %v1084_v35, 0.0  ;;  %v1090_v35 = vmul.f32 %v4824_v58, %v4824_v58 }
 0x243   :  { %v1180_v2 = vadd.f32 %v1179_v13, %v1178_v10  ;;  %v1187_v10 = vsel %vm846_vm2, %v1085_v56, 0.0  ;;  %v1091_v56 = vmul.f32 %v4828_v0, %v4828_v0 }
 0x245   :  { %v1182_v54 = vadd.f32 %v1181_v32, %v1180_v2  ;;  %v1189_v2 = vsel %vm846_vm2, %v1086_v17, 0.0  ;;  %v1092_v17 = vmul.f32 %v4832_v6, %v4832_v6 }
 0x247   :  { %v1184_v43 = vadd.f32 %v1183_v44, %v1182_v54  ;;  %v1191_v54 = vsel %vm846_vm2, %v1087_v49, 0.0  ;;  %v1093_v49 = vmul.f32 %v4836_v12, %v4836_v12 }
 0x249   :  { %v1186_v15 = vadd.f32 %v1185_v14, %v1184_v43  ;;  %v1193_v43 = vsel %vm846_vm2, %v1088_v61, 0.0  ;;  %v1094_v61 = vmul.f32 %v4840_v22, %v4840_v22 }
 0x24b   :  { %v1188_v13 = vadd.f32 %v1187_v10, %v1186_v15  ;;  %v1195_v15 = vsel %vm846_vm2, %v1089_v23, 0.0  ;;  %v1095_v23 = vmul.f32 %v4844_v30, %v4844_v30 }
 0x24d   :  { %v1190_v32 = vadd.f32 %v1189_v2, %v1188_v13  ;;  %v1197_v13 = vsel %vm846_vm2, %v1090_v35, 0.0  ;;  %v1096_v35 = vmul.f32 %v4848_v38, %v4848_v38 }
 0x24f   :  { %v1192_v44 = vadd.f32 %v1191_v54, %v1190_v32  ;;  %v1199_v32 = vsel %vm846_vm2, %v1091_v56, 0.0  ;;  %v8192_v56 = vld [vmem:[#allocation5_spill] sm:$0xff] }
 0x251   :  { %v1194_v14 = vadd.f32 %v1193_v43, %v1192_v44  ;;  %v1201_v44 = vsel %vm846_vm2, %v1092_v17, 0.0  ;;  %v5056_v17 = vpop.permute.xlu0 %2918 }
 0x252   :  { %8193 = vst [vmem:[#allocation5_spill] sm:$0xff] %v5056_v17 }
 0x253   :  { %v1196_v10 = vadd.f32 %v1195_v15, %v1194_v14  ;;  %v1203_v14 = vsel %vm846_vm2, %v1093_v49, 0.0 }
 0x255   :  { %v1198_v2 = vadd.f32 %v1197_v13, %v1196_v10  ;;  %v1205_v10 = vsel %vm846_vm2, %v1094_v61, 0.0  ;;  %v1099_v61 = vmul.f32 %v8196_v59, %v8196_v59  ;;  %v5069_v17 = vpop.permute.xlu0 %2982 }
 0x257   :  { %v1200_v54 = vadd.f32 %v1199_v32, %v1198_v2  ;;  %v1097_v2 = vmul.f32 %v8192_v56, %v8192_v56  ;;  %v1207_v32 = vsel %vm846_vm2, %v1095_v23, 0.0  ;;  %v1100_v23 = vmul.f32 %v8197_v21, %v8197_v21 }
 0x259   :  { %v1202_v43 = vadd.f32 %v1201_v44, %v1200_v54  ;;  %v5058_v54 = vpop.permute.xlu1 %2920  ;;  %v8195_v44 = vld [vmem:[#allocation6_spill] sm:$0xff] }
 0x25a   :  { %8194 = vst [vmem:[#allocation32_spill] sm:$0xff] %v5058_v54  ;;  %v1098_v49 = vmul.f32 %v8195_v44, %v8195_v44  ;;  %8198 = vst [vmem:[#allocation6_spill] sm:$0xff] %v5069_v17  ;;  %v5082_v17 = vpop.permute.xlu0 %2922 }
 0x25b   :  { %v1204_v15 = vadd.f32 %v1203_v14, %v1202_v43  ;;  %v1209_v43 = vsel %vm846_vm2, %v1096_v35, 0.0  ;;  %v1101_v35 = vmul.f32 %v4868_v24, %v4868_v24  ;;  %8200 = vst [vmem:[#allocation30_spill] sm:$0xff] %v5082_v17 }
 0x25d   :  { %v1206_v13 = vadd.f32 %v1205_v10, %v1204_v15  ;;  %v1211_v15 = vsel %vm846_vm2, %v1097_v2, 0.0  ;;  %v5071_v54 = vpop.permute.xlu1 %2984  ;;  %v1102_v2 = vmul.f32 %v4872_v36, %v4872_v36 }
 0x25e   :  { %8199 = vst [vmem:[#allocation29_spill] sm:$0xff] %v5071_v54  ;;  %v5095_v17 = vpop.permute.xlu0 %2986 }
 0x25f   :  { %v1208_v60 = vadd.f32 %v1207_v32, %v1206_v13  ;;  %v1213_v13 = vsel %vm846_vm2, %v1098_v49, 0.0  ;;  %v1103_v49 = vmul.f32 %v4876_v50, %v4876_v50  ;;  %8204 = vst [vmem:[#allocation13_spill] sm:$0xff] %v5095_v17 }
 0x261   :  { %v1210_v14 = vadd.f32 %v1209_v43, %v1208_v60  ;;  %v1215_v60 = vsel %vm846_vm2, %v1099_v61, 0.0  ;;  %v5084_v54 = vpop.permute.xlu1 %2924  ;;  %v1104_v61 = vmul.f32 %v4880_v62, %v4880_v62 }
 0x262   :  { %8201 = vst [vmem:[#allocation33_spill] sm:$0xff] %v5084_v54  ;;  %v5108_v17 = vpop.permute.xlu0 %2926 }
 0x263   :  { %v1212_v10 = vadd.f32 %v1211_v15, %v1210_v14  ;;  %v1217_v14 = vsel %vm846_vm2, %v1100_v23, 0.0  ;;  %v1105_v23 = vmul.f32 %v8202_v53, %v8202_v53  ;;  %8209 = vst [vmem:[#allocation17_spill] sm:$0xff] %v5108_v17 }
 0x265   :  { %v1214_v32 = vadd.f32 %v1213_v13, %v1212_v10  ;;  %v1219_v10 = vsel %vm846_vm2, %v1101_v35, 0.0  ;;  %v1106_v35 = vmul.f32 %v8203_v25, %v8203_v25  ;;  %v5097_v54 = vpop.permute.xlu1 %2988 }
 0x266   :  { %8205 = vst [vmem:[#allocation15_spill] sm:$0xff] %v5097_v54  ;;  %v5114_v47 = vpop.permute.xlu0 %2990 }
 0x267   :  { %v1216_v43 = vadd.f32 %v1215_v60, %v1214_v32  ;;  %v1221_v32 = vsel %vm846_vm2, %v1102_v2, 0.0  ;;  %v1107_v2 = vmul.f32 %v8206_v48, %v8206_v48  ;;  %8211 = vst [vmem:[#allocation31_spill] sm:$0xff] %v5114_v47 }
 0x269   :  { %v1218_v15 = vadd.f32 %v1217_v14, %v1216_v43  ;;  %v1223_v43 = vsel %vm846_vm2, %v1103_v49, 0.0  ;;  %v1108_v49 = vmul.f32 %v8207_v18, %v8207_v18  ;;  %v5110_v54 = vpop.permute.xlu1 %2928 }
 0x26a   :  { %8210 = vst [vmem:[#allocation19_spill] sm:$0xff] %v5110_v54 }
 0x26b   :  { %v1220_v13 = vadd.f32 %v1219_v10, %v1218_v15  ;;  %v1225_v15 = vsel %vm846_vm2, %v1104_v61, 0.0  ;;  %v1109_v61 = vmul.f32 %v8208_v9, %v8208_v9  ;;  %v1233_v1 = vsel %vm846_vm2, %v1108_v49, 0.0 }
 0x26d   :  { %v1222_v60 = vadd.f32 %v1221_v32, %v1220_v13  ;;  %v1227_v13 = vsel %vm846_vm2, %v1105_v23, 0.0 }
 0x26f   :  { %v1224_v14 = vadd.f32 %v1223_v43, %v1222_v60  ;;  %v1229_v60 = vsel %vm846_vm2, %v1106_v35, 0.0  ;;  %v5116_v35 = vpop.permute.xlu1 %2992 }
 0x270   :  { %8212 = vst [vmem:[#allocation34_spill] sm:$0xff] %v5116_v35 }
 0x271   :  { %v1226_v10 = vadd.f32 %v1225_v15, %v1224_v14  ;;  %v1231_v14 = vsel %vm846_vm2, %v1107_v2, 0.0  ;;  %v5118_v2 = vpop.permute.xlu0 %2930 }
 0x272   :  { %8213 = vst [vmem:[#allocation35_spill] sm:$0xff] %v5118_v2 }
 0x273   :  { %v1228_v32 = vadd.f32 %v1227_v13, %v1226_v10  ;;  %v1235_v10 = vsel %vm846_vm2, %v1109_v61, 0.0 }
 0x275   :  { %v1230_v43 = vadd.f32 %v1229_v60, %v1228_v32  ;;  %v5122_v17 = vpop.permute.xlu0 %2994 }
 0x276   :  { %8215 = vst [vmem:[#allocation37_spill] sm:$0xff] %v5122_v17 }
 0x277   :  { %v1232_v15 = vadd.f32 %v1231_v14, %v1230_v43  ;;  %v5120_v43 = vpop.permute.xlu1 %2932 }
 0x278   :  { %8214 = vst [vmem:[#allocation36_spill] sm:$0xff] %v5120_v43 }
 0x279   :  { %v1234_v23 = vadd.f32 %v1233_v1, %v1232_v15  ;;  %v5126_v15 = vpop.permute.xlu0 %2934 }
 0x27a   :  { %8217 = vst [vmem:[#allocation39_spill] sm:$0xff] %v5126_v15 }
 0x27b   :  { %v1236_v13 = vadd.f32 %v1235_v10, %v1234_v23  ;;  %v5124_v49 = vpop.permute.xlu1 %2996 }
 0x27c   :  { %8216 = vst [vmem:[#allocation38_spill] sm:$0xff] %v5124_v49  ;;  %v8230_v49 = vld [vmem:[#allocation23_spill] sm:$0xff] }
 0x27d   :  { %v1237_v55 = vrot.slane %v1236_v13, 4  ;;  %v5130_v47 = vpop.permute.xlu0 %2998 }
 0x27e   :  { %8219 = vst [vmem:[#allocation41_spill] sm:$0xff] %v5130_v47  ;;  %v8228_v47 = vld [vmem:[#allocation22_spill] sm:$0xff] }
 0x27f   :  { %v1238_v32 = vadd.f32 %v1237_v55, %v1236_v13  ;;  %v5128_v23 = vpop.permute.xlu1 %2936 }
 0x280   :  { %8218 = vst [vmem:[#allocation40_spill] sm:$0xff] %v5128_v23 }
 0x281   :  { %v1239_v60 = vrot.slane %v1238_v32, 2  ;;  %v5134_v13 = vpop.permute.xlu0 %2938 }
 0x282   :  { %8221 = vst [vmem:[#allocation43_spill] sm:$0xff] %v5134_v13 }
 0x283   :  { %v1240_v37 = vadd.f32 %v1239_v60, %v1238_v32  ;;  %v5132_v55 = vpop.permute.xlu1 %3000 }
 0x284   :  { %8220 = vst [vmem:[#allocation42_spill] sm:$0xff] %v5132_v55 }
 0x285   :  { %v1241_v14 = vrot.slane %v1240_v37, 1  ;;  %v5140_v17 = vpop.permute.xlu0 %3002 }
 0x286   :  { %8223 = vst [vmem:[#allocation45_spill] sm:$0xff] %v5140_v17  ;;  %v8232_v17 = vld [vmem:[#allocation24_spill] sm:$0xff] }
 0x287   :  { %v1242_v1 = vadd.f32 %v1241_v14, %v1240_v37  ;;  %v5136_v32 = vpop.permute.xlu1 %2940 }
 0x288   :  { %8222 = vst [vmem:[#allocation44_spill] sm:$0xff] %v5136_v32 }
 0x289   :  { %v1243_v61 = vmul.f32 0.001953125, %v1242_v1  ;;  %v8226_v1 = vld [vmem:[#allocation21_spill] sm:$0xff]  ;;  %v5218_v13 = vpop.permute.xlu0 %2942 }
 0x28a   :  { %8247 = vst [vmem:[#allocation61_spill] sm:$0xff] %v5218_v13 }
 0x28b   :  { %v1244_v10 = vadd.f32 1e-05, %v1243_v61  ;;  %v5142_v37 = vpop.permute.xlu1 %3004 }
 0x28c   :  { %8224 = vst [vmem:[#allocation46_spill] sm:$0xff] %v5142_v37 }
 0x28d   :  { %3664 = vrsqrt.f32 %v1244_v10  ;;  %v5152_v10 = vstv %s3613_s13 }
 0x297   :  { %v5138_v60 = vpop.eup %3664 }
 0x298   :  { %v5146_v14 = vmul.f32 %v5138_v60, %v8208_v9  ;;  %v5150_v61 = vmul.f32 %v5138_v60, %v8226_v1  ;;  %v5156_v55 = vmul.f32 %v5138_v60, %v8228_v47  ;;  %v5160_v35 = vmul.f32 %v5138_v60, %v8230_v49 }
 0x299   :  { %v5164_v37 = vmul.f32 %v5138_v60, %v8232_v17  ;;  %v5168_v9 = vmul.f32 %v5138_v60, %v4664_v8  ;;  %v5172_v1 = vmul.f32 %v5138_v60, %v4668_v16  ;;  %v5176_v47 = vmul.f32 %v5138_v60, %v4672_v20 }
 0x29a   :  { %8225 = vst [vmem:[#allocation47_spill] sm:$0xff] %v5146_v14  ;;  %8227 = vst [vmem:[#allocation21_spill] sm:$0xff] %v5150_v61  ;;  %v5180_v49 = vmul.f32 %v5138_v60, %v4676_v27  ;;  %v5184_v17 = vmul.f32 %v5138_v60, %v4680_v33  ;;  %v5188_v8 = vmul.f32 %v5138_v60, %v4684_v39 }
 0x29b   :  { %8229 = vst [vmem:[#allocation22_spill] sm:$0xff] %v5156_v55  ;;  %8231 = vst [vmem:[#allocation23_spill] sm:$0xff] %v5160_v35  ;;  %v5192_v16 = vmul.f32 %v5138_v60, %v4776_v31  ;;  %v5196_v20 = vmul.f32 %v5138_v60, %v4780_v4  ;;  %v5200_v27 = vmul.f32 %v5138_v60, %v4784_v26  ;;  %v5220_v26 = vpop.permute.xlu1 %2944 }
 0x29c   :  { %8233 = vst [vmem:[#allocation24_spill] sm:$0xff] %v5164_v37  ;;  %8234 = vst [vmem:[#allocation48_spill] sm:$0xff] %v5168_v9  ;;  %v5204_v33 = vmul.f32 %v5138_v60, %v4788_v7  ;;  %v5208_v39 = vmul.f32 %v5138_v60, %v4792_v3  ;;  %v5212_v31 = vmul.f32 %v5138_v60, %v4796_v41 }
 0x29d   :  { %8235 = vst [vmem:[#allocation49_spill] sm:$0xff] %v5172_v1  ;;  %8236 = vst [vmem:[#allocation50_spill] sm:$0xff] %v5176_v47  ;;  %v5216_v4 = vmul.f32 %v5138_v60, %v4800_v42  ;;  %v5224_v7 = vmul.f32 %v5138_v60, %v4804_v28  ;;  %v5228_v3 = vmul.f32 %v5138_v60, %v4808_v34 }
 0x29e   :  { %8237 = vst [vmem:[#allocation51_spill] sm:$0xff] %v5180_v49  ;;  %8238 = vst [vmem:[#allocation52_spill] sm:$0xff] %v5184_v17  ;;  %v1382_v41 = vmul.f32 %v5152_v10, %v5160_v35  ;;  %v1380_v32 = vmul.f32 %v5152_v10, %v5150_v61  ;;  %v5236_v42 = vmul.f32 %v5138_v60, %v4812_v40 }
 0x29f   :  { %8239 = vst [vmem:[#allocation53_spill] sm:$0xff] %v5188_v8  ;;  %8240 = vst [vmem:[#allocation54_spill] sm:$0xff] %v5192_v16  ;;  %v5240_v13 = vmul.f32 %v5138_v60, %v4816_v46  ;;  %v5244_v28 = vmul.f32 %v5138_v60, %v4820_v52  ;;  %v5248_v34 = vmul.f32 %v5138_v60, %v4824_v58  ;;  %v5310_v15 = vpop.permute.xlu1 %3008 }
 0x2a0   :  { %8241 = vst [vmem:[#allocation55_spill] sm:$0xff] %v5196_v20  ;;  %8242 = vst [vmem:[#allocation56_spill] sm:$0xff] %v5200_v27  ;;  %v5256_v40 = vmul.f32 %v5138_v60, %v4832_v6  ;;  %v5260_v46 = vmul.f32 %v5138_v60, %v4836_v12  ;;  %1512 = vrot.lane.b32.xlu1 %v1382_v41, %s3747_s14  ;;  %1508 = vrot.lane.b32.xlu0 %v1380_v32, %s3747_s14  ;;  %v5308_v41 = vpop.permute.xlu0 %3006 }
 0x2a1   :  { %8243 = vst [vmem:[#allocation57_spill] sm:$0xff] %v5204_v33  ;;  %8244 = vst [vmem:[#allocation58_spill] sm:$0xff] %v5208_v39  ;;  %v5266_v52 = vmul.f32 %v5138_v60, %v4840_v22  ;;  %v5270_v58 = vmul.f32 %v5138_v60, %v4844_v30  ;;  %v5278_v6 = vmul.f32 %v5138_v60, %v8192_v56 }
 0x2a2   :  { %8245 = vst [vmem:[#allocation59_spill] sm:$0xff] %v5212_v31  ;;  %8246 = vst [vmem:[#allocation60_spill] sm:$0xff] %v5216_v4  ;;  %v5282_v12 = vmul.f32 %v5138_v60, %v8195_v44  ;;  %v5286_v22 = vmul.f32 %v5138_v60, %v8196_v59  ;;  %v1383_v30 = vmul.f32 %v5152_v10, %v5164_v37 }
 0x2a3   :  { %8248 = vst [vmem:[#allocation62_spill] sm:$0xff] %v5220_v26  ;;  %8249 = vst [vmem:[#allocation63_spill] sm:$0xff] %v5224_v7  ;;  %v5252_v26 = vmul.f32 %v5138_v60, %v4828_v0  ;;  %v5274_v0 = vmul.f32 %v5138_v60, %v4848_v38  ;;  %v1381_v32 = vmul.f32 %v5152_v10, %v5156_v55  ;;  %v5398_v35 = vpop.permute.xlu1 %2948 }
 0x2a4   :  { %8250 = vst [vmem:[#allocation64_spill] sm:$0xff] %v5228_v3  ;;  %8251 = vst [vmem:[#allocation65_spill] sm:$0xff] %v5236_v42  ;;  %v5294_v38 = vmul.f32 %v5138_v60, %v8197_v21  ;;  %v5298_v56 = vmul.f32 %v5138_v60, %v4868_v24  ;;  %v5302_v44 = vmul.f32 %v5138_v60, %v4872_v36  ;;  %1514 = vrot.lane.b32.xlu1 %v1383_v30, %s3747_s14 }
 0x2a5   :  { %8252 = vst [vmem:[#allocation66_spill] sm:$0xff] %v5240_v13  ;;  %8253 = vst [vmem:[#allocation67_spill] sm:$0xff] %v5244_v28  ;;  %v5306_v59 = vmul.f32 %v5138_v60, %v4876_v50  ;;  %v5314_v21 = vmul.f32 %v5138_v60, %v4880_v62  ;;  %v5318_v24 = vmul.f32 %v5138_v60, %v8202_v53  ;;  %1510 = vrot.lane.b32.xlu0 %v1381_v32, %s3747_s14 }
 0x2a6   :  { %8254 = vst [vmem:[#allocation68_spill] sm:$0xff] %v5248_v34  ;;  %8255 = vst [vmem:[#allocation69_spill] sm:$0xff] %v5252_v26  ;;  %v5322_v36 = vmul.f32 %v5138_v60, %v8203_v25  ;;  %v5328_v50 = vmul.f32 %v5138_v60, %v8206_v48  ;;  %v5332_v62 = vmul.f32 %v5138_v60, %v8207_v18 }
 0x2a7   :  { %8256 = vst [vmem:[#allocation70_spill] sm:$0xff] %v5256_v40  ;;  %8257 = vst [vmem:[#allocation71_spill] sm:$0xff] %v5260_v46  ;;  %v1385_v53 = vmul.f32 %v5152_v10, %v5172_v1  ;;  %v1387_v25 = vmul.f32 %v5152_v10, %v5180_v49  ;;  %v1386_v30 = vmul.f32 %v5152_v10, %v5176_v47  ;;  %v5396_v1 = vpop.permute.xlu0 %2946 }
 0x2a8   :  { %8258 = vst [vmem:[#allocation72_spill] sm:$0xff] %v5266_v52  ;;  %8259 = vst [vmem:[#allocation73_spill] sm:$0xff] %v5270_v58  ;;  %v5344_v48 = vmul.f32 %v5152_v10, %v5196_v20  ;;  %v5348_v18 = vmul.f32 %v5152_v10, %v5192_v16  ;;  %v5352_v32 = vmul.f32 %v5152_v10, %v5204_v33 }
 0x2a9   :  { %8260 = vst [vmem:[#allocation74_spill] sm:$0xff] %v5274_v0  ;;  %8261 = vst [vmem:[#allocation75_spill] sm:$0xff] %v5278_v6  ;;  %v5360_v23 = vmul.f32 %v5152_v10, %v5212_v31  ;;  %v5364_v2 = vmul.f32 %v5152_v10, %v5208_v39  ;;  %1518 = vrot.lane.b32.xlu1 %v1385_v53, %s3747_s14  ;;  %v5370_v43 = vmul.f32 %v5152_v10, %v5224_v7 }
 0x2aa   :  { %8262 = vst [vmem:[#allocation76_spill] sm:$0xff] %v5282_v12  ;;  %8263 = vst [vmem:[#allocation77_spill] sm:$0xff] %v5286_v22  ;;  %v5374_v54 = vmul.f32 %v5152_v10, %v5216_v4  ;;  %v5378_v47 = vmul.f32 %v5152_v10, %v5236_v42  ;;  %v5382_v49 = vmul.f32 %v5152_v10, %v5228_v3 }
 0x2ab   :  { %8264 = vst [vmem:[#allocation78_spill] sm:$0xff] %v5294_v38  ;;  %8265 = vst [vmem:[#allocation79_spill] sm:$0xff] %v5298_v56  ;;  %v5386_v53 = vmul.f32 %v5152_v10, %v5244_v28  ;;  %v5402_v37 = vmul.f32 %v5152_v10, %v5248_v34  ;;  %v5406_v61 = vmul.f32 %v5152_v10, %v5260_v46 }
 0x2ac   :  { %8266 = vst [vmem:[#allocation80_spill] sm:$0xff] %v5302_v44  ;;  %8267 = vst [vmem:[#allocation81_spill] sm:$0xff] %v5306_v59  ;;  %v5410_v55 = vmul.f32 %v5152_v10, %v5256_v40 }
 0x2ad   :  { %8268 = vst [vmem:[#allocation82_spill] sm:$0xff] %v5308_v41  ;;  %8269 = vst [vmem:[#allocation83_spill] sm:$0xff] %v5310_v15  ;;  %v1384_v41 = vmul.f32 %v5152_v10, %v5168_v9  ;;  %v5356_v15 = vmul.f32 %v5152_v10, %v5200_v27  ;;  %v5394_v9 = vmul.f32 %v5152_v10, %v5252_v26  ;;  %1522 = vrot.lane.b32.xlu1 %v1387_v25, %s3747_s14 }
 0x2ae   :  { %8270 = vst [vmem:[#allocation84_spill] sm:$0xff] %v5314_v21  ;;  %8271 = vst [vmem:[#allocation85_spill] sm:$0xff] %v5318_v24  ;;  %v5452_v25 = vmul.f32 %v5138_v60, %v4692_v51  ;;  %v5472_v51 = vmul.f32 %v5152_v10, %v5314_v21 }
 0x2af   :  { %8272 = vst [vmem:[#allocation86_spill] sm:$0xff] %v5322_v36  ;;  %8273 = vst [vmem:[#allocation87_spill] sm:$0xff] %v5328_v50  ;;  %1516 = vrot.lane.b32.xlu0 %v1384_v41, %s3747_s14  ;;  %v5390_v41 = vmul.f32 %v5152_v10, %v5240_v13 }
 0x2b0   :  { %8274 = vst [vmem:[#allocation88_spill] sm:$0xff] %v5332_v62  ;;  %8276 = vst [vmem:[#allocation90_spill] sm:$0xff] %v5396_v1  ;;  %v5418_v1 = vmul.f32 %v5152_v10, %v5266_v52 }
 0x2b1   :  { %8275 = vst [vmem:[#allocation89_spill] sm:$0xff] %v5390_v41  ;;  %8277 = vst [vmem:[#allocation91_spill] sm:$0xff] %v5398_v35  ;;  %v5414_v41 = vmul.f32 %v5152_v10, %v5270_v58  ;;  %v5422_v35 = vmul.f32 %v5152_v10, %v5278_v6 }
 0x2b2   :  { %8278 = vst [vmem:[#allocation92_spill] sm:$0xff] %v5402_v37  ;;  %8279 = vst [vmem:[#allocation93_spill] sm:$0xff] %v5406_v61  ;;  %v5426_v37 = vmul.f32 %v5152_v10, %v5274_v0  ;;  %v5430_v61 = vmul.f32 %v5152_v10, %v5286_v22 }
 0x2b3   :  { %8280 = vst [vmem:[#allocation94_spill] sm:$0xff] %v5414_v41  ;;  %8281 = vst [vmem:[#allocation95_spill] sm:$0xff] %v5418_v1  ;;  %1520 = vrot.lane.b32.xlu0 %v1386_v30, %s3747_s14  ;;  %v5436_v41 = vmul.f32 %v5152_v10, %v5282_v12  ;;  %v5440_v1 = vmul.f32 %v5152_v10, %v5298_v56  ;;  %v5456_v30 = vmul.f32 %v5152_v10, %v5306_v59 }
 0x2b4   :  { %8282 = vst [vmem:[#allocation96_spill] sm:$0xff] %v5422_v35  ;;  %8283 = vst [vmem:[#allocation97_spill] sm:$0xff] %v5426_v37  ;;  %v5444_v35 = vmul.f32 %v5152_v10, %v5294_v38  ;;  %v5448_v37 = vmul.f32 %v5138_v60, %v4688_v45  ;;  %v5468_v45 = vmul.f32 %v5152_v10, %v5318_v24 }
 0x2b5   :  { %8284 = vst [vmem:[#allocation98_spill] sm:$0xff] %v5430_v61  ;;  %8285 = vst [vmem:[#allocation99_spill] sm:$0xff] %v5436_v41  ;;  %v5460_v41 = vmul.f32 %v5152_v10, %v5302_v44  ;;  %v5484_v61 = vpop.permute.xlu1 %3012 }
 0x2b6   :  { %8286 = vst [vmem:[#allocation100_spill] sm:$0xff] %v5440_v1  ;;  %8287 = vst [vmem:[#allocation101_spill] sm:$0xff] %v5444_v35  ;;  %v1389_v1 = vmul.f32 %v5152_v10, %v5188_v8  ;;  %v1388_v35 = vmul.f32 %v5152_v10, %v5184_v17  ;;  %v5482_v8 = vpop.permute.xlu0 %3010  ;;  %v5490_v17 = vmul.f32 %v5152_v10, %v5146_v14 }
 0x2b7   :  { %8288 = vst [vmem:[#allocation102_spill] sm:$0xff] %v5448_v37  ;;  %8289 = vst [vmem:[#allocation103_spill] sm:$0xff] %v5452_v25 }
 0x2b8   :  { %8290 = vst [vmem:[#allocation104_spill] sm:$0xff] %v5456_v30  ;;  %8291 = vst [vmem:[#allocation105_spill] sm:$0xff] %v5460_v41  ;;  %v5476_v30 = vmul.f32 %v5152_v10, %v5328_v50  ;;  %v5480_v41 = vmul.f32 %v5152_v10, %v5322_v36  ;;  %1526 = vrot.lane.b32.xlu1 %v1389_v1, %s3747_s14  ;;  %1524 = vrot.lane.b32.xlu0 %v1388_v35, %s3747_s14 }
 0x2b9   :  { %8292 = vst [vmem:[#allocation106_spill] sm:$0xff] %v5468_v45  ;;  %8293 = vst [vmem:[#allocation107_spill] sm:$0xff] %v5472_v51  ;;  %v5494_v51 = vmul.f32 %v5152_v10, %v5332_v62  ;;  %v1391_v1 = vmul.f32 %v5152_v10, %v5452_v25  ;;  %v1390_v35 = vmul.f32 %v5152_v10, %v5448_v37  ;;  %v8312_v25 = vld [vmem:[#allocation8_spill] sm:$0xff] }
 0x2ba   :  { %8294 = vst [vmem:[#allocation108_spill] sm:$0xff] %v5476_v30  ;;  %8295 = vst [vmem:[#allocation109_spill] sm:$0xff] %v5480_v41  ;;  %v5498_v30 = vmul.f32 %v5138_v60, %v4696_v57  ;;  %v5516_v57 = vmul.f32 %v5138_v60, %v4704_v5  ;;  %v5534_v5 = vmul.f32 %v5138_v60, %v4716_v29 }
 0x2bb   :  { %8296 = vst [vmem:[#allocation110_spill] sm:$0xff] %v5482_v8  ;;  %8297 = vst [vmem:[#allocation111_spill] sm:$0xff] %v5484_v61  ;;  %v5502_v8 = vmul.f32 %v5138_v60, %v4700_v63  ;;  %v5510_v61 = vpop.permute.xlu0 %2950  ;;  %v5520_v63 = vmul.f32 %v5138_v60, %v4708_v11 }
 0x2bc   :  { %8298 = vst [vmem:[#allocation112_spill] sm:$0xff] %v5490_v17  ;;  %8299 = vst [vmem:[#allocation113_spill] sm:$0xff] %v5494_v51  ;;  %1530 = vrot.lane.b32.xlu1 %v1391_v1, %s3747_s14  ;;  %1528 = vrot.lane.b32.xlu0 %v1390_v35, %s3747_s14  ;;  %v5512_v51 = vpop.permute.xlu1 %2952  ;;  %v1392_v1 = vmul.f32 %v5152_v10, %v5498_v30  ;;  %v5530_v35 = vmul.f32 %v5138_v60, %v4712_v19  ;;  %v8314_v17 = vld [vmem:[#allocation9_spill] sm:$0xff] }
 0x2bd   :  { %8300 = vst [vmem:[#allocation114_spill] sm:$0xff] %v5498_v30  ;;  %8301 = vst [vmem:[#allocation115_spill] sm:$0xff] %v5502_v8  ;;  %v1393_v37 = vmul.f32 %v5152_v10, %v5502_v8  ;;  %v1395_v11 = vmul.f32 %v5152_v10, %v5520_v63  ;;  %v8306_v30 = vld [vmem:[#allocation25_spill] sm:$0xff]  ;;  %v8310_v8 = vld [vmem:[#allocation7_spill] sm:$0xff] }
 0x2be   :  { %8302 = vst [vmem:[#allocation116_spill] sm:$0xff] %v5510_v61  ;;  %8303 = vst [vmem:[#allocation117_spill] sm:$0xff] %v5512_v51  ;;  %v1394_v61 = vmul.f32 %v5152_v10, %v5516_v57  ;;  %v5540_v51 = vstv %s3612_s15  ;;  %v5552_v29 = vmul.f32 %v5138_v60, %v8310_v8  ;;  %v1396_v45 = vmul.f32 %v5152_v10, %v5530_v35 }
 0x2bf   :  { %8304 = vst [vmem:[#allocation118_spill] sm:$0xff] %v5516_v57  ;;  %8305 = vst [vmem:[#allocation119_spill] sm:$0xff] %v5520_v63  ;;  %v5556_v63 = vmul.f32 %v5138_v60, %v8312_v25  ;;  %v5560_v57 = vmul.f32 %v5138_v60, %v8314_v17  ;;  %v5562_v41 = vpop.permute.xlu0 %3014  ;;  %v1397_v25 = vmul.f32 %v5152_v10, %v5534_v5 }
 0x2c0   :  { %1534 = vrot.lane.b32.xlu1 %v1393_v37, %s3747_s14  ;;  %1532 = vrot.lane.b32.xlu0 %v1392_v1, %s3747_s14  ;;  %v5544_v37 = vmul.f32 %v5138_v60, %v8306_v30  ;;  %v8308_v1 = vld [vmem:[#allocation26_spill] sm:$0xff]  ;;  %8311 = vst [vmem:[#allocation7_spill] sm:$0xff] %v5552_v29  ;;  %8316 = vst [vmem:[#allocation120_spill] sm:$0xff] %v5562_v41  ;;  %v5564_v30 = vpop.permute.xlu1 %3016  ;;  %v5578_v17 = vmul.f32 %v5540_v51, %v5196_v20 }
 0x2c1   :  { %v5548_v19 = vmul.f32 %v5138_v60, %v8308_v1  ;;  %8313 = vst [vmem:[#allocation8_spill] sm:$0xff] %v5556_v63  ;;  %8315 = vst [vmem:[#allocation9_spill] sm:$0xff] %v5560_v57  ;;  %v8318_v1 = vld [vmem:[#allocation10_spill] sm:$0xff]  ;;  %v5582_v41 = vmul.f32 %v5540_v51, %v5192_v16 }
 0x2c2   :  { %8307 = vst [vmem:[#allocation25_spill] sm:$0xff] %v5544_v37  ;;  %8317 = vst [vmem:[#allocation121_spill] sm:$0xff] %v5564_v30  ;;  %v5570_v8 = vmul.f32 %v5138_v60, %v8318_v1  ;;  %v5594_v1 = vmul.f32 %v5540_v51, %v5212_v31 }
 0x2c3   :  { %8309 = vst [vmem:[#allocation26_spill] sm:$0xff] %v5548_v19  ;;  %8320 = vst [vmem:[#allocation122_spill] sm:$0xff] %v5578_v17  ;;  %v1399_v30 = vmul.f32 %v5152_v10, %v5548_v19  ;;  %v5600_v17 = vmul.f32 %v5540_v51, %v5208_v39  ;;  %v8366_v19 = vld [vmem:[#allocation27_spill] sm:$0xff] }
 0x2c4   :  { %1538 = vrot.lane.b32.xlu1 %v1395_v11, %s3747_s14  ;;  %1536 = vrot.lane.b32.xlu0 %v1394_v61, %s3747_s14  ;;  %8319 = vst [vmem:[#allocation10_spill] sm:$0xff] %v5570_v8  ;;  %8321 = vst [vmem:[#allocation123_spill] sm:$0xff] %v5582_v41  ;;  %v5586_v61 = vmul.f32 %v5540_v51, %v5204_v33  ;;  %v5590_v11 = vmul.f32 %v5540_v51, %v5200_v27 }
 0x2c5   :  { %8324 = vst [vmem:[#allocation126_spill] sm:$0xff] %v5594_v1  ;;  %8325 = vst [vmem:[#allocation127_spill] sm:$0xff] %v5600_v17  ;;  %v5604_v41 = vmul.f32 %v5540_v51, %v5224_v7  ;;  %v1398_v1 = vmul.f32 %v5152_v10, %v5544_v37  ;;  %v5620_v17 = vmul.f32 %v5540_v51, %v5228_v3  ;;  %v5640_v37 = vpop.permute.xlu1 %2956 }
 0x2c6   :  { %8322 = vst [vmem:[#allocation124_spill] sm:$0xff] %v5586_v61  ;;  %8323 = vst [vmem:[#allocation125_spill] sm:$0xff] %v5590_v11  ;;  %v5608_v61 = vmul.f32 %v5540_v51, %v5216_v4  ;;  %v5616_v11 = vmul.f32 %v5540_v51, %v5236_v42 }
 0x2c7   :  { %8326 = vst [vmem:[#allocation128_spill] sm:$0xff] %v5604_v41  ;;  %8329 = vst [vmem:[#allocation131_spill] sm:$0xff] %v5620_v17  ;;  %v5624_v41 = vmul.f32 %v5540_v51, %v5244_v28  ;;  %v5644_v17 = vmul.f32 %v5540_v51, %v5260_v46 }
 0x2c8   :  { %8327 = vst [vmem:[#allocation129_spill] sm:$0xff] %v5608_v61  ;;  %1542 = vrot.lane.b32.xlu1 %v1397_v25, %s3747_s14  ;;  %1540 = vrot.lane.b32.xlu0 %v1396_v45, %s3747_s14  ;;  %8328 = vst [vmem:[#allocation130_spill] sm:$0xff] %v5616_v11  ;;  %v5628_v25 = vmul.f32 %v5540_v51, %v5240_v13  ;;  %v5632_v45 = vmul.f32 %v5540_v51, %v5252_v26  ;;  %v5638_v11 = vpop.permute.xlu0 %2954 }
 0x2c9   :  { %8330 = vst [vmem:[#allocation132_spill] sm:$0xff] %v5624_v41  ;;  %v5636_v61 = vmul.f32 %v5540_v51, %v5248_v34  ;;  %8334 = vst [vmem:[#allocation136_spill] sm:$0xff] %v5638_v11  ;;  %v5648_v41 = vmul.f32 %v5540_v51, %v5256_v40  ;;  %v1401_v11 = vmul.f32 %v5152_v10, %v5556_v63  ;;  %v8365_v63 = vld [vmem:[#allocation18_spill] sm:$0xff] }
 0x2ca   :  { %8331 = vst [vmem:[#allocation133_spill] sm:$0xff] %v5628_v25  ;;  %8332 = vst [vmem:[#allocation134_spill] sm:$0xff] %v5632_v45  ;;  %v5652_v25 = vmul.f32 %v5540_v51, %v5270_v58  ;;  %v5656_v45 = vmul.f32 %v5540_v51, %v5266_v52 }
 0x2cb   :  { %8333 = vst [vmem:[#allocation135_spill] sm:$0xff] %v5636_v61  ;;  %8335 = vst [vmem:[#allocation137_spill] sm:$0xff] %v5640_v37  ;;  %v5662_v37 = vmul.f32 %v5540_v51, %v5278_v6  ;;  %v8358_v61 = vld [vmem:[#allocation12_spill] sm:$0xff] }
 0x2cc   :  { %8336 = vst [vmem:[#allocation138_spill] sm:$0xff] %v5644_v17  ;;  %8337 = vst [vmem:[#allocation139_spill] sm:$0xff] %v5648_v41  ;;  %v5666_v17 = vmul.f32 %v5540_v51, %v5274_v0  ;;  %v5670_v41 = vmul.f32 %v5540_v51, %v5286_v22  ;;  %1546 = vrot.lane.b32.xlu1 %v1399_v30, %s3747_s14  ;;  %1544 = vrot.lane.b32.xlu0 %v1398_v1, %s3747_s14 }
 0x2cd   :  { %8338 = vst [vmem:[#allocation140_spill] sm:$0xff] %v5652_v25  ;;  %8339 = vst [vmem:[#allocation141_spill] sm:$0xff] %v5656_v45  ;;  %v1400_v45 = vmul.f32 %v5152_v10, %v5552_v29  ;;  %v5678_v25 = vmul.f32 %v5540_v51, %v5282_v12  ;;  %v5690_v30 = vmul.f32 %v5540_v51, %v5306_v59 }
 0x2ce   :  { %8340 = vst [vmem:[#allocation142_spill] sm:$0xff] %v5662_v37  ;;  %8341 = vst [vmem:[#allocation143_spill] sm:$0xff] %v5666_v17  ;;  %v5682_v37 = vmul.f32 %v5540_v51, %v5298_v56  ;;  %v5686_v17 = vmul.f32 %v5540_v51, %v5294_v38  ;;  %v5694_v1 = vmul.f32 %v5540_v51, %v5302_v44 }
 0x2cf   :  { %8342 = vst [vmem:[#allocation144_spill] sm:$0xff] %v5670_v41  ;;  %8343 = vst [vmem:[#allocation145_spill] sm:$0xff] %v5678_v25  ;;  %v5698_v41 = vmul.f32 %v5540_v51, %v5318_v24  ;;  %v5702_v25 = vmul.f32 %v5540_v51, %v5314_v21  ;;  %v1403_v29 = vmul.f32 %v5152_v10, %v5570_v8 }
 0x2d0   :  { %8344 = vst [vmem:[#allocation146_spill] sm:$0xff] %v5682_v37  ;;  %8345 = vst [vmem:[#allocation147_spill] sm:$0xff] %v5686_v17  ;;  %v5706_v37 = vmul.f32 %v5540_v51, %v5328_v50  ;;  %v5710_v17 = vmul.f32 %v5540_v51, %v5322_v36  ;;  %1550 = vrot.lane.b32.xlu1 %v1401_v11, %s3747_s14  ;;  %1548 = vrot.lane.b32.xlu0 %v1400_v45, %s3747_s14  ;;  %v8360_v11 = vld [vmem:[#allocation14_spill] sm:$0xff] }
 0x2d1   :  { %8346 = vst [vmem:[#allocation148_spill] sm:$0xff] %v5690_v30  ;;  %8347 = vst [vmem:[#allocation149_spill] sm:$0xff] %v5694_v1  ;;  %v5714_v30 = vmul.f32 %v5540_v51, %v5146_v14  ;;  %v5720_v1 = vpop.permute.xlu0 %3018  ;;  %v5742_v45 = vmul.f32 %v5138_v60, %v8360_v11 }
 0x2d2   :  { %8348 = vst [vmem:[#allocation150_spill] sm:$0xff] %v5698_v41  ;;  %8349 = vst [vmem:[#allocation151_spill] sm:$0xff] %v5702_v25  ;;  %v5718_v41 = vmul.f32 %v5540_v51, %v5332_v62  ;;  %v5722_v25 = vpop.permute.xlu1 %3020 }
 0x2d3   :  { %8350 = vst [vmem:[#allocation152_spill] sm:$0xff] %v5706_v37  ;;  %8351 = vst [vmem:[#allocation153_spill] sm:$0xff] %v5710_v17  ;;  %v8356_v37 = vld [vmem:[#allocation11_spill] sm:$0xff] }
 0x2d4   :  { %8352 = vst [vmem:[#allocation154_spill] sm:$0xff] %v5714_v30  ;;  %8353 = vst [vmem:[#allocation155_spill] sm:$0xff] %v5718_v41  ;;  %v5728_v17 = vmul.f32 %v5138_v60, %v8356_v37  ;;  %v5732_v30 = vmul.f32 %v5138_v60, %v8358_v61  ;;  %1554 = vrot.lane.b32.xlu1 %v1403_v29, %s3747_s14  ;;  %v8361_v37 = vld [vmem:[#allocation16_spill] sm:$0xff] }
 0x2d5   :  { %8354 = vst [vmem:[#allocation156_spill] sm:$0xff] %v5720_v1  ;;  %8355 = vst [vmem:[#allocation157_spill] sm:$0xff] %v5722_v25  ;;  %v1402_v1 = vmul.f32 %v5152_v10, %v5560_v57  ;;  %v5746_v25 = vmul.f32 %v5138_v60, %v8361_v37  ;;  %v5748_v61 = vpop.permute.xlu0 %2958  ;;  %v5756_v57 = vstv %s3614_s16  ;;  %v5764_v37 = vmul.f32 %v5138_v60, %v8365_v63 }
 0x2d6   :  { %8357 = vst [vmem:[#allocation11_spill] sm:$0xff] %v5728_v17  ;;  %8359 = vst [vmem:[#allocation12_spill] sm:$0xff] %v5732_v30  ;;  %v5750_v41 = vpop.permute.xlu1 %2960  ;;  %v1405_v8 = vmul.f32 %v5152_v10, %v5732_v30  ;;  %v1404_v29 = vmul.f32 %v5152_v10, %v5728_v17  ;;  %v1406_v17 = vmul.f32 %v5152_v10, %v5742_v45 }
 0x2d7   :  { %1552 = vrot.lane.b32.xlu0 %v1402_v1, %s3747_s14  ;;  %8362 = vst [vmem:[#allocation14_spill] sm:$0xff] %v5748_v61  ;;  %8363 = vst [vmem:[#allocation16_spill] sm:$0xff] %v5750_v41  ;;  %v8364_v1 = vld [vmem:[#allocation20_spill] sm:$0xff]  ;;  %v5768_v61 = vmul.f32 %v5138_v60, %v8366_v19  ;;  %v5782_v63 = vmul.f32 %v5756_v57, %v5196_v20  ;;  %v5786_v19 = vmul.f32 %v5756_v57, %v5192_v16 }
 0x2d8   :  { %v5760_v11 = vmul.f32 %v5138_v60, %v8364_v1  ;;  %v8367_v41 = vld [vmem:[#allocation28_spill] sm:$0xff]  ;;  %1558 = vrot.lane.b32.xlu1 %v1405_v8, %s3747_s14  ;;  %v1407_v1 = vmul.f32 %v5152_v10, %v5746_v25  ;;  %v5798_v8 = vmul.f32 %v5756_v57, %v5212_v31  ;;  %v5808_v20 = vmul.f32 %v5756_v57, %v5224_v7 }
 0x2d9   :  { %v5772_v30 = vmul.f32 %v5138_v60, %v8367_v41  ;;  %v5790_v60 = vmul.f32 %v5756_v57, %v5204_v33  ;;  %v5794_v41 = vmul.f32 %v5756_v57, %v5200_v27  ;;  %v5812_v33 = vmul.f32 %v5756_v57, %v5216_v4  ;;  %v5818_v31 = vpop.permute.xlu0 %3022 }
 0x2da   :  { %8368 = vst [vmem:[#allocation20_spill] sm:$0xff] %v5798_v8  ;;  %v1409_v16 = vmul.f32 %v5152_v10, %v5760_v11  ;;  %v5816_v27 = vmul.f32 %v5756_v57, %v5236_v42  ;;  %8369 = vst [vmem:[#allocation18_spill] sm:$0xff] %v5818_v31  ;;  %v5820_v8 = vpop.permute.xlu1 %3024  ;;  %v1408_v7 = vmul.f32 %v5152_v10, %v5764_v37 }
 0x2db   :  { %1556 = vrot.lane.b32.xlu0 %v1404_v29, %s3747_s14  ;;  %v5802_v29 = vmul.f32 %v5756_v57, %v5208_v39  ;;  %8370 = vst [vmem:[#allocation27_spill] sm:$0xff] %v5820_v8  ;;  %v5828_v39 = vmul.f32 %v5756_v57, %v5228_v3  ;;  %v5832_v4 = vmul.f32 %v5756_v57, %v5244_v28 }
 0x2dc   :  { %1562 = vrot.lane.b32.xlu1 %v1407_v1, %s3747_s14  ;;  %v5836_v31 = vmul.f32 %v5756_v57, %v5240_v13  ;;  %v5840_v1 = vmul.f32 %v5756_v57, %v5252_v26  ;;  %v5848_v8 = vmul.f32 %v5756_v57, %v5260_v46  ;;  %v5852_v28 = vmul.f32 %v5756_v57, %v5256_v40 }
 0x2dd   :  { %v5856_v13 = vmul.f32 %v5756_v57, %v5270_v58  ;;  %v5860_v26 = vmul.f32 %v5756_v57, %v5266_v52  ;;  %v1411_v46 = vmul.f32 %v5152_v10, %v5772_v30  ;;  %v5870_v3 = vmul.f32 %v5756_v57, %v5274_v0 }
 0x2de   :  { %v5874_v40 = vmul.f32 %v5756_v57, %v5286_v22  ;;  %v5878_v58 = vmul.f32 %v5756_v57, %v5282_v12  ;;  %v5886_v52 = vmul.f32 %v5756_v57, %v5298_v56  ;;  %v5890_v0 = vmul.f32 %v5756_v57, %v5294_v38  ;;  %v5908_v56 = vpop.permute.xlu0 %2962  ;;  %v5910_v38 = vpop.permute.xlu1 %2964 }
 0x2df   :  { %1560 = vrot.lane.b32.xlu0 %v1406_v17, %s3747_s14  ;;  %v5844_v17 = vmul.f32 %v5756_v57, %v5248_v34  ;;  %v5864_v34 = vmul.f32 %v5756_v57, %v5278_v6  ;;  %v1410_v6 = vmul.f32 %v5152_v10, %v5768_v61  ;;  %v5894_v22 = vmul.f32 %v5756_v57, %v5306_v59 }
 0x2e0   :  { %1566 = vrot.lane.b32.xlu1 %v1409_v16, %s3747_s14  ;;  %8371 = vst [vmem:[#allocation28_spill] sm:$0xff] %v5890_v0  ;;  %v5898_v16 = vmul.f32 %v5756_v57, %v5302_v44  ;;  %v5906_v10 = vmul.f32 %v5756_v57, %v5314_v21  ;;  %8376 = vst [vmem:[#allocation162_spill] sm:$0xff] %v5908_v56  ;;  %v5914_v59 = vmul.f32 %v5756_v57, %v5328_v50  ;;  %v8436_v50 = vld [vmem:[#allocation48_spill] sm:$0xff] }
 0x2e1   :  { %8372 = vst [vmem:[#allocation158_spill] sm:$0xff] %v5894_v22  ;;  %8377 = vst [vmem:[#allocation163_spill] sm:$0xff] %v5910_v38  ;;  %v5918_v44 = vmul.f32 %v5756_v57, %v5322_v36  ;;  %v5926_v21 = vmul.f32 %v5756_v57, %v5332_v62 }
 0x2e2   :  { %8373 = vst [vmem:[#allocation159_spill] sm:$0xff] %v5898_v16  ;;  %8375 = vst [vmem:[#allocation161_spill] sm:$0xff] %v5906_v10  ;;  %v5930_v56 = vpop.permute.xlu0 %3026  ;;  %v5932_v38 = vpop.permute.xlu1 %3028 }
 0x2e3   :  { %1564 = vrot.lane.b32.xlu0 %v1408_v7, %s3747_s14  ;;  %v5902_v7 = vmul.f32 %v5756_v57, %v5318_v24  ;;  %8378 = vst [vmem:[#allocation164_spill] sm:$0xff] %v5914_v59  ;;  %8379 = vst [vmem:[#allocation165_spill] sm:$0xff] %v5918_v44  ;;  %v5922_v24 = vmul.f32 %v5756_v57, %v5146_v14 }
 0x2e4   :  { %8381 = vst [vmem:[#allocation167_spill] sm:$0xff] %v5926_v21  ;;  %1570 = vrot.lane.b32.xlu1 %v1411_v46, %s3747_s14  ;;  %8382 = vst [vmem:[#allocation168_spill] sm:$0xff] %v5930_v56  ;;  %v8415_v56 = vld [vmem:[#allocation106_spill] sm:$0xff] }
 0x2e5   :  { %8374 = vst [vmem:[#allocation160_spill] sm:$0xff] %v5902_v7  ;;  %8380 = vst [vmem:[#allocation166_spill] sm:$0xff] %v5922_v24 }
 0x2e6   :  { %8383 = vst [vmem:[#allocation169_spill] sm:$0xff] %v5932_v38  ;;  %v5942_v62 = vpop.permute.xlu0 %2966  ;;  %v5944_v46 = vpop.permute.xlu1 %2968 }
 0x2e7   :  { %1568 = vrot.lane.b32.xlu0 %v1410_v6, %s3747_s14  ;;  %8384 = vst [vmem:[#allocation170_spill] sm:$0xff] %v5942_v62  ;;  %8385 = vst [vmem:[#allocation171_spill] sm:$0xff] %v5944_v46  ;;  %v8432_v62 = vld [vmem:[#allocation23_spill] sm:$0xff] }
 0x2e8   :  { %1574 = vrot.lane.b32.xlu1 %v5344_v48, %s3747_s14  ;;  %v1767_v46 = vmul.f32 %v5540_v51, %v8432_v62 }
 0x2ea   :  { %v5950_v6 = vpop.permute.xlu0 %3030  ;;  %v5952_v48 = vpop.permute.xlu1 %3032 }
 0x2eb   :  { %1572 = vrot.lane.b32.xlu0 %v5348_v18, %s3747_s14  ;;  %8386 = vst [vmem:[#allocation172_spill] sm:$0xff] %v5950_v6  ;;  %8387 = vst [vmem:[#allocation173_spill] sm:$0xff] %v5952_v48 }
 0x2ec   :  { %1578 = vrot.lane.b32.xlu1 %v5352_v32, %s3747_s14 }
 0x2ef   :  { %1576 = vrot.lane.b32.xlu0 %v5356_v15, %s3747_s14  ;;  %v5962_v15 = vpop.permute.xlu0 %2970 }
 0x2f0   :  { %1582 = vrot.lane.b32.xlu1 %v5360_v23, %s3747_s14  ;;  %8388 = vst [vmem:[#allocation174_spill] sm:$0xff] %v5962_v15  ;;  %v5964_v23 = vpop.permute.xlu1 %2972 }
 0x2f1   :  { %8389 = vst [vmem:[#allocation175_spill] sm:$0xff] %v5964_v23 }
 0x2f3   :  { %1580 = vrot.lane.b32.xlu0 %v5364_v2, %s3747_s14  ;;  %v8390_v2 = vld [vmem:[#allocation89_spill] sm:$0xff] }
 0x2f4   :  { %1586 = vrot.lane.b32.xlu1 %v5370_v43, %s3747_s14  ;;  %v5970_v43 = vpop.permute.xlu0 %3034  ;;  %v5972_v18 = vpop.permute.xlu1 %3036 }
 0x2f5   :  { %8391 = vst [vmem:[#allocation89_spill] sm:$0xff] %v5970_v43  ;;  %8392 = vst [vmem:[#allocation176_spill] sm:$0xff] %v5972_v18  ;;  %v8404_v18 = vld [vmem:[#allocation99_spill] sm:$0xff] }
 0x2f7   :  { %1584 = vrot.lane.b32.xlu0 %v5374_v54, %s3747_s14  ;;  %v8393_v54 = vld [vmem:[#allocation92_spill] sm:$0xff] }
 0x2f8   :  { %1590 = vrot.lane.b32.xlu1 %v5378_v47, %s3747_s14  ;;  %v8394_v47 = vld [vmem:[#allocation93_spill] sm:$0xff]  ;;  %v5984_v32 = vpop.permute.xlu1 %2976 }
 0x2f9   :  { %8396 = vst [vmem:[#allocation93_spill] sm:$0xff] %v5984_v32  ;;  %v8428_v32 = vld [vmem:[#allocation21_spill] sm:$0xff] }
 0x2fb   :  { %1588 = vrot.lane.b32.xlu0 %v5382_v49, %s3747_s14  ;;  %v5982_v49 = vpop.permute.xlu0 %2974 }
 0x2fc   :  { %1594 = vrot.lane.b32.xlu1 %v5386_v53, %s3747_s14  ;;  %8395 = vst [vmem:[#allocation92_spill] sm:$0xff] %v5982_v49  ;;  %v8397_v53 = vld [vmem:[#allocation94_spill] sm:$0xff]  ;;  %v5992_v43 = vpop.permute.xlu1 %3040 }
 0x2fd   :  { %v8427_v49 = vld [vmem:[#allocation22_spill] sm:$0xff] }
 0x2ff   :  { %1592 = vrot.lane.b32.xlu0 %v8390_v2, %s3747_s14  ;;  %v8398_v2 = vld [vmem:[#allocation95_spill] sm:$0xff] }
 0x300   :  { %1598 = vrot.lane.b32.xlu1 %v5394_v9, %s3747_s14  ;;  %v5990_v9 = vpop.permute.xlu0 %3038  ;;  %8400 = vst [vmem:[#allocation95_spill] sm:$0xff] %v5992_v43  ;;  %v6004_v6 = vpop.permute.xlu1 %2980 }
 0x301   :  { %8399 = vst [vmem:[#allocation94_spill] sm:$0xff] %v5990_v9  ;;  %v8408_v9 = vld [vmem:[#allocation101_spill] sm:$0xff] }
 0x303   :  { %1596 = vrot.lane.b32.xlu0 %v8393_v54, %s3747_s14  ;;  %v8401_v54 = vld [vmem:[#allocation96_spill] sm:$0xff] }
 0x304   :  { %1602 = vrot.lane.b32.xlu1 %v8394_v47, %s3747_s14  ;;  %v8402_v47 = vld [vmem:[#allocation97_spill] sm:$0xff]  ;;  %v6012_v43 = vpop.permute.xlu1 %3044 }
 0x305   :  { %8406 = vst [vmem:[#allocation97_spill] sm:$0xff] %v6004_v6  ;;  %8410 = vst [vmem:[#allocation99_spill] sm:$0xff] %v6012_v43  ;;  %v8419_v43 = vld [vmem:[#allocation108_spill] sm:$0xff] }
 0x307   :  { %1600 = vrot.lane.b32.xlu0 %v5410_v55, %s3747_s14  ;;  %v8403_v55 = vld [vmem:[#allocation98_spill] sm:$0xff] }
 0x308   :  { %1606 = vrot.lane.b32.xlu1 %v8397_v53, %s3747_s14  ;;  %v6002_v53 = vpop.permute.xlu0 %2978 }
 0x309   :  { %8405 = vst [vmem:[#allocation96_spill] sm:$0xff] %v6002_v53  ;;  %v8423_v53 = vld [vmem:[#allocation112_spill] sm:$0xff] }
 0x30b   :  { %1604 = vrot.lane.b32.xlu0 %v8398_v2, %s3747_s14  ;;  %v8407_v2 = vld [vmem:[#allocation100_spill] sm:$0xff] }
 0x30c   :  { %1610 = vrot.lane.b32.xlu1 %v8401_v54, %s3747_s14  ;;  %v6010_v54 = vpop.permute.xlu0 %3042 }
 0x30d   :  { %8409 = vst [vmem:[#allocation98_spill] sm:$0xff] %v6010_v54 }
 0x30f   :  { %1608 = vrot.lane.b32.xlu0 %v8402_v47, %s3747_s14  ;;  %v8411_v47 = vld [vmem:[#allocation104_spill] sm:$0xff] }
 0x310   :  { %1614 = vrot.lane.b32.xlu1 %v8403_v55, %s3747_s14  ;;  %v8412_v55 = vld [vmem:[#allocation105_spill] sm:$0xff] }
 0x312   :  { %v6020_v48 = vpop.permute.xlu0 %1508 }
 0x313   :  { %1612 = vrot.lane.b32.xlu0 %v8404_v18, %s3747_s14  ;;  %v6018_v18 = vpop.permute.xlu1 %1512  ;;  %8414 = vst [vmem:[#allocation101_spill] sm:$0xff] %v6020_v48 }
 0x314   :  { %1618 = vrot.lane.b32.xlu1 %v8407_v2, %s3747_s14  ;;  %8413 = vst [vmem:[#allocation100_spill] sm:$0xff] %v6018_v18  ;;  %v8416_v2 = vld [vmem:[#allocation107_spill] sm:$0xff] }
 0x317   :  { %1616 = vrot.lane.b32.xlu0 %v8408_v9, %s3747_s14  ;;  %v6026_v9 = vpop.permute.xlu1 %1514  ;;  %v6028_v54 = vpop.permute.xlu0 %1510 }
 0x318   :  { %1622 = vrot.lane.b32.xlu1 %v8411_v47, %s3747_s14  ;;  %8417 = vst [vmem:[#allocation104_spill] sm:$0xff] %v6026_v9  ;;  %8418 = vst [vmem:[#allocation105_spill] sm:$0xff] %v6028_v54  ;;  %v8420_v47 = vld [vmem:[#allocation109_spill] sm:$0xff] }
 0x31b   :  { %1620 = vrot.lane.b32.xlu0 %v8412_v55, %s3747_s14  ;;  %v6034_v55 = vpop.permute.xlu1 %1518 }
 0x31c   :  { %1626 = vrot.lane.b32.xlu1 %v8415_v56, %s3747_s14  ;;  %8421 = vst [vmem:[#allocation106_spill] sm:$0xff] %v6034_v55  ;;  %v8424_v56 = vld [vmem:[#allocation113_spill] sm:$0xff] }
 0x31f   :  { %1624 = vrot.lane.b32.xlu0 %v8416_v2, %s3747_s14  ;;  %v6042_v2 = vpop.permute.xlu1 %1522 }
 0x320   :  { %1630 = vrot.lane.b32.xlu1 %v8419_v43, %s3747_s14  ;;  %8425 = vst [vmem:[#allocation108_spill] sm:$0xff] %v6042_v2  ;;  %v1766_v43 = vmul.f32 %v5540_v51, %v8427_v49 }
 0x321   :  { %v6036_v38 = vpop.permute.xlu0 %1516 }
 0x322   :  { %8422 = vst [vmem:[#allocation107_spill] sm:$0xff] %v6036_v38 }
 0x323   :  { %1628 = vrot.lane.b32.xlu0 %v8420_v47, %s3747_s14  ;;  %v1765_v47 = vmul.f32 %v5540_v51, %v8428_v32 }
 0x324   :  { %1634 = vrot.lane.b32.xlu1 %v8423_v53, %s3747_s14 }
 0x325   :  { %v6044_v6 = vpop.permute.xlu0 %1520 }
 0x326   :  { %8426 = vst [vmem:[#allocation109_spill] sm:$0xff] %v6044_v6 }
 0x327   :  { %1632 = vrot.lane.b32.xlu0 %v8424_v56, %s3747_s14  ;;  %v8431_v56 = vld [vmem:[#allocation24_spill] sm:$0xff] }
 0x328   :  { %1895 = vrot.lane.b32.xlu1 %v1766_v43, %s3748_s17  ;;  %v1768_v23 = vmul.f32 %v5540_v51, %v8431_v56  ;;  %v8435_v43 = vld [vmem:[#allocation49_spill] sm:$0xff] }
 0x32a   :  { %v6052_v15 = vpop.permute.xlu1 %1526  ;;  %v6054_v53 = vpop.permute.xlu0 %1524 }
 0x32b   :  { %1893 = vrot.lane.b32.xlu0 %v1765_v47, %s3748_s17  ;;  %8429 = vst [vmem:[#allocation112_spill] sm:$0xff] %v6052_v15  ;;  %8430 = vst [vmem:[#allocation113_spill] sm:$0xff] %v6054_v53  ;;  %v1770_v47 = vmul.f32 %v5540_v51, %v8435_v43  ;;  %v1769_v53 = vmul.f32 %v5540_v51, %v8436_v50 }
 0x32c   :  { %1899 = vrot.lane.b32.xlu1 %v1768_v23, %s3748_s17  ;;  %v8439_v23 = vld [vmem:[#allocation51_spill] sm:$0xff] }
 0x32e   :  { %v6062_v14 = vpop.permute.xlu1 %1530  ;;  %v6064_v36 = vpop.permute.xlu0 %1528 }
 0x32f   :  { %1897 = vrot.lane.b32.xlu0 %v1767_v46, %s3748_s17  ;;  %8433 = vst [vmem:[#allocation22_spill] sm:$0xff] %v6062_v14  ;;  %8434 = vst [vmem:[#allocation21_spill] sm:$0xff] %v6064_v36  ;;  %v1772_v46 = vmul.f32 %v5540_v51, %v8439_v23  ;;  %v8440_v14 = vld [vmem:[#allocation50_spill] sm:$0xff] }
 0x330   :  { %1903 = vrot.lane.b32.xlu1 %v1770_v47, %s3748_s17  ;;  %v1771_v36 = vmul.f32 %v5540_v51, %v8440_v14  ;;  %v8443_v47 = vld [vmem:[#allocation53_spill] sm:$0xff] }
 0x332   :  { %v6072_v15 = vpop.permute.xlu1 %1534  ;;  %v6074_v6 = vpop.permute.xlu0 %1532 }
 0x333   :  { %1901 = vrot.lane.b32.xlu0 %v1769_v53, %s3748_s17  ;;  %8437 = vst [vmem:[#allocation24_spill] sm:$0xff] %v6072_v15  ;;  %8438 = vst [vmem:[#allocation23_spill] sm:$0xff] %v6074_v6  ;;  %v1774_v53 = vmul.f32 %v5540_v51, %v8443_v47  ;;  %v8444_v15 = vld [vmem:[#allocation52_spill] sm:$0xff] }
 0x334   :  { %1907 = vrot.lane.b32.xlu1 %v1772_v46, %s3748_s17  ;;  %v1773_v6 = vmul.f32 %v5540_v51, %v8444_v15  ;;  %v8447_v46 = vld [vmem:[#allocation103_spill] sm:$0xff] }
 0x336   :  { %v6082_v2 = vpop.permute.xlu1 %1538  ;;  %v6084_v38 = vpop.permute.xlu0 %1536 }
 0x337   :  { %1905 = vrot.lane.b32.xlu0 %v1771_v36, %s3748_s17  ;;  %8441 = vst [vmem:[#allocation49_spill] sm:$0xff] %v6082_v2  ;;  %8442 = vst [vmem:[#allocation48_spill] sm:$0xff] %v6084_v38  ;;  %v1776_v36 = vmul.f32 %v5540_v51, %v8447_v46  ;;  %v8448_v2 = vld [vmem:[#allocation102_spill] sm:$0xff] }
 0x338   :  { %1911 = vrot.lane.b32.xlu1 %v1774_v53, %s3748_s17  ;;  %v1775_v38 = vmul.f32 %v5540_v51, %v8448_v2  ;;  %v8451_v53 = vld [vmem:[#allocation115_spill] sm:$0xff] }
 0x33a   :  { %v6092_v55 = vpop.permute.xlu1 %1542  ;;  %v6094_v9 = vpop.permute.xlu0 %1540 }
 0x33b   :  { %1909 = vrot.lane.b32.xlu0 %v1773_v6, %s3748_s17  ;;  %8445 = vst [vmem:[#allocation51_spill] sm:$0xff] %v6092_v55  ;;  %8446 = vst [vmem:[#allocation50_spill] sm:$0xff] %v6094_v9  ;;  %v1778_v6 = vmul.f32 %v5540_v51, %v8451_v53  ;;  %v8452_v55 = vld [vmem:[#allocation114_spill] sm:$0xff] }
 0x33c   :  { %1915 = vrot.lane.b32.xlu1 %v1776_v36, %s3748_s17  ;;  %v1777_v9 = vmul.f32 %v5540_v51, %v8452_v55  ;;  %v8455_v36 = vld [vmem:[#allocation119_spill] sm:$0xff] }
 0x33e   :  { %v6102_v18 = vpop.permute.xlu1 %1546  ;;  %v6104_v54 = vpop.permute.xlu0 %1544 }
 0x33f   :  { %1913 = vrot.lane.b32.xlu0 %v1775_v38, %s3748_s17  ;;  %8449 = vst [vmem:[#allocation53_spill] sm:$0xff] %v6102_v18  ;;  %8450 = vst [vmem:[#allocation52_spill] sm:$0xff] %v6104_v54  ;;  %v1780_v38 = vmul.f32 %v5540_v51, %v8455_v36  ;;  %v8456_v18 = vld [vmem:[#allocation118_spill] sm:$0xff] }
 0x340   :  { %1919 = vrot.lane.b32.xlu1 %v1778_v6, %s3748_s17  ;;  %v1779_v54 = vmul.f32 %v5540_v51, %v8456_v18  ;;  %v1781_v6 = vmul.f32 %v5540_v51, %v5530_v35 }
 0x342   :  { %v6112_v48 = vpop.permute.xlu1 %1550  ;;  %v6114_v12 = vpop.permute.xlu0 %1548 }
 0x343   :  { %1917 = vrot.lane.b32.xlu0 %v1777_v9, %s3748_s17  ;;  %8453 = vst [vmem:[#allocation103_spill] sm:$0xff] %v6112_v48  ;;  %8454 = vst [vmem:[#allocation102_spill] sm:$0xff] %v6114_v12  ;;  %v1782_v9 = vmul.f32 %v5540_v51, %v5534_v5 }
 0x344   :  { %1923 = vrot.lane.b32.xlu1 %v1780_v38, %s3748_s17  ;;  %v8461_v38 = vld [vmem:[#allocation26_spill] sm:$0xff] }
 0x346   :  { %v6122_v42 = vpop.permute.xlu1 %1554 }
 0x347   :  { %1921 = vrot.lane.b32.xlu0 %v1779_v54, %s3748_s17  ;;  %8457 = vst [vmem:[#allocation115_spill] sm:$0xff] %v6122_v42  ;;  %v1784_v54 = vmul.f32 %v5540_v51, %v8461_v38  ;;  %v8462_v42 = vld [vmem:[#allocation25_spill] sm:$0xff] }
 0x348   :  { %1927 = vrot.lane.b32.xlu1 %v1782_v9, %s3748_s17  ;;  %v8465_v9 = vld [vmem:[#allocation8_spill] sm:$0xff] }
 0x349   :  { %v6124_v21 = vpop.permute.xlu0 %1552 }
 0x34a   :  { %8458 = vst [vmem:[#allocation114_spill] sm:$0xff] %v6124_v21  ;;  %v6132_v12 = vpop.permute.xlu1 %1558  ;;  %v1783_v21 = vmul.f32 %v5540_v51, %v8462_v42 }
 0x34b   :  { %1925 = vrot.lane.b32.xlu0 %v1781_v6, %s3748_s17  ;;  %8459 = vst [vmem:[#allocation119_spill] sm:$0xff] %v6132_v12  ;;  %v1786_v6 = vmul.f32 %v5540_v51, %v8465_v9  ;;  %v8466_v12 = vld [vmem:[#allocation7_spill] sm:$0xff] }
 0x34c   :  { %1931 = vrot.lane.b32.xlu1 %v1784_v54, %s3748_s17  ;;  %v8469_v54 = vld [vmem:[#allocation10_spill] sm:$0xff] }
 0x34d   :  { %v6134_v48 = vpop.permute.xlu0 %1556 }
 0x34e   :  { %8460 = vst [vmem:[#allocation118_spill] sm:$0xff] %v6134_v48  ;;  %v6142_v24 = vpop.permute.xlu1 %1562  ;;  %v1785_v48 = vmul.f32 %v5540_v51, %v8466_v12 }
 0x34f   :  { %1929 = vrot.lane.b32.xlu0 %v1783_v21, %s3748_s17  ;;  %8463 = vst [vmem:[#allocation26_spill] sm:$0xff] %v6142_v24  ;;  %v1788_v21 = vmul.f32 %v5540_v51, %v8469_v54  ;;  %v8470_v24 = vld [vmem:[#allocation9_spill] sm:$0xff] }
 0x350   :  { %1935 = vrot.lane.b32.xlu1 %v1786_v6, %s3748_s17  ;;  %v8473_v6 = vld [vmem:[#allocation12_spill] sm:$0xff] }
 0x351   :  { %v6144_v44 = vpop.permute.xlu0 %1560 }
 0x352   :  { %8464 = vst [vmem:[#allocation25_spill] sm:$0xff] %v6144_v44  ;;  %v6152_v59 = vpop.permute.xlu1 %1566  ;;  %v1787_v44 = vmul.f32 %v5540_v51, %v8470_v24 }
 0x353   :  { %1933 = vrot.lane.b32.xlu0 %v1785_v48, %s3748_s17  ;;  %8467 = vst [vmem:[#allocation8_spill] sm:$0xff] %v6152_v59  ;;  %v1790_v48 = vmul.f32 %v5540_v51, %v8473_v6  ;;  %v8474_v59 = vld [vmem:[#allocation11_spill] sm:$0xff] }
 0x354   :  { %1939 = vrot.lane.b32.xlu1 %v1788_v21, %s3748_s17  ;;  %v1791_v21 = vmul.f32 %v5540_v51, %v5742_v45 }
 0x355   :  { %v6154_v10 = vpop.permute.xlu0 %1564 }
 0x356   :  { %8468 = vst [vmem:[#allocation7_spill] sm:$0xff] %v6154_v10  ;;  %v6162_v7 = vpop.permute.xlu1 %1570  ;;  %v1789_v10 = vmul.f32 %v5540_v51, %v8474_v59 }
 0x357   :  { %1937 = vrot.lane.b32.xlu0 %v1787_v44, %s3748_s17  ;;  %8471 = vst [vmem:[#allocation10_spill] sm:$0xff] %v6162_v7  ;;  %v1792_v44 = vmul.f32 %v5540_v51, %v5746_v25 }
 0x358   :  { %1943 = vrot.lane.b32.xlu1 %v1790_v48, %s3748_s17  ;;  %v1793_v48 = vmul.f32 %v5540_v51, %v5764_v37 }
 0x359   :  { %v6164_v16 = vpop.permute.xlu0 %1568 }
 0x35a   :  { %8472 = vst [vmem:[#allocation9_spill] sm:$0xff] %v6164_v16  ;;  %v6172_v22 = vpop.permute.xlu1 %1574 }
 0x35b   :  { %1941 = vrot.lane.b32.xlu0 %v1789_v10, %s3748_s17  ;;  %8475 = vst [vmem:[#allocation12_spill] sm:$0xff] %v6172_v22  ;;  %v1794_v10 = vmul.f32 %v5540_v51, %v5760_v11 }
 0x35c   :  { %1947 = vrot.lane.b32.xlu1 %v1792_v44, %s3748_s17  ;;  %v1796_v44 = vmul.f32 %v5540_v51, %v5772_v30 }
 0x35d   :  { %v6174_v0 = vpop.permute.xlu0 %1572 }
 0x35e   :  { %8476 = vst [vmem:[#allocation11_spill] sm:$0xff] %v6174_v0  ;;  %v6182_v16 = vpop.permute.xlu1 %1578 }
 0x35f   :  { %1945 = vrot.lane.b32.xlu0 %v1791_v21, %s3748_s17  ;;  %8477 = vst [vmem:[#allocation177_spill] sm:$0xff] %v6182_v16  ;;  %v1795_v21 = vmul.f32 %v5540_v51, %v5768_v61  ;;  %v8487_v51 = vld [vmem:[#allocation124_spill] sm:$0xff] }
 0x360   :  { %1951 = vrot.lane.b32.xlu1 %v1794_v10, %s3748_s17  ;;  %v8483_v10 = vld [vmem:[#allocation122_spill] sm:$0xff] }
 0x361   :  { %v6184_v7 = vpop.permute.xlu0 %1576 }
 0x362   :  { %8478 = vst [vmem:[#allocation178_spill] sm:$0xff] %v6184_v7  ;;  %v6192_v0 = vpop.permute.xlu1 %1582 }
 0x363   :  { %1949 = vrot.lane.b32.xlu0 %v1793_v48, %s3748_s17  ;;  %8479 = vst [vmem:[#allocation179_spill] sm:$0xff] %v6192_v0  ;;  %v8484_v48 = vld [vmem:[#allocation123_spill] sm:$0xff] }
 0x364   :  { %1955 = vrot.lane.b32.xlu1 %v1796_v44, %s3748_s17  ;;  %v8488_v44 = vld [vmem:[#allocation125_spill] sm:$0xff] }
 0x365   :  { %v6194_v22 = vpop.permute.xlu0 %1580 }
 0x366   :  { %8480 = vst [vmem:[#allocation180_spill] sm:$0xff] %v6194_v22  ;;  %v6202_v7 = vpop.permute.xlu1 %1586 }
 0x367   :  { %1953 = vrot.lane.b32.xlu0 %v1795_v21, %s3748_s17  ;;  %8481 = vst [vmem:[#allocation181_spill] sm:$0xff] %v6202_v7 }
 0x368   :  { %1959 = vrot.lane.b32.xlu1 %v8483_v10, %s3748_s17  ;;  %v8492_v10 = vld [vmem:[#allocation127_spill] sm:$0xff] }
 0x369   :  { %v6204_v16 = vpop.permute.xlu0 %1584 }
 0x36a   :  { %8482 = vst [vmem:[#allocation182_spill] sm:$0xff] %v6204_v16  ;;  %v6210_v22 = vpop.permute.xlu1 %1590  ;;  %v8491_v16 = vld [vmem:[#allocation126_spill] sm:$0xff] }
 0x36b   :  { %1957 = vrot.lane.b32.xlu0 %v8484_v48, %s3748_s17  ;;  %8485 = vst [vmem:[#allocation122_spill] sm:$0xff] %v6210_v22 }
 0x36c   :  { %1963 = vrot.lane.b32.xlu1 %v8487_v51, %s3748_s17  ;;  %v8496_v51 = vld [vmem:[#allocation129_spill] sm:$0xff] }
 0x36d   :  { %v6212_v0 = vpop.permute.xlu0 %1588 }
 0x36e   :  { %8486 = vst [vmem:[#allocation123_spill] sm:$0xff] %v6212_v0  ;;  %v6218_v21 = vpop.permute.xlu1 %1594  ;;  %v8495_v0 = vld [vmem:[#allocation128_spill] sm:$0xff] }
 0x36f   :  { %1961 = vrot.lane.b32.xlu0 %v8488_v44, %s3748_s17  ;;  %8489 = vst [vmem:[#allocation124_spill] sm:$0xff] %v6218_v21 }
 0x370   :  { %1967 = vrot.lane.b32.xlu1 %v8491_v16, %s3748_s17  ;;  %v8500_v16 = vld [vmem:[#allocation131_spill] sm:$0xff] }
 0x371   :  { %v6220_v7 = vpop.permute.xlu0 %1592 }
 0x372   :  { %8490 = vst [vmem:[#allocation125_spill] sm:$0xff] %v6220_v7  ;;  %v6226_v48 = vpop.permute.xlu1 %1598  ;;  %v8499_v7 = vld [vmem:[#allocation130_spill] sm:$0xff] }
 0x373   :  { %1965 = vrot.lane.b32.xlu0 %v8492_v10, %s3748_s17  ;;  %8493 = vst [vmem:[#allocation126_spill] sm:$0xff] %v6226_v48 }
 0x374   :  { %1971 = vrot.lane.b32.xlu1 %v8495_v0, %s3748_s17  ;;  %v8504_v0 = vld [vmem:[#allocation133_spill] sm:$0xff] }
 0x375   :  { %v6228_v22 = vpop.permute.xlu0 %1596 }
 0x376   :  { %8494 = vst [vmem:[#allocation127_spill] sm:$0xff] %v6228_v22  ;;  %v6234_v44 = vpop.permute.xlu1 %1602  ;;  %v8503_v22 = vld [vmem:[#allocation132_spill] sm:$0xff] }
 0x377   :  { %1969 = vrot.lane.b32.xlu0 %v8496_v51, %s3748_s17  ;;  %8497 = vst [vmem:[#allocation128_spill] sm:$0xff] %v6234_v44 }
 0x378   :  { %1975 = vrot.lane.b32.xlu1 %v8499_v7, %s3748_s17  ;;  %v8508_v7 = vld [vmem:[#allocation135_spill] sm:$0xff] }
 0x379   :  { %v6236_v21 = vpop.permute.xlu0 %1600 }
 0x37a   :  { %8498 = vst [vmem:[#allocation129_spill] sm:$0xff] %v6236_v21  ;;  %v6242_v10 = vpop.permute.xlu1 %1606  ;;  %v8507_v21 = vld [vmem:[#allocation134_spill] sm:$0xff] }
 0x37b   :  { %1973 = vrot.lane.b32.xlu0 %v8500_v16, %s3748_s17  ;;  %8501 = vst [vmem:[#allocation130_spill] sm:$0xff] %v6242_v10 }
 0x37c   :  { %1979 = vrot.lane.b32.xlu1 %v8503_v22, %s3748_s17  ;;  %v8512_v22 = vld [vmem:[#allocation139_spill] sm:$0xff] }
 0x37d   :  { %v6244_v48 = vpop.permute.xlu0 %1604 }
 0x37e   :  { %8502 = vst [vmem:[#allocation131_spill] sm:$0xff] %v6244_v48  ;;  %v6250_v51 = vpop.permute.xlu1 %1610  ;;  %v8511_v48 = vld [vmem:[#allocation138_spill] sm:$0xff] }
 0x37f   :  { %1977 = vrot.lane.b32.xlu0 %v8504_v0, %s3748_s17  ;;  %8505 = vst [vmem:[#allocation132_spill] sm:$0xff] %v6250_v51 }
 0x380   :  { %1983 = vrot.lane.b32.xlu1 %v8507_v21, %s3748_s17  ;;  %v8516_v21 = vld [vmem:[#allocation141_spill] sm:$0xff] }
 0x381   :  { %v6252_v44 = vpop.permute.xlu0 %1608 }
 0x382   :  { %8506 = vst [vmem:[#allocation133_spill] sm:$0xff] %v6252_v44  ;;  %v6258_v16 = vpop.permute.xlu1 %1614  ;;  %v8515_v44 = vld [vmem:[#allocation140_spill] sm:$0xff] }
 0x383   :  { %1981 = vrot.lane.b32.xlu0 %v8508_v7, %s3748_s17  ;;  %8509 = vst [vmem:[#allocation134_spill] sm:$0xff] %v6258_v16 }
 0x384   :  { %1987 = vrot.lane.b32.xlu1 %v8511_v48, %s3748_s17  ;;  %v8520_v48 = vld [vmem:[#allocation143_spill] sm:$0xff] }
 0x385   :  { %v6260_v10 = vpop.permute.xlu0 %1612 }
 0x386   :  { %8510 = vst [vmem:[#allocation135_spill] sm:$0xff] %v6260_v10  ;;  %v6266_v0 = vpop.permute.xlu1 %1618  ;;  %v8519_v10 = vld [vmem:[#allocation142_spill] sm:$0xff] }
 0x387   :  { %1985 = vrot.lane.b32.xlu0 %v8512_v22, %s3748_s17  ;;  %8513 = vst [vmem:[#allocation138_spill] sm:$0xff] %v6266_v0 }
 0x388   :  { %1991 = vrot.lane.b32.xlu1 %v8515_v44, %s3748_s17  ;;  %v8524_v44 = vld [vmem:[#allocation145_spill] sm:$0xff] }
 0x389   :  { %v6268_v51 = vpop.permute.xlu0 %1616 }
 0x38a   :  { %8514 = vst [vmem:[#allocation139_spill] sm:$0xff] %v6268_v51  ;;  %v6274_v7 = vpop.permute.xlu1 %1622  ;;  %v8523_v51 = vld [vmem:[#allocation144_spill] sm:$0xff] }
 0x38b   :  { %1989 = vrot.lane.b32.xlu0 %v8516_v21, %s3748_s17  ;;  %8517 = vst [vmem:[#allocation140_spill] sm:$0xff] %v6274_v7 }
 0x38c   :  { %1995 = vrot.lane.b32.xlu1 %v8519_v10, %s3748_s17  ;;  %v8528_v10 = vld [vmem:[#allocation147_spill] sm:$0xff] }
 0x38d   :  { %v6276_v16 = vpop.permute.xlu0 %1620 }
 0x38e   :  { %8518 = vst [vmem:[#allocation141_spill] sm:$0xff] %v6276_v16  ;;  %v6282_v22 = vpop.permute.xlu1 %1626  ;;  %v8527_v16 = vld [vmem:[#allocation146_spill] sm:$0xff] }
 0x38f   :  { %1993 = vrot.lane.b32.xlu0 %v8520_v48, %s3748_s17  ;;  %8521 = vst [vmem:[#allocation142_spill] sm:$0xff] %v6282_v22 }
 0x390   :  { %1999 = vrot.lane.b32.xlu1 %v8523_v51, %s3748_s17  ;;  %v8532_v51 = vld [vmem:[#allocation149_spill] sm:$0xff] }
 0x391   :  { %v6284_v0 = vpop.permute.xlu0 %1624 }
 0x392   :  { %8522 = vst [vmem:[#allocation143_spill] sm:$0xff] %v6284_v0  ;;  %v6290_v21 = vpop.permute.xlu1 %1630  ;;  %v8531_v0 = vld [vmem:[#allocation148_spill] sm:$0xff] }
 0x393   :  { %1997 = vrot.lane.b32.xlu0 %v8524_v44, %s3748_s17  ;;  %8525 = vst [vmem:[#allocation144_spill] sm:$0xff] %v6290_v21 }
 0x394   :  { %2003 = vrot.lane.b32.xlu1 %v8527_v16, %s3748_s17  ;;  %v8536_v16 = vld [vmem:[#allocation151_spill] sm:$0xff] }
 0x395   :  { %v6292_v7 = vpop.permute.xlu0 %1628 }
 0x396   :  { %8526 = vst [vmem:[#allocation145_spill] sm:$0xff] %v6292_v7  ;;  %v6298_v48 = vpop.permute.xlu1 %1634  ;;  %v8535_v7 = vld [vmem:[#allocation150_spill] sm:$0xff] }
 0x397   :  { %2001 = vrot.lane.b32.xlu0 %v8528_v10, %s3748_s17  ;;  %8529 = vst [vmem:[#allocation146_spill] sm:$0xff] %v6298_v48 }
 0x398   :  { %2007 = vrot.lane.b32.xlu1 %v8531_v0, %s3748_s17  ;;  %v8539_v0 = vld [vmem:[#allocation153_spill] sm:$0xff] }
 0x399   :  { %v6300_v22 = vpop.permute.xlu0 %1632 }
 0x39a   :  { %8530 = vst [vmem:[#allocation147_spill] sm:$0xff] %v6300_v22  ;;  %v6306_v44 = vpop.permute.xlu1 %1895  ;;  %v8538_v22 = vld [vmem:[#allocation152_spill] sm:$0xff] }
 0x39b   :  { %2005 = vrot.lane.b32.xlu0 %v8532_v51, %s3748_s17  ;;  %8533 = vst [vmem:[#allocation148_spill] sm:$0xff] %v6306_v44 }
 0x39c   :  { %2011 = vrot.lane.b32.xlu1 %v8535_v7, %s3748_s17  ;;  %v8543_v7 = vld [vmem:[#allocation155_spill] sm:$0xff] }
 0x39d   :  { %v6308_v21 = vpop.permute.xlu0 %1893 }
 0x39e   :  { %8534 = vst [vmem:[#allocation149_spill] sm:$0xff] %v6308_v21  ;;  %v6314_v10 = vpop.permute.xlu1 %1899  ;;  %v8542_v21 = vld [vmem:[#allocation154_spill] sm:$0xff] }
 0x39f   :  { %2009 = vrot.lane.b32.xlu0 %v8536_v16, %s3748_s17  ;;  %8537 = vst [vmem:[#allocation150_spill] sm:$0xff] %v6314_v10 }
 0x3a0   :  { %2015 = vrot.lane.b32.xlu1 %v8538_v22, %s3748_s17  ;;  %v2151_v22 = vmul.f32 %v5756_v57, %v8427_v49 }
 0x3a1   :  { %v6316_v48 = vpop.permute.xlu0 %1897 }
 0x3a2   :  { %v6322_v51 = vpop.permute.xlu1 %1903 }
 0x3a3   :  { %2013 = vrot.lane.b32.xlu0 %v8539_v0, %s3748_s17  ;;  %8540 = vst [vmem:[#allocation151_spill] sm:$0xff] %v6322_v51  ;;  %v2150_v0 = vmul.f32 %v5756_v57, %v8428_v32 }
 0x3a4   :  { %2019 = vrot.lane.b32.xlu1 %v8542_v21, %s3748_s17 }
 0x3a5   :  { %v6324_v44 = vpop.permute.xlu0 %1901 }
 0x3a6   :  { %8541 = vst [vmem:[#allocation152_spill] sm:$0xff] %v6324_v44  ;;  %v6330_v16 = vpop.permute.xlu1 %1907 }
 0x3a7   :  { %2017 = vrot.lane.b32.xlu0 %v8543_v7, %s3748_s17  ;;  %8544 = vst [vmem:[#allocation153_spill] sm:$0xff] %v6330_v16  ;;  %v2153_v7 = vmul.f32 %v5756_v57, %v8431_v56 }
 0x3a8   :  { %2280 = vrot.lane.b32.xlu1 %v2151_v22, %s3749_s18  ;;  %v2155_v22 = vmul.f32 %v5756_v57, %v8435_v43 }
 0x3a9   :  { %v6332_v10 = vpop.permute.xlu0 %1905 }
 0x3aa   :  { %8545 = vst [vmem:[#allocation154_spill] sm:$0xff] %v6332_v10  ;;  %v6340_v44 = vpop.permute.xlu1 %1911  ;;  %v2152_v10 = vmul.f32 %v5756_v57, %v8432_v62 }
 0x3ab   :  { %2278 = vrot.lane.b32.xlu0 %v2150_v0, %s3749_s18  ;;  %8546 = vst [vmem:[#allocation155_spill] sm:$0xff] %v6340_v44  ;;  %v2154_v0 = vmul.f32 %v5756_v57, %v8436_v50 }
 0x3ac   :  { %2284 = vrot.lane.b32.xlu1 %v2153_v7, %s3749_s18  ;;  %v2156_v7 = vmul.f32 %v5756_v57, %v8440_v14 }
 0x3ad   :  { %v6342_v21 = vpop.permute.xlu0 %1909 }
 0x3ae   :  { %8547 = vst [vmem:[#allocation183_spill] sm:$0xff] %v6342_v21  ;;  %v6350_v16 = vpop.permute.xlu1 %1915 }
 0x3af   :  { %2282 = vrot.lane.b32.xlu0 %v2152_v10, %s3749_s18  ;;  %8548 = vst [vmem:[#allocation184_spill] sm:$0xff] %v6350_v16  ;;  %v2157_v10 = vmul.f32 %v5756_v57, %v8439_v23 }
 0x3b0   :  { %2288 = vrot.lane.b32.xlu1 %v2155_v22, %s3749_s18  ;;  %v2159_v22 = vmul.f32 %v5756_v57, %v8443_v47 }
 0x3b1   :  { %v6352_v51 = vpop.permute.xlu0 %1913 }
 0x3b2   :  { %8549 = vst [vmem:[#allocation185_spill] sm:$0xff] %v6352_v51  ;;  %v6360_v21 = vpop.permute.xlu1 %1919 }
 0x3b3   :  { %2286 = vrot.lane.b32.xlu0 %v2154_v0, %s3749_s18  ;;  %8550 = vst [vmem:[#allocation186_spill] sm:$0xff] %v6360_v21  ;;  %v2158_v0 = vmul.f32 %v5756_v57, %v8444_v15 }
 0x3b4   :  { %2292 = vrot.lane.b32.xlu1 %v2157_v10, %s3749_s18  ;;  %v2161_v10 = vmul.f32 %v5756_v57, %v8447_v46 }
 0x3b5   :  { %v6362_v44 = vpop.permute.xlu0 %1917 }
 0x3b6   :  { %8551 = vst [vmem:[#allocation187_spill] sm:$0xff] %v6362_v44  ;;  %v6370_v51 = vpop.permute.xlu1 %1923 }
 0x3b7   :  { %2290 = vrot.lane.b32.xlu0 %v2156_v7, %s3749_s18  ;;  %8552 = vst [vmem:[#allocation188_spill] sm:$0xff] %v6370_v51  ;;  %v2160_v7 = vmul.f32 %v5756_v57, %v8448_v2 }
 0x3b8   :  { %2296 = vrot.lane.b32.xlu1 %v2159_v22, %s3749_s18  ;;  %v2163_v22 = vmul.f32 %v5756_v57, %v8451_v53 }
 0x3b9   :  { %v6372_v16 = vpop.permute.xlu0 %1921 }
 0x3ba   :  { %8553 = vst [vmem:[#allocation189_spill] sm:$0xff] %v6372_v16  ;;  %v6380_v44 = vpop.permute.xlu1 %1927 }
 0x3bb   :  { %2294 = vrot.lane.b32.xlu0 %v2158_v0, %s3749_s18  ;;  %8554 = vst [vmem:[#allocation190_spill] sm:$0xff] %v6380_v44  ;;  %v2162_v0 = vmul.f32 %v5756_v57, %v8452_v55 }
 0x3bc   :  { %2300 = vrot.lane.b32.xlu1 %v2161_v10, %s3749_s18  ;;  %v2165_v10 = vmul.f32 %v5756_v57, %v8455_v36 }
 0x3bd   :  { %v6382_v21 = vpop.permute.xlu0 %1925 }
 0x3be   :  { %8555 = vst [vmem:[#allocation191_spill] sm:$0xff] %v6382_v21  ;;  %v6390_v16 = vpop.permute.xlu1 %1931 }
 0x3bf   :  { %2298 = vrot.lane.b32.xlu0 %v2160_v7, %s3749_s18  ;;  %8556 = vst [vmem:[#allocation192_spill] sm:$0xff] %v6390_v16  ;;  %v2164_v7 = vmul.f32 %v5756_v57, %v8456_v18 }
 0x3c0   :  { %2304 = vrot.lane.b32.xlu1 %v2163_v22, %s3749_s18  ;;  %v2167_v22 = vmul.f32 %v5756_v57, %v5534_v5 }
 0x3c1   :  { %v6392_v51 = vpop.permute.xlu0 %1929 }
 0x3c2   :  { %8557 = vst [vmem:[#allocation193_spill] sm:$0xff] %v6392_v51  ;;  %v6400_v21 = vpop.permute.xlu1 %1935 }
 0x3c3   :  { %2302 = vrot.lane.b32.xlu0 %v2162_v0, %s3749_s18  ;;  %8558 = vst [vmem:[#allocation194_spill] sm:$0xff] %v6400_v21  ;;  %v2166_v0 = vmul.f32 %v5756_v57, %v5530_v35 }
 0x3c4   :  { %2308 = vrot.lane.b32.xlu1 %v2165_v10, %s3749_s18  ;;  %v2169_v10 = vmul.f32 %v5756_v57, %v8461_v38 }
 0x3c5   :  { %v6402_v44 = vpop.permute.xlu0 %1933 }
 0x3c6   :  { %8559 = vst [vmem:[#allocation195_spill] sm:$0xff] %v6402_v44  ;;  %v6410_v51 = vpop.permute.xlu1 %1939 }
 0x3c7   :  { %2306 = vrot.lane.b32.xlu0 %v2164_v7, %s3749_s18  ;;  %8560 = vst [vmem:[#allocation196_spill] sm:$0xff] %v6410_v51  ;;  %v2168_v7 = vmul.f32 %v5756_v57, %v8462_v42 }
 0x3c8   :  { %2312 = vrot.lane.b32.xlu1 %v2167_v22, %s3749_s18  ;;  %v2171_v22 = vmul.f32 %v5756_v57, %v8465_v9 }
 0x3c9   :  { %v6412_v16 = vpop.permute.xlu0 %1937 }
 0x3ca   :  { %8561 = vst [vmem:[#allocation197_spill] sm:$0xff] %v6412_v16  ;;  %v6420_v44 = vpop.permute.xlu1 %1943 }
 0x3cb   :  { %2310 = vrot.lane.b32.xlu0 %v2166_v0, %s3749_s18  ;;  %8562 = vst [vmem:[#allocation198_spill] sm:$0xff] %v6420_v44  ;;  %v2170_v0 = vmul.f32 %v5756_v57, %v8466_v12 }
 0x3cc   :  { %2316 = vrot.lane.b32.xlu1 %v2169_v10, %s3749_s18  ;;  %v2173_v10 = vmul.f32 %v5756_v57, %v8469_v54 }
 0x3cd   :  { %v6422_v21 = vpop.permute.xlu0 %1941 }
 0x3ce   :  { %8563 = vst [vmem:[#allocation199_spill] sm:$0xff] %v6422_v21  ;;  %v6430_v16 = vpop.permute.xlu1 %1947 }
 0x3cf   :  { %2314 = vrot.lane.b32.xlu0 %v2168_v7, %s3749_s18  ;;  %8564 = vst [vmem:[#allocation200_spill] sm:$0xff] %v6430_v16  ;;  %v2172_v7 = vmul.f32 %v5756_v57, %v8470_v24 }
 0x3d0   :  { %2320 = vrot.lane.b32.xlu1 %v2171_v22, %s3749_s18  ;;  %v2175_v22 = vmul.f32 %v5756_v57, %v8473_v6 }
 0x3d1   :  { %v6432_v51 = vpop.permute.xlu0 %1945 }
 0x3d2   :  { %8565 = vst [vmem:[#allocation201_spill] sm:$0xff] %v6432_v51  ;;  %v6440_v21 = vpop.permute.xlu1 %1951 }
 0x3d3   :  { %2318 = vrot.lane.b32.xlu0 %v2170_v0, %s3749_s18  ;;  %8566 = vst [vmem:[#allocation202_spill] sm:$0xff] %v6440_v21  ;;  %v2174_v0 = vmul.f32 %v5756_v57, %v8474_v59 }
 0x3d4   :  { %2324 = vrot.lane.b32.xlu1 %v2173_v10, %s3749_s18  ;;  %v2177_v10 = vmul.f32 %v5756_v57, %v5746_v25 }
 0x3d5   :  { %v6442_v44 = vpop.permute.xlu0 %1949 }
 0x3d6   :  { %8567 = vst [vmem:[#allocation203_spill] sm:$0xff] %v6442_v44  ;;  %v6450_v51 = vpop.permute.xlu1 %1955 }
 0x3d7   :  { %2322 = vrot.lane.b32.xlu0 %v2172_v7, %s3749_s18  ;;  %8568 = vst [vmem:[#allocation204_spill] sm:$0xff] %v6450_v51  ;;  %v2176_v7 = vmul.f32 %v5756_v57, %v5742_v45 }
 0x3d8   :  { %2328 = vrot.lane.b32.xlu1 %v2175_v22, %s3749_s18  ;;  %v2179_v22 = vmul.f32 %v5756_v57, %v5760_v11 }
 0x3d9   :  { %v6452_v16 = vpop.permute.xlu0 %1953 }
 0x3da   :  { %8569 = vst [vmem:[#allocation205_spill] sm:$0xff] %v6452_v16  ;;  %v6460_v44 = vpop.permute.xlu1 %1959 }
 0x3db   :  { %2326 = vrot.lane.b32.xlu0 %v2174_v0, %s3749_s18  ;;  %8570 = vst [vmem:[#allocation206_spill] sm:$0xff] %v6460_v44  ;;  %v2178_v0 = vmul.f32 %v5756_v57, %v5764_v37 }
 0x3dc   :  { %2332 = vrot.lane.b32.xlu1 %v2177_v10, %s3749_s18  ;;  %v2181_v10 = vmul.f32 %v5756_v57, %v5772_v30 }
 0x3dd   :  { %v6462_v21 = vpop.permute.xlu0 %1957 }
 0x3de   :  { %8571 = vst [vmem:[#allocation207_spill] sm:$0xff] %v6462_v21  ;;  %v6470_v16 = vpop.permute.xlu1 %1963 }
 0x3df   :  { %2330 = vrot.lane.b32.xlu0 %v2176_v7, %s3749_s18  ;;  %8572 = vst [vmem:[#allocation208_spill] sm:$0xff] %v6470_v16  ;;  %v2180_v7 = vmul.f32 %v5756_v57, %v5768_v61 }
 0x3e0   :  { %2336 = vrot.lane.b32.xlu1 %v2179_v22, %s3749_s18 }
 0x3e1   :  { %v6472_v51 = vpop.permute.xlu0 %1961 }
 0x3e2   :  { %8573 = vst [vmem:[#allocation209_spill] sm:$0xff] %v6472_v51  ;;  %v6480_v21 = vpop.permute.xlu1 %1967 }
 0x3e3   :  { %2334 = vrot.lane.b32.xlu0 %v2178_v0, %s3749_s18 }
 0x3e4   :  { %2340 = vrot.lane.b32.xlu1 %v2181_v10, %s3749_s18 }
 0x3e5   :  { %v6482_v44 = vpop.permute.xlu0 %1965 }
 0x3e6   :  { %v6490_v51 = vpop.permute.xlu1 %1971 }
 0x3e7   :  { %2338 = vrot.lane.b32.xlu0 %v2180_v7, %s3749_s18  ;;  %v8578_v7 = vld [vmem:[#allocation20_spill] sm:$0xff] }
 0x3e8   :  { %2344 = vrot.lane.b32.xlu1 %v5782_v63, %s3749_s18 }
 0x3e9   :  { %v6492_v16 = vpop.permute.xlu0 %1969 }
 0x3ea   :  { %v6498_v22 = vpop.permute.xlu1 %1975 }
 0x3eb   :  { %2342 = vrot.lane.b32.xlu0 %v5786_v19, %s3749_s18  ;;  %8574 = vst [vmem:[#allocation210_spill] sm:$0xff] %v6498_v22  ;;  %v8665_v22 = vld [vmem:[#allocation149_spill] sm:$0xff] }
 0x3ec   :  { %2348 = vrot.lane.b32.xlu1 %v5790_v60, %s3749_s18 }
 0x3ed   :  { %v6500_v0 = vpop.permute.xlu0 %1973 }
 0x3ee   :  { %8575 = vst [vmem:[#allocation211_spill] sm:$0xff] %v6500_v0  ;;  %v6506_v57 = vpop.permute.xlu1 %1979  ;;  %v8664_v0 = vld [vmem:[#allocation148_spill] sm:$0xff] }
 0x3ef   :  { %2346 = vrot.lane.b32.xlu0 %v5794_v41, %s3749_s18  ;;  %8576 = vst [vmem:[#allocation212_spill] sm:$0xff] %v6506_v57 }
 0x3f0   :  { %2352 = vrot.lane.b32.xlu1 %v8578_v7, %s3749_s18 }
 0x3f1   :  { %v6508_v10 = vpop.permute.xlu0 %1977 }
 0x3f2   :  { %8577 = vst [vmem:[#allocation213_spill] sm:$0xff] %v6508_v10  ;;  %v6514_v63 = vpop.permute.xlu1 %1983 }
 0x3f3   :  { %2350 = vrot.lane.b32.xlu0 %v5802_v29, %s3749_s18  ;;  %8579 = vst [vmem:[#allocation20_spill] sm:$0xff] %v6514_v63 }
 0x3f4   :  { %2356 = vrot.lane.b32.xlu1 %v5808_v20, %s3749_s18 }
 0x3f5   :  { %v6516_v19 = vpop.permute.xlu0 %1981 }
 0x3f6   :  { %8580 = vst [vmem:[#allocation214_spill] sm:$0xff] %v6516_v19  ;;  %v6522_v60 = vpop.permute.xlu1 %1987  ;;  %v8622_v19 = vld [vmem:[#allocation60_spill] sm:$0xff] }
 0x3f7   :  { %2354 = vrot.lane.b32.xlu0 %v5812_v33, %s3749_s18  ;;  %8581 = vst [vmem:[#allocation215_spill] sm:$0xff] %v6522_v60 }
 0x3f8   :  { %2360 = vrot.lane.b32.xlu1 %v5816_v27, %s3749_s18 }
 0x3f9   :  { %v6524_v41 = vpop.permute.xlu0 %1985 }
 0x3fa   :  { %8582 = vst [vmem:[#allocation216_spill] sm:$0xff] %v6524_v41  ;;  %v6530_v29 = vpop.permute.xlu1 %1991  ;;  %v8618_v41 = vld [vmem:[#allocation58_spill] sm:$0xff] }
 0x3fb   :  { %2358 = vrot.lane.b32.xlu0 %v5828_v39, %s3749_s18  ;;  %8583 = vst [vmem:[#allocation217_spill] sm:$0xff] %v6530_v29 }
 0x3fc   :  { %2364 = vrot.lane.b32.xlu1 %v5832_v4, %s3749_s18 }
 0x3fd   :  { %v6532_v7 = vpop.permute.xlu0 %1989 }
 0x3fe   :  { %8584 = vst [vmem:[#allocation218_spill] sm:$0xff] %v6532_v7  ;;  %v6538_v20 = vpop.permute.xlu1 %1995  ;;  %v8614_v7 = vld [vmem:[#allocation56_spill] sm:$0xff] }
 0x3ff   :  { %2362 = vrot.lane.b32.xlu0 %v5836_v31, %s3749_s18  ;;  %8585 = vst [vmem:[#allocation219_spill] sm:$0xff] %v6538_v20 }
 0x400   :  { %2368 = vrot.lane.b32.xlu1 %v5840_v1, %s3749_s18 }
 0x401   :  { %v6540_v33 = vpop.permute.xlu0 %1993 }
 0x402   :  { %8586 = vst [vmem:[#allocation220_spill] sm:$0xff] %v6540_v33  ;;  %v6546_v27 = vpop.permute.xlu1 %1999  ;;  %v8610_v33 = vld [vmem:[#allocation54_spill] sm:$0xff] }
 0x403   :  { %2366 = vrot.lane.b32.xlu0 %v5844_v17, %s3749_s18  ;;  %8587 = vst [vmem:[#allocation221_spill] sm:$0xff] %v6546_v27 }
 0x404   :  { %2372 = vrot.lane.b32.xlu1 %v5848_v8, %s3749_s18 }
 0x405   :  { %v6548_v39 = vpop.permute.xlu0 %1997 }
 0x406   :  { %8588 = vst [vmem:[#allocation222_spill] sm:$0xff] %v6548_v39  ;;  %v6554_v31 = vpop.permute.xlu1 %2003 }
 0x407   :  { %2370 = vrot.lane.b32.xlu0 %v5852_v28, %s3749_s18  ;;  %8589 = vst [vmem:[#allocation223_spill] sm:$0xff] %v6554_v31  ;;  %v2535_v31 = vmax.f32 %v8427_v49, 0.0 }
 0x408   :  { %2376 = vrot.lane.b32.xlu1 %v5856_v13, %s3749_s18 }
 0x409   :  { %v6556_v4 = vpop.permute.xlu0 %2001 }
 0x40a   :  { %8590 = vst [vmem:[#allocation224_spill] sm:$0xff] %v6556_v4  ;;  %v6562_v1 = vpop.permute.xlu1 %2007 }
 0x40b   :  { %2374 = vrot.lane.b32.xlu0 %v5860_v26, %s3749_s18  ;;  %8591 = vst [vmem:[#allocation225_spill] sm:$0xff] %v6562_v1  ;;  %v8606_v1 = vld [vmem:[#allocation166_spill] sm:$0xff] }
 0x40c   :  { %2380 = vrot.lane.b32.xlu1 %v5864_v34, %s3749_s18  ;;  %v8597_v34 = vld [vmem:[#allocation28_spill] sm:$0xff] }
 0x40d   :  { %v6564_v17 = vpop.permute.xlu0 %2005 }
 0x40e   :  { %8592 = vst [vmem:[#allocation226_spill] sm:$0xff] %v6564_v17  ;;  %v6570_v28 = vpop.permute.xlu1 %2011 }
 0x40f   :  { %2378 = vrot.lane.b32.xlu0 %v5870_v3, %s3749_s18  ;;  %8593 = vst [vmem:[#allocation227_spill] sm:$0xff] %v6570_v28 }
 0x410   :  { %2384 = vrot.lane.b32.xlu1 %v5874_v40, %s3749_s18  ;;  %v8601_v40 = vld [vmem:[#allocation159_spill] sm:$0xff] }
 0x411   :  { %v6572_v8 = vpop.permute.xlu0 %2009 }
 0x412   :  { %8594 = vst [vmem:[#allocation228_spill] sm:$0xff] %v6572_v8  ;;  %v6578_v13 = vpop.permute.xlu1 %2015  ;;  %v8600_v8 = vld [vmem:[#allocation158_spill] sm:$0xff] }
 0x413   :  { %2382 = vrot.lane.b32.xlu0 %v5878_v58, %s3749_s18  ;;  %8595 = vst [vmem:[#allocation229_spill] sm:$0xff] %v6578_v13 }
 0x414   :  { %2388 = vrot.lane.b32.xlu1 %v5886_v52, %s3749_s18  ;;  %v8603_v52 = vld [vmem:[#allocation161_spill] sm:$0xff] }
 0x415   :  { %v6580_v26 = vpop.permute.xlu0 %2013 }
 0x416   :  { %8596 = vst [vmem:[#allocation230_spill] sm:$0xff] %v6580_v26  ;;  %v6586_v3 = vpop.permute.xlu1 %2019  ;;  %v8602_v26 = vld [vmem:[#allocation160_spill] sm:$0xff] }
 0x417   :  { %2386 = vrot.lane.b32.xlu0 %v8597_v34, %s3749_s18  ;;  %8598 = vst [vmem:[#allocation28_spill] sm:$0xff] %v6586_v3 }
 0x418   :  { %2392 = vrot.lane.b32.xlu1 %v8600_v8, %s3749_s18  ;;  %v8605_v8 = vld [vmem:[#allocation165_spill] sm:$0xff] }
 0x419   :  { %v6588_v28 = vpop.permute.xlu0 %2017 }
 0x41a   :  { %8599 = vst [vmem:[#allocation231_spill] sm:$0xff] %v6588_v28  ;;  %v6594_v58 = vpop.permute.xlu1 %2280  ;;  %v8604_v28 = vld [vmem:[#allocation164_spill] sm:$0xff] }
 0x41b   :  { %2390 = vrot.lane.b32.xlu0 %v8601_v40, %s3749_s18 }
 0x41c   :  { %2396 = vrot.lane.b32.xlu1 %v8602_v26, %s3749_s18  ;;  %v8607_v26 = vld [vmem:[#allocation167_spill] sm:$0xff] }
 0x41d   :  { %v6596_v13 = vpop.permute.xlu0 %2278 }
 0x41e   :  { %v6602_v34 = vpop.permute.xlu1 %2284 }
 0x41f   :  { %2394 = vrot.lane.b32.xlu0 %v8603_v52, %s3749_s18 }
 0x420   :  { %2400 = vrot.lane.b32.xlu1 %v8604_v28, %s3749_s18  ;;  %v2534_v28 = vmax.f32 %v8428_v32, 0.0  ;;  %v2539_v32 = vmax.f32 %v8435_v43, 0.0 }
 0x421   :  { %v6604_v3 = vpop.permute.xlu0 %2282 }
 0x422   :  { %v6610_v40 = vpop.permute.xlu1 %2288 }
 0x423   :  { %2398 = vrot.lane.b32.xlu0 %v8605_v8, %s3749_s18 }
 0x424   :  { %2404 = vrot.lane.b32.xlu1 %v8606_v1, %s3749_s18  ;;  %v2537_v1 = vmax.f32 %v8431_v56, 0.0 }
 0x425   :  { %v6612_v17 = vpop.permute.xlu0 %2286 }
 0x426   :  { %v6618_v52 = vpop.permute.xlu1 %2292 }
 0x427   :  { %2402 = vrot.lane.b32.xlu0 %v8607_v26, %s3749_s18  ;;  %v2536_v26 = vmax.f32 %v8432_v62, 0.0  ;;  %v2541_v62 = vmax.f32 %v8439_v23, 0.0 }
 0x428   :  { %3176 = vrot.lane.b32.xlu1 %v2535_v31, %s3746_s12  ;;  %v2538_v31 = vmax.f32 %v8436_v50, 0.0  ;;  %v2543_v50 = vmax.f32 %v8443_v47, 0.0 }
 0x429   :  { %v6620_v4 = vpop.permute.xlu0 %2290 }
 0x42a   :  { %v6626_v8 = vpop.permute.xlu1 %2296 }
 0x42b   :  { %3174 = vrot.lane.b32.xlu0 %v2534_v28, %s3746_s12 }
 0x42c   :  { %3180 = vrot.lane.b32.xlu1 %v2537_v1, %s3746_s12  ;;  %v2540_v1 = vmax.f32 %v8440_v14, 0.0  ;;  %v2545_v14 = vmax.f32 %v8447_v46, 0.0 }
 0x42d   :  { %v6628_v39 = vpop.permute.xlu0 %2294 }
 0x42e   :  { %v6634_v27 = vpop.permute.xlu1 %2300 }
 0x42f   :  { %3178 = vrot.lane.b32.xlu0 %v2536_v26, %s3746_s12 }
 0x430   :  { %3184 = vrot.lane.b32.xlu1 %v2539_v32, %s3746_s12  ;;  %v2542_v32 = vmax.f32 %v8444_v15, 0.0  ;;  %v2547_v15 = vmax.f32 %v8451_v53, 0.0 }
 0x431   :  { %v6636_v49 = vpop.permute.xlu0 %2298 }
 0x432   :  { %v6642_v28 = vpop.permute.xlu1 %2304 }
 0x433   :  { %3182 = vrot.lane.b32.xlu0 %v2538_v31, %s3746_s12 }
 0x434   :  { %3188 = vrot.lane.b32.xlu1 %v2541_v62, %s3746_s12  ;;  %v2544_v62 = vmax.f32 %v8448_v2, 0.0  ;;  %v2549_v2 = vmax.f32 %v8455_v36, 0.0 }
 0x435   :  { %v6644_v56 = vpop.permute.xlu0 %2302 }
 0x436   :  { %v6650_v26 = vpop.permute.xlu1 %2308 }
 0x437   :  { %3186 = vrot.lane.b32.xlu0 %v2540_v1, %s3746_s12 }
 0x438   :  { %3192 = vrot.lane.b32.xlu1 %v2543_v50, %s3746_s12  ;;  %v2546_v50 = vmax.f32 %v8452_v55, 0.0  ;;  %v2551_v55 = vmax.f32 %v5534_v5, 0.0 }
 0x439   :  { %v6652_v43 = vpop.permute.xlu0 %2306 }
 0x43a   :  { %v6658_v31 = vpop.permute.xlu1 %2312 }
 0x43b   :  { %3190 = vrot.lane.b32.xlu0 %v2542_v32, %s3746_s12 }
 0x43c   :  { %3196 = vrot.lane.b32.xlu1 %v2545_v14, %s3746_s12  ;;  %v2548_v14 = vmax.f32 %v8456_v18, 0.0  ;;  %v2553_v18 = vmax.f32 %v8461_v38, 0.0 }
 0x43d   :  { %v6660_v23 = vpop.permute.xlu0 %2310 }
 0x43e   :  { %v6666_v1 = vpop.permute.xlu1 %2316 }
 0x43f   :  { %3194 = vrot.lane.b32.xlu0 %v2544_v62, %s3746_s12 }
 0x440   :  { %3200 = vrot.lane.b32.xlu1 %v2547_v15, %s3746_s12  ;;  %v2550_v15 = vmax.f32 %v5530_v35, 0.0  ;;  %v2555_v35 = vmax.f32 %v8465_v9, 0.0 }
 0x441   :  { %v6668_v47 = vpop.permute.xlu0 %2314 }
 0x442   :  { %v6674_v32 = vpop.permute.xlu1 %2320 }
 0x443   :  { %3198 = vrot.lane.b32.xlu0 %v2546_v50, %s3746_s12 }
 0x444   :  { %3204 = vrot.lane.b32.xlu1 %v2549_v2, %s3746_s12  ;;  %v2552_v2 = vmax.f32 %v8462_v42, 0.0  ;;  %v2557_v42 = vmax.f32 %v8469_v54, 0.0 }
 0x445   :  { %v6676_v46 = vpop.permute.xlu0 %2318 }
 0x446   :  { %v6682_v62 = vpop.permute.xlu1 %2324 }
 0x447   :  { %3202 = vrot.lane.b32.xlu0 %v2548_v14, %s3746_s12 }
 0x448   :  { %3208 = vrot.lane.b32.xlu1 %v2551_v55, %s3746_s12  ;;  %v2554_v55 = vmax.f32 %v8466_v12, 0.0  ;;  %v2559_v12 = vmax.f32 %v8473_v6, 0.0 }
 0x449   :  { %v6684_v53 = vpop.permute.xlu0 %2322 }
 0x44a   :  { %v6690_v50 = vpop.permute.xlu1 %2328 }
 0x44b   :  { %3206 = vrot.lane.b32.xlu0 %v2550_v15, %s3746_s12 }
 0x44c   :  { %3212 = vrot.lane.b32.xlu1 %v2553_v18, %s3746_s12  ;;  %v2556_v18 = vmax.f32 %v8470_v24, 0.0  ;;  %v2561_v24 = vmax.f32 %v5746_v25, 0.0 }
 0x44d   :  { %v6692_v36 = vpop.permute.xlu0 %2326 }
 0x44e   :  { %v6698_v14 = vpop.permute.xlu1 %2332 }
 0x44f   :  { %3210 = vrot.lane.b32.xlu0 %v2552_v2, %s3746_s12 }
 0x450   :  { %3216 = vrot.lane.b32.xlu1 %v2555_v35, %s3746_s12  ;;  %v2558_v35 = vmax.f32 %v8474_v59, 0.0  ;;  %v2563_v59 = vmax.f32 %v5760_v11, 0.0 }
 0x451   :  { %v6700_v5 = vpop.permute.xlu0 %2330 }
 0x452   :  { %v6706_v15 = vpop.permute.xlu1 %2336 }
 0x453   :  { %3214 = vrot.lane.b32.xlu0 %v2554_v55, %s3746_s12 }
 0x454   :  { %3220 = vrot.lane.b32.xlu1 %v2557_v42, %s3746_s12  ;;  %v2560_v42 = vmax.f32 %v5742_v45, 0.0  ;;  %v2565_v45 = vmax.f32 %v5772_v30, 0.0 }
 0x455   :  { %v6708_v38 = vpop.permute.xlu0 %2334 }
 0x456   :  { %v6714_v2 = vpop.permute.xlu1 %2340 }
 0x457   :  { %3218 = vrot.lane.b32.xlu0 %v2556_v18, %s3746_s12 }
 0x458   :  { %3224 = vrot.lane.b32.xlu1 %v2559_v12, %s3746_s12  ;;  %v2562_v12 = vmax.f32 %v5764_v37, 0.0  ;;  %v8609_v37 = vld [vmem:[#allocation55_spill] sm:$0xff] }
 0x459   :  { %v6716_v9 = vpop.permute.xlu0 %2338 }
 0x45a   :  { %v6722_v55 = vpop.permute.xlu1 %2344 }
 0x45b   :  { %3222 = vrot.lane.b32.xlu0 %v2558_v35, %s3746_s12 }
 0x45c   :  { %3228 = vrot.lane.b32.xlu1 %v2561_v24, %s3746_s12  ;;  %v2564_v24 = vmax.f32 %v5768_v61, 0.0  ;;  %v8613_v61 = vld [vmem:[#allocation57_spill] sm:$0xff] }
 0x45d   :  { %v6724_v54 = vpop.permute.xlu0 %2342 }
 0x45e   :  { %v6730_v18 = vpop.permute.xlu1 %2348 }
 0x45f   :  { %3226 = vrot.lane.b32.xlu0 %v2560_v42, %s3746_s12 }
 0x460   :  { %3232 = vrot.lane.b32.xlu1 %v2563_v59, %s3746_s12  ;;  %v2567_v59 = vmax.f32 %v8609_v37, 0.0 }
 0x461   :  { %v6732_v6 = vpop.permute.xlu0 %2346 }
 0x462   :  { %v6738_v35 = vpop.permute.xlu1 %2352 }
 0x463   :  { %3230 = vrot.lane.b32.xlu0 %v2562_v12, %s3746_s12  ;;  %v2566_v12 = vmax.f32 %v8610_v33, 0.0  ;;  %v8617_v33 = vld [vmem:[#allocation59_spill] sm:$0xff] }
 0x464   :  { %3236 = vrot.lane.b32.xlu1 %v2565_v45, %s3746_s12  ;;  %v2569_v45 = vmax.f32 %v8613_v61, 0.0 }
 0x465   :  { %v6740_v25 = vpop.permute.xlu0 %2350 }
 0x466   :  { %v6746_v42 = vpop.permute.xlu1 %2356 }
 0x467   :  { %3234 = vrot.lane.b32.xlu0 %v2564_v24, %s3746_s12  ;;  %v2568_v24 = vmax.f32 %v8614_v7, 0.0  ;;  %v8621_v7 = vld [vmem:[#allocation63_spill] sm:$0xff] }
 0x468   :  { %3240 = vrot.lane.b32.xlu1 %v2567_v59, %s3746_s12  ;;  %v2571_v59 = vmax.f32 %v8617_v33, 0.0 }
 0x469   :  { %v6748_v11 = vpop.permute.xlu0 %2354 }
 0x46a   :  { %8608 = vst [vmem:[#allocation158_spill] sm:$0xff] %v6748_v11  ;;  %v6754_v20 = vpop.permute.xlu1 %2360 }
 0x46b   :  { %3238 = vrot.lane.b32.xlu0 %v2566_v12, %s3746_s12  ;;  %8611 = vst [vmem:[#allocation159_spill] sm:$0xff] %v6754_v20  ;;  %v2570_v12 = vmax.f32 %v8618_v41, 0.0  ;;  %v8625_v41 = vld [vmem:[#allocation65_spill] sm:$0xff] }
 0x46c   :  { %3244 = vrot.lane.b32.xlu1 %v2569_v45, %s3746_s12  ;;  %v2573_v45 = vmax.f32 %v8621_v7, 0.0 }
 0x46d   :  { %v6756_v30 = vpop.permute.xlu0 %2358 }
 0x46e   :  { %8612 = vst [vmem:[#allocation160_spill] sm:$0xff] %v6756_v30  ;;  %v6762_v29 = vpop.permute.xlu1 %2364  ;;  %v8663_v30 = vld [vmem:[#allocation84_spill] sm:$0xff] }
 0x46f   :  { %3242 = vrot.lane.b32.xlu0 %v2568_v24, %s3746_s12  ;;  %8615 = vst [vmem:[#allocation161_spill] sm:$0xff] %v6762_v29  ;;  %v2572_v24 = vmax.f32 %v8622_v19, 0.0  ;;  %v8629_v19 = vld [vmem:[#allocation67_spill] sm:$0xff]  ;;  %v6840_v29 = vstv %s1310_s2  ;;  %v2592_v20 = vmax.f32 %v8663_v30, 0.0 }
 0x470   :  { %3248 = vrot.lane.b32.xlu1 %v2571_v59, %s3746_s12  ;;  %v2575_v59 = vmax.f32 %v8625_v41, 0.0 }
 0x471   :  { %v6764_v37 = vpop.permute.xlu0 %2362 }
 0x472   :  { %8616 = vst [vmem:[#allocation164_spill] sm:$0xff] %v6764_v37  ;;  %v6770_v60 = vpop.permute.xlu1 %2368  ;;  %v8626_v37 = vld [vmem:[#allocation64_spill] sm:$0xff] }
 0x473   :  { %3246 = vrot.lane.b32.xlu0 %v2570_v12, %s3746_s12  ;;  %8619 = vst [vmem:[#allocation165_spill] sm:$0xff] %v6770_v60  ;;  %v2574_v12 = vmax.f32 %v8626_v37, 0.0  ;;  %v8630_v60 = vld [vmem:[#allocation66_spill] sm:$0xff]  ;;  %v8633_v37 = vld [vmem:[#allocation69_spill] sm:$0xff] }
 0x474   :  { %3252 = vrot.lane.b32.xlu1 %v2573_v45, %s3746_s12  ;;  %v2577_v45 = vmax.f32 %v8629_v19, 0.0 }
 0x475   :  { %v6772_v61 = vpop.permute.xlu0 %2366 }
 0x476   :  { %8620 = vst [vmem:[#allocation166_spill] sm:$0xff] %v6772_v61  ;;  %v6778_v63 = vpop.permute.xlu1 %2372 }
 0x477   :  { %3250 = vrot.lane.b32.xlu0 %v2572_v24, %s3746_s12  ;;  %8623 = vst [vmem:[#allocation167_spill] sm:$0xff] %v6778_v63  ;;  %v2576_v24 = vmax.f32 %v8630_v60, 0.0  ;;  %v8634_v63 = vld [vmem:[#allocation68_spill] sm:$0xff]  ;;  %v8637_v60 = vld [vmem:[#allocation71_spill] sm:$0xff] }
 0x478   :  { %3256 = vrot.lane.b32.xlu1 %v2575_v59, %s3746_s12  ;;  %v2579_v59 = vmax.f32 %v8633_v37, 0.0 }
 0x479   :  { %v6780_v33 = vpop.permute.xlu0 %2370 }
 0x47a   :  { %8624 = vst [vmem:[#allocation55_spill] sm:$0xff] %v6780_v33  ;;  %v6786_v61 = vpop.permute.xlu1 %2376 }
 0x47b   :  { %3254 = vrot.lane.b32.xlu0 %v2574_v12, %s3746_s12  ;;  %8627 = vst [vmem:[#allocation54_spill] sm:$0xff] %v6786_v61  ;;  %v2578_v12 = vmax.f32 %v8634_v63, 0.0  ;;  %v8638_v61 = vld [vmem:[#allocation70_spill] sm:$0xff]  ;;  %v8641_v63 = vld [vmem:[#allocation73_spill] sm:$0xff] }
 0x47c   :  { %3260 = vrot.lane.b32.xlu1 %v2577_v45, %s3746_s12  ;;  %v2581_v45 = vmax.f32 %v8637_v60, 0.0 }
 0x47d   :  { %v6788_v7 = vpop.permute.xlu0 %2374 }
 0x47e   :  { %8628 = vst [vmem:[#allocation57_spill] sm:$0xff] %v6788_v7  ;;  %v6794_v33 = vpop.permute.xlu1 %2380 }
 0x47f   :  { %3258 = vrot.lane.b32.xlu0 %v2576_v24, %s3746_s12  ;;  %8631 = vst [vmem:[#allocation56_spill] sm:$0xff] %v6794_v33  ;;  %v2580_v24 = vmax.f32 %v8638_v61, 0.0  ;;  %v8642_v33 = vld [vmem:[#allocation72_spill] sm:$0xff]  ;;  %v8645_v61 = vld [vmem:[#allocation75_spill] sm:$0xff] }
 0x480   :  { %3264 = vrot.lane.b32.xlu1 %v2579_v59, %s3746_s12  ;;  %v2583_v59 = vmax.f32 %v8641_v63, 0.0 }
 0x481   :  { %v6796_v41 = vpop.permute.xlu0 %2378 }
 0x482   :  { %8632 = vst [vmem:[#allocation59_spill] sm:$0xff] %v6796_v41  ;;  %v6802_v7 = vpop.permute.xlu1 %2384 }
 0x483   :  { %3262 = vrot.lane.b32.xlu0 %v2578_v12, %s3746_s12  ;;  %8635 = vst [vmem:[#allocation58_spill] sm:$0xff] %v6802_v7  ;;  %v2582_v12 = vmax.f32 %v8642_v33, 0.0  ;;  %v8646_v7 = vld [vmem:[#allocation74_spill] sm:$0xff] }
 0x484   :  { %3268 = vrot.lane.b32.xlu1 %v2581_v45, %s3746_s12  ;;  %v2585_v45 = vmax.f32 %v8645_v61, 0.0 }
 0x485   :  { %v6804_v19 = vpop.permute.xlu0 %2382 }
 0x486   :  { %8636 = vst [vmem:[#allocation63_spill] sm:$0xff] %v6804_v19  ;;  %v6810_v41 = vpop.permute.xlu1 %2388 }
 0x487   :  { %3266 = vrot.lane.b32.xlu0 %v2580_v24, %s3746_s12  ;;  %8639 = vst [vmem:[#allocation60_spill] sm:$0xff] %v6810_v41  ;;  %v2584_v24 = vmax.f32 %v8646_v7, 0.0 }
 0x488   :  { %3272 = vrot.lane.b32.xlu1 %v2583_v59, %s3746_s12  ;;  %v8649_v59 = vld [vmem:[#allocation77_spill] sm:$0xff] }
 0x489   :  { %v6812_v37 = vpop.permute.xlu0 %2386 }
 0x48a   :  { %8640 = vst [vmem:[#allocation65_spill] sm:$0xff] %v6812_v37  ;;  %v6818_v19 = vpop.permute.xlu1 %2392  ;;  %v2587_v37 = vmax.f32 %v8649_v59, 0.0  ;;  %v3667_v59 = vld [vmem:[%s8004_s0 + $0x10] sm:$0xff] }
 0x48b   :  { %3270 = vrot.lane.b32.xlu0 %v2582_v12, %s3746_s12  ;;  %8643 = vst [vmem:[#allocation64_spill] sm:$0xff] %v6818_v19  ;;  %v8650_v12 = vld [vmem:[#allocation76_spill] sm:$0xff]  ;;  %v8654_v19 = vld [vmem:[#allocation78_spill] sm:$0xff] }
 0x48c   :  { %3276 = vrot.lane.b32.xlu1 %v2585_v45, %s3746_s12  ;;  %v2586_v41 = vmax.f32 %v8650_v12, 0.0 }
 0x48d   :  { %v6820_v60 = vpop.permute.xlu0 %2390 }
 0x48e   :  { %8644 = vst [vmem:[#allocation67_spill] sm:$0xff] %v6820_v60  ;;  %v6826_v63 = vpop.permute.xlu1 %2396  ;;  %v8653_v60 = vld [vmem:[#allocation79_spill] sm:$0xff] }
 0x48f   :  { %3274 = vrot.lane.b32.xlu0 %v2584_v24, %s3746_s12  ;;  %8647 = vst [vmem:[#allocation66_spill] sm:$0xff] %v6826_v63  ;;  %v2589_v45 = vmax.f32 %v8653_v60, 0.0  ;;  %v2588_v24 = vmax.f32 %v8654_v19, 0.0  ;;  %v1316_v60 = vmul.f32 %v3667_v59, %v6840_v29  ;;  %v3669_v59 = vld [vmem:[%s8004_s0 + $0x30] sm:$0xff]  ;;  %v8660_v63 = vld [vmem:[#allocation105_spill] sm:$0xff] }
 0x490   :  { %3280 = vrot.lane.b32.xlu1 %v2587_v37, %s3746_s12  ;;  %v3666_v37 = vld [vmem:[%s8004_s0] sm:$0xff] }
 0x491   :  { %v6828_v33 = vpop.permute.xlu0 %2394 }
 0x492   :  { %8648 = vst [vmem:[#allocation69_spill] sm:$0xff] %v6828_v33  ;;  %v6834_v61 = vpop.permute.xlu1 %2400 }
 0x493   :  { %3278 = vrot.lane.b32.xlu0 %v2586_v41, %s3746_s12  ;;  %8651 = vst [vmem:[#allocation68_spill] sm:$0xff] %v6834_v61  ;;  %v1315_v41 = vmul.f32 %v3666_v37, %v6840_v29  ;;  %v8658_v61 = vld [vmem:[#allocation80_spill] sm:$0xff]  ;;  %v3668_v37 = vld [vmem:[%s8004_s0 + $0x20] sm:$0xff] }
 0x494   :  { %3284 = vrot.lane.b32.xlu1 %v2589_v45, %s3746_s12  ;;  %v1317_v33 = vmul.f32 %v3668_v37, %v6840_v29 }
 0x495   :  { %v6836_v7 = vpop.permute.xlu0 %2398 }
 0x496   :  { %8652 = vst [vmem:[#allocation71_spill] sm:$0xff] %v6836_v7  ;;  %v6852_v12 = vpop.permute.xlu1 %2404  ;;  %v8657_v7 = vld [vmem:[#allocation81_spill] sm:$0xff] }
 0x497   :  { %3282 = vrot.lane.b32.xlu0 %v2588_v24, %s3746_s12  ;;  %8655 = vst [vmem:[#allocation70_spill] sm:$0xff] %v6852_v12  ;;  %v2591_v45 = vmax.f32 %v8657_v7, 0.0  ;;  %v2590_v24 = vmax.f32 %v8658_v61, 0.0  ;;  %v8659_v12 = vld [vmem:[#allocation101_spill] sm:$0xff]  ;;  %v1701_v61 = vadd.f32 %v8660_v63, %v1316_v60  ;;  %v3670_v63 = vld [vmem:[%s8004_s0 + $0x50] sm:$0xff] }
 0x498   :  { %v1700_v7 = vadd.f32 %v8659_v12, %v1315_v41  ;;  %v1320_v41 = vmul.f32 %v3670_v63, %v6840_v29  ;;  %v3671_v60 = vld [vmem:[%s8004_s0 + $0x40] sm:$0xff]  ;;  %v8666_v12 = vld [vmem:[#allocation100_spill] sm:$0xff] }
 0x499   :  { %v6854_v19 = vpop.permute.xlu0 %2402  ;;  %3288 = vrot.lane.b32.xlu1 %v2591_v45, %s3746_s12  ;;  %v2086_v37 = vadd.f32 %v8664_v0, %v1701_v61  ;;  %v1319_v30 = vmul.f32 %v3671_v60, %v6840_v29  ;;  %v1702_v0 = vadd.f32 %v8666_v12, %v1317_v33  ;;  %v3672_v33 = vld [vmem:[%s8004_s0 + $0x70] sm:$0xff] }
 0x49a   :  { %8656 = vst [vmem:[#allocation73_spill] sm:$0xff] %v6854_v19  ;;  %v1318_v19 = vmul.f32 %v3669_v59, %v6840_v29  ;;  %v6870_v10 = vpop.permute.xlu1 %3176  ;;  %v2085_v11 = vadd.f32 %v8665_v22, %v1700_v7  ;;  %v8667_v59 = vld [vmem:[#allocation104_spill] sm:$0xff] }
 0x49b   :  { %3286 = vrot.lane.b32.xlu0 %v2590_v24, %s3746_s12  ;;  %v8662_v24 = vld [vmem:[#allocation85_spill] sm:$0xff] }
 0x49c   :  { %v2593_v57 = vmax.f32 %v8662_v24, 0.0  ;;  %v1703_v22 = vadd.f32 %v8667_v59, %v1318_v19  ;;  %v8668_v24 = vld [vmem:[#allocation150_spill] sm:$0xff] }
 0x49d   :  { %v6872_v45 = vpop.permute.xlu0 %3174  ;;  %v8669_v19 = vld [vmem:[#allocation106_spill] sm:$0xff] }
 0x49e   :  { %8661 = vst [vmem:[#allocation72_spill] sm:$0xff] %v6872_v45  ;;  %3292 = vrot.lane.b32.xlu1 %v2593_v57, %s3746_s12  ;;  %v2471_v57 = vadd.f32 %v6594_v58, %v2086_v37  ;;  %v6892_v7 = vpop.permute.xlu1 %3180  ;;  %v2088_v63 = vadd.f32 %v8668_v24, %v1703_v22  ;;  %v2087_v45 = vadd.f32 %v6316_v48, %v1702_v0  ;;  %v8670_v48 = vld [vmem:[#allocation107_spill] sm:$0xff]  ;;  %v8672_v24 = vld [vmem:[#allocation152_spill] sm:$0xff] }
 0x49f   :  { %3290 = vrot.lane.b32.xlu0 %v2592_v20, %s3746_s12  ;;  %v2470_v20 = vadd.f32 %v6596_v13, %v2085_v11  ;;  %v1322_v58 = vmul.f32 %v3672_v33, %v6840_v29  ;;  %v3673_v13 = vld [vmem:[%s8004_s0 + $0x60] sm:$0xff]  ;;  %v1705_v37 = vadd.f32 %v8669_v19, %v1320_v41  ;;  %v1704_v60 = vadd.f32 %v8670_v48, %v1319_v30  ;;  %v3674_v41 = vld [vmem:[%s8004_s0 + $0x90] sm:$0xff]  ;;  %v8673_v30 = vld [vmem:[#allocation108_spill] sm:$0xff] }
 0x4a0   :  { %v1321_v11 = vmul.f32 %v3673_v13, %v6840_v29  ;;  %v2473_v12 = vadd.f32 %v6602_v34, %v2088_v63  ;;  %v2472_v0 = vadd.f32 %v6604_v3, %v2087_v45  ;;  %v1324_v34 = vmul.f32 %v3674_v41, %v6840_v29  ;;  %v3675_v3 = vld [vmem:[%s8004_s0 + $0x80] sm:$0xff] }
 0x4a1   :  { %v6894_v61 = vpop.permute.xlu0 %3178  ;;  %v2089_v33 = vadd.f32 %v8672_v24, %v1704_v60  ;;  %v1323_v45 = vmul.f32 %v3675_v3, %v6840_v29  ;;  %v1707_v63 = vadd.f32 %v8673_v30, %v1322_v58  ;;  %v8674_v13 = vld [vmem:[#allocation109_spill] sm:$0xff]  ;;  %v8676_v24 = vld [vmem:[#allocation154_spill] sm:$0xff]  ;;  %v3676_v58 = vld [vmem:[%s8004_s0 + $0xb0] sm:$0xff] }
 0x4a2   :  { %2664 = vrot.lane.b32.xlu1 %v2471_v57, %s3750_s4  ;;  %v6912_v59 = vpop.permute.xlu1 %3184  ;;  %v8671_v57 = vld [vmem:[#allocation151_spill] sm:$0xff]  ;;  %v1706_v19 = vadd.f32 %v8674_v13, %v1321_v11  ;;  %v8678_v3 = vld [vmem:[#allocation113_spill] sm:$0xff] }
 0x4a3   :  { %2662 = vrot.lane.b32.xlu0 %v2470_v20, %s3750_s4  ;;  %v2090_v20 = vadd.f32 %v8671_v57, %v1705_v37  ;;  %v2474_v48 = vadd.f32 %v6612_v17, %v2089_v33  ;;  %v3677_v17 = vld [vmem:[%s8004_s0 + $0xa0] sm:$0xff]  ;;  %v1708_v30 = vadd.f32 %v8678_v3, %v1323_v45 }
 0x4a4   :  { %v2091_v41 = vadd.f32 %v8676_v24, %v1706_v19  ;;  %v1325_v11 = vmul.f32 %v3677_v17, %v6840_v29  ;;  %v8680_v24 = vld [vmem:[#allocation183_spill] sm:$0xff]  ;;  %v8682_v17 = vld [vmem:[#allocation21_spill] sm:$0xff] }
 0x4a5   :  { %v6914_v22 = vpop.permute.xlu0 %3182  ;;  %v2475_v37 = vadd.f32 %v6610_v40, %v2090_v20  ;;  %v1326_v40 = vmul.f32 %v3676_v58, %v6840_v29  ;;  %v8677_v20 = vld [vmem:[#allocation112_spill] sm:$0xff]  ;;  %v2093_v58 = vadd.f32 %v8680_v24, %v1708_v30  ;;  %v8684_v24 = vld [vmem:[#allocation185_spill] sm:$0xff] }
 0x4a6   :  { %2668 = vrot.lane.b32.xlu1 %v2473_v12, %s3750_s4  ;;  %v6932_v60 = vpop.permute.xlu1 %3188  ;;  %v1709_v33 = vadd.f32 %v8677_v20, %v1324_v34  ;;  %v2476_v13 = vadd.f32 %v6620_v4, %v2091_v41  ;;  %v3678_v34 = vld [vmem:[%s8004_s0 + $0xd0] sm:$0xff]  ;;  %v3679_v4 = vld [vmem:[%s8004_s0 + $0xc0] sm:$0xff]  ;;  %v1710_v20 = vadd.f32 %v8682_v17, %v1325_v11 }
 0x4a7   :  { %2666 = vrot.lane.b32.xlu0 %v2472_v0, %s3750_s4  ;;  %v8675_v0 = vld [vmem:[#allocation153_spill] sm:$0xff]  ;;  %v1327_v45 = vmul.f32 %v3679_v4, %v6840_v29  ;;  %v2478_v3 = vadd.f32 %v6628_v39, %v2093_v58  ;;  %v8686_v4 = vld [vmem:[#allocation23_spill] sm:$0xff] }
 0x4a8   :  { %v2092_v57 = vadd.f32 %v8675_v0, %v1707_v63  ;;  %v3681_v39 = vld [vmem:[%s8004_s0 + $0xe0] sm:$0xff] }
 0x4a9   :  { %v6934_v12 = vpop.permute.xlu0 %3186  ;;  %v1329_v11 = vmul.f32 %v3681_v39, %v6840_v29  ;;  %v8690_v39 = vld [vmem:[#allocation48_spill] sm:$0xff] }
 0x4aa   :  { %2672 = vrot.lane.b32.xlu1 %v2475_v37, %s3750_s4  ;;  %v2477_v63 = vadd.f32 %v6618_v52, %v2092_v57  ;;  %v6952_v19 = vpop.permute.xlu1 %3192  ;;  %v1328_v52 = vmul.f32 %v3678_v34, %v6840_v29  ;;  %v8681_v57 = vld [vmem:[#allocation22_spill] sm:$0xff]  ;;  %v2095_v34 = vadd.f32 %v8684_v24, %v1710_v20  ;;  %v8688_v24 = vld [vmem:[#allocation187_spill] sm:$0xff] }
 0x4ab   :  { %2670 = vrot.lane.b32.xlu0 %v2474_v48, %s3750_s4  ;;  %v8679_v48 = vld [vmem:[#allocation155_spill] sm:$0xff]  ;;  %v1711_v41 = vadd.f32 %v8681_v57, %v1326_v40  ;;  %v1712_v57 = vadd.f32 %v8686_v4, %v1327_v45 }
 0x4ac   :  { %v2094_v0 = vadd.f32 %v8679_v48, %v1709_v33  ;;  %v3680_v40 = vld [vmem:[%s8004_s0 + $0xf0] sm:$0xff]  ;;  %v2480_v17 = vadd.f32 %v6636_v49, %v2095_v34  ;;  %v3683_v49 = vld [vmem:[%s8004_s0 + $0x100] sm:$0xff] }
 0x4ad   :  { %v6954_v37 = vpop.permute.xlu0 %3190  ;;  %v1331_v45 = vmul.f32 %v3683_v49, %v6840_v29  ;;  %v8694_v49 = vld [vmem:[#allocation50_spill] sm:$0xff] }
 0x4ae   :  { %2676 = vrot.lane.b32.xlu1 %v2477_v63, %s3750_s4  ;;  %v2479_v33 = vadd.f32 %v6626_v8, %v2094_v0  ;;  %v6972_v30 = vpop.permute.xlu1 %3196  ;;  %v1330_v8 = vmul.f32 %v3680_v40, %v6840_v29  ;;  %v8685_v0 = vld [vmem:[#allocation24_spill] sm:$0xff]  ;;  %v2097_v40 = vadd.f32 %v8688_v24, %v1712_v57  ;;  %v8692_v24 = vld [vmem:[#allocation189_spill] sm:$0xff] }
 0x4af   :  { %2674 = vrot.lane.b32.xlu0 %v2476_v13, %s3750_s4  ;;  %v8683_v13 = vld [vmem:[#allocation184_spill] sm:$0xff]  ;;  %v1713_v58 = vadd.f32 %v8685_v0, %v1328_v52  ;;  %v3682_v52 = vld [vmem:[%s8004_s0 + $0x110] sm:$0xff]  ;;  %v1714_v0 = vadd.f32 %v8690_v39, %v1329_v11 }
 0x4b0   :  { %v2096_v48 = vadd.f32 %v8683_v13, %v1711_v41  ;;  %v2482_v4 = vadd.f32 %v6644_v56, %v2097_v40  ;;  %v3685_v56 = vld [vmem:[%s8004_s0 + $0x120] sm:$0xff] }
 0x4b1   :  { %v6974_v63 = vpop.permute.xlu0 %3194  ;;  %v1333_v11 = vmul.f32 %v3685_v56, %v6840_v29  ;;  %v8698_v56 = vld [vmem:[#allocation52_spill] sm:$0xff] }
 0x4b2   :  { %2680 = vrot.lane.b32.xlu1 %v2479_v33, %s3750_s4  ;;  %v2481_v41 = vadd.f32 %v6634_v27, %v2096_v48  ;;  %v6992_v20 = vpop.permute.xlu1 %3200  ;;  %v1332_v27 = vmul.f32 %v3682_v52, %v6840_v29  ;;  %v8689_v48 = vld [vmem:[#allocation49_spill] sm:$0xff]  ;;  %v2099_v52 = vadd.f32 %v8692_v24, %v1714_v0  ;;  %v8696_v24 = vld [vmem:[#allocation191_spill] sm:$0xff] }
 0x4b3   :  { %2678 = vrot.lane.b32.xlu0 %v2478_v3, %s3750_s4  ;;  %v8687_v3 = vld [vmem:[#allocation186_spill] sm:$0xff]  ;;  %v1715_v34 = vadd.f32 %v8689_v48, %v1330_v8  ;;  %v3684_v8 = vld [vmem:[%s8004_s0 + $0x130] sm:$0xff]  ;;  %v1716_v48 = vadd.f32 %v8694_v49, %v1331_v45 }
 0x4b4   :  { %v2098_v13 = vadd.f32 %v8687_v3, %v1713_v58  ;;  %v2484_v39 = vadd.f32 %v6652_v43, %v2099_v52  ;;  %v3687_v43 = vld [vmem:[%s8004_s0 + $0x140] sm:$0xff] }
 0x4b5   :  { %v6994_v33 = vpop.permute.xlu0 %3198  ;;  %v1335_v45 = vmul.f32 %v3687_v43, %v6840_v29  ;;  %v8702_v43 = vld [vmem:[#allocation102_spill] sm:$0xff] }
 0x4b6   :  { %2684 = vrot.lane.b32.xlu1 %v2481_v41, %s3750_s4  ;;  %v2483_v58 = vadd.f32 %v6642_v28, %v2098_v13  ;;  %v7012_v57 = vpop.permute.xlu1 %3204  ;;  %v1334_v28 = vmul.f32 %v3684_v8, %v6840_v29  ;;  %v8693_v13 = vld [vmem:[#allocation51_spill] sm:$0xff]  ;;  %v2101_v8 = vadd.f32 %v8696_v24, %v1716_v48  ;;  %v8700_v24 = vld [vmem:[#allocation193_spill] sm:$0xff] }
 0x4b7   :  { %2682 = vrot.lane.b32.xlu0 %v2480_v17, %s3750_s4  ;;  %v8691_v17 = vld [vmem:[#allocation188_spill] sm:$0xff]  ;;  %v1717_v40 = vadd.f32 %v8693_v13, %v1332_v27  ;;  %v3686_v27 = vld [vmem:[%s8004_s0 + $0x150] sm:$0xff]  ;;  %v1718_v13 = vadd.f32 %v8698_v56, %v1333_v11 }
 0x4b8   :  { %v2100_v3 = vadd.f32 %v8691_v17, %v1715_v34  ;;  %v2486_v49 = vadd.f32 %v6660_v23, %v2101_v8  ;;  %v3689_v23 = vld [vmem:[%s8004_s0 + $0x160] sm:$0xff] }
 0x4b9   :  { %v7014_v41 = vpop.permute.xlu0 %3202  ;;  %v1337_v11 = vmul.f32 %v3689_v23, %v6840_v29  ;;  %v8706_v23 = vld [vmem:[#allocation114_spill] sm:$0xff] }
 0x4ba   :  { %2688 = vrot.lane.b32.xlu1 %v2483_v58, %s3750_s4  ;;  %v2485_v34 = vadd.f32 %v6650_v26, %v2100_v3  ;;  %v7032_v0 = vpop.permute.xlu1 %3208  ;;  %v1336_v26 = vmul.f32 %v3686_v27, %v6840_v29  ;;  %v8697_v3 = vld [vmem:[#allocation53_spill] sm:$0xff]  ;;  %v2103_v27 = vadd.f32 %v8700_v24, %v1718_v13  ;;  %v8704_v24 = vld [vmem:[#allocation195_spill] sm:$0xff] }
 0x4bb   :  { %2686 = vrot.lane.b32.xlu0 %v2482_v4, %s3750_s4  ;;  %v8695_v4 = vld [vmem:[#allocation190_spill] sm:$0xff]  ;;  %v1719_v52 = vadd.f32 %v8697_v3, %v1334_v28  ;;  %v3688_v28 = vld [vmem:[%s8004_s0 + $0x170] sm:$0xff]  ;;  %v1720_v3 = vadd.f32 %v8702_v43, %v1335_v45 }
 0x4bc   :  { %v2102_v17 = vadd.f32 %v8695_v4, %v1717_v40  ;;  %v2488_v56 = vadd.f32 %v6668_v47, %v2103_v27  ;;  %v3691_v47 = vld [vmem:[%s8004_s0 + $0x180] sm:$0xff] }
 0x4bd   :  { %v7034_v58 = vpop.permute.xlu0 %3206  ;;  %v1339_v45 = vmul.f32 %v3691_v47, %v6840_v29  ;;  %v8710_v47 = vld [vmem:[#allocation118_spill] sm:$0xff] }
 0x4be   :  { %2692 = vrot.lane.b32.xlu1 %v2485_v34, %s3750_s4  ;;  %v2487_v40 = vadd.f32 %v6658_v31, %v2102_v17  ;;  %v7052_v48 = vpop.permute.xlu1 %3212  ;;  %v1338_v31 = vmul.f32 %v3688_v28, %v6840_v29  ;;  %v8701_v17 = vld [vmem:[#allocation103_spill] sm:$0xff]  ;;  %v2105_v28 = vadd.f32 %v8704_v24, %v1720_v3  ;;  %v8708_v24 = vld [vmem:[#allocation197_spill] sm:$0xff] }
 0x4bf   :  { %2690 = vrot.lane.b32.xlu0 %v2484_v39, %s3750_s4  ;;  %v8699_v39 = vld [vmem:[#allocation192_spill] sm:$0xff]  ;;  %v1721_v8 = vadd.f32 %v8701_v17, %v1336_v26  ;;  %v3690_v26 = vld [vmem:[%s8004_s0 + $0x190] sm:$0xff]  ;;  %v1722_v17 = vadd.f32 %v8706_v23, %v1337_v11 }
 0x4c0   :  { %v2104_v4 = vadd.f32 %v8699_v39, %v1719_v52  ;;  %v2490_v43 = vadd.f32 %v6676_v46, %v2105_v28  ;;  %v3693_v46 = vld [vmem:[%s8004_s0 + $0x1a0] sm:$0xff] }
 0x4c1   :  { %v7054_v34 = vpop.permute.xlu0 %3210  ;;  %v1341_v11 = vmul.f32 %v3693_v46, %v6840_v29  ;;  %v8714_v46 = vld [vmem:[#allocation25_spill] sm:$0xff] }
 0x4c2   :  { %2696 = vrot.lane.b32.xlu1 %v2487_v40, %s3750_s4  ;;  %v2489_v52 = vadd.f32 %v6666_v1, %v2104_v4  ;;  %v7072_v13 = vpop.permute.xlu1 %3216  ;;  %v1340_v1 = vmul.f32 %v3690_v26, %v6840_v29  ;;  %v8705_v4 = vld [vmem:[#allocation115_spill] sm:$0xff]  ;;  %v2107_v26 = vadd.f32 %v8708_v24, %v1722_v17 }
 0x4c3   :  { %2694 = vrot.lane.b32.xlu0 %v2486_v49, %s3750_s4  ;;  %v8703_v49 = vld [vmem:[#allocation194_spill] sm:$0xff]  ;;  %v1723_v27 = vadd.f32 %v8705_v4, %v1338_v31  ;;  %v3692_v31 = vld [vmem:[%s8004_s0 + $0x1b0] sm:$0xff]  ;;  %v1724_v4 = vadd.f32 %v8710_v47, %v1339_v45 }
 0x4c4   :  { %v2106_v39 = vadd.f32 %v8703_v49, %v1721_v8  ;;  %v2492_v23 = vadd.f32 %v6684_v53, %v2107_v26  ;;  %v8712_v24 = vld [vmem:[#allocation199_spill] sm:$0xff]  ;;  %v3695_v53 = vld [vmem:[%s8004_s0 + $0x1c0] sm:$0xff] }
 0x4c5   :  { %v7074_v40 = vpop.permute.xlu0 %3214  ;;  %v1343_v45 = vmul.f32 %v3695_v53, %v6840_v29  ;;  %v8718_v53 = vld [vmem:[#allocation7_spill] sm:$0xff] }
 0x4c6   :  { %2700 = vrot.lane.b32.xlu1 %v2489_v52, %s3750_s4  ;;  %v2491_v8 = vadd.f32 %v6674_v32, %v2106_v39  ;;  %v7092_v3 = vpop.permute.xlu1 %3220  ;;  %v1342_v32 = vmul.f32 %v3692_v31, %v6840_v29  ;;  %v8709_v39 = vld [vmem:[#allocation119_spill] sm:$0xff]  ;;  %v2109_v31 = vadd.f32 %v8712_v24, %v1724_v4  ;;  %v8716_v24 = vld [vmem:[#allocation201_spill] sm:$0xff] }
 0x4c7   :  { %2698 = vrot.lane.b32.xlu0 %v2488_v56, %s3750_s4  ;;  %v8707_v56 = vld [vmem:[#allocation196_spill] sm:$0xff]  ;;  %v1725_v28 = vadd.f32 %v8709_v39, %v1340_v1  ;;  %v3694_v1 = vld [vmem:[%s8004_s0 + $0x1d0] sm:$0xff]  ;;  %v1726_v39 = vadd.f32 %v8714_v46, %v1341_v11 }
 0x4c8   :  { %v2108_v49 = vadd.f32 %v8707_v56, %v1723_v27  ;;  %v2494_v47 = vadd.f32 %v6692_v36, %v2109_v31  ;;  %v3697_v36 = vld [vmem:[%s8004_s0 + $0x1e0] sm:$0xff] }
 0x4c9   :  { %v7094_v52 = vpop.permute.xlu0 %3218  ;;  %v1345_v11 = vmul.f32 %v3697_v36, %v6840_v29  ;;  %v8722_v36 = vld [vmem:[#allocation9_spill] sm:$0xff] }
 0x4ca   :  { %2704 = vrot.lane.b32.xlu1 %v2491_v8, %s3750_s4  ;;  %v2493_v27 = vadd.f32 %v6682_v62, %v2108_v49  ;;  %v7112_v17 = vpop.permute.xlu1 %3224  ;;  %v1344_v62 = vmul.f32 %v3694_v1, %v6840_v29  ;;  %v8713_v49 = vld [vmem:[#allocation26_spill] sm:$0xff]  ;;  %v2111_v1 = vadd.f32 %v8716_v24, %v1726_v39  ;;  %v8720_v24 = vld [vmem:[#allocation203_spill] sm:$0xff] }
 0x4cb   :  { %2702 = vrot.lane.b32.xlu0 %v2490_v43, %s3750_s4  ;;  %v8711_v43 = vld [vmem:[#allocation198_spill] sm:$0xff]  ;;  %v1727_v26 = vadd.f32 %v8713_v49, %v1342_v32  ;;  %v3696_v32 = vld [vmem:[%s8004_s0 + $0x1f0] sm:$0xff]  ;;  %v1728_v49 = vadd.f32 %v8718_v53, %v1343_v45 }
 0x4cc   :  { %v2110_v56 = vadd.f32 %v8711_v43, %v1725_v28  ;;  %v2496_v46 = vadd.f32 %v6700_v5, %v2111_v1  ;;  %v3699_v5 = vld [vmem:[%s8004_s0 + $0x200] sm:$0xff] }
 0x4cd   :  { %v7114_v8 = vpop.permute.xlu0 %3222  ;;  %v1347_v45 = vmul.f32 %v3699_v5, %v6840_v29  ;;  %v8726_v5 = vld [vmem:[#allocation11_spill] sm:$0xff] }
 0x4ce   :  { %2708 = vrot.lane.b32.xlu1 %v2493_v27, %s3750_s4  ;;  %v2495_v28 = vadd.f32 %v6690_v50, %v2110_v56  ;;  %v7132_v4 = vpop.permute.xlu1 %3228  ;;  %v1346_v50 = vmul.f32 %v3696_v32, %v6840_v29  ;;  %v8717_v56 = vld [vmem:[#allocation8_spill] sm:$0xff]  ;;  %v2113_v32 = vadd.f32 %v8720_v24, %v1728_v49  ;;  %v8724_v24 = vld [vmem:[#allocation205_spill] sm:$0xff] }
 0x4cf   :  { %2706 = vrot.lane.b32.xlu0 %v2492_v23, %s3750_s4  ;;  %v8715_v23 = vld [vmem:[#allocation200_spill] sm:$0xff]  ;;  %v1729_v31 = vadd.f32 %v8717_v56, %v1344_v62  ;;  %v3698_v62 = vld [vmem:[%s8004_s0 + $0x210] sm:$0xff]  ;;  %v1730_v56 = vadd.f32 %v8722_v36, %v1345_v11 }
 0x4d0   :  { %v2112_v43 = vadd.f32 %v8715_v23, %v1727_v26  ;;  %v2498_v53 = vadd.f32 %v6708_v38, %v2113_v32  ;;  %v3701_v38 = vld [vmem:[%s8004_s0 + $0x220] sm:$0xff] }
 0x4d1   :  { %v7134_v27 = vpop.permute.xlu0 %3226  ;;  %v1349_v11 = vmul.f32 %v3701_v38, %v6840_v29  ;;  %v8730_v38 = vld [vmem:[#allocation178_spill] sm:$0xff] }
 0x4d2   :  { %2712 = vrot.lane.b32.xlu1 %v2495_v28, %s3750_s4  ;;  %v2497_v26 = vadd.f32 %v6698_v14, %v2112_v43  ;;  %v7152_v39 = vpop.permute.xlu1 %3232  ;;  %v1348_v14 = vmul.f32 %v3698_v62, %v6840_v29  ;;  %v8721_v43 = vld [vmem:[#allocation10_spill] sm:$0xff]  ;;  %v2115_v62 = vadd.f32 %v8724_v24, %v1730_v56  ;;  %v8728_v24 = vld [vmem:[#allocation207_spill] sm:$0xff] }
 0x4d3   :  { %2710 = vrot.lane.b32.xlu0 %v2494_v47, %s3750_s4  ;;  %v8719_v47 = vld [vmem:[#allocation202_spill] sm:$0xff]  ;;  %v1731_v1 = vadd.f32 %v8721_v43, %v1346_v50  ;;  %v3700_v50 = vld [vmem:[%s8004_s0 + $0x230] sm:$0xff]  ;;  %v1732_v43 = vadd.f32 %v8726_v5, %v1347_v45 }
 0x4d4   :  { %v2114_v23 = vadd.f32 %v8719_v47, %v1729_v31  ;;  %v2500_v36 = vadd.f32 %v6716_v9, %v2115_v62  ;;  %v3703_v9 = vld [vmem:[%s8004_s0 + $0x240] sm:$0xff] }
 0x4d5   :  { %v7154_v28 = vpop.permute.xlu0 %3230  ;;  %v1351_v45 = vmul.f32 %v3703_v9, %v6840_v29  ;;  %v8734_v9 = vld [vmem:[#allocation180_spill] sm:$0xff] }
 0x4d6   :  { %2716 = vrot.lane.b32.xlu1 %v2497_v26, %s3750_s4  ;;  %v2499_v31 = vadd.f32 %v6706_v15, %v2114_v23  ;;  %v7172_v49 = vpop.permute.xlu1 %3236  ;;  %v1350_v15 = vmul.f32 %v3700_v50, %v6840_v29  ;;  %v8725_v23 = vld [vmem:[#allocation12_spill] sm:$0xff]  ;;  %v2117_v50 = vadd.f32 %v8728_v24, %v1732_v43  ;;  %v8732_v24 = vld [vmem:[#allocation209_spill] sm:$0xff] }
 0x4d7   :  { %2714 = vrot.lane.b32.xlu0 %v2496_v46, %s3750_s4  ;;  %v8723_v46 = vld [vmem:[#allocation204_spill] sm:$0xff]  ;;  %v1733_v32 = vadd.f32 %v8725_v23, %v1348_v14  ;;  %v3702_v14 = vld [vmem:[%s8004_s0 + $0x250] sm:$0xff]  ;;  %v1734_v23 = vadd.f32 %v8730_v38, %v1349_v11 }
 0x4d8   :  { %v2116_v47 = vadd.f32 %v8723_v46, %v1731_v1  ;;  %v2502_v5 = vadd.f32 %v6724_v54, %v2117_v50  ;;  %v3705_v54 = vld [vmem:[%s8004_s0 + $0x260] sm:$0xff] }
 0x4d9   :  { %v7174_v26 = vpop.permute.xlu0 %3234  ;;  %v1353_v11 = vmul.f32 %v3705_v54, %v6840_v29 }
 0x4da   :  { %2720 = vrot.lane.b32.xlu1 %v2499_v31, %s3750_s4  ;;  %v2501_v1 = vadd.f32 %v6714_v2, %v2116_v47  ;;  %v7192_v56 = vpop.permute.xlu1 %3240  ;;  %v1352_v2 = vmul.f32 %v3702_v14, %v6840_v29  ;;  %v8729_v47 = vld [vmem:[#allocation177_spill] sm:$0xff]  ;;  %v2119_v14 = vadd.f32 %v8732_v24, %v1734_v23  ;;  %v8736_v24 = vld [vmem:[#allocation182_spill] sm:$0xff] }
 0x4db   :  { %2718 = vrot.lane.b32.xlu0 %v2498_v53, %s3750_s4  ;;  %v8727_v53 = vld [vmem:[#allocation206_spill] sm:$0xff]  ;;  %v1735_v62 = vadd.f32 %v8729_v47, %v1350_v15  ;;  %v3704_v15 = vld [vmem:[%s8004_s0 + $0x270] sm:$0xff]  ;;  %v1736_v47 = vadd.f32 %v8734_v9, %v1351_v45 }
 0x4dc   :  { %v2118_v46 = vadd.f32 %v8727_v53, %v1733_v32  ;;  %v2504_v38 = vadd.f32 %v6732_v6, %v2119_v14  ;;  %v3707_v6 = vld [vmem:[%s8004_s0 + $0x280] sm:$0xff] }
 0x4dd   :  { %v7194_v31 = vpop.permute.xlu0 %3238  ;;  %v1355_v45 = vmul.f32 %v3707_v6, %v6840_v29 }
 0x4de   :  { %2724 = vrot.lane.b32.xlu1 %v2501_v1, %s3750_s4  ;;  %v2503_v32 = vadd.f32 %v6722_v55, %v2118_v46  ;;  %v7212_v43 = vpop.permute.xlu1 %3244  ;;  %v1354_v55 = vmul.f32 %v3704_v15, %v6840_v29  ;;  %v8733_v46 = vld [vmem:[#allocation179_spill] sm:$0xff] }
 0x4df   :  { %2722 = vrot.lane.b32.xlu0 %v2500_v36, %s3750_s4  ;;  %v8731_v36 = vld [vmem:[#allocation208_spill] sm:$0xff]  ;;  %v1737_v50 = vadd.f32 %v8733_v46, %v1352_v2  ;;  %v3706_v2 = vld [vmem:[%s8004_s0 + $0x290] sm:$0xff] }
 0x4e0   :  { %v2120_v53 = vadd.f32 %v8731_v36, %v1735_v62  ;;  %v2121_v36 = vadd.f32 %v6482_v44, %v1736_v47  ;;  %v1738_v44 = vadd.f32 %v8736_v24, %v1353_v11  ;;  %v8737_v47 = vld [vmem:[#allocation122_spill] sm:$0xff]  ;;  %v8741_v24 = vld [vmem:[#allocation211_spill] sm:$0xff] }
 0x4e1   :  { %v7214_v1 = vpop.permute.xlu0 %3242 }
 0x4e2   :  { %2728 = vrot.lane.b32.xlu1 %v2503_v32, %s3750_s4  ;;  %v2505_v62 = vadd.f32 %v6730_v18, %v2120_v53  ;;  %v7232_v23 = vpop.permute.xlu1 %3248  ;;  %v1356_v18 = vmul.f32 %v3706_v2, %v6840_v29  ;;  %v8735_v53 = vld [vmem:[#allocation181_spill] sm:$0xff]  ;;  %v2506_v15 = vadd.f32 %v6740_v25, %v2121_v36  ;;  %v2123_v9 = vadd.f32 %v6492_v16, %v1738_v44 }
 0x4e3   :  { %2726 = vrot.lane.b32.xlu0 %v2502_v5, %s3750_s4  ;;  %v2122_v5 = vadd.f32 %v6480_v21, %v1737_v50  ;;  %v1739_v21 = vadd.f32 %v8735_v53, %v1354_v55  ;;  %v3708_v55 = vld [vmem:[%s8004_s0 + $0x2b0] sm:$0xff]  ;;  %v3709_v25 = vld [vmem:[%s8004_s0 + $0x2a0] sm:$0xff]  ;;  %v8740_v53 = vld [vmem:[#allocation210_spill] sm:$0xff] }
 0x4e4   :  { %v1357_v11 = vmul.f32 %v3709_v25, %v6840_v29  ;;  %v8744_v25 = vld [vmem:[#allocation159_spill] sm:$0xff] }
 0x4e5   :  { %v7234_v32 = vpop.permute.xlu0 %3246  ;;  %v2507_v14 = vadd.f32 %v6738_v35, %v2122_v5  ;;  %v2124_v50 = vadd.f32 %v6490_v51, %v1739_v21  ;;  %v1358_v35 = vmul.f32 %v3708_v55, %v6840_v29  ;;  %v1741_v51 = vadd.f32 %v8737_v47, %v1356_v18  ;;  %v8739_v5 = vld [vmem:[#allocation158_spill] sm:$0xff]  ;;  %v3710_v18 = vld [vmem:[%s8004_s0 + $0x2d0] sm:$0xff] }
 0x4e6   :  { %2732 = vrot.lane.b32.xlu1 %v2505_v62, %s3750_s4  ;;  %v7252_v54 = vpop.permute.xlu1 %3252  ;;  %v8738_v62 = vld [vmem:[#allocation123_spill] sm:$0xff]  ;;  %v2508_v36 = vadd.f32 %v8739_v5, %v2123_v9  ;;  %v8743_v9 = vld [vmem:[#allocation125_spill] sm:$0xff]  ;;  %v8748_v5 = vld [vmem:[#allocation212_spill] sm:$0xff] }
 0x4e7   :  { %2730 = vrot.lane.b32.xlu0 %v2504_v38, %s3750_s4  ;;  %v1740_v16 = vadd.f32 %v8738_v62, %v1355_v45  ;;  %v2509_v38 = vadd.f32 %v6746_v42, %v2124_v50  ;;  %v2126_v21 = vadd.f32 %v8740_v53, %v1741_v51  ;;  %v1360_v42 = vmul.f32 %v3710_v18, %v6840_v29  ;;  %v3711_v45 = vld [vmem:[%s8004_s0 + $0x2c0] sm:$0xff]  ;;  %v8745_v51 = vld [vmem:[#allocation160_spill] sm:$0xff]  ;;  %v8750_v18 = vld [vmem:[#allocation126_spill] sm:$0xff] }
 0x4e8   :  { %v1742_v55 = vadd.f32 %v8743_v9, %v1357_v11  ;;  %v8749_v53 = vld [vmem:[#allocation213_spill] sm:$0xff] }
 0x4e9   :  { %v7254_v46 = vpop.permute.xlu0 %3250  ;;  %v2125_v44 = vadd.f32 %v8741_v24, %v1740_v16  ;;  %v2511_v47 = vadd.f32 %v8744_v25, %v2126_v21  ;;  %v3713_v21 = vld [vmem:[%s8004_s0 + $0x2e0] sm:$0xff]  ;;  %v8753_v25 = vld [vmem:[#allocation164_spill] sm:$0xff] }
 0x4ea   :  { %2736 = vrot.lane.b32.xlu1 %v2507_v14, %s3750_s4  ;;  %v7272_v2 = vpop.permute.xlu1 %3256  ;;  %v1359_v14 = vmul.f32 %v3711_v45, %v6840_v29  ;;  %v2127_v24 = vadd.f32 %v8749_v53, %v1742_v55  ;;  %v1745_v45 = vadd.f32 %v8750_v18, %v1360_v42  ;;  %v8752_v9 = vld [vmem:[#allocation161_spill] sm:$0xff]  ;;  %v3714_v42 = vld [vmem:[%s8004_s0 + $0x310] sm:$0xff] }
 0x4eb   :  { %2734 = vrot.lane.b32.xlu0 %v2506_v15, %s3750_s4  ;;  %v8742_v15 = vld [vmem:[#allocation124_spill] sm:$0xff]  ;;  %v2510_v62 = vadd.f32 %v8745_v51, %v2125_v44  ;;  %v1361_v44 = vmul.f32 %v3713_v21, %v6840_v29 }
 0x4ec   :  { %v1743_v50 = vadd.f32 %v8742_v15, %v1358_v35  ;;  %v3712_v35 = vld [vmem:[%s8004_s0 + $0x2f0] sm:$0xff]  ;;  %v8758_v21 = vld [vmem:[#allocation128_spill] sm:$0xff] }
 0x4ed   :  { %v7274_v6 = vpop.permute.xlu0 %3254  ;;  %v1362_v11 = vmul.f32 %v3712_v35, %v6840_v29  ;;  %v8751_v15 = vld [vmem:[#allocation127_spill] sm:$0xff]  ;;  %v8757_v35 = vld [vmem:[#allocation214_spill] sm:$0xff] }
 0x4ee   :  { %2740 = vrot.lane.b32.xlu1 %v2509_v38, %s3750_s4  ;;  %v7292_v16 = vpop.permute.xlu1 %3260 }
 0x4ef   :  { %2738 = vrot.lane.b32.xlu0 %v2508_v36, %s3750_s4  ;;  %8746 = vst [vmem:[#allocation75_spill] sm:$0xff] %v7292_v16  ;;  %v2128_v36 = vadd.f32 %v8748_v5, %v1743_v50  ;;  %v1744_v50 = vadd.f32 %v8751_v15, %v1359_v14  ;;  %v8756_v5 = vld [vmem:[#allocation20_spill] sm:$0xff]  ;;  %v1364_v14 = vmul.f32 %v3714_v42, %v6840_v29  ;;  %v8821_v16 = vld [vmem:[#allocation230_spill] sm:$0xff] }
 0x4f0   :  { %v2130_v53 = vadd.f32 %v8756_v5, %v1745_v45  ;;  %v1747_v18 = vadd.f32 %v8758_v21, %v1362_v11  ;;  %v8759_v45 = vld [vmem:[#allocation129_spill] sm:$0xff]  ;;  %v3716_v11 = vld [vmem:[%s8004_s0 + $0x330] sm:$0xff] }
 0x4f1   :  { %v7294_v38 = vpop.permute.xlu0 %3258  ;;  %v2513_v55 = vadd.f32 %v8752_v9, %v2128_v36  ;;  %v3715_v36 = vld [vmem:[%s8004_s0 + $0x300] sm:$0xff]  ;;  %v1746_v15 = vadd.f32 %v8759_v45, %v1361_v44  ;;  %v1366_v44 = vmul.f32 %v3716_v11, %v6840_v29  ;;  %v8768_v45 = vld [vmem:[#allocation167_spill] sm:$0xff] }
 0x4f2   :  { %8747 = vst [vmem:[#allocation74_spill] sm:$0xff] %v7294_v38  ;;  %2744 = vrot.lane.b32.xlu1 %v2511_v47, %s3750_s4  ;;  %v2512_v47 = vadd.f32 %v8753_v25, %v2127_v24  ;;  %v7312_v51 = vpop.permute.xlu1 %3264  ;;  %v2129_v38 = vadd.f32 %v8757_v35, %v1744_v50  ;;  %v1363_v24 = vmul.f32 %v3715_v36, %v6840_v29  ;;  %v8760_v50 = vld [vmem:[#allocation165_spill] sm:$0xff]  ;;  %v8764_v35 = vld [vmem:[#allocation215_spill] sm:$0xff]  ;;  %v8766_v36 = vld [vmem:[#allocation130_spill] sm:$0xff] }
 0x4f3   :  { %2742 = vrot.lane.b32.xlu0 %v2510_v62, %s3750_s4  ;;  %8754 = vst [vmem:[#allocation77_spill] sm:$0xff] %v7312_v51  ;;  %v2515_v9 = vadd.f32 %v8760_v50, %v2130_v53  ;;  %v2132_v42 = vadd.f32 %v8764_v35, %v1747_v18  ;;  %v1749_v21 = vadd.f32 %v8766_v36, %v1364_v14  ;;  %v8767_v18 = vld [vmem:[#allocation131_spill] sm:$0xff]  ;;  %v8772_v35 = vld [vmem:[#allocation217_spill] sm:$0xff] }
 0x4f4   :  { %v8769_v50 = vld [vmem:[#allocation55_spill] sm:$0xff] }
 0x4f5   :  { %v7314_v62 = vpop.permute.xlu0 %3262  ;;  %v2134_v11 = vadd.f32 %v8772_v35, %v1749_v21  ;;  %v3718_v14 = vld [vmem:[%s8004_s0 + $0x350] sm:$0xff]  ;;  %v8775_v21 = vld [vmem:[#allocation133_spill] sm:$0xff] }
 0x4f6   :  { %8755 = vst [vmem:[#allocation76_spill] sm:$0xff] %v7314_v62  ;;  %2748 = vrot.lane.b32.xlu1 %v2513_v55, %s3750_s4  ;;  %v8761_v55 = vld [vmem:[#allocation166_spill] sm:$0xff]  ;;  %v8765_v62 = vld [vmem:[#allocation216_spill] sm:$0xff]  ;;  %v8780_v35 = vld [vmem:[#allocation219_spill] sm:$0xff] }
 0x4f7   :  { %2746 = vrot.lane.b32.xlu0 %v2512_v47, %s3750_s4  ;;  %v2514_v25 = vadd.f32 %v8761_v55, %v2129_v38  ;;  %v7332_v47 = vpop.permute.xlu1 %3268  ;;  %v2131_v51 = vadd.f32 %v8765_v62, %v1746_v15  ;;  %v3717_v38 = vld [vmem:[%s8004_s0 + $0x320] sm:$0xff]  ;;  %v1748_v62 = vadd.f32 %v8767_v18, %v1363_v24  ;;  %v2517_v15 = vadd.f32 %v8768_v45, %v2132_v42  ;;  %v8776_v18 = vld [vmem:[#allocation54_spill] sm:$0xff] }
 0x4f8   :  { %8762 = vst [vmem:[#allocation79_spill] sm:$0xff] %v7332_v47  ;;  %v1365_v53 = vmul.f32 %v3717_v38, %v6840_v29  ;;  %v1368_v24 = vmul.f32 %v3718_v14, %v6840_v29  ;;  %v8774_v38 = vld [vmem:[#allocation132_spill] sm:$0xff]  ;;  %v8777_v45 = vld [vmem:[#allocation57_spill] sm:$0xff] }
 0x4f9   :  { %v7334_v5 = vpop.permute.xlu0 %3266  ;;  %v1751_v36 = vadd.f32 %v8774_v38, %v1366_v44  ;;  %v3720_v44 = vld [vmem:[%s8004_s0 + $0x370] sm:$0xff] }
 0x4fa   :  { %8763 = vst [vmem:[#allocation78_spill] sm:$0xff] %v7334_v5  ;;  %2752 = vrot.lane.b32.xlu1 %v2515_v9, %s3750_s4  ;;  %v2516_v9 = vadd.f32 %v8769_v50, %v2131_v51  ;;  %v8773_v5 = vld [vmem:[#allocation218_spill] sm:$0xff]  ;;  %v3719_v51 = vld [vmem:[%s8004_s0 + $0x340] sm:$0xff] }
 0x4fb   :  { %2750 = vrot.lane.b32.xlu0 %v2514_v25, %s3750_s4  ;;  %v7352_v55 = vpop.permute.xlu1 %3272  ;;  %v2133_v47 = vadd.f32 %v8773_v5, %v1748_v62  ;;  %v1367_v42 = vmul.f32 %v3719_v51, %v6840_v29  ;;  %v1750_v5 = vadd.f32 %v8775_v21, %v1365_v53  ;;  %v2519_v62 = vadd.f32 %v8776_v18, %v2134_v11  ;;  %v8782_v51 = vld [vmem:[#allocation134_spill] sm:$0xff]  ;;  %v8784_v21 = vld [vmem:[#allocation56_spill] sm:$0xff]  ;;  %v8785_v18 = vld [vmem:[#allocation59_spill] sm:$0xff] }
 0x4fc   :  { %8770 = vst [vmem:[#allocation81_spill] sm:$0xff] %v7352_v55  ;;  %v2136_v14 = vadd.f32 %v8780_v35, %v1751_v36  ;;  %v1370_v53 = vmul.f32 %v3720_v44, %v6840_v29  ;;  %v1753_v38 = vadd.f32 %v8782_v51, %v1368_v24  ;;  %v8783_v36 = vld [vmem:[#allocation135_spill] sm:$0xff]  ;;  %v8788_v35 = vld [vmem:[#allocation221_spill] sm:$0xff] }
 0x4fd   :  { %v7354_v25 = vpop.permute.xlu0 %3270  ;;  %v3722_v24 = vld [vmem:[%s8004_s0 + $0x390] sm:$0xff] }
 0x4fe   :  { %8771 = vst [vmem:[#allocation80_spill] sm:$0xff] %v7354_v25  ;;  %2756 = vrot.lane.b32.xlu1 %v2517_v15, %s3750_s4  ;;  %v2518_v15 = vadd.f32 %v8777_v45, %v2133_v47  ;;  %v8781_v25 = vld [vmem:[#allocation220_spill] sm:$0xff]  ;;  %v3721_v47 = vld [vmem:[%s8004_s0 + $0x360] sm:$0xff]  ;;  %v2138_v44 = vadd.f32 %v8788_v35, %v1753_v38  ;;  %v8791_v38 = vld [vmem:[#allocation139_spill] sm:$0xff] }
 0x4ff   :  { %2754 = vrot.lane.b32.xlu0 %v2516_v9, %s3750_s4  ;;  %v7372_v50 = vpop.permute.xlu1 %3276  ;;  %v2135_v55 = vadd.f32 %v8781_v25, %v1750_v5  ;;  %v1369_v11 = vmul.f32 %v3721_v47, %v6840_v29  ;;  %v1752_v25 = vadd.f32 %v8783_v36, %v1367_v42  ;;  %v2521_v5 = vadd.f32 %v8784_v21, %v2136_v14  ;;  %v8790_v47 = vld [vmem:[#allocation138_spill] sm:$0xff]  ;;  %v8793_v21 = vld [vmem:[#allocation63_spill] sm:$0xff] }
 0x500   :  { %8778 = vst [vmem:[#allocation101_spill] sm:$0xff] %v7372_v50  ;;  %v1372_v42 = vmul.f32 %v3722_v24, %v6840_v29  ;;  %v1755_v51 = vadd.f32 %v8790_v47, %v1370_v53  ;;  %v8792_v36 = vld [vmem:[#allocation58_spill] sm:$0xff]  ;;  %v8796_v35 = vld [vmem:[#allocation223_spill] sm:$0xff] }
 0x501   :  { %v7374_v9 = vpop.permute.xlu0 %3274  ;;  %v3724_v53 = vld [vmem:[%s8004_s0 + $0x3b0] sm:$0xff] }
 0x502   :  { %8779 = vst [vmem:[#allocation105_spill] sm:$0xff] %v7374_v9  ;;  %2760 = vrot.lane.b32.xlu1 %v2519_v62, %s3750_s4  ;;  %v2520_v62 = vadd.f32 %v8785_v18, %v2135_v55  ;;  %v8789_v9 = vld [vmem:[#allocation222_spill] sm:$0xff]  ;;  %v3723_v55 = vld [vmem:[%s8004_s0 + $0x380] sm:$0xff]  ;;  %v2140_v24 = vadd.f32 %v8796_v35, %v1755_v51 }
 0x503   :  { %2758 = vrot.lane.b32.xlu0 %v2518_v15, %s3750_s4  ;;  %v7392_v45 = vpop.permute.xlu1 %3280  ;;  %v2137_v50 = vadd.f32 %v8789_v9, %v1752_v25  ;;  %v1371_v14 = vmul.f32 %v3723_v55, %v6840_v29  ;;  %v1754_v9 = vadd.f32 %v8791_v38, %v1369_v11  ;;  %v2523_v25 = vadd.f32 %v8792_v36, %v2138_v44  ;;  %v8798_v55 = vld [vmem:[#allocation140_spill] sm:$0xff]  ;;  %v8799_v51 = vld [vmem:[#allocation141_spill] sm:$0xff] }
 0x504   :  { %8786 = vst [vmem:[#allocation85_spill] sm:$0xff] %v7392_v45  ;;  %v1374_v11 = vmul.f32 %v3724_v53, %v6840_v29  ;;  %v1757_v47 = vadd.f32 %v8798_v55, %v1372_v42  ;;  %v8800_v38 = vld [vmem:[#allocation60_spill] sm:$0xff]  ;;  %v8801_v36 = vld [vmem:[#allocation65_spill] sm:$0xff]  ;;  %v3726_v42 = vld [vmem:[%s8004_s0 + $0x3d0] sm:$0xff] }
 0x505   :  { %v7394_v15 = vpop.permute.xlu0 %3278  ;;  %v8804_v35 = vld [vmem:[#allocation225_spill] sm:$0xff] }
 0x506   :  { %8787 = vst [vmem:[#allocation84_spill] sm:$0xff] %v7394_v15  ;;  %2764 = vrot.lane.b32.xlu1 %v2521_v5, %s3750_s4  ;;  %v2522_v5 = vadd.f32 %v8793_v21, %v2137_v50  ;;  %v8797_v15 = vld [vmem:[#allocation224_spill] sm:$0xff]  ;;  %v3725_v50 = vld [vmem:[%s8004_s0 + $0x3a0] sm:$0xff]  ;;  %v2142_v53 = vadd.f32 %v8804_v35, %v1757_v47  ;;  %v8807_v47 = vld [vmem:[#allocation143_spill] sm:$0xff] }
 0x507   :  { %2762 = vrot.lane.b32.xlu0 %v2520_v62, %s3750_s4  ;;  %v7412_v18 = vpop.permute.xlu1 %3284  ;;  %v2139_v45 = vadd.f32 %v8797_v15, %v1754_v9  ;;  %v1373_v44 = vmul.f32 %v3725_v50, %v6840_v29  ;;  %v1756_v15 = vadd.f32 %v8799_v51, %v1371_v14  ;;  %v2525_v9 = vadd.f32 %v8800_v38, %v2140_v24  ;;  %v8806_v50 = vld [vmem:[#allocation142_spill] sm:$0xff]  ;;  %v8808_v51 = vld [vmem:[#allocation64_spill] sm:$0xff]  ;;  %v8809_v38 = vld [vmem:[#allocation67_spill] sm:$0xff] }
 0x508   :  { %8794 = vst [vmem:[#allocation148_spill] sm:$0xff] %v7412_v18  ;;  %v1376_v14 = vmul.f32 %v3726_v42, %v6840_v29  ;;  %v1759_v55 = vadd.f32 %v8806_v50, %v1374_v11  ;;  %v8812_v35 = vld [vmem:[#allocation227_spill] sm:$0xff]  ;;  %v8814_v11 = vld [vmem:[#allocation144_spill] sm:$0xff] }
 0x509   :  { %v7414_v62 = vpop.permute.xlu0 %3282 }
 0x50a   :  { %8795 = vst [vmem:[#allocation149_spill] sm:$0xff] %v7414_v62  ;;  %2768 = vrot.lane.b32.xlu1 %v2523_v25, %s3750_s4  ;;  %v2524_v25 = vadd.f32 %v8801_v36, %v2139_v45  ;;  %v8805_v62 = vld [vmem:[#allocation226_spill] sm:$0xff]  ;;  %v3727_v45 = vld [vmem:[%s8004_s0 + $0x3c0] sm:$0xff]  ;;  %v2144_v42 = vadd.f32 %v8812_v35, %v1759_v55 }
 0x50b   :  { %2766 = vrot.lane.b32.xlu0 %v2522_v5, %s3750_s4  ;;  %v7432_v21 = vpop.permute.xlu1 %3288  ;;  %v2141_v18 = vadd.f32 %v8805_v62, %v1756_v15  ;;  %v1375_v24 = vmul.f32 %v3727_v45, %v6840_v29  ;;  %v1758_v62 = vadd.f32 %v8807_v47, %v1373_v44  ;;  %v2527_v15 = vadd.f32 %v8808_v51, %v2142_v53  ;;  %v3728_v44 = vld [vmem:[%s8004_s0 + $0x3f0] sm:$0xff]  ;;  %v3729_v53 = vld [vmem:[%s8004_s0 + $0x3e0] sm:$0xff]  ;;  %v8816_v47 = vld [vmem:[#allocation66_spill] sm:$0xff] }
 0x50c   :  { %8802 = vst [vmem:[#allocation100_spill] sm:$0xff] %v7432_v21  ;;  %v1761_v45 = vadd.f32 %v8814_v11, %v1376_v14  ;;  %v1377_v50 = vmul.f32 %v3729_v53, %v6840_v29  ;;  %v8817_v51 = vld [vmem:[#allocation69_spill] sm:$0xff]  ;;  %v8819_v11 = vld [vmem:[#allocation32_spill] sm:$0xff] }
 0x50d   :  { %v7434_v5 = vpop.permute.xlu0 %3286  ;;  %v8822_v53 = vld [vmem:[#allocation72_spill] sm:$0xff] }
 0x50e   :  { %8803 = vst [vmem:[#allocation104_spill] sm:$0xff] %v7434_v5  ;;  %2772 = vrot.lane.b32.xlu1 %v2525_v9, %s3750_s4  ;;  %v2526_v9 = vadd.f32 %v8809_v38, %v2141_v18  ;;  %v8813_v5 = vld [vmem:[#allocation228_spill] sm:$0xff]  ;;  %v1378_v18 = vmul.f32 %v3728_v44, %v6840_v29 }
 0x50f   :  { %2770 = vrot.lane.b32.xlu0 %v2524_v25, %s3750_s4  ;;  %v2143_v21 = vadd.f32 %v8813_v5, %v1758_v62  ;;  %v8815_v5 = vld [vmem:[#allocation145_spill] sm:$0xff]  ;;  %v2529_v62 = vadd.f32 %v8816_v47, %v2144_v42 }
 0x510   :  { %v7452_v36 = vpop.permute.xlu1 %3292  ;;  %v1760_v55 = vadd.f32 %v8815_v5, %v1375_v24  ;;  %v8826_v5 = vld [vmem:[#allocation71_spill] sm:$0xff] }
 0x511   :  { %8810 = vst [vmem:[#allocation150_spill] sm:$0xff] %v7452_v36  ;;  %v7454_v25 = vpop.permute.xlu0 %3290 }
 0x512   :  { %8811 = vst [vmem:[#allocation106_spill] sm:$0xff] %v7454_v25  ;;  %2776 = vrot.lane.b32.xlu1 %v2527_v15, %s3750_s4  ;;  %v2528_v15 = vadd.f32 %v8817_v51, %v2143_v21  ;;  %v8820_v25 = vld [vmem:[#allocation5_spill] sm:$0xff]  ;;  %v2145_v29 = vadd.f32 %v8821_v16, %v1760_v55  ;;  %v8823_v21 = vld [vmem:[#allocation146_spill] sm:$0xff]  ;;  %v8827_v51 = vld [vmem:[#allocation28_spill] sm:$0xff] }
 0x513   :  { %2774 = vrot.lane.b32.xlu0 %v2526_v9, %s3750_s4  ;;  %v8818_v9 = vld [vmem:[#allocation229_spill] sm:$0xff] }
 0x514   :  { %v2665_v14 = vpop.permute.xlu1 %2664  ;;  %v2146_v35 = vadd.f32 %v8818_v9, %v1761_v45  ;;  %v1763_v45 = vadd.f32 %v8823_v21, %v1378_v18  ;;  %v2530_v55 = vadd.f32 %v8826_v5, %v2145_v29  ;;  %v8833_v21 = vld [vmem:[#allocation19_spill] sm:$0xff] }
 0x515   :  { %v2663_v38 = vpop.permute.xlu0 %2662  ;;  %v3368_v44 = vsel %vm3366_vm3, %v2665_v14, %v8819_v11  ;;  %v8830_v11 = vld [vmem:[#allocation231_spill] sm:$0xff] }
 0x516   :  { %v3367_v36 = vsel %vm3366_vm3, %v2663_v38, %v8820_v25  ;;  %v3433_v24 = vsel %vm3431_vm4, %v3368_v44, %v6870_v10  ;;  %2780 = vrot.lane.b32.xlu1 %v2529_v62, %s3750_s4  ;;  %v8824_v10 = vld [vmem:[#allocation147_spill] sm:$0xff]  ;;  %v8825_v25 = vld [vmem:[#allocation68_spill] sm:$0xff]  ;;  %v2148_v18 = vadd.f32 %v8827_v51, %v1763_v45  ;;  %v8829_v38 = vld [vmem:[#allocation30_spill] sm:$0xff] }
 0x517   :  { %v3432_v42 = vsel %vm3431_vm4, %v3367_v36, %v8822_v53  ;;  %2778 = vrot.lane.b32.xlu0 %v2528_v15, %s3750_s4  ;;  %3498 = vst.msk [vmem:[%s8007_s3 + $0x8] sm:$0xff] %vm3496_vm5, %v3433_v24  ;;  %v1762_v16 = vadd.f32 %v8824_v10, %v1377_v50  ;;  %v2531_v36 = vadd.f32 %v8825_v25, %v2146_v35  ;;  %v8828_v15 = vld [vmem:[#allocation33_spill] sm:$0xff]  ;;  %v8831_v35 = vld [vmem:[#allocation70_spill] sm:$0xff]  ;;  %v8837_v51 = vld [vmem:[#allocation36_spill] sm:$0xff] }
 0x518   :  { %3497 = vst.msk [vmem:[%s8007_s3] sm:$0xff] %vm3496_vm5, %v3432_v42  ;;  %v2669_v47 = vpop.permute.xlu1 %2668  ;;  %v2533_v29 = vadd.f32 %v8831_v35, %v2148_v18  ;;  %v8834_v10 = vld [vmem:[#allocation17_spill] sm:$0xff]  ;;  %v8841_v35 = vld [vmem:[#allocation40_spill] sm:$0xff] }
 0x519   :  { %v2667_v62 = vpop.permute.xlu0 %2666  ;;  %v3370_v14 = vsel %vm3366_vm3, %v2669_v47, %v8828_v15  ;;  %v2147_v44 = vadd.f32 %v8830_v11, %v1762_v16  ;;  %v8838_v15 = vld [vmem:[#allocation35_spill] sm:$0xff] }
 0x51a   :  { %v3369_v9 = vsel %vm3366_vm3, %v2667_v62, %v8829_v38  ;;  %v3435_v24 = vsel %vm3431_vm4, %v3370_v14, %v6892_v7  ;;  %2784 = vrot.lane.b32.xlu1 %v2531_v36, %s3750_s4  ;;  %v8832_v7 = vld [vmem:[#allocation73_spill] sm:$0xff]  ;;  %v8836_v62 = vld [vmem:[#allocation86_spill] sm:$0xff] }
 0x51b   :  { %v3434_v50 = vsel %vm3431_vm4, %v3369_v9, %v6894_v61  ;;  %2782 = vrot.lane.b32.xlu0 %v2530_v55, %s3750_s4  ;;  %3500 = vst.msk [vmem:[%s8007_s3 + $0x18] sm:$0xff] %vm3496_vm5, %v3435_v24  ;;  %v2532_v53 = vadd.f32 %v8832_v7, %v2147_v44  ;;  %v8842_v7 = vld [vmem:[#allocation39_spill] sm:$0xff] }
 0x51c   :  { %3499 = vst.msk [vmem:[%s8007_s3 + $0x10] sm:$0xff] %vm3496_vm5, %v3434_v50  ;;  %v2673_v42 = vpop.permute.xlu1 %2672  ;;  %v8840_v50 = vld [vmem:[#allocation88_spill] sm:$0xff] }
 0x51d   :  { %v2671_v61 = vpop.permute.xlu0 %2670  ;;  %v3372_v45 = vsel %vm3366_vm3, %v2673_v42, %v8833_v21 }
 0x51e   :  { %v3371_v16 = vsel %vm3366_vm3, %v2671_v61, %v8834_v10  ;;  %v3437_v25 = vsel %vm3431_vm4, %v3372_v45, %v6912_v59  ;;  %2788 = vrot.lane.b32.xlu1 %v2533_v29, %s3750_s4  ;;  %v8835_v59 = vld [vmem:[#allocation87_spill] sm:$0xff] }
 0x51f   :  { %v3436_v36 = vsel %vm3431_vm4, %v3371_v16, %v6914_v22  ;;  %2786 = vrot.lane.b32.xlu0 %v2532_v53, %s3750_s4  ;;  %3502 = vst.msk [vmem:[%s8007_s3 + $0x28] sm:$0xff] %vm3496_vm5, %v3437_v25  ;;  %v2595_v47 = vmax.f32 %v8835_v59, 0.0  ;;  %v2594_v22 = vmax.f32 %v8836_v62, 0.0  ;;  %v8845_v59 = vld [vmem:[#allocation62_spill] sm:$0xff]  ;;  %v8846_v62 = vld [vmem:[#allocation61_spill] sm:$0xff] }
 0x520   :  { %3501 = vst.msk [vmem:[%s8007_s3 + $0x20] sm:$0xff] %vm3496_vm5, %v3436_v36  ;;  %v2677_v5 = vpop.permute.xlu1 %2676 }
 0x521   :  { %v2675_v55 = vpop.permute.xlu0 %2674  ;;  %v3374_v18 = vsel %vm3366_vm3, %v2677_v5, %v8837_v51 }
 0x522   :  { %v3373_v14 = vsel %vm3366_vm3, %v2675_v55, %v8838_v15  ;;  %v3439_v38 = vsel %vm3431_vm4, %v3374_v18, %v6932_v60  ;;  %3296 = vrot.lane.b32.xlu1 %v2595_v47, %s3746_s12  ;;  %v8839_v60 = vld [vmem:[#allocation47_spill] sm:$0xff] }
 0x523   :  { %v3438_v9 = vsel %vm3431_vm4, %v3373_v14, %v6934_v12  ;;  %3294 = vrot.lane.b32.xlu0 %v2594_v22, %s3746_s12  ;;  %3504 = vst.msk [vmem:[%s8007_s3 + $0x38] sm:$0xff] %vm3496_vm5, %v3439_v38  ;;  %v2597_v24 = vmax.f32 %v8839_v60, 0.0  ;;  %v2596_v12 = vmax.f32 %v8840_v50, 0.0  ;;  %v8847_v15 = vld [vmem:[#allocation91_spill] sm:$0xff]  ;;  %v8848_v38 = vld [vmem:[#allocation90_spill] sm:$0xff]  ;;  %v8849_v60 = vld [vmem:[#allocation117_spill] sm:$0xff] }
 0x524   :  { %3503 = vst.msk [vmem:[%s8007_s3 + $0x30] sm:$0xff] %vm3496_vm5, %v3438_v9  ;;  %v2681_v11 = vpop.permute.xlu1 %2680  ;;  %v8850_v50 = vld [vmem:[#allocation116_spill] sm:$0xff] }
 0x525   :  { %v2679_v44 = vpop.permute.xlu0 %2678  ;;  %v3376_v29 = vsel %vm3366_vm3, %v2681_v11, %v8841_v35 }
 0x526   :  { %v3375_v53 = vsel %vm3366_vm3, %v2679_v44, %v8842_v7  ;;  %v3441_v42 = vsel %vm3431_vm4, %v3376_v29, %v6952_v19  ;;  %3300 = vrot.lane.b32.xlu1 %v2597_v24, %s3746_s12  ;;  %v8843_v19 = vld [vmem:[#allocation44_spill] sm:$0xff]  ;;  %v8851_v7 = vld [vmem:[#allocation137_spill] sm:$0xff] }
 0x527   :  { %v3440_v61 = vsel %vm3431_vm4, %v3375_v53, %v6954_v37  ;;  %3298 = vrot.lane.b32.xlu0 %v2596_v12, %s3746_s12  ;;  %3506 = vst.msk [vmem:[%s8007_s3 + $0x48] sm:$0xff] %vm3496_vm5, %v3441_v42  ;;  %v8844_v37 = vld [vmem:[#allocation43_spill] sm:$0xff]  ;;  %v8852_v42 = vld [vmem:[#allocation136_spill] sm:$0xff] }
 0x528   :  { %3505 = vst.msk [vmem:[%s8007_s3 + $0x40] sm:$0xff] %vm3496_vm5, %v3440_v61  ;;  %v2685_v21 = vpop.permute.xlu1 %2684 }
 0x529   :  { %v2683_v45 = vpop.permute.xlu0 %2682  ;;  %v3378_v10 = vsel %vm3366_vm3, %v2685_v21, %v8843_v19  ;;  %v8853_v19 = vld [vmem:[#allocation16_spill] sm:$0xff] }
 0x52a   :  { %v3377_v16 = vsel %vm3366_vm3, %v2683_v45, %v8844_v37  ;;  %v3443_v25 = vsel %vm3431_vm4, %v3378_v10, %v6972_v30  ;;  %v8854_v37 = vld [vmem:[#allocation14_spill] sm:$0xff] }
 0x52b   :  { %v3442_v36 = vsel %vm3431_vm4, %v3377_v16, %v6974_v63  ;;  %3508 = vst.msk [vmem:[%s8007_s3 + $0x58] sm:$0xff] %vm3496_vm5, %v3443_v25 }
 0x52c   :  { %3507 = vst.msk [vmem:[%s8007_s3 + $0x50] sm:$0xff] %vm3496_vm5, %v3442_v36  ;;  %v2689_v5 = vpop.permute.xlu1 %2688 }
 0x52d   :  { %v2687_v55 = vpop.permute.xlu0 %2686  ;;  %v3380_v47 = vsel %vm3366_vm3, %v2689_v5, %v8845_v59  ;;  %v8855_v5 = vld [vmem:[#allocation163_spill] sm:$0xff]  ;;  %v8856_v59 = vld [vmem:[#allocation162_spill] sm:$0xff] }
 0x52e   :  { %v3379_v30 = vsel %vm3366_vm3, %v2687_v55, %v8846_v62  ;;  %v3445_v63 = vsel %vm3431_vm4, %v3380_v47, %v6992_v20 }
 0x52f   :  { %v3444_v22 = vsel %vm3431_vm4, %v3379_v30, %v6994_v33  ;;  %3510 = vst.msk [vmem:[%s8007_s3 + $0x68] sm:$0xff] %vm3496_vm5, %v3445_v63  ;;  %v8857_v63 = vld [vmem:[#allocation171_spill] sm:$0xff] }
 0x530   :  { %3509 = vst.msk [vmem:[%s8007_s3 + $0x60] sm:$0xff] %vm3496_vm5, %v3444_v22  ;;  %v2693_v51 = vpop.permute.xlu1 %2692 }
 0x531   :  { %v2691_v18 = vpop.permute.xlu0 %2690  ;;  %v3382_v14 = vsel %vm3366_vm3, %v2693_v51, %v8847_v15  ;;  %v8858_v51 = vld [vmem:[#allocation170_spill] sm:$0xff] }
 0x532   :  { %v3381_v20 = vsel %vm3366_vm3, %v2691_v18, %v8848_v38  ;;  %v3447_v33 = vsel %vm3431_vm4, %v3382_v14, %v7012_v57  ;;  %v8859_v38 = vld [vmem:[#allocation175_spill] sm:$0xff] }
 0x533   :  { %v3446_v9 = vsel %vm3431_vm4, %v3381_v20, %v7014_v41  ;;  %3512 = vst.msk [vmem:[%s8007_s3 + $0x78] sm:$0xff] %vm3496_vm5, %v3447_v33  ;;  %v8860_v33 = vld [vmem:[#allocation174_spill] sm:$0xff] }
 0x534   :  { %3511 = vst.msk [vmem:[%s8007_s3 + $0x70] sm:$0xff] %vm3496_vm5, %v3446_v9  ;;  %v2697_v11 = vpop.permute.xlu1 %2696 }
 0x535   :  { %v2695_v44 = vpop.permute.xlu0 %2694  ;;  %v3384_v24 = vsel %vm3366_vm3, %v2697_v11, %v8849_v60  ;;  %v8861_v60 = vld [vmem:[#allocation93_spill] sm:$0xff] }
 0x536   :  { %v3383_v57 = vsel %vm3366_vm3, %v2695_v44, %v8850_v50  ;;  %v3449_v41 = vsel %vm3431_vm4, %v3384_v24, %v7032_v0  ;;  %v8862_v50 = vld [vmem:[#allocation92_spill] sm:$0xff] }
 0x537   :  { %v3448_v12 = vsel %vm3431_vm4, %v3383_v57, %v7034_v58  ;;  %3514 = vst.msk [vmem:[%s8007_s3 + $0x88] sm:$0xff] %vm3496_vm5, %v3449_v41 }
 0x538   :  { %3513 = vst.msk [vmem:[%s8007_s3 + $0x80] sm:$0xff] %vm3496_vm5, %v3448_v12  ;;  %v2701_v35 = vpop.permute.xlu1 %2700 }
 0x539   :  { %v2699_v29 = vpop.permute.xlu0 %2698  ;;  %v3386_v53 = vsel %vm3366_vm3, %v2701_v35, %v8851_v7  ;;  %v8863_v35 = vld [vmem:[#allocation97_spill] sm:$0xff]  ;;  %v8864_v7 = vld [vmem:[#allocation96_spill] sm:$0xff] }
 0x53a   :  { %v3385_v0 = vsel %vm3366_vm3, %v2699_v29, %v8852_v42  ;;  %v3451_v58 = vsel %vm3431_vm4, %v3386_v53, %v7052_v48 }
 0x53b   :  { %v3450_v61 = vsel %vm3431_vm4, %v3385_v0, %v7054_v34  ;;  %3516 = vst.msk [vmem:[%s8007_s3 + $0x98] sm:$0xff] %vm3496_vm5, %v3451_v58  ;;  %v8865_v58 = vld [vmem:[#allocation29_spill] sm:$0xff] }
 0x53c   :  { %3515 = vst.msk [vmem:[%s8007_s3 + $0x90] sm:$0xff] %vm3496_vm5, %v3450_v61  ;;  %v2705_v21 = vpop.permute.xlu1 %2704 }
 0x53d   :  { %v2703_v45 = vpop.permute.xlu0 %2702  ;;  %v3388_v10 = vsel %vm3366_vm3, %v2705_v21, %v8853_v19  ;;  %v8866_v21 = vld [vmem:[#allocation6_spill] sm:$0xff] }
 0x53e   :  { %v3387_v48 = vsel %vm3366_vm3, %v2703_v45, %v8854_v37  ;;  %v3453_v34 = vsel %vm3431_vm4, %v3388_v10, %v7072_v13  ;;  %v8867_v37 = vld [vmem:[#allocation15_spill] sm:$0xff] }
 0x53f   :  { %v3452_v16 = vsel %vm3431_vm4, %v3387_v48, %v7074_v40  ;;  %3518 = vst.msk [vmem:[%s8007_s3 + $0xa8] sm:$0xff] %vm3496_vm5, %v3453_v34  ;;  %v8868_v34 = vld [vmem:[#allocation13_spill] sm:$0xff] }
 0x540   :  { %3517 = vst.msk [vmem:[%s8007_s3 + $0xa0] sm:$0xff] %vm3496_vm5, %v3452_v16  ;;  %v2709_v25 = vpop.permute.xlu1 %2708 }
 0x541   :  { %v2707_v36 = vpop.permute.xlu0 %2706  ;;  %v3390_v55 = vsel %vm3366_vm3, %v2709_v25, %v8855_v5  ;;  %v8869_v5 = vld [vmem:[#allocation34_spill] sm:$0xff] }
 0x542   :  { %v3389_v13 = vsel %vm3366_vm3, %v2707_v36, %v8856_v59  ;;  %v3455_v40 = vsel %vm3431_vm4, %v3390_v55, %v7092_v3  ;;  %v8870_v59 = vld [vmem:[#allocation31_spill] sm:$0xff] }
 0x543   :  { %v3454_v47 = vsel %vm3431_vm4, %v3389_v13, %v7094_v52  ;;  %3520 = vst.msk [vmem:[%s8007_s3 + $0xb8] sm:$0xff] %vm3496_vm5, %v3455_v40 }
 0x544   :  { %3519 = vst.msk [vmem:[%s8007_s3 + $0xb0] sm:$0xff] %vm3496_vm5, %v3454_v47  ;;  %v2713_v62 = vpop.permute.xlu1 %2712 }
 0x545   :  { %v2711_v30 = vpop.permute.xlu0 %2710  ;;  %v3392_v22 = vsel %vm3366_vm3, %v2713_v62, %v8857_v63  ;;  %v8871_v62 = vld [vmem:[#allocation38_spill] sm:$0xff]  ;;  %v8872_v63 = vld [vmem:[#allocation37_spill] sm:$0xff] }
 0x546   :  { %v3391_v3 = vsel %vm3366_vm3, %v2711_v30, %v8858_v51  ;;  %v3457_v52 = vsel %vm3431_vm4, %v3392_v22, %v7112_v17 }
 0x547   :  { %v3456_v18 = vsel %vm3431_vm4, %v3391_v3, %v7114_v8  ;;  %3522 = vst.msk [vmem:[%s8007_s3 + $0xc8] sm:$0xff] %vm3496_vm5, %v3457_v52  ;;  %v8873_v52 = vld [vmem:[#allocation42_spill] sm:$0xff] }
 0x548   :  { %3521 = vst.msk [vmem:[%s8007_s3 + $0xc0] sm:$0xff] %vm3496_vm5, %v3456_v18  ;;  %v2717_v15 = vpop.permute.xlu1 %2716 }
 0x549   :  { %v2715_v14 = vpop.permute.xlu0 %2714  ;;  %v3394_v20 = vsel %vm3366_vm3, %v2717_v15, %v8859_v38  ;;  %v8874_v15 = vld [vmem:[#allocation41_spill] sm:$0xff] }
 0x54a   :  { %v3393_v17 = vsel %vm3366_vm3, %v2715_v14, %v8860_v33  ;;  %v3459_v8 = vsel %vm3431_vm4, %v3394_v20, %v7132_v4  ;;  %v8875_v33 = vld [vmem:[#allocation46_spill] sm:$0xff] }
 0x54b   :  { %v3458_v9 = vsel %vm3431_vm4, %v3393_v17, %v7134_v27  ;;  %3524 = vst.msk [vmem:[%s8007_s3 + $0xd8] sm:$0xff] %vm3496_vm5, %v3459_v8  ;;  %v8876_v8 = vld [vmem:[#allocation45_spill] sm:$0xff] }
 0x54c   :  { %3523 = vst.msk [vmem:[%s8007_s3 + $0xd0] sm:$0xff] %vm3496_vm5, %v3458_v9  ;;  %v2721_v11 = vpop.permute.xlu1 %2720  ;;  %v8877_v9 = vld [vmem:[#allocation75_spill] sm:$0xff] }
 0x54d   :  { %v2719_v44 = vpop.permute.xlu0 %2718  ;;  %v3396_v24 = vsel %vm3366_vm3, %v2721_v11, %v8861_v60  ;;  %v8878_v11 = vld [vmem:[#allocation74_spill] sm:$0xff] }
 0x54e   :  { %v3395_v4 = vsel %vm3366_vm3, %v2719_v44, %v8862_v50  ;;  %v3461_v27 = vsel %vm3431_vm4, %v3396_v24, %v7152_v39  ;;  %v8879_v50 = vld [vmem:[#allocation83_spill] sm:$0xff] }
 0x54f   :  { %v3460_v57 = vsel %vm3431_vm4, %v3395_v4, %v7154_v28  ;;  %3526 = vst.msk [vmem:[%s8007_s3 + $0xe8] sm:$0xff] %vm3496_vm5, %v3461_v27  ;;  %v8880_v27 = vld [vmem:[#allocation82_spill] sm:$0xff] }
 0x550   :  { %3525 = vst.msk [vmem:[%s8007_s3 + $0xe0] sm:$0xff] %vm3496_vm5, %v3460_v57  ;;  %v2725_v41 = vpop.permute.xlu1 %2724 }
 0x551   :  { %v2723_v12 = vpop.permute.xlu0 %2722  ;;  %v3398_v29 = vsel %vm3366_vm3, %v2725_v41, %v8863_v35  ;;  %v8881_v41 = vld [vmem:[#allocation77_spill] sm:$0xff]  ;;  %v8882_v35 = vld [vmem:[#allocation76_spill] sm:$0xff] }
 0x552   :  { %v3397_v39 = vsel %vm3366_vm3, %v2723_v12, %v8864_v7  ;;  %v3463_v28 = vsel %vm3431_vm4, %v3398_v29, %v7172_v49 }
 0x553   :  { %v3462_v53 = vsel %vm3431_vm4, %v3397_v39, %v7174_v26  ;;  %3528 = vst.msk [vmem:[%s8007_s3 + $0xf8] sm:$0xff] %vm3496_vm5, %v3463_v28  ;;  %v8883_v28 = vld [vmem:[#allocation111_spill] sm:$0xff] }
 0x554   :  { %3527 = vst.msk [vmem:[%s8007_s3 + $0xf0] sm:$0xff] %vm3496_vm5, %v3462_v53  ;;  %v2729_v42 = vpop.permute.xlu1 %2728 }
 0x555   :  { %v2727_v0 = vpop.permute.xlu0 %2726  ;;  %v3400_v61 = vsel %vm3366_vm3, %v2729_v42, %v8865_v58  ;;  %v8884_v42 = vld [vmem:[#allocation110_spill] sm:$0xff]  ;;  %v8885_v58 = vld [vmem:[#allocation79_spill] sm:$0xff] }
 0x556   :  { %v3399_v49 = vsel %vm3366_vm3, %v2727_v0, %v8866_v21  ;;  %v3465_v26 = vsel %vm3431_vm4, %v3400_v61, %v7192_v56  ;;  %v8886_v21 = vld [vmem:[#allocation78_spill] sm:$0xff] }
 0x557   :  { %v3464_v45 = vsel %vm3431_vm4, %v3399_v49, %v7194_v31  ;;  %3530 = vst.msk [vmem:[%s8007_s3 + $0x108] sm:$0xff] %vm3496_vm5, %v3465_v26 }
 0x558   :  { %3529 = vst.msk [vmem:[%s8007_s3 + $0x100] sm:$0xff] %vm3496_vm5, %v3464_v45  ;;  %v2733_v19 = vpop.permute.xlu1 %2732 }
 0x559   :  { %v2731_v10 = vpop.permute.xlu0 %2730  ;;  %v3402_v48 = vsel %vm3366_vm3, %v2733_v19, %v8867_v37  ;;  %v8887_v19 = vld [vmem:[#allocation121_spill] sm:$0xff]  ;;  %v8888_v37 = vld [vmem:[#allocation120_spill] sm:$0xff] }
 0x55a   :  { %v3401_v56 = vsel %vm3366_vm3, %v2731_v10, %v8868_v34  ;;  %v3467_v31 = vsel %vm3431_vm4, %v3402_v48, %v7212_v43  ;;  %v8889_v34 = vld [vmem:[#allocation81_spill] sm:$0xff] }
 0x55b   :  { %v3466_v16 = vsel %vm3431_vm4, %v3401_v56, %v7214_v1  ;;  %3532 = vst.msk [vmem:[%s8007_s3 + $0x118] sm:$0xff] %vm3496_vm5, %v3467_v31  ;;  %v8890_v31 = vld [vmem:[#allocation80_spill] sm:$0xff] }
 0x55c   :  { %3531 = vst.msk [vmem:[%s8007_s3 + $0x110] sm:$0xff] %vm3496_vm5, %v3466_v16  ;;  %v2737_v25 = vpop.permute.xlu1 %2736 }
 0x55d   :  { %v2735_v36 = vpop.permute.xlu0 %2734  ;;  %v3404_v55 = vsel %vm3366_vm3, %v2737_v25, %v8869_v5  ;;  %v8891_v5 = vld [vmem:[#allocation157_spill] sm:$0xff] }
 0x55e   :  { %v3403_v43 = vsel %vm3366_vm3, %v2735_v36, %v8870_v59  ;;  %v3469_v1 = vsel %vm3431_vm4, %v3404_v55, %v7232_v23  ;;  %v8892_v59 = vld [vmem:[#allocation156_spill] sm:$0xff] }
 0x55f   :  { %v3468_v13 = vsel %vm3431_vm4, %v3403_v43, %v7234_v32  ;;  %3534 = vst.msk [vmem:[%s8007_s3 + $0x128] sm:$0xff] %vm3496_vm5, %v3469_v1  ;;  %v8893_v1 = vld [vmem:[#allocation101_spill] sm:$0xff] }
 0x560   :  { %3533 = vst.msk [vmem:[%s8007_s3 + $0x120] sm:$0xff] %vm3496_vm5, %v3468_v13  ;;  %v2741_v40 = vpop.permute.xlu1 %2740 }
 0x561   :  { %v2739_v47 = vpop.permute.xlu0 %2738  ;;  %v3406_v30 = vsel %vm3366_vm3, %v2741_v40, %v8871_v62  ;;  %v8894_v40 = vld [vmem:[#allocation105_spill] sm:$0xff] }
 0x562   :  { %v3405_v23 = vsel %vm3366_vm3, %v2739_v47, %v8872_v63  ;;  %v3471_v32 = vsel %vm3431_vm4, %v3406_v30, %v7252_v54  ;;  %v8895_v63 = vld [vmem:[#allocation27_spill] sm:$0xff] }
 0x563   :  { %v3470_v22 = vsel %vm3431_vm4, %v3405_v23, %v7254_v46  ;;  %3536 = vst.msk [vmem:[%s8007_s3 + $0x138] sm:$0xff] %vm3496_vm5, %v3471_v32  ;;  %v8896_v32 = vld [vmem:[#allocation18_spill] sm:$0xff] }
 0x564   :  { %3535 = vst.msk [vmem:[%s8007_s3 + $0x130] sm:$0xff] %vm3496_vm5, %v3470_v22  ;;  %v2745_v51 = vpop.permute.xlu1 %2744 }
 0x565   :  { %v2743_v3 = vpop.permute.xlu0 %2742  ;;  %v3408_v18 = vsel %vm3366_vm3, %v2745_v51, %v8873_v52  ;;  %v8897_v51 = vld [vmem:[#allocation85_spill] sm:$0xff]  ;;  %v8898_v52 = vld [vmem:[#allocation84_spill] sm:$0xff] }
 0x566   :  { %v3407_v54 = vsel %vm3366_vm3, %v2743_v3, %v8874_v15  ;;  %v3473_v46 = vsel %vm3431_vm4, %v3408_v18, %v7272_v2 }
 0x567   :  { %v3472_v14 = vsel %vm3431_vm4, %v3407_v54, %v7274_v6  ;;  %3538 = vst.msk [vmem:[%s8007_s3 + $0x148] sm:$0xff] %vm3496_vm5, %v3473_v46  ;;  %v8899_v46 = vld [vmem:[#allocation169_spill] sm:$0xff] }
 0x568   :  { %3537 = vst.msk [vmem:[%s8007_s3 + $0x140] sm:$0xff] %vm3496_vm5, %v3472_v14  ;;  %v2749_v38 = vpop.permute.xlu1 %2748 }
 0x569   :  { %v2747_v20 = vpop.permute.xlu0 %2746  ;;  %v3410_v17 = vsel %vm3366_vm3, %v2749_v38, %v8875_v33  ;;  %v8900_v38 = vld [vmem:[#allocation168_spill] sm:$0xff] }
 0x56a   :  { %v3409_v2 = vsel %vm3366_vm3, %v2747_v20, %v8876_v8  ;;  %v3475_v6 = vsel %vm3431_vm4, %v3410_v17, %v8877_v9  ;;  %v8901_v33 = vld [vmem:[#allocation148_spill] sm:$0xff]  ;;  %v8902_v8 = vld [vmem:[#allocation149_spill] sm:$0xff] }
 0x56b   :  { %v3474_v44 = vsel %vm3431_vm4, %v3409_v2, %v8878_v11  ;;  %3540 = vst.msk [vmem:[%s8007_s3 + $0x158] sm:$0xff] %vm3496_vm5, %v3475_v6  ;;  %v8903_v11 = vld [vmem:[#allocation173_spill] sm:$0xff] }
 0x56c   :  { %3539 = vst.msk [vmem:[%s8007_s3 + $0x150] sm:$0xff] %vm3496_vm5, %v3474_v44  ;;  %v2753_v60 = vpop.permute.xlu1 %2752 }
 0x56d   :  { %v2751_v24 = vpop.permute.xlu0 %2750  ;;  %v3412_v4 = vsel %vm3366_vm3, %v2753_v60, %v8879_v50  ;;  %v8904_v60 = vld [vmem:[#allocation172_spill] sm:$0xff] }
 0x56e   :  { %v3411_v57 = vsel %vm3366_vm3, %v2751_v24, %v8880_v27  ;;  %v3477_v12 = vsel %vm3431_vm4, %v3412_v4, %v8881_v41  ;;  %v8905_v50 = vld [vmem:[#allocation100_spill] sm:$0xff] }
 0x56f   :  { %v3476_v29 = vsel %vm3431_vm4, %v3411_v57, %v8882_v35  ;;  %3542 = vst.msk [vmem:[%s8007_s3 + $0x168] sm:$0xff] %vm3496_vm5, %v3477_v12  ;;  %v8906_v27 = vld [vmem:[#allocation104_spill] sm:$0xff] }
 0x570   :  { %3541 = vst.msk [vmem:[%s8007_s3 + $0x160] sm:$0xff] %vm3496_vm5, %v3476_v29  ;;  %v2757_v7 = vpop.permute.xlu1 %2756  ;;  %v8907_v35 = vld [vmem:[#allocation176_spill] sm:$0xff] }
 0x571   :  { %v2755_v39 = vpop.permute.xlu0 %2754  ;;  %v3414_v53 = vsel %vm3366_vm3, %v2757_v7, %v8883_v28  ;;  %v8908_v7 = vld [vmem:[#allocation89_spill] sm:$0xff]  ;;  %v8909_v28 = vld [vmem:[#allocation150_spill] sm:$0xff] }
 0x572   :  { %v3413_v0 = vsel %vm3366_vm3, %v2755_v39, %v8884_v42  ;;  %v3479_v61 = vsel %vm3431_vm4, %v3414_v53, %v8885_v58  ;;  %v8910_v42 = vld [vmem:[#allocation106_spill] sm:$0xff] }
 0x573   :  { %v3478_v49 = vsel %vm3431_vm4, %v3413_v0, %v8886_v21  ;;  %3544 = vst.msk [vmem:[%s8007_s3 + $0x178] sm:$0xff] %vm3496_vm5, %v3479_v61 }
 0x574   :  { %3543 = vst.msk [vmem:[%s8007_s3 + $0x170] sm:$0xff] %vm3496_vm5, %v3478_v49  ;;  %v2761_v26 = vpop.permute.xlu1 %2760 }
 0x575   :  { %v2759_v45 = vpop.permute.xlu0 %2758  ;;  %v3416_v10 = vsel %vm3366_vm3, %v2761_v26, %v8887_v19  ;;  %v8911_v26 = vld [vmem:[#allocation95_spill] sm:$0xff]  ;;  %v8912_v19 = vld [vmem:[#allocation94_spill] sm:$0xff] }
 0x576   :  { %v3415_v48 = vsel %vm3366_vm3, %v2759_v45, %v8888_v37  ;;  %v3481_v56 = vsel %vm3431_vm4, %v3416_v10, %v8889_v34 }
 0x577   :  { %v3480_v16 = vsel %vm3431_vm4, %v3415_v48, %v8890_v31  ;;  %3546 = vst.msk [vmem:[%s8007_s3 + $0x188] sm:$0xff] %vm3496_vm5, %v3481_v56  ;;  %v8913_v31 = vld [vmem:[#allocation99_spill] sm:$0xff] }
 0x578   :  { %3545 = vst.msk [vmem:[%s8007_s3 + $0x180] sm:$0xff] %vm3496_vm5, %v3480_v16  ;;  %v2765_v25 = vpop.permute.xlu1 %2764 }
 0x579   :  { %v2763_v36 = vpop.permute.xlu0 %2762  ;;  %v3418_v55 = vsel %vm3366_vm3, %v2765_v25, %v8891_v5  ;;  %v8914_v25 = vld [vmem:[#allocation98_spill] sm:$0xff] }
 0x57a   :  { %v3417_v43 = vsel %vm3366_vm3, %v2763_v36, %v8892_v59  ;;  %v3483_v13 = vsel %vm3431_vm4, %v3418_v55, %v8893_v1 }
 0x57b   :  { %v3482_v47 = vsel %vm3431_vm4, %v3417_v43, %v8894_v40  ;;  %3548 = vst.msk [vmem:[%s8007_s3 + $0x198] sm:$0xff] %vm3496_vm5, %v3483_v13 }
 0x57c   :  { %3547 = vst.msk [vmem:[%s8007_s3 + $0x190] sm:$0xff] %vm3496_vm5, %v3482_v47  ;;  %v2769_v62 = vpop.permute.xlu1 %2768 }
 0x57d   :  { %v2767_v30 = vpop.permute.xlu0 %2766  ;;  %v3420_v23 = vsel %vm3366_vm3, %v2769_v62, %v8895_v63 }
 0x57e   :  { %v3419_v22 = vsel %vm3366_vm3, %v2767_v30, %v8896_v32  ;;  %v3485_v3 = vsel %vm3431_vm4, %v3420_v23, %v8897_v51 }
 0x57f   :  { %v3484_v18 = vsel %vm3431_vm4, %v3419_v22, %v8898_v52  ;;  %3550 = vst.msk [vmem:[%s8007_s3 + $0x1a8] sm:$0xff] %vm3496_vm5, %v3485_v3 }
 0x580   :  { %3549 = vst.msk [vmem:[%s8007_s3 + $0x1a0] sm:$0xff] %vm3496_vm5, %v3484_v18  ;;  %v2773_v15 = vpop.permute.xlu1 %2772 }
 0x581   :  { %v2771_v54 = vpop.permute.xlu0 %2770  ;;  %v3422_v14 = vsel %vm3366_vm3, %v2773_v15, %v8899_v46 }
 0x582   :  { %v3421_v20 = vsel %vm3366_vm3, %v2771_v54, %v8900_v38  ;;  %v3487_v17 = vsel %vm3431_vm4, %v3422_v14, %v8901_v33 }
 0x583   :  { %v3486_v2 = vsel %vm3431_vm4, %v3421_v20, %v8902_v8  ;;  %3552 = vst.msk [vmem:[%s8007_s3 + $0x1b8] sm:$0xff] %vm3496_vm5, %v3487_v17 }
 0x584   :  { %3551 = vst.msk [vmem:[%s8007_s3 + $0x1b0] sm:$0xff] %vm3496_vm5, %v3486_v2  ;;  %v2777_v9 = vpop.permute.xlu1 %2776 }
 0x585   :  { %v2775_v6 = vpop.permute.xlu0 %2774  ;;  %v3424_v44 = vsel %vm3366_vm3, %v2777_v9, %v8903_v11 }
 0x586   :  { %v3423_v24 = vsel %vm3366_vm3, %v2775_v6, %v8904_v60  ;;  %v3489_v4 = vsel %vm3431_vm4, %v3424_v44, %v8905_v50 }
 0x587   :  { %v3488_v57 = vsel %vm3431_vm4, %v3423_v24, %v8906_v27  ;;  %3554 = vst.msk [vmem:[%s8007_s3 + $0x1c8] sm:$0xff] %vm3496_vm5, %v3489_v4 }
 0x588   :  { %3553 = vst.msk [vmem:[%s8007_s3 + $0x1c0] sm:$0xff] %vm3496_vm5, %v3488_v57  ;;  %v2781_v41 = vpop.permute.xlu1 %2780 }
 0x589   :  { %v2779_v12 = vpop.permute.xlu0 %2778  ;;  %v3426_v29 = vsel %vm3366_vm3, %v2781_v41, %v8907_v35 }
 0x58a   :  { %v3425_v39 = vsel %vm3366_vm3, %v2779_v12, %v8908_v7  ;;  %v3491_v53 = vsel %vm3431_vm4, %v3426_v29, %v8909_v28 }
 0x58b   :  { %v3490_v0 = vsel %vm3431_vm4, %v3425_v39, %v8910_v42  ;;  %3556 = vst.msk [vmem:[%s8007_s3 + $0x1d8] sm:$0xff] %vm3496_vm5, %v3491_v53 }
 0x58c   :  { %3555 = vst.msk [vmem:[%s8007_s3 + $0x1d0] sm:$0xff] %vm3496_vm5, %v3490_v0  ;;  %v2785_v58 = vpop.permute.xlu1 %2784 }
 0x58d   :  { %v2783_v61 = vpop.permute.xlu0 %2782  ;;  %v3428_v45 = vsel %vm3366_vm3, %v2785_v58, %v8911_v26 }
 0x58e   :  { %v3427_v10 = vsel %vm3366_vm3, %v2783_v61, %v8912_v19 }
 0x590   :  { %v2789_v21 = vpop.permute.xlu1 %2788 }
 0x591   :  { %v2787_v49 = vpop.permute.xlu0 %2786  ;;  %v3430_v16 = vsel %vm3366_vm3, %v2789_v21, %v8913_v31 }
 0x592   :  { %v3429_v36 = vsel %vm3366_vm3, %v2787_v49, %v8914_v25 }
 0x594   :  { %v3297_v37 = vpop.permute.xlu1 %3296 }
 0x595   :  { %v3295_v48 = vpop.permute.xlu0 %3294  ;;  %v3493_v34 = vsel %vm3431_vm4, %v3428_v45, %v3297_v37 }
 0x596   :  { %v3492_v56 = vsel %vm3431_vm4, %v3427_v10, %v3295_v48  ;;  %3558 = vst.msk [vmem:[%s8007_s3 + $0x1e8] sm:$0xff] %vm3496_vm5, %v3493_v34 }
 0x597   :  { %3557 = vst.msk [vmem:[%s8007_s3 + $0x1e0] sm:$0xff] %vm3496_vm5, %v3492_v56 }
 0x598   :  { %v3301_v5 = vpop.permute.xlu1 %3300 }
 0x599   :  { %v3299_v55 = vpop.permute.xlu0 %3298  ;;  %v3495_v59 = vsel %vm3431_vm4, %v3430_v16, %v3301_v5 }
 0x59a   :  { %v3494_v43 = vsel %vm3431_vm4, %v3429_v36, %v3299_v55  ;;  %3560 = vst.msk [vmem:[%s8007_s3 + $0x1f8] sm:$0xff] %vm3496_vm5, %v3495_v59 }
 0x59b   :  { %3559 = vst.msk [vmem:[%s8007_s3 + $0x1f0] sm:$0xff] %vm3496_vm5, %v3494_v43 }
 0x59c   :  { %3565 = vsyncpa [#allocation3], 1 }

// kernel: cell_pcdarts_forward.11
= control target key start
LH: loop header
LB: loop body
LE: loop exit
PB: predicated region body
PF: predicated region fallthrough
CT: control target
= control target key end

     0   :  { %9 = vsyncpa [#allocation3], 0  ;;  %s4235_s0 = inlined_call_operand.vmem [shape: f32[512,120], index: 0, kind: input, shape index: {}]   ;;  %s4236_s1 = inlined_call_operand.vmem [shape: f32[512,4], index: 1, kind: input, shape index: {}]   ;;  %s4237_s2 = inlined_call_operand.vmem [shape: bf16[120,8], index: 2, kind: input, shape index: {}]   ;;  %s4238_s3 = inlined_call_operand.vmem [shape: f32[3], index: 3, kind: input, shape index: {}]   ;;  %s4239_s4 = inlined_call_operand.vmem [shape: f32[512,4], index: 4, kind: output, shape index: {}]  }
   0x1   :  { %s22_s17 = sshll.u32 %s4238_s3, 4  ;;  %s23_s17 = int_to_ptr.vmem [resolvable:$true] %s22_s17 }
   0x2   :  { %s1949_s18 = scalar_lea.vmem %s23_s17, 16  ;;  %p1954_p1 = scmp.lt.s32.totalorder %s23_s17, %s23_s17 }
   0x3   :  { %p1950_p0 = scmp.ne.s32.totalorder %s23_s17, %s1949_s18  ;;  %p1955_p2 = scmp.lt.s32.totalorder %s1949_s18, %s1949_s18 }
   0x5   :  { %p1956_p3 = por %p1955_p2, %p1954_p1 }
   0x7   :  { %p1957_p4 = pnand %p1956_p3, %p1950_p0 }
   0x9   :  { %1960 = shalt.err (!%p1957_p4)
}
   0xa   :  { %s1963_s19 = smov [#allocation2]  }
   0xb   :  { %25 = dma.vmem_to_smem %s23_s17, 16, %s1963_s19, [#allocation3]  }
   0xc   :  { %1961 = dma.done.wait [#allocation3], 16  }
   0xd   :  { %1962 = vsyncadd [#allocation3], 4294967280 }
   0xe   :  { %29 = sfence }
   0xf   :  { %v1939_v0 = vld [vmem:[%s4237_s2] sm:$0xff]   ;;  %v1940_v1 = vld [vmem:[%s4237_s2 + $0x8] sm:$0xff]   ;;  %v1941_v2 = vld [vmem:[%s4237_s2 + $0x10] sm:$0xff]   ;;  %vm187_vm0 = vcmask 982016   ;;  %vm284_vm1 = vcmask 1043456   ;;  %vm577_vm2 = vcmask 64512  }
  0x10   :  { %1839 = vmatprep.subr.bf16.mxu0 %v1939_v0  ;;  %1919 = vmatprep.subr.bf16.mxu1 %v1939_v0  ;;  %v31_v3 = vld [vmem:[%s4235_s0] sm:$0xff]  ;;  %v1942_v4 = vld [vmem:[%s4237_s2 + $0x18] sm:$0xff]   ;;  %v32_v5 = vld [vmem:[%s4235_s0 + $0x8] sm:$0xff]  ;;  %s1964_s3 = smov 124   ;;  %s1041_s24 = sld [smem:[#allocation2]]  ;;  %vm1687_vm3 = vcmask 31744  }
  0x11   :  { %1840 = vmatpush3.bf16.msra.mxu0 %v1939_v0  ;;  %1927 = vmatpush3.bf16.msra.mxu1 %v1939_v0  ;;  %v95_v6 = vpack.c.bf16 %v32_v5, %v31_v3  ;;  %v1943_v7 = vld [vmem:[%s4237_s2 + $0x20] sm:$0xff]   ;;  %v1944_v8 = vld [vmem:[%s4237_s2 + $0x28] sm:$0xff]   ;;  %v1945_v12 = vld [vmem:[%s4237_s2 + $0x30] sm:$0xff]   ;;  %s1798_s25 = sld [smem:[#allocation2 + $0x2]] }
  0x12   :  { %1841 = vmatprep.subr.bf16.mxu0 %v1940_v1  ;;  %1920 = vmatprep.subr.bf16.mxu1 %v1940_v1  ;;  %v63_v9 = vld [vmem:[%s4235_s0 + $0x100] sm:$0xff]  ;;  %v64_v10 = vld [vmem:[%s4235_s0 + $0x108] sm:$0xff]  ;;  %v1946_v13 = vld [vmem:[%s4237_s2 + $0x38] ss:$0 sps:$4 sm:$0xff]  }
  0x13   :  { %1855 = vmatprep.mubr.msk.bf16.mxu0 %vm187_vm0, %v95_v6  ;;  %v111_v11 = vpack.c.bf16 %v64_v10, %v63_v9  ;;  %v33_v14 = vld [vmem:[%s4235_s0 + $0x10] sm:$0xff]  ;;  %v34_v15 = vld [vmem:[%s4235_s0 + $0x18] sm:$0xff]  ;;  %v35_v16 = vld [vmem:[%s4235_s0 + $0x20] sm:$0xff]  ;;  %v286_v17 = vsel %vm284_vm1, %v1946_v13, 0 }
  0x14   :  { %v36_v18 = vld [vmem:[%s4235_s0 + $0x28] sm:$0xff]  ;;  %v65_v19 = vld [vmem:[%s4235_s0 + $0x110] sm:$0xff]  ;;  %v66_v20 = vld [vmem:[%s4235_s0 + $0x118] sm:$0xff]  ;;  %v96_v23 = vpack.c.bf16 %v34_v15, %v33_v14 }
  0x15   :  { %1842 = vmatpush3.bf16.msra.mxu0 %v1940_v1  ;;  %1928 = vmatpush3.bf16.msra.mxu1 %v1940_v1  ;;  %v67_v21 = vld [vmem:[%s4235_s0 + $0x120] sm:$0xff]  ;;  %v68_v22 = vld [vmem:[%s4235_s0 + $0x128] sm:$0xff]  ;;  %v97_v24 = vpack.c.bf16 %v36_v18, %v35_v16  ;;  %v112_v25 = vpack.c.bf16 %v66_v20, %v65_v19  ;;  %v37_v27 = vld [vmem:[%s4235_s0 + $0x30] sm:$0xff] }
  0x16   :  { %1843 = vmatprep.subr.bf16.mxu0 %v1941_v2  ;;  %1921 = vmatprep.subr.bf16.mxu1 %v1941_v2  ;;  %v113_v26 = vpack.c.bf16 %v68_v22, %v67_v21  ;;  %v38_v28 = vld [vmem:[%s4235_s0 + $0x38] sm:$0xff]  ;;  %v39_v29 = vld [vmem:[%s4235_s0 + $0x40] sm:$0xff]  ;;  %v40_v30 = vld [vmem:[%s4235_s0 + $0x48] sm:$0xff] }
  0x17   :  { %1887 = vmatprep.mubr.msk.bf16.mxu1 %vm187_vm0, %v111_v11  ;;  %v69_v31 = vld [vmem:[%s4235_s0 + $0x130] sm:$0xff]  ;;  %v70_v32 = vld [vmem:[%s4235_s0 + $0x138] sm:$0xff]  ;;  %v71_v33 = vld [vmem:[%s4235_s0 + $0x140] sm:$0xff]  ;;  %v98_v35 = vpack.c.bf16 %v38_v28, %v37_v27  ;;  %v99_v36 = vpack.c.bf16 %v40_v30, %v39_v29 }
  0x18   :  { %v72_v34 = vld [vmem:[%s4235_s0 + $0x148] sm:$0xff]  ;;  %v114_v37 = vpack.c.bf16 %v70_v32, %v69_v31  ;;  %v41_v39 = vld [vmem:[%s4235_s0 + $0x50] sm:$0xff]  ;;  %v42_v40 = vld [vmem:[%s4235_s0 + $0x58] sm:$0xff] }
  0x19   :  { %1844 = vmatpush3.bf16.msra.mxu0 %v1941_v2  ;;  %1929 = vmatpush3.bf16.msra.mxu1 %v1941_v2  ;;  %v115_v38 = vpack.c.bf16 %v72_v34, %v71_v33  ;;  %v43_v41 = vld [vmem:[%s4235_s0 + $0x60] sm:$0xff]  ;;  %v44_v42 = vld [vmem:[%s4235_s0 + $0x68] sm:$0xff]  ;;  %v73_v43 = vld [vmem:[%s4235_s0 + $0x150] sm:$0xff]  ;;  %v100_v47 = vpack.c.bf16 %v42_v40, %v41_v39 }
  0x1a   :  { %1845 = vmatprep.subr.bf16.mxu0 %v1942_v4  ;;  %1922 = vmatprep.subr.bf16.mxu1 %v1942_v4  ;;  %v74_v44 = vld [vmem:[%s4235_s0 + $0x158] sm:$0xff]  ;;  %v75_v45 = vld [vmem:[%s4235_s0 + $0x160] sm:$0xff]  ;;  %v76_v46 = vld [vmem:[%s4235_s0 + $0x168] sm:$0xff]  ;;  %v101_v48 = vpack.c.bf16 %v44_v42, %v43_v41 }
  0x1b   :  { %v116_v49 = vpack.c.bf16 %v74_v44, %v73_v43  ;;  %v117_v50 = vpack.c.bf16 %v76_v46, %v75_v45  ;;  %v45_v51 = vld [vmem:[%s4235_s0 + $0x70] sm:$0xff]  ;;  %v46_v52 = vld [vmem:[%s4235_s0 + $0x78] sm:$0xff]  ;;  %v47_v53 = vld [vmem:[%s4235_s0 + $0x80] sm:$0xff] }
  0x1c   :  { %v48_v54 = vld [vmem:[%s4235_s0 + $0x88] sm:$0xff]  ;;  %v77_v55 = vld [vmem:[%s4235_s0 + $0x170] sm:$0xff]  ;;  %v78_v56 = vld [vmem:[%s4235_s0 + $0x178] sm:$0xff]  ;;  %v102_v59 = vpack.c.bf16 %v46_v52, %v45_v51 }
  0x1d   :  { %1846 = vmatpush3.bf16.msra.mxu0 %v1942_v4  ;;  %1930 = vmatpush3.bf16.msra.mxu1 %v1942_v4  ;;  %v79_v57 = vld [vmem:[%s4235_s0 + $0x180] sm:$0xff]  ;;  %v80_v58 = vld [vmem:[%s4235_s0 + $0x188] sm:$0xff]  ;;  %v103_v60 = vpack.c.bf16 %v48_v54, %v47_v53  ;;  %v118_v61 = vpack.c.bf16 %v78_v56, %v77_v55  ;;  %v49_v63 = vld [vmem:[%s4235_s0 + $0x90] sm:$0xff] }
  0x1e   :  { %1847 = vmatprep.subr.bf16.mxu0 %v1943_v7  ;;  %1923 = vmatprep.subr.bf16.mxu1 %v1943_v7  ;;  %v119_v62 = vpack.c.bf16 %v80_v58, %v79_v57  ;;  %v50_v0 = vld [vmem:[%s4235_s0 + $0x98] sm:$0xff]  ;;  %v51_v1 = vld [vmem:[%s4235_s0 + $0xa0] sm:$0xff]  ;;  %v52_v2 = vld [vmem:[%s4235_s0 + $0xa8] sm:$0xff] }
  0x1f   :  { %v81_v3 = vld [vmem:[%s4235_s0 + $0x190] sm:$0xff]  ;;  %v82_v4 = vld [vmem:[%s4235_s0 + $0x198] sm:$0xff]  ;;  %v83_v5 = vld [vmem:[%s4235_s0 + $0x1a0] sm:$0xff] }
  0x20   :  { %v84_v6 = vld [vmem:[%s4235_s0 + $0x1a8] sm:$0xff]  ;;  %v120_v9 = vpack.c.bf16 %v82_v4, %v81_v3  ;;  %v53_v11 = vld [vmem:[%s4235_s0 + $0xb0] sm:$0xff]  ;;  %v86_v16 = vld [vmem:[%s4235_s0 + $0x1b8] sm:$0xff] }
  0x21   :  { %1848 = vmatpush3.bf16.msra.mxu0 %v1943_v7  ;;  %1931 = vmatpush3.bf16.msra.mxu1 %v1943_v7  ;;  %v104_v7 = vpack.c.bf16 %v50_v0, %v49_v63  ;;  %v121_v10 = vpack.c.bf16 %v84_v6, %v83_v5  ;;  %v56_v14 = vld [vmem:[%s4235_s0 + $0xc8] sm:$0xff]  ;;  %v85_v15 = vld [vmem:[%s4235_s0 + $0x1b0] sm:$0xff]  ;;  %v90_v28 = vld [vmem:[%s4235_s0 + $0x1d8] sm:$0xff] }
  0x22   :  { %1849 = vmatprep.subr.bf16.mxu0 %v1944_v8  ;;  %1924 = vmatprep.subr.bf16.mxu1 %v1944_v8  ;;  %v88_v18 = vld [vmem:[%s4235_s0 + $0x1c8] sm:$0xff]  ;;  %v122_v21 = vpack.c.bf16 %v86_v16, %v85_v15  ;;  %v89_v27 = vld [vmem:[%s4235_s0 + $0x1d0] sm:$0xff]  ;;  %v91_v29 = vld [vmem:[%s4235_s0 + $0x1e0] sm:$0xff] }
  0x23   :  { %v92_v30 = vld [vmem:[%s4235_s0 + $0x1e8] sm:$0xff]  ;;  %v124_v33 = vpack.c.bf16 %v90_v28, %v89_v27 }
  0x24   :  { %v125_v34 = vpack.c.bf16 %v92_v30, %v91_v29 }
  0x25   :  { %1850 = vmatpush3.bf16.msra.mxu0 %v1944_v8  ;;  %1932 = vmatpush3.bf16.msra.mxu1 %v1944_v8  ;;  %v105_v8 = vpack.c.bf16 %v52_v2, %v51_v1 }
  0x26   :  { %1851 = vmatprep.subr.bf16.mxu0 %v1945_v12  ;;  %1925 = vmatprep.subr.bf16.mxu1 %v1945_v12 }
  0x29   :  { %1852 = vmatpush3.bf16.msra.mxu0 %v1945_v12  ;;  %1933 = vmatpush3.bf16.msra.mxu1 %v1945_v12  ;;  %v54_v12 = vld [vmem:[%s4235_s0 + $0xb8] sm:$0xff] }
  0x2a   :  { %1935 = vmatprep.subr.msk.bf16.mxu0 %vm284_vm1, %v1946_v13  ;;  %1936 = vmatprep.subr.msk.bf16.mxu1 %vm284_vm1, %v1946_v13  ;;  %v55_v13 = vld [vmem:[%s4235_s0 + $0xc0] sm:$0xff]  ;;  %v106_v19 = vpack.c.bf16 %v54_v12, %v53_v11 }
  0x2b   :  { %v107_v20 = vpack.c.bf16 %v56_v14, %v55_v13 }
  0x2d   :  { %1854 = vmatpush3.bf16.msra.mxu0 %v286_v17  ;;  %1934 = vmatpush3.bf16.msra.mxu1 %v286_v17  ;;  %v87_v17 = vld [vmem:[%s4235_s0 + $0x1c0] sm:$0xff] }
  0x2e   :  { %v123_v22 = vpack.c.bf16 %v88_v18, %v87_v17 }
  0x30   :  { %1856 = vmatmul.mubr.msk.bf16.vlgmr.msra.gmra.mrb[0].mxu0 %vm187_vm0, %v96_v23  ;;  %1888 = vmatmul.mubr.msk.bf16.vlgmr.msra.gmra.mrb[0].mxu1 %vm187_vm0, %v112_v25  ;;  %v57_v23 = vld [vmem:[%s4235_s0 + $0xd0] sm:$0xff]  ;;  %v59_v25 = vld [vmem:[%s4235_s0 + $0xe0] sm:$0xff] }
  0x31   :  { %1859 = vmatprep.mubr.msk.bf16.mxu0 %vm187_vm0, %v97_v24  ;;  %1891 = vmatprep.mubr.msk.bf16.mxu1 %vm187_vm0, %v113_v26  ;;  %v58_v24 = vld [vmem:[%s4235_s0 + $0xd8] sm:$0xff]  ;;  %v60_v26 = vld [vmem:[%s4235_s0 + $0xe8] sm:$0xff] }
  0x32   :  { %v108_v31 = vpack.c.bf16 %v58_v24, %v57_v23  ;;  %v109_v32 = vpack.c.bf16 %v60_v26, %v59_v25 }
  0x38   :  { %1860 = vmatmul.mubr.msk.bf16.gmra.mrb[4].mxu0 %vm187_vm0, %v98_v35  ;;  %1892 = vmatmul.mubr.msk.bf16.gmra.mrb[4].mxu1 %vm187_vm0, %v114_v37  ;;  %v61_v35 = vld [vmem:[%s4235_s0 + $0xf0] sm:$0xff] }
  0x39   :  { %1863 = vmatprep.mubr.msk.bf16.mxu0 %vm187_vm0, %v99_v36  ;;  %1895 = vmatprep.mubr.msk.bf16.mxu1 %vm187_vm0, %v115_v38  ;;  %v62_v36 = vld [vmem:[%s4235_s0 + $0xf8] sm:$0xff]  ;;  %v93_v37 = vld [vmem:[%s4235_s0 + $0x1f0] sm:$0xff] }
  0x3a   :  { %v94_v38 = vld [vmem:[%s4235_s0 + $0x1f8] sm:$0xff]  ;;  %v110_v39 = vpack.c.bf16 %v62_v36, %v61_v35  ;;  %s1797_s0 = sld [smem:[#allocation2 + $0x1]] }
  0x3b   :  { %v126_v40 = vpack.c.bf16 %v94_v38, %v93_v37 }
  0x40   :  { %1864 = vmatmul.mubr.msk.bf16.gmra.mrb[8].mxu0 %vm187_vm0, %v100_v47  ;;  %1896 = vmatmul.mubr.msk.bf16.gmra.mrb[8].mxu1 %vm187_vm0, %v116_v49 }
  0x41   :  { %1867 = vmatprep.mubr.msk.bf16.mxu0 %vm187_vm0, %v101_v48  ;;  %1899 = vmatprep.mubr.msk.bf16.mxu1 %vm187_vm0, %v117_v50 }
  0x48   :  { %1868 = vmatmul.mubr.msk.bf16.gmra.mrb[12].mxu0 %vm187_vm0, %v102_v59  ;;  %1900 = vmatmul.mubr.msk.bf16.gmra.mrb[12].mxu1 %vm187_vm0, %v118_v61 }
  0x49   :  { %1871 = vmatprep.mubr.msk.bf16.mxu0 %vm187_vm0, %v103_v60  ;;  %1903 = vmatprep.mubr.msk.bf16.mxu1 %vm187_vm0, %v119_v62 }
  0x50   :  { %1872 = vmatmul.mubr.msk.bf16.gmra.mrb[16].mxu0 %vm187_vm0, %v104_v7  ;;  %1904 = vmatmul.mubr.msk.bf16.gmra.mrb[16].mxu1 %vm187_vm0, %v120_v9 }
  0x51   :  { %1875 = vmatprep.mubr.msk.bf16.mxu0 %vm187_vm0, %v105_v8  ;;  %1907 = vmatprep.mubr.msk.bf16.mxu1 %vm187_vm0, %v121_v10 }
  0x58   :  { %1876 = vmatmul.mubr.msk.bf16.gmra.mrb[20].mxu0 %vm187_vm0, %v106_v19  ;;  %1908 = vmatmul.mubr.msk.bf16.gmra.mrb[20].mxu1 %vm187_vm0, %v122_v21 }
  0x59   :  { %1879 = vmatprep.mubr.msk.bf16.mxu0 %vm187_vm0, %v107_v20  ;;  %1911 = vmatprep.mubr.msk.bf16.mxu1 %vm187_vm0, %v123_v22 }
  0x60   :  { %1880 = vmatmul.mubr.msk.bf16.gmra.mrb[24].mxu0 %vm187_vm0, %v108_v31  ;;  %1912 = vmatmul.mubr.msk.bf16.gmra.mrb[24].mxu1 %vm187_vm0, %v124_v33 }
  0x61   :  { %1883 = vmatprep.mubr.msk.bf16.mxu0 %vm187_vm0, %v109_v32  ;;  %1915 = vmatprep.mubr.msk.bf16.mxu1 %vm187_vm0, %v125_v34 }
  0x68   :  { %1884 = vmatmul.mubr.msk.bf16.gmra.mrb[28].mxu0 %vm187_vm0, %v110_v39  ;;  %1916 = vmatmul.mubr.msk.bf16.gmra.mrb[28].mxu1 %vm187_vm0, %v126_v40 }
 0x103   :  { %v2241_v41 = vpop.f32.mrb[0].mxu0  ;;  %v2245_v43 = vpop.f32.mrb[0].mxu1 }
 0x104   :  { %v2243_v42 = vpop.f32.mrb[1].mxu0  ;;  %v2249_v45 = vpop.f32.mrb[1].mxu1  ;;  %v581_v52 = vsel %vm577_vm2, %v2241_v41, 0.0 }
 0x105   :  { %v2247_v44 = vpop.f32.mrb[2].mxu0  ;;  %v2253_v47 = vpop.f32.mrb[2].mxu1  ;;  %v578_v48 = vsel %vm577_vm2, %v2243_v42, 0.0 }
 0x106   :  { %v2251_v46 = vpop.f32.mrb[3].mxu0  ;;  %v2259_v50 = vpop.f32.mrb[3].mxu1  ;;  %v583_v54 = vsel %vm577_vm2, %v2247_v44, 0.0 }
 0x107   :  { %v579_v49 = vsel %vm577_vm2, %v2251_v46, 0.0 }
 0x108   :  { %v580_v51 = vadd.f32 %v579_v49, %v578_v48 }
 0x10a   :  { %v582_v53 = vadd.f32 %v581_v52, %v580_v51 }
 0x10b   :  { %v2265_v55 = vpop.f32.mrb[4].mxu0  ;;  %v2269_v58 = vpop.f32.mrb[4].mxu1 }
 0x10c   :  { %v2267_v56 = vpop.f32.mrb[5].mxu0  ;;  %v584_v57 = vadd.f32 %v583_v54, %v582_v53  ;;  %v2275_v61 = vpop.f32.mrb[5].mxu1  ;;  %v589_v4 = vsel %vm577_vm2, %v2265_v55, 0.0 }
 0x10d   :  { %v585_v59 = vsel %vm577_vm2, %v2267_v56, 0.0  ;;  %v2273_v60 = vpop.f32.mrb[6].mxu0  ;;  %v2279_v0 = vpop.f32.mrb[6].mxu1 }
 0x10e   :  { %v586_v62 = vadd.f32 %v585_v59, %v584_v57  ;;  %v2277_v63 = vpop.f32.mrb[7].mxu0  ;;  %v2283_v2 = vpop.f32.mrb[7].mxu1  ;;  %v591_v6 = vsel %vm577_vm2, %v2273_v60, 0.0 }
 0x10f   :  { %v587_v1 = vsel %vm577_vm2, %v2277_v63, 0.0 }
 0x110   :  { %v588_v3 = vadd.f32 %v587_v1, %v586_v62 }
 0x112   :  { %v590_v5 = vadd.f32 %v589_v4, %v588_v3 }
 0x113   :  { %v2289_v7 = vpop.f32.mrb[8].mxu0  ;;  %v2293_v10 = vpop.f32.mrb[8].mxu1 }
 0x114   :  { %v2291_v8 = vpop.f32.mrb[9].mxu0  ;;  %v592_v9 = vadd.f32 %v591_v6, %v590_v5  ;;  %v2299_v13 = vpop.f32.mrb[9].mxu1  ;;  %v597_v20 = vsel %vm577_vm2, %v2289_v7, 0.0 }
 0x115   :  { %v593_v11 = vsel %vm577_vm2, %v2291_v8, 0.0  ;;  %v2297_v12 = vpop.f32.mrb[10].mxu0  ;;  %v2303_v16 = vpop.f32.mrb[10].mxu1 }
 0x116   :  { %v594_v14 = vadd.f32 %v593_v11, %v592_v9  ;;  %v2301_v15 = vpop.f32.mrb[11].mxu0  ;;  %v2307_v18 = vpop.f32.mrb[11].mxu1  ;;  %v599_v22 = vsel %vm577_vm2, %v2297_v12, 0.0 }
 0x117   :  { %v595_v17 = vsel %vm577_vm2, %v2301_v15, 0.0 }
 0x118   :  { %v596_v19 = vadd.f32 %v595_v17, %v594_v14 }
 0x11a   :  { %v598_v21 = vadd.f32 %v597_v20, %v596_v19 }
 0x11b   :  { %v2313_v23 = vpop.f32.mrb[12].mxu0  ;;  %v2317_v26 = vpop.f32.mrb[12].mxu1 }
 0x11c   :  { %v2315_v24 = vpop.f32.mrb[13].mxu0  ;;  %v600_v25 = vadd.f32 %v599_v22, %v598_v21  ;;  %v2323_v29 = vpop.f32.mrb[13].mxu1  ;;  %v605_v36 = vsel %vm577_vm2, %v2313_v23, 0.0 }
 0x11d   :  { %v601_v27 = vsel %vm577_vm2, %v2315_v24, 0.0  ;;  %v2321_v28 = vpop.f32.mrb[14].mxu0  ;;  %v2327_v32 = vpop.f32.mrb[14].mxu1 }
 0x11e   :  { %v602_v30 = vadd.f32 %v601_v27, %v600_v25  ;;  %v2325_v31 = vpop.f32.mrb[15].mxu0  ;;  %v2331_v34 = vpop.f32.mrb[15].mxu1  ;;  %v607_v38 = vsel %vm577_vm2, %v2321_v28, 0.0 }
 0x11f   :  { %v603_v33 = vsel %vm577_vm2, %v2325_v31, 0.0 }
 0x120   :  { %v604_v35 = vadd.f32 %v603_v33, %v602_v30 }
 0x122   :  { %v606_v37 = vadd.f32 %v605_v36, %v604_v35 }
 0x123   :  { %v2337_v39 = vpop.f32.mrb[16].mxu0  ;;  %v2341_v49 = vpop.f32.mrb[16].mxu1 }
 0x124   :  { %4301 = vst [vmem:[#allocation5_spill] sm:$0xff] %v2337_v39  ;;  %v2339_v40 = vpop.f32.mrb[17].mxu0  ;;  %v608_v48 = vadd.f32 %v607_v38, %v606_v37  ;;  %v2347_v53 = vpop.f32.mrb[17].mxu1  ;;  %v613_v4 = vsel %vm577_vm2, %v2337_v39, 0.0 }
 0x125   :  { %v609_v51 = vsel %vm577_vm2, %v2339_v40, 0.0  ;;  %v2345_v52 = vpop.f32.mrb[18].mxu0  ;;  %v2351_v59 = vpop.f32.mrb[18].mxu1 }
 0x126   :  { %4302 = vst [vmem:[#allocation6_spill] sm:$0xff] %v2345_v52  ;;  %v610_v54 = vadd.f32 %v609_v51, %v608_v48  ;;  %v2349_v57 = vpop.f32.mrb[19].mxu0  ;;  %v2355_v1 = vpop.f32.mrb[19].mxu1  ;;  %v615_v6 = vsel %vm577_vm2, %v2345_v52, 0.0  ;;  %v643_v52 = vsel %vm577_vm2, %v2259_v50, 0.0 }
 0x127   :  { %v611_v62 = vsel %vm577_vm2, %v2349_v57, 0.0 }
 0x128   :  { %v612_v3 = vadd.f32 %v611_v62, %v610_v54 }
 0x12a   :  { %v614_v5 = vadd.f32 %v613_v4, %v612_v3 }
 0x12b   :  { %v2361_v9 = vpop.f32.mrb[20].mxu0  ;;  %v2365_v17 = vpop.f32.mrb[20].mxu1 }
 0x12c   :  { %4303 = vst [vmem:[#allocation7_spill] sm:$0xff] %v2361_v9  ;;  %v2363_v11 = vpop.f32.mrb[21].mxu0  ;;  %v616_v14 = vadd.f32 %v615_v6, %v614_v5  ;;  %v2371_v21 = vpop.f32.mrb[21].mxu1  ;;  %v621_v36 = vsel %vm577_vm2, %v2361_v9, 0.0 }
 0x12d   :  { %4304 = vst [vmem:[#allocation8_spill] sm:$0xff] %v2363_v11  ;;  %v617_v19 = vsel %vm577_vm2, %v2363_v11, 0.0  ;;  %v2369_v20 = vpop.f32.mrb[22].mxu0  ;;  %v2375_v27 = vpop.f32.mrb[22].mxu1 }
 0x12e   :  { %4305 = vst [vmem:[#allocation9_spill] sm:$0xff] %v2369_v20  ;;  %v618_v22 = vadd.f32 %v617_v19, %v616_v14  ;;  %v2373_v25 = vpop.f32.mrb[23].mxu0  ;;  %v2379_v33 = vpop.f32.mrb[23].mxu1  ;;  %v623_v38 = vsel %vm577_vm2, %v2369_v20, 0.0 }
 0x12f   :  { %4306 = vst [vmem:[#allocation10_spill] sm:$0xff] %v2373_v25  ;;  %v619_v30 = vsel %vm577_vm2, %v2373_v25, 0.0 }
 0x130   :  { %v620_v35 = vadd.f32 %v619_v30, %v618_v22 }
 0x132   :  { %v622_v37 = vadd.f32 %v621_v36, %v620_v35 }
 0x133   :  { %v2385_v48 = vpop.f32.mrb[24].mxu0  ;;  %v2389_v62 = vpop.f32.mrb[24].mxu1 }
 0x134   :  { %4307 = vst [vmem:[#allocation11_spill] sm:$0xff] %v2385_v48  ;;  %v2387_v51 = vpop.f32.mrb[25].mxu0  ;;  %v624_v54 = vadd.f32 %v623_v38, %v622_v37  ;;  %4309 = vst [vmem:[#allocation13_spill] sm:$0xff] %v2389_v62  ;;  %v2395_v5 = vpop.f32.mrb[25].mxu1  ;;  %v629_v36 = vsel %vm577_vm2, %v2385_v48, 0.0 }
 0x135   :  { %4308 = vst [vmem:[#allocation12_spill] sm:$0xff] %v2387_v51  ;;  %v625_v3 = vsel %vm577_vm2, %v2387_v51, 0.0  ;;  %v2393_v4 = vpop.f32.mrb[26].mxu0  ;;  %v2399_v19 = vpop.f32.mrb[26].mxu1 }
 0x136   :  { %4310 = vst [vmem:[#allocation14_spill] sm:$0xff] %v2393_v4  ;;  %v626_v6 = vadd.f32 %v625_v3, %v624_v54  ;;  %v2397_v14 = vpop.f32.mrb[27].mxu0  ;;  %4312 = vst [vmem:[#allocation16_spill] sm:$0xff] %v2399_v19  ;;  %v2403_v30 = vpop.f32.mrb[27].mxu1  ;;  %v631_v38 = vsel %vm577_vm2, %v2393_v4, 0.0 }
 0x137   :  { %4311 = vst [vmem:[#allocation15_spill] sm:$0xff] %v2397_v14  ;;  %v627_v22 = vsel %vm577_vm2, %v2397_v14, 0.0  ;;  %4313 = vst [vmem:[#allocation17_spill] sm:$0xff] %v2403_v30 }
 0x138   :  { %v628_v35 = vadd.f32 %v627_v22, %v626_v6 }
 0x13a   :  { %v630_v37 = vadd.f32 %v629_v36, %v628_v35 }
 0x13b   :  { %v2409_v51 = vpop.f32.mrb[28].mxu0  ;;  %v2413_v20 = vpop.f32.mrb[28].mxu1 }
 0x13c   :  { %v2411_v54 = vpop.f32.mrb[29].mxu0  ;;  %v632_v3 = vadd.f32 %v631_v38, %v630_v37  ;;  %v2419_v6 = vpop.f32.mrb[29].mxu1  ;;  %v637_v38 = vsel %vm577_vm2, %v2409_v51, 0.0 }
 0x13d   :  { %4314 = vst [vmem:[#allocation18_spill] sm:$0xff] %v2411_v54  ;;  %v633_v14 = vsel %vm577_vm2, %v2411_v54, 0.0  ;;  %v2417_v9 = vpop.f32.mrb[30].mxu0  ;;  %4316 = vst [vmem:[#allocation20_spill] sm:$0xff] %v2419_v6  ;;  %v2423_v35 = vpop.f32.mrb[30].mxu1 }
 0x13e   :  { %4315 = vst [vmem:[#allocation19_spill] sm:$0xff] %v2417_v9  ;;  %v634_v22 = vadd.f32 %v633_v14, %v632_v3  ;;  %v2421_v48 = vpop.f32.mrb[31].mxu0  ;;  %v2427_v4 = vpop.f32.mrb[31].mxu1  ;;  %v639_v54 = vsel %vm577_vm2, %v2417_v9, 0.0  ;;  %v641_v14 = vsel %vm577_vm2, %v2249_v45, 0.0 }
 0x13f   :  { %4317 = vst [vmem:[#allocation21_spill] sm:$0xff] %v2421_v48  ;;  %v635_v36 = vsel %vm577_vm2, %v2421_v48, 0.0  ;;  %v645_v48 = vsel %vm577_vm2, %v2245_v43, 0.0 }
 0x140   :  { %v636_v37 = vadd.f32 %v635_v36, %v634_v22  ;;  %v647_v36 = vsel %vm577_vm2, %v2253_v47, 0.0 }
 0x142   :  { %v638_v25 = vadd.f32 %v637_v38, %v636_v37  ;;  %v649_v37 = vsel %vm577_vm2, %v2275_v61, 0.0 }
 0x144   :  { %v640_v3 = vadd.f32 %v639_v54, %v638_v25  ;;  %v651_v25 = vsel %vm577_vm2, %v2283_v2, 0.0 }
 0x146   :  { %v642_v11 = vadd.f32 %v641_v14, %v640_v3  ;;  %v653_v14 = vsel %vm577_vm2, %v2269_v58, 0.0 }
 0x148   :  { %v644_v39 = vadd.f32 %v643_v52, %v642_v11  ;;  %v655_v11 = vsel %vm577_vm2, %v2279_v0, 0.0 }
 0x14a   :  { %v646_v22 = vadd.f32 %v645_v48, %v644_v39  ;;  %v657_v39 = vsel %vm577_vm2, %v2299_v13, 0.0 }
 0x14c   :  { %v648_v38 = vadd.f32 %v647_v36, %v646_v22  ;;  %v659_v22 = vsel %vm577_vm2, %v2307_v18, 0.0 }
 0x14e   :  { %v650_v9 = vadd.f32 %v649_v37, %v648_v38  ;;  %v661_v37 = vsel %vm577_vm2, %v2293_v10, 0.0  ;;  %v663_v38 = vsel %vm577_vm2, %v2303_v16, 0.0 }
 0x150   :  { %v652_v54 = vadd.f32 %v651_v25, %v650_v9  ;;  %v665_v25 = vsel %vm577_vm2, %v2323_v29, 0.0 }
 0x152   :  { %v654_v52 = vadd.f32 %v653_v14, %v652_v54 }
 0x154   :  { %v656_v48 = vadd.f32 %v655_v11, %v654_v52  ;;  %v667_v52 = vsel %vm577_vm2, %v2331_v34, 0.0 }
 0x156   :  { %v658_v3 = vadd.f32 %v657_v39, %v656_v48  ;;  %v669_v39 = vsel %vm577_vm2, %v2317_v26, 0.0 }
 0x158   :  { %v660_v36 = vadd.f32 %v659_v22, %v658_v3  ;;  %v671_v3 = vsel %vm577_vm2, %v2327_v32, 0.0  ;;  %v673_v22 = vsel %vm577_vm2, %v2347_v53, 0.0 }
 0x15a   :  { %v662_v9 = vadd.f32 %v661_v37, %v660_v36 }
 0x15c   :  { %v664_v54 = vadd.f32 %v663_v38, %v662_v9  ;;  %v675_v9 = vsel %vm577_vm2, %v2355_v1, 0.0 }
 0x15e   :  { %v666_v14 = vadd.f32 %v665_v25, %v664_v54  ;;  %v677_v25 = vsel %vm577_vm2, %v2341_v49, 0.0 }
 0x160   :  { %v668_v11 = vadd.f32 %v667_v52, %v666_v14  ;;  %v679_v14 = vsel %vm577_vm2, %v2351_v59, 0.0  ;;  %v681_v52 = vsel %vm577_vm2, %v2371_v21, 0.0 }
 0x162   :  { %v670_v48 = vadd.f32 %v669_v39, %v668_v11 }
 0x164   :  { %v672_v36 = vadd.f32 %v671_v3, %v670_v48  ;;  %v683_v48 = vsel %vm577_vm2, %v2379_v33, 0.0 }
 0x166   :  { %v674_v37 = vadd.f32 %v673_v22, %v672_v36  ;;  %v685_v22 = vsel %vm577_vm2, %v2365_v17, 0.0 }
 0x168   :  { %v676_v38 = vadd.f32 %v675_v9, %v674_v37  ;;  %v687_v37 = vsel %vm577_vm2, %v2375_v27, 0.0  ;;  %v689_v9 = vsel %vm577_vm2, %v2395_v5, 0.0 }
 0x16a   :  { %v678_v54 = vadd.f32 %v677_v25, %v676_v38 }
 0x16c   :  { %v680_v11 = vadd.f32 %v679_v14, %v678_v54  ;;  %v691_v54 = vsel %vm577_vm2, %v2403_v30, 0.0 }
 0x16e   :  { %v682_v39 = vadd.f32 %v681_v52, %v680_v11  ;;  %v693_v52 = vsel %vm577_vm2, %v2389_v62, 0.0 }
 0x170   :  { %v684_v3 = vadd.f32 %v683_v48, %v682_v39  ;;  %v695_v39 = vsel %vm577_vm2, %v2399_v19, 0.0  ;;  %v697_v48 = vsel %vm577_vm2, %v2419_v6, 0.0 }
 0x172   :  { %v686_v36 = vadd.f32 %v685_v22, %v684_v3 }
 0x174   :  { %v688_v38 = vadd.f32 %v687_v37, %v686_v36  ;;  %v699_v36 = vsel %vm577_vm2, %v2427_v4, 0.0 }
 0x176   :  { %v690_v25 = vadd.f32 %v689_v9, %v688_v38  ;;  %v701_v9 = vsel %vm577_vm2, %v2413_v20, 0.0 }
 0x178   :  { %v692_v14 = vadd.f32 %v691_v54, %v690_v25  ;;  %v703_v25 = vsel %vm577_vm2, %v2423_v35, 0.0 }
 0x17a   :  { %v694_v11 = vadd.f32 %v693_v52, %v692_v14 }
 0x17c   :  { %v696_v3 = vadd.f32 %v695_v39, %v694_v11 }
 0x17e   :  { %v698_v22 = vadd.f32 %v697_v48, %v696_v3 }
 0x180   :  { %v700_v37 = vadd.f32 %v699_v36, %v698_v22  ;;  %v4329_v36 = vld [vmem:[#allocation10_spill] sm:$0xff] }
 0x182   :  { %v702_v38 = vadd.f32 %v701_v9, %v700_v37  ;;  %v4331_v37 = vld [vmem:[#allocation7_spill] sm:$0xff]  ;;  %v4333_v9 = vld [vmem:[#allocation9_spill] sm:$0xff] }
 0x184   :  { %v704_v54 = vadd.f32 %v703_v25, %v702_v38  ;;  %v4335_v25 = vld [vmem:[#allocation12_spill] sm:$0xff] }
 0x186   :  { %v705_v14 = vrot.slane %v704_v54, 4 }
 0x188   :  { %v706_v52 = vadd.f32 %v705_v14, %v704_v54  ;;  %v4337_v14 = vld [vmem:[#allocation15_spill] sm:$0xff] }
 0x18a   :  { %v707_v19 = vrot.slane %v706_v52, 2 }
 0x18c   :  { %v708_v62 = vadd.f32 %v707_v19, %v706_v52  ;;  %v4323_v19 = vld [vmem:[#allocation5_spill] sm:$0xff] }
 0x18e   :  { %v709_v30 = vrot.slane %v708_v62, 1 }
 0x190   :  { %v710_v6 = vadd.f32 %v709_v30, %v708_v62  ;;  %v4325_v30 = vld [vmem:[#allocation6_spill] sm:$0xff] }
 0x192   :  { %v2497_v11 = vmul.f32 0.001953125, %v710_v6  ;;  %v4327_v6 = vld [vmem:[#allocation8_spill] sm:$0xff] }
 0x194   :  { %v2501_v39 = vsub.f32 %v2243_v42, %v2497_v11  ;;  %v2505_v48 = vsub.f32 %v2251_v46, %v2497_v11  ;;  %v2509_v3 = vsub.f32 %v2241_v41, %v2497_v11  ;;  %v2513_v22 = vsub.f32 %v2247_v44, %v2497_v11 }
 0x195   :  { %v2517_v62 = vsub.f32 %v2267_v56, %v2497_v11  ;;  %v2521_v42 = vsub.f32 %v2277_v63, %v2497_v11  ;;  %v2525_v46 = vsub.f32 %v2265_v55, %v2497_v11  ;;  %v2529_v41 = vsub.f32 %v2273_v60, %v2497_v11 }
 0x196   :  { %4318 = vst [vmem:[#allocation22_spill] sm:$0xff] %v2501_v39  ;;  %4319 = vst [vmem:[#allocation23_spill] sm:$0xff] %v2505_v48  ;;  %v2533_v44 = vsub.f32 %v2291_v8, %v2497_v11  ;;  %v2537_v56 = vsub.f32 %v2301_v15, %v2497_v11  ;;  %v2541_v63 = vsub.f32 %v2289_v7, %v2497_v11 }
 0x197   :  { %4320 = vst [vmem:[#allocation24_spill] sm:$0xff] %v2509_v3  ;;  %4321 = vst [vmem:[#allocation25_spill] sm:$0xff] %v2513_v22  ;;  %v2545_v55 = vsub.f32 %v2297_v12, %v2497_v11  ;;  %v2549_v60 = vsub.f32 %v2315_v24, %v2497_v11  ;;  %v2553_v8 = vsub.f32 %v2325_v31, %v2497_v11 }
 0x198   :  { %v2557_v15 = vsub.f32 %v2313_v23, %v2497_v11  ;;  %v2561_v7 = vsub.f32 %v2321_v28, %v2497_v11  ;;  %v2565_v12 = vsub.f32 %v2339_v40, %v2497_v11  ;;  %v2569_v24 = vsub.f32 %v2349_v57, %v2497_v11 }
 0x199   :  { %v2573_v31 = vsub.f32 %v4323_v19, %v2497_v11  ;;  %v2577_v23 = vsub.f32 %v4325_v30, %v2497_v11  ;;  %v2581_v28 = vsub.f32 %v4327_v6, %v2497_v11  ;;  %v2585_v40 = vsub.f32 %v4329_v36, %v2497_v11  ;;  %v4339_v19 = vld [vmem:[#allocation11_spill] sm:$0xff]  ;;  %v4341_v6 = vld [vmem:[#allocation14_spill] sm:$0xff] }
 0x19a   :  { %4322 = vst [vmem:[#allocation26_spill] sm:$0xff] %v2569_v24  ;;  %v2589_v57 = vsub.f32 %v4331_v37, %v2497_v11  ;;  %v2593_v38 = vsub.f32 %v4333_v9, %v2497_v11  ;;  %v2597_v54 = vsub.f32 %v4335_v25, %v2497_v11  ;;  %v2601_v52 = vsub.f32 %v4337_v14, %v2497_v11  ;;  %v4343_v37 = vld [vmem:[#allocation18_spill] sm:$0xff] }
 0x19b   :  { %4324 = vst [vmem:[#allocation5_spill] sm:$0xff] %v2573_v31  ;;  %4326 = vst [vmem:[#allocation6_spill] sm:$0xff] %v2577_v23  ;;  %v2605_v30 = vsub.f32 %v4339_v19, %v2497_v11  ;;  %v2609_v36 = vsub.f32 %v4341_v6, %v2497_v11  ;;  %v2613_v9 = vsub.f32 %v4343_v37, %v2497_v11 }
 0x19c   :  { %4328 = vst [vmem:[#allocation8_spill] sm:$0xff] %v2581_v28  ;;  %4330 = vst [vmem:[#allocation10_spill] sm:$0xff] %v2585_v40  ;;  %v2621_v14 = vsub.f32 %v2409_v51, %v2497_v11  ;;  %v2629_v6 = vsub.f32 %v2249_v45, %v2497_v11  ;;  %v2633_v37 = vsub.f32 %v2259_v50, %v2497_v11 }
 0x19d   :  { %4332 = vst [vmem:[#allocation7_spill] sm:$0xff] %v2589_v57  ;;  %4334 = vst [vmem:[#allocation9_spill] sm:$0xff] %v2593_v38  ;;  %v4345_v38 = vld [vmem:[#allocation21_spill] sm:$0xff]  ;;  %v2641_v51 = vsub.f32 %v2253_v47, %v2497_v11  ;;  %v2649_v45 = vsub.f32 %v2283_v2, %v2497_v11  ;;  %v2653_v50 = vsub.f32 %v2269_v58, %v2497_v11 }
 0x19e   :  { %4336 = vst [vmem:[#allocation12_spill] sm:$0xff] %v2597_v54  ;;  %4338 = vst [vmem:[#allocation15_spill] sm:$0xff] %v2601_v52  ;;  %v2617_v25 = vsub.f32 %v4345_v38, %v2497_v11  ;;  %v4348_v52 = vld [vmem:[#allocation19_spill] sm:$0xff]  ;;  %v2637_v38 = vsub.f32 %v2245_v43, %v2497_v11  ;;  %v2657_v43 = vsub.f32 %v2279_v0, %v2497_v11 }
 0x19f   :  { %4340 = vst [vmem:[#allocation11_spill] sm:$0xff] %v2605_v30  ;;  %4342 = vst [vmem:[#allocation14_spill] sm:$0xff] %v2609_v36  ;;  %v2625_v19 = vsub.f32 %v4348_v52, %v2497_v11  ;;  %v2645_v52 = vsub.f32 %v2275_v61, %v2497_v11  ;;  %v2661_v47 = vsub.f32 %v2299_v13, %v2497_v11 }
 0x1a0   :  { %4344 = vst [vmem:[#allocation18_spill] sm:$0xff] %v2613_v9  ;;  %4346 = vst [vmem:[#allocation21_spill] sm:$0xff] %v2617_v25  ;;  %v2665_v61 = vsub.f32 %v2307_v18, %v2497_v11  ;;  %v2669_v2 = vsub.f32 %v2293_v10, %v2497_v11  ;;  %v2673_v58 = vsub.f32 %v2303_v16, %v2497_v11 }
 0x1a1   :  { %4347 = vst [vmem:[#allocation27_spill] sm:$0xff] %v2621_v14  ;;  %4349 = vst [vmem:[#allocation19_spill] sm:$0xff] %v2625_v19  ;;  %v2677_v0 = vsub.f32 %v2323_v29, %v2497_v11  ;;  %v2681_v13 = vsub.f32 %v2331_v34, %v2497_v11  ;;  %v2685_v18 = vsub.f32 %v2317_v26, %v2497_v11 }
 0x1a2   :  { %v2689_v10 = vsub.f32 %v2327_v32, %v2497_v11  ;;  %v2693_v16 = vsub.f32 %v2347_v53, %v2497_v11  ;;  %v2697_v29 = vsub.f32 %v2355_v1, %v2497_v11  ;;  %v2701_v34 = vsub.f32 %v2341_v49, %v2497_v11 }
 0x1a3   :  { %v2705_v26 = vsub.f32 %v2351_v59, %v2497_v11  ;;  %v2709_v32 = vsub.f32 %v2371_v21, %v2497_v11  ;;  %v2713_v53 = vsub.f32 %v2379_v33, %v2497_v11  ;;  %v2717_v1 = vsub.f32 %v2365_v17, %v2497_v11 }
 0x1a4   :  { %v2721_v49 = vsub.f32 %v2375_v27, %v2497_v11  ;;  %v2725_v59 = vsub.f32 %v2395_v5, %v2497_v11  ;;  %v2745_v5 = vsub.f32 %v2427_v4, %v2497_v11  ;;  %v780_v4 = vmul.f32 %v2513_v22, %v2513_v22 }
 0x1a5   :  { %4350 = vst [vmem:[#allocation28_spill] sm:$0xff] %v2705_v26  ;;  %4351 = vst [vmem:[#allocation29_spill] sm:$0xff] %v2709_v32  ;;  %v4354_v26 = vld [vmem:[#allocation17_spill] sm:$0xff]  ;;  %v783_v22 = vmul.f32 %v2525_v46, %v2525_v46 }
 0x1a6   :  { %4352 = vst [vmem:[#allocation30_spill] sm:$0xff] %v2713_v53  ;;  %4353 = vst [vmem:[#allocation31_spill] sm:$0xff] %v2717_v1  ;;  %v2729_v21 = vsub.f32 %v4354_v26, %v2497_v11  ;;  %v4355_v32 = vld [vmem:[#allocation13_spill] sm:$0xff]  ;;  %v4356_v53 = vld [vmem:[#allocation16_spill] sm:$0xff]  ;;  %v2749_v26 = vsub.f32 %v2413_v20, %v2497_v11 }
 0x1a7   :  { %v2733_v33 = vsub.f32 %v4355_v32, %v2497_v11  ;;  %v2737_v17 = vsub.f32 %v4356_v53, %v2497_v11  ;;  %v4358_v1 = vld [vmem:[#allocation20_spill] sm:$0xff]  ;;  %4360 = vst [vmem:[#allocation16_spill] sm:$0xff] %v2745_v5  ;;  %v2753_v32 = vsub.f32 %v2423_v35, %v2497_v11  ;;  %v777_v53 = vmul.f32 %v2501_v39, %v2501_v39 }
 0x1a8   :  { %v2741_v27 = vsub.f32 %v4358_v1, %v2497_v11  ;;  %4361 = vst [vmem:[#allocation20_spill] sm:$0xff] %v2749_v26  ;;  %v779_v1 = vmul.f32 %v2509_v3, %v2509_v3  ;;  %v781_v35 = vmul.f32 %v2517_v62, %v2517_v62 }
 0x1a9   :  { %4357 = vst [vmem:[#allocation17_spill] sm:$0xff] %v2737_v17  ;;  %4362 = vst [vmem:[#allocation32_spill] sm:$0xff] %v2753_v32  ;;  %v778_v17 = vmul.f32 %v2505_v48, %v2505_v48  ;;  %v841_v5 = vsel %vm577_vm2, %v777_v53, 0.0  ;;  %v782_v48 = vmul.f32 %v2521_v42, %v2521_v42  ;;  %v846_v32 = vsel %vm577_vm2, %v780_v4, 0.0 }
 0x1aa   :  { %4359 = vst [vmem:[#allocation13_spill] sm:$0xff] %v2741_v27  ;;  %v844_v11 = vsel %vm577_vm2, %v779_v1, 0.0  ;;  %v848_v53 = vsel %vm577_vm2, %v781_v35, 0.0  ;;  %v852_v1 = vsel %vm577_vm2, %v783_v22, 0.0  ;;  %v789_v22 = vmul.f32 %v2549_v60, %v2549_v60 }
 0x1ab   :  { %v842_v20 = vsel %vm577_vm2, %v778_v17, 0.0  ;;  %v784_v17 = vmul.f32 %v2529_v41, %v2529_v41 }
 0x1ac   :  { %v843_v26 = vadd.f32 %v842_v20, %v841_v5  ;;  %v850_v5 = vsel %vm577_vm2, %v782_v48, 0.0  ;;  %v788_v48 = vmul.f32 %v2545_v55, %v2545_v55 }
 0x1ae   :  { %v845_v39 = vadd.f32 %v844_v11, %v843_v26  ;;  %v785_v26 = vmul.f32 %v2533_v44, %v2533_v44 }
 0x1b0   :  { %v847_v3 = vadd.f32 %v846_v32, %v845_v39  ;;  %v786_v39 = vmul.f32 %v2537_v56, %v2537_v56  ;;  %v854_v32 = vsel %vm577_vm2, %v784_v17, 0.0  ;;  %v856_v35 = vsel %vm577_vm2, %v785_v26, 0.0 }
 0x1b1   :  { %v790_v17 = vmul.f32 %v2553_v8, %v2553_v8  ;;  %v791_v26 = vmul.f32 %v2557_v15, %v2557_v15 }
 0x1b2   :  { %v849_v27 = vadd.f32 %v848_v53, %v847_v3  ;;  %v787_v3 = vmul.f32 %v2541_v63, %v2541_v63 }
 0x1b4   :  { %v851_v20 = vadd.f32 %v850_v5, %v849_v27  ;;  %v858_v27 = vsel %vm577_vm2, %v786_v39, 0.0  ;;  %v792_v39 = vmul.f32 %v2561_v7, %v2561_v7 }
 0x1b6   :  { %v853_v11 = vadd.f32 %v852_v1, %v851_v20  ;;  %v860_v20 = vsel %vm577_vm2, %v787_v3, 0.0  ;;  %v793_v3 = vmul.f32 %v2565_v12, %v2565_v12 }
 0x1b8   :  { %v855_v4 = vadd.f32 %v854_v32, %v853_v11  ;;  %v862_v11 = vsel %vm577_vm2, %v788_v48, 0.0  ;;  %v794_v48 = vmul.f32 %v2569_v24, %v2569_v24 }
 0x1ba   :  { %v857_v53 = vadd.f32 %v856_v35, %v855_v4  ;;  %v864_v4 = vsel %vm577_vm2, %v789_v22, 0.0  ;;  %v795_v22 = vmul.f32 %v2573_v31, %v2573_v31 }
 0x1bc   :  { %v859_v5 = vadd.f32 %v858_v27, %v857_v53  ;;  %v866_v53 = vsel %vm577_vm2, %v790_v17, 0.0  ;;  %v796_v17 = vmul.f32 %v2577_v23, %v2577_v23 }
 0x1be   :  { %v861_v1 = vadd.f32 %v860_v20, %v859_v5  ;;  %v868_v5 = vsel %vm577_vm2, %v791_v26, 0.0  ;;  %v797_v26 = vmul.f32 %v2581_v28, %v2581_v28 }
 0x1c0   :  { %v863_v32 = vadd.f32 %v862_v11, %v861_v1  ;;  %v870_v1 = vsel %vm577_vm2, %v792_v39, 0.0  ;;  %v798_v39 = vmul.f32 %v2585_v40, %v2585_v40 }
 0x1c2   :  { %v865_v35 = vadd.f32 %v864_v4, %v863_v32  ;;  %v872_v32 = vsel %vm577_vm2, %v793_v3, 0.0  ;;  %v799_v3 = vmul.f32 %v2589_v57, %v2589_v57 }
 0x1c4   :  { %v867_v27 = vadd.f32 %v866_v53, %v865_v35  ;;  %v874_v35 = vsel %vm577_vm2, %v794_v48, 0.0  ;;  %v4363_v48 = vld [vmem:[#allocation9_spill] sm:$0xff] }
 0x1c6   :  { %v869_v20 = vadd.f32 %v868_v5, %v867_v27  ;;  %v876_v27 = vsel %vm577_vm2, %v795_v22, 0.0  ;;  %v801_v22 = vmul.f32 %v2597_v54, %v2597_v54 }
 0x1c8   :  { %v871_v11 = vadd.f32 %v870_v1, %v869_v20  ;;  %v878_v20 = vsel %vm577_vm2, %v796_v17, 0.0  ;;  %v4364_v17 = vld [vmem:[#allocation15_spill] sm:$0xff] }
 0x1ca   :  { %v873_v4 = vadd.f32 %v872_v32, %v871_v11  ;;  %v880_v11 = vsel %vm577_vm2, %v797_v26, 0.0  ;;  %v803_v26 = vmul.f32 %v2605_v30, %v2605_v30 }
 0x1cc   :  { %v875_v53 = vadd.f32 %v874_v35, %v873_v4  ;;  %v800_v4 = vmul.f32 %v4363_v48, %v4363_v48  ;;  %v882_v35 = vsel %vm577_vm2, %v798_v39, 0.0  ;;  %v804_v39 = vmul.f32 %v2609_v36, %v2609_v36 }
 0x1ce   :  { %v877_v5 = vadd.f32 %v876_v27, %v875_v53  ;;  %v884_v53 = vsel %vm577_vm2, %v799_v3, 0.0  ;;  %v892_v3 = vsel %vm577_vm2, %v803_v26, 0.0  ;;  %v809_v26 = vmul.f32 %v2629_v6, %v2629_v6 }
 0x1d0   :  { %v879_v1 = vadd.f32 %v878_v20, %v877_v5  ;;  %v802_v5 = vmul.f32 %v4364_v17, %v4364_v17  ;;  %v886_v20 = vsel %vm577_vm2, %v800_v4, 0.0  ;;  %v806_v4 = vmul.f32 %v2617_v25, %v2617_v25 }
 0x1d2   :  { %v881_v32 = vadd.f32 %v880_v11, %v879_v1  ;;  %v888_v1 = vsel %vm577_vm2, %v801_v22, 0.0 }
 0x1d4   :  { %v883_v28 = vadd.f32 %v882_v35, %v881_v32  ;;  %v890_v32 = vsel %vm577_vm2, %v802_v5, 0.0  ;;  %v808_v5 = vmul.f32 %v2625_v19, %v2625_v19 }
 0x1d6   :  { %v885_v27 = vadd.f32 %v884_v53, %v883_v28  ;;  %v805_v28 = vmul.f32 %v2613_v9, %v2613_v9 }
 0x1d8   :  { %v887_v57 = vadd.f32 %v886_v20, %v885_v27  ;;  %v894_v27 = vsel %vm577_vm2, %v804_v39, 0.0  ;;  %v896_v22 = vsel %vm577_vm2, %v805_v28, 0.0  ;;  %v810_v39 = vmul.f32 %v2633_v37, %v2633_v37 }
 0x1d9   :  { %v811_v28 = vmul.f32 %v2637_v38, %v2637_v38 }
 0x1da   :  { %v889_v11 = vadd.f32 %v888_v1, %v887_v57  ;;  %v807_v57 = vmul.f32 %v2621_v14, %v2621_v14 }
 0x1dc   :  { %v891_v35 = vadd.f32 %v890_v32, %v889_v11  ;;  %v898_v11 = vsel %vm577_vm2, %v806_v4, 0.0  ;;  %v812_v4 = vmul.f32 %v2641_v51, %v2641_v51 }
 0x1de   :  { %v893_v53 = vadd.f32 %v892_v3, %v891_v35  ;;  %v900_v35 = vsel %vm577_vm2, %v807_v57, 0.0  ;;  %v813_v57 = vmul.f32 %v2645_v52, %v2645_v52 }
 0x1e0   :  { %v895_v20 = vadd.f32 %v894_v27, %v893_v53  ;;  %v902_v53 = vsel %vm577_vm2, %v808_v5, 0.0  ;;  %v814_v5 = vmul.f32 %v2649_v45, %v2649_v45 }
 0x1e2   :  { %v897_v1 = vadd.f32 %v896_v22, %v895_v20  ;;  %v904_v20 = vsel %vm577_vm2, %v809_v26, 0.0  ;;  %v815_v26 = vmul.f32 %v2653_v50, %v2653_v50 }
 0x1e4   :  { %v899_v32 = vadd.f32 %v898_v11, %v897_v1  ;;  %v906_v1 = vsel %vm577_vm2, %v810_v39, 0.0  ;;  %v816_v39 = vmul.f32 %v2657_v43, %v2657_v43 }
 0x1e6   :  { %v901_v3 = vadd.f32 %v900_v35, %v899_v32  ;;  %v908_v32 = vsel %vm577_vm2, %v811_v28, 0.0  ;;  %v817_v28 = vmul.f32 %v2661_v47, %v2661_v47 }
 0x1e8   :  { %v903_v27 = vadd.f32 %v902_v53, %v901_v3  ;;  %v910_v3 = vsel %vm577_vm2, %v812_v4, 0.0  ;;  %v818_v4 = vmul.f32 %v2665_v61, %v2665_v61 }
 0x1ea   :  { %v905_v22 = vadd.f32 %v904_v20, %v903_v27  ;;  %v912_v27 = vsel %vm577_vm2, %v813_v57, 0.0  ;;  %v819_v57 = vmul.f32 %v2669_v2, %v2669_v2 }
 0x1ec   :  { %v907_v11 = vadd.f32 %v906_v1, %v905_v22  ;;  %v914_v22 = vsel %vm577_vm2, %v814_v5, 0.0  ;;  %v820_v5 = vmul.f32 %v2673_v58, %v2673_v58 }
 0x1ee   :  { %v909_v35 = vadd.f32 %v908_v32, %v907_v11  ;;  %v916_v11 = vsel %vm577_vm2, %v815_v26, 0.0  ;;  %v821_v26 = vmul.f32 %v2677_v0, %v2677_v0 }
 0x1f0   :  { %v911_v53 = vadd.f32 %v910_v3, %v909_v35  ;;  %v918_v35 = vsel %vm577_vm2, %v816_v39, 0.0  ;;  %v822_v39 = vmul.f32 %v2681_v13, %v2681_v13 }
 0x1f2   :  { %v913_v20 = vadd.f32 %v912_v27, %v911_v53  ;;  %v920_v53 = vsel %vm577_vm2, %v817_v28, 0.0  ;;  %v823_v28 = vmul.f32 %v2685_v18, %v2685_v18 }
 0x1f4   :  { %v915_v1 = vadd.f32 %v914_v22, %v913_v20  ;;  %v922_v20 = vsel %vm577_vm2, %v818_v4, 0.0  ;;  %v824_v4 = vmul.f32 %v2689_v10, %v2689_v10 }
 0x1f6   :  { %v917_v32 = vadd.f32 %v916_v11, %v915_v1  ;;  %v924_v1 = vsel %vm577_vm2, %v819_v57, 0.0  ;;  %v825_v57 = vmul.f32 %v2693_v16, %v2693_v16 }
 0x1f8   :  { %v919_v3 = vadd.f32 %v918_v35, %v917_v32  ;;  %v926_v32 = vsel %vm577_vm2, %v820_v5, 0.0  ;;  %v826_v5 = vmul.f32 %v2697_v29, %v2697_v29 }
 0x1fa   :  { %v921_v27 = vadd.f32 %v920_v53, %v919_v3  ;;  %v928_v3 = vsel %vm577_vm2, %v821_v26, 0.0  ;;  %v827_v26 = vmul.f32 %v2701_v34, %v2701_v34 }
 0x1fc   :  { %v923_v22 = vadd.f32 %v922_v20, %v921_v27  ;;  %v930_v27 = vsel %vm577_vm2, %v822_v39, 0.0  ;;  %v4365_v39 = vld [vmem:[#allocation28_spill] sm:$0xff] }
 0x1fe   :  { %v925_v11 = vadd.f32 %v924_v1, %v923_v22  ;;  %v932_v22 = vsel %vm577_vm2, %v823_v28, 0.0  ;;  %v4366_v28 = vld [vmem:[#allocation29_spill] sm:$0xff] }
 0x200   :  { %v927_v35 = vadd.f32 %v926_v32, %v925_v11  ;;  %v934_v11 = vsel %vm577_vm2, %v824_v4, 0.0  ;;  %v4367_v4 = vld [vmem:[#allocation30_spill] sm:$0xff] }
 0x202   :  { %v929_v53 = vadd.f32 %v928_v3, %v927_v35  ;;  %v936_v35 = vsel %vm577_vm2, %v825_v57, 0.0  ;;  %v4368_v57 = vld [vmem:[#allocation31_spill] sm:$0xff] }
 0x204   :  { %v931_v20 = vadd.f32 %v930_v27, %v929_v53  ;;  %v828_v53 = vmul.f32 %v4365_v39, %v4365_v39  ;;  %v938_v27 = vsel %vm577_vm2, %v826_v5, 0.0  ;;  %v832_v5 = vmul.f32 %v2721_v49, %v2721_v49 }
 0x206   :  { %v933_v1 = vadd.f32 %v932_v22, %v931_v20  ;;  %v829_v20 = vmul.f32 %v4366_v28, %v4366_v28  ;;  %v940_v22 = vsel %vm577_vm2, %v827_v26, 0.0 }
 0x208   :  { %v935_v32 = vadd.f32 %v934_v11, %v933_v1  ;;  %v830_v1 = vmul.f32 %v4367_v4, %v4367_v4  ;;  %v942_v11 = vsel %vm577_vm2, %v828_v53, 0.0  ;;  %v950_v53 = vsel %vm577_vm2, %v832_v5, 0.0  ;;  %v4371_v5 = vld [vmem:[#allocation16_spill] sm:$0xff] }
 0x20a   :  { %v937_v3 = vadd.f32 %v936_v35, %v935_v32  ;;  %v831_v32 = vmul.f32 %v4368_v57, %v4368_v57  ;;  %v944_v35 = vsel %vm577_vm2, %v829_v20, 0.0 }
 0x20c   :  { %v939_v19 = vadd.f32 %v938_v27, %v937_v3  ;;  %v946_v3 = vsel %vm577_vm2, %v830_v1, 0.0  ;;  %v948_v26 = vsel %vm577_vm2, %v831_v32, 0.0  ;;  %v4369_v1 = vld [vmem:[#allocation17_spill] sm:$0xff] }
 0x20d   :  { %v4370_v32 = vld [vmem:[#allocation13_spill] sm:$0xff] }
 0x20e   :  { %v941_v14 = vadd.f32 %v940_v22, %v939_v19  ;;  %v833_v19 = vmul.f32 %v2725_v59, %v2725_v59 }
 0x210   :  { %v943_v25 = vadd.f32 %v942_v11, %v941_v14  ;;  %v834_v14 = vmul.f32 %v2729_v21, %v2729_v21  ;;  %v952_v20 = vsel %vm577_vm2, %v833_v19, 0.0  ;;  %v4372_v19 = vld [vmem:[#allocation20_spill] sm:$0xff] }
 0x212   :  { %v945_v9 = vadd.f32 %v944_v35, %v943_v25  ;;  %v835_v25 = vmul.f32 %v2733_v33, %v2733_v33 }
 0x214   :  { %v947_v27 = vadd.f32 %v946_v3, %v945_v9  ;;  %v836_v9 = vmul.f32 %v4369_v1, %v4369_v1  ;;  %v954_v3 = vsel %vm577_vm2, %v834_v14, 0.0  ;;  %v4373_v14 = vld [vmem:[#allocation32_spill] sm:$0xff] }
 0x216   :  { %v949_v22 = vadd.f32 %v948_v26, %v947_v27  ;;  %v837_v27 = vmul.f32 %v4370_v32, %v4370_v32  ;;  %v956_v26 = vsel %vm577_vm2, %v835_v25, 0.0 }
 0x218   :  { %v951_v11 = vadd.f32 %v950_v53, %v949_v22  ;;  %v838_v22 = vmul.f32 %v4371_v5, %v4371_v5  ;;  %v958_v53 = vsel %vm577_vm2, %v836_v9, 0.0 }
 0x21a   :  { %v953_v35 = vadd.f32 %v952_v20, %v951_v11  ;;  %v839_v11 = vmul.f32 %v4372_v19, %v4372_v19  ;;  %v960_v20 = vsel %vm577_vm2, %v837_v27, 0.0 }
 0x21c   :  { %v955_v36 = vadd.f32 %v954_v3, %v953_v35  ;;  %v840_v35 = vmul.f32 %v4373_v14, %v4373_v14  ;;  %v962_v3 = vsel %vm577_vm2, %v838_v22, 0.0  ;;  %v2949_v22 = vstv %s1797_s0 }
 0x21e   :  { %v957_v30 = vadd.f32 %v956_v26, %v955_v36  ;;  %v964_v36 = vsel %vm577_vm2, %v839_v11, 0.0  ;;  %v966_v26 = vsel %vm577_vm2, %v840_v35, 0.0 }
 0x220   :  { %v959_v17 = vadd.f32 %v958_v53, %v957_v30 }
 0x222   :  { %v961_v54 = vadd.f32 %v960_v20, %v959_v17 }
 0x224   :  { %v963_v48 = vadd.f32 %v962_v3, %v961_v54 }
 0x226   :  { %v965_v25 = vadd.f32 %v964_v36, %v963_v48  ;;  %v4374_v48 = vld [vmem:[#allocation23_spill] sm:$0xff]  ;;  %v4384_v36 = vld [vmem:[#allocation24_spill] sm:$0xff] }
 0x228   :  { %v967_v40 = vadd.f32 %v966_v26, %v965_v25  ;;  %v4386_v25 = vld [vmem:[#allocation22_spill] sm:$0xff] }
 0x22a   :  { %v968_v9 = vrot.slane %v967_v40, 4 }
 0x22c   :  { %v969_v30 = vadd.f32 %v968_v9, %v967_v40  ;;  %v4376_v40 = vld [vmem:[#allocation25_spill] sm:$0xff] }
 0x22e   :  { %v970_v53 = vrot.slane %v969_v30, 2 }
 0x230   :  { %v971_v23 = vadd.f32 %v970_v53, %v969_v30 }
 0x232   :  { %v972_v31 = vrot.slane %v971_v23, 1 }
 0x234   :  { %v973_v24 = vadd.f32 %v972_v31, %v971_v23 }
 0x236   :  { %v974_v27 = vmul.f32 0.001953125, %v973_v24 }
 0x238   :  { %v975_v17 = vadd.f32 1e-05, %v974_v27 }
 0x23a   :  { %1947 = vrsqrt.f32 %v975_v17 }
 0x244   :  { %v2947_v20 = vpop.eup %1947 }
 0x245   :  { %v2953_v54 = vmul.f32 %v2947_v20, %v4371_v5  ;;  %v2957_v11 = vmul.f32 %v2947_v20, %v4374_v48  ;;  %v2961_v35 = vmul.f32 %v2947_v20, %v4376_v40  ;;  %v2965_v24 = vmul.f32 %v2947_v20, %v2517_v62 }
 0x246   :  { %v2969_v31 = vmul.f32 %v2947_v20, %v2521_v42  ;;  %v2973_v23 = vmul.f32 %v2947_v20, %v2525_v46  ;;  %v2977_v5 = vmul.f32 %v2947_v20, %v2529_v41  ;;  %v2981_v3 = vmul.f32 %v2947_v20, %v2533_v44 }
 0x247   :  { %4375 = vst [vmem:[#allocation28_spill] sm:$0xff] %v2957_v11  ;;  %4377 = vst [vmem:[#allocation29_spill] sm:$0xff] %v2961_v35  ;;  %v2985_v62 = vmul.f32 %v2947_v20, %v2537_v56  ;;  %v2989_v42 = vmul.f32 %v2947_v20, %v2629_v6  ;;  %v2993_v46 = vmul.f32 %v2947_v20, %v2633_v37 }
 0x248   :  { %4378 = vst [vmem:[#allocation30_spill] sm:$0xff] %v2965_v24  ;;  %4379 = vst [vmem:[#allocation31_spill] sm:$0xff] %v2969_v31  ;;  %v2997_v41 = vmul.f32 %v2947_v20, %v2637_v38  ;;  %v3001_v44 = vmul.f32 %v2947_v20, %v2641_v51  ;;  %v3005_v56 = vmul.f32 %v2947_v20, %v2645_v52 }
 0x249   :  { %4380 = vst [vmem:[#allocation17_spill] sm:$0xff] %v2973_v23  ;;  %4381 = vst [vmem:[#allocation13_spill] sm:$0xff] %v2977_v5  ;;  %v3009_v6 = vmul.f32 %v2947_v20, %v4384_v36  ;;  %v3013_v37 = vmul.f32 %v2947_v20, %v4386_v25  ;;  %v3017_v38 = vmul.f32 %v2947_v20, %v2649_v45 }
 0x24a   :  { %4382 = vst [vmem:[#allocation16_spill] sm:$0xff] %v2981_v3  ;;  %4383 = vst [vmem:[#allocation20_spill] sm:$0xff] %v2985_v62  ;;  %v3021_v51 = vmul.f32 %v2947_v20, %v2653_v50  ;;  %v3025_v52 = vmul.f32 %v2947_v20, %v2657_v43  ;;  %v3029_v26 = vmul.f32 %v2947_v20, %v2661_v47 }
 0x24b   :  { %4385 = vst [vmem:[#allocation32_spill] sm:$0xff] %v3009_v6  ;;  %4387 = vst [vmem:[#allocation23_spill] sm:$0xff] %v3013_v37  ;;  %v3033_v9 = vmul.f32 %v2947_v20, %v2665_v61  ;;  %v3037_v45 = vmul.f32 %v2947_v20, %v2669_v2  ;;  %v1240_v50 = vmul.f32 %v2949_v22, %v3009_v6 }
 0x24c   :  { %v1238_v30 = vmul.f32 %v2949_v22, %v3013_v37  ;;  %v3045_v43 = vmul.f32 %v2947_v20, %v2673_v58  ;;  %v3049_v47 = vmul.f32 %v2947_v20, %v2677_v0  ;;  %v3053_v61 = vmul.f32 %v2947_v20, %v2681_v13 }
 0x24d   :  { %v3057_v2 = vmul.f32 %v2947_v20, %v2685_v18  ;;  %v3061_v53 = vmul.f32 %v2947_v20, %v2689_v10  ;;  %v3065_v58 = vmul.f32 %v2947_v20, %v2693_v16  ;;  %v3069_v0 = vmul.f32 %v2947_v20, %v2697_v29  ;;  %1370 = vrot.lane.b32.xlu1 %v1240_v50, %s1964_s3 }
 0x24e   :  { %1366 = vrot.lane.b32.xlu0 %v1238_v30, %s1964_s3  ;;  %v3075_v13 = vmul.f32 %v2947_v20, %v2701_v34  ;;  %v3079_v18 = vmul.f32 %v2947_v20, %v4365_v39  ;;  %v3083_v10 = vmul.f32 %v2947_v20, %v4366_v28  ;;  %v3087_v16 = vmul.f32 %v2947_v20, %v4367_v4 }
 0x24f   :  { %v3091_v29 = vmul.f32 %v2947_v20, %v4368_v57  ;;  %v3095_v34 = vmul.f32 %v2947_v20, %v2721_v49  ;;  %v1241_v39 = vmul.f32 %v2949_v22, %v2961_v35  ;;  %v1239_v27 = vmul.f32 %v2949_v22, %v2957_v11 }
 0x250   :  { %v3103_v28 = vmul.f32 %v2947_v20, %v2725_v59  ;;  %v3107_v4 = vmul.f32 %v2947_v20, %v2729_v21  ;;  %v3111_v57 = vmul.f32 %v2947_v20, %v2733_v33  ;;  %v3115_v49 = vmul.f32 %v2947_v20, %v4369_v1 }
 0x251   :  { %v3119_v17 = vmul.f32 %v2947_v20, %v4370_v32  ;;  %1372 = vrot.lane.b32.xlu1 %v1241_v39, %s1964_s3  ;;  %v1243_v59 = vmul.f32 %v2949_v22, %v2969_v31  ;;  %v1242_v21 = vmul.f32 %v2949_v22, %v2965_v24  ;;  %v1245_v33 = vmul.f32 %v2949_v22, %v2977_v5 }
 0x252   :  { %1368 = vrot.lane.b32.xlu0 %v1239_v27, %s1964_s3  ;;  %v1244_v1 = vmul.f32 %v2949_v22, %v2973_v23  ;;  %v3133_v32 = vmul.f32 %v2949_v22, %v2993_v46  ;;  %v3137_v48 = vmul.f32 %v2949_v22, %v2989_v42  ;;  %v3141_v40 = vmul.f32 %v2949_v22, %v3001_v44 }
 0x253   :  { %v3145_v36 = vmul.f32 %v2949_v22, %v2997_v41  ;;  %v3149_v25 = vmul.f32 %v2949_v22, %v3017_v38  ;;  %v3153_v50 = vmul.f32 %v2949_v22, %v3005_v56  ;;  %v3157_v30 = vmul.f32 %v2949_v22, %v3025_v52 }
 0x254   :  { %v3161_v39 = vmul.f32 %v2949_v22, %v3021_v51  ;;  %v3165_v27 = vmul.f32 %v2949_v22, %v3033_v9  ;;  %v3169_v23 = vmul.f32 %v2949_v22, %v3029_v26  ;;  %v3175_v5 = vmul.f32 %v2949_v22, %v3045_v43 }
 0x255   :  { %1376 = vrot.lane.b32.xlu1 %v1243_v59, %s1964_s3  ;;  %v3179_v24 = vmul.f32 %v2949_v22, %v3037_v45  ;;  %v3183_v31 = vmul.f32 %v2949_v22, %v3053_v61  ;;  %v3187_v11 = vmul.f32 %v2949_v22, %v3049_v47  ;;  %v3191_v59 = vmul.f32 %v2949_v22, %v3061_v53 }
 0x256   :  { %1374 = vrot.lane.b32.xlu0 %v1242_v21, %s1964_s3  ;;  %v3195_v21 = vmul.f32 %v2949_v22, %v3057_v2  ;;  %v3199_v35 = vmul.f32 %v2949_v22, %v3069_v0  ;;  %v3203_v37 = vmul.f32 %v2949_v22, %v3065_v58  ;;  %v3207_v6 = vmul.f32 %v2949_v22, %v3079_v18 }
 0x257   :  { %4388 = vst [vmem:[#allocation25_spill] sm:$0xff] %v3187_v11  ;;  %4389 = vst [vmem:[#allocation24_spill] sm:$0xff] %v3191_v59  ;;  %v3211_v11 = vmul.f32 %v2949_v22, %v3075_v13  ;;  %v3215_v59 = vmul.f32 %v2949_v22, %v3087_v16 }
 0x258   :  { %4390 = vst [vmem:[#allocation22_spill] sm:$0xff] %v3195_v21  ;;  %4391 = vst [vmem:[#allocation33_spill] sm:$0xff] %v3199_v35  ;;  %v3219_v21 = vmul.f32 %v2949_v22, %v3083_v10  ;;  %v3223_v35 = vmul.f32 %v2949_v22, %v3095_v34 }
 0x259   :  { %4392 = vst [vmem:[#allocation34_spill] sm:$0xff] %v3203_v37  ;;  %4393 = vst [vmem:[#allocation35_spill] sm:$0xff] %v3207_v6  ;;  %v3227_v37 = vmul.f32 %v2949_v22, %v3091_v29  ;;  %v3231_v6 = vmul.f32 %v2949_v22, %v3107_v4  ;;  %1380 = vrot.lane.b32.xlu1 %v1245_v33, %s1964_s3  ;;  %v3261_v33 = vmul.f32 %v2949_v22, %v3111_v57 }
 0x25a   :  { %4394 = vst [vmem:[#allocation36_spill] sm:$0xff] %v3211_v11  ;;  %4395 = vst [vmem:[#allocation37_spill] sm:$0xff] %v3215_v59  ;;  %v3235_v11 = vmul.f32 %v2947_v20, %v4372_v19  ;;  %v3239_v59 = vmul.f32 %v2947_v20, %v4373_v14  ;;  %1378 = vrot.lane.b32.xlu0 %v1244_v1, %s1964_s3  ;;  %v3253_v19 = vmul.f32 %v2947_v20, %v2545_v55 }
 0x25b   :  { %4396 = vst [vmem:[#allocation38_spill] sm:$0xff] %v3223_v35  ;;  %4397 = vst [vmem:[#allocation39_spill] sm:$0xff] %v3227_v37  ;;  %v3245_v35 = vmul.f32 %v2949_v22, %v3103_v28  ;;  %v3249_v37 = vmul.f32 %v2947_v20, %v2541_v63  ;;  %v3257_v14 = vmul.f32 %v2949_v22, %v3115_v49 }
 0x25c   :  { %4400 = vst [vmem:[#allocation42_spill] sm:$0xff] %v3253_v19  ;;  %4401 = vst [vmem:[#allocation43_spill] sm:$0xff] %v3261_v33  ;;  %v1247_v1 = vmul.f32 %v2949_v22, %v2985_v62  ;;  %v3269_v63 = vmul.f32 %v2949_v22, %v2953_v54  ;;  %v3273_v55 = vmul.f32 %v2949_v22, %v3119_v17 }
 0x25d   :  { %4398 = vst [vmem:[#allocation40_spill] sm:$0xff] %v3245_v35  ;;  %4399 = vst [vmem:[#allocation41_spill] sm:$0xff] %v3249_v37  ;;  %v1246_v35 = vmul.f32 %v2949_v22, %v2981_v3  ;;  %v3279_v33 = vmul.f32 %v2949_v22, %v3239_v59  ;;  %v3283_v62 = vmul.f32 %v2949_v22, %v3235_v11 }
 0x25e   :  { %4402 = vst [vmem:[#allocation44_spill] sm:$0xff] %v3269_v63  ;;  %1384 = vrot.lane.b32.xlu1 %v1247_v1, %s1964_s3  ;;  %v3287_v3 = vmul.f32 %v2947_v20, %v2549_v60  ;;  %v3291_v63 = vmul.f32 %v2947_v20, %v2553_v8  ;;  %v1249_v1 = vmul.f32 %v2949_v22, %v3253_v19 }
 0x25f   :  { %1382 = vrot.lane.b32.xlu0 %v1246_v35, %s1964_s3  ;;  %4403 = vst [vmem:[#allocation45_spill] sm:$0xff] %v3283_v62  ;;  %v1248_v35 = vmul.f32 %v2949_v22, %v3249_v37  ;;  %v3301_v62 = vmul.f32 %v2947_v20, %v2557_v15  ;;  %v3305_v60 = vmul.f32 %v2947_v20, %v2561_v7  ;;  %v4408_v15 = vld [vmem:[#allocation26_spill] sm:$0xff]  ;;  %v3325_v37 = vstv %s1041_s24 }
 0x260   :  { %4404 = vst [vmem:[#allocation46_spill] sm:$0xff] %v3287_v3  ;;  %4405 = vst [vmem:[#allocation47_spill] sm:$0xff] %v3291_v63  ;;  %v1251_v8 = vmul.f32 %v2949_v22, %v3291_v63  ;;  %v1250_v19 = vmul.f32 %v2949_v22, %v3287_v3  ;;  %v3343_v3 = vmul.f32 %v3325_v37, %v2993_v46 }
 0x261   :  { %4406 = vst [vmem:[#allocation48_spill] sm:$0xff] %v3301_v62  ;;  %4407 = vst [vmem:[#allocation49_spill] sm:$0xff] %v3305_v60  ;;  %v1253_v7 = vmul.f32 %v2949_v22, %v3305_v60  ;;  %v1252_v63 = vmul.f32 %v2949_v22, %v3301_v62  ;;  %v3363_v46 = vmul.f32 %v3325_v37, %v3005_v56 }
 0x262   :  { %1388 = vrot.lane.b32.xlu1 %v1249_v1, %s1964_s3  ;;  %v3315_v1 = vmul.f32 %v2947_v20, %v2565_v12  ;;  %v3381_v56 = vmul.f32 %v3325_v37, %v3025_v52  ;;  %v3401_v52 = vmul.f32 %v3325_v37, %v3037_v45 }
 0x263   :  { %1386 = vrot.lane.b32.xlu0 %v1248_v35, %s1964_s3  ;;  %v3319_v35 = vmul.f32 %v2947_v20, %v4408_v15 }
 0x264   :  { %v1254_v62 = vmul.f32 %v2949_v22, %v3315_v1 }
 0x265   :  { %v1255_v60 = vmul.f32 %v2949_v22, %v3319_v35 }
 0x266   :  { %1392 = vrot.lane.b32.xlu1 %v1251_v8, %s1964_s3  ;;  %v4410_v8 = vld [vmem:[#allocation6_spill] sm:$0xff] }
 0x267   :  { %1390 = vrot.lane.b32.xlu0 %v1250_v19, %s1964_s3  ;;  %v4409_v19 = vld [vmem:[#allocation5_spill] sm:$0xff]  ;;  %v3335_v15 = vmul.f32 %v2947_v20, %v4410_v8  ;;  %v3359_v8 = vmul.f32 %v3325_v37, %v3017_v38 }
 0x268   :  { %v3331_v12 = vmul.f32 %v2947_v20, %v4409_v19  ;;  %v3355_v19 = vmul.f32 %v3325_v37, %v2997_v41 }
 0x269   :  { %4412 = vst [vmem:[#allocation5_spill] sm:$0xff] %v3359_v8  ;;  %v1257_v38 = vmul.f32 %v2949_v22, %v3335_v15 }
 0x26a   :  { %1396 = vrot.lane.b32.xlu1 %v1253_v7, %s1964_s3  ;;  %v3351_v7 = vmul.f32 %v3325_v37, %v3001_v44  ;;  %v1256_v8 = vmul.f32 %v2949_v22, %v3331_v12 }
 0x26b   :  { %1394 = vrot.lane.b32.xlu0 %v1252_v63, %s1964_s3  ;;  %v3347_v63 = vmul.f32 %v3325_v37, %v2989_v42  ;;  %v4413_v42 = vld [vmem:[#allocation8_spill] sm:$0xff] }
 0x26c   :  { %4411 = vst [vmem:[#allocation26_spill] sm:$0xff] %v3351_v7  ;;  %v3369_v44 = vmul.f32 %v2947_v20, %v4413_v42  ;;  %v4414_v7 = vld [vmem:[#allocation10_spill] sm:$0xff]  ;;  %v3397_v42 = vmul.f32 %v3325_v37, %v3045_v43  ;;  %4416 = vst [vmem:[#allocation8_spill] sm:$0xff] %v3401_v52 }
 0x26d   :  { %v3373_v41 = vmul.f32 %v2947_v20, %v4414_v7  ;;  %v3393_v7 = vmul.f32 %v3325_v37, %v3029_v26 }
 0x26e   :  { %1400 = vrot.lane.b32.xlu1 %v1255_v60, %s1964_s3  ;;  %v3389_v60 = vmul.f32 %v3325_v37, %v3033_v9  ;;  %v4417_v9 = vld [vmem:[#allocation7_spill] sm:$0xff]  ;;  %v1258_v52 = vmul.f32 %v2949_v22, %v3369_v44 }
 0x26f   :  { %1398 = vrot.lane.b32.xlu0 %v1254_v62, %s1964_s3  ;;  %v3385_v62 = vmul.f32 %v3325_v37, %v3021_v51  ;;  %4415 = vst [vmem:[#allocation6_spill] sm:$0xff] %v3393_v7  ;;  %v3405_v51 = vmul.f32 %v3325_v37, %v3053_v61  ;;  %v3411_v26 = vmul.f32 %v2947_v20, %v4417_v9  ;;  %v4418_v7 = vld [vmem:[#allocation9_spill] sm:$0xff] }
 0x270   :  { %v3415_v43 = vmul.f32 %v2947_v20, %v4418_v7  ;;  %v1259_v45 = vmul.f32 %v2949_v22, %v3373_v41  ;;  %v3423_v61 = vmul.f32 %v3325_v37, %v3049_v47  ;;  %v3435_v7 = vmul.f32 %v3325_v37, %v3069_v0  ;;  %v4421_v0 = vld [vmem:[#allocation12_spill] sm:$0xff] }
 0x271   :  { %v3439_v9 = vmul.f32 %v3325_v37, %v3065_v58  ;;  %v3443_v47 = vmul.f32 %v3325_v37, %v3079_v18  ;;  %v3457_v58 = vmul.f32 %v2947_v20, %v4421_v0  ;;  %v3485_v0 = vmul.f32 %v3325_v37, %v3103_v28 }
 0x272   :  { %1404 = vrot.lane.b32.xlu1 %v1257_v38, %s1964_s3  ;;  %v3431_v38 = vmul.f32 %v3325_v37, %v3057_v2  ;;  %v3451_v2 = vmul.f32 %v3325_v37, %v3087_v16  ;;  %v3469_v16 = vmul.f32 %v3325_v37, %v3083_v10  ;;  %v3489_v10 = vmul.f32 %v3325_v37, %v3115_v49 }
 0x273   :  { %1402 = vrot.lane.b32.xlu0 %v1256_v8, %s1964_s3  ;;  %v3427_v8 = vmul.f32 %v3325_v37, %v3061_v53  ;;  %4419 = vst [vmem:[#allocation10_spill] sm:$0xff] %v3439_v9  ;;  %v3447_v53 = vmul.f32 %v3325_v37, %v3075_v13  ;;  %v4422_v9 = vld [vmem:[#allocation15_spill] sm:$0xff]  ;;  %v1261_v13 = vmul.f32 %v2949_v22, %v3415_v43 }
 0x274   :  { %v3461_v18 = vmul.f32 %v2947_v20, %v4422_v9  ;;  %v3481_v9 = vmul.f32 %v3325_v37, %v3107_v4  ;;  %4424 = vst [vmem:[#allocation12_spill] sm:$0xff] %v3489_v10  ;;  %v1262_v10 = vmul.f32 %v2949_v22, %v3457_v58 }
 0x275   :  { %4420 = vst [vmem:[#allocation7_spill] sm:$0xff] %v3447_v53  ;;  %v1260_v53 = vmul.f32 %v2949_v22, %v3411_v26 }
 0x276   :  { %1408 = vrot.lane.b32.xlu1 %v1259_v45, %s1964_s3  ;;  %v3477_v45 = vmul.f32 %v3325_v37, %v3091_v29  ;;  %4423 = vst [vmem:[#allocation9_spill] sm:$0xff] %v3481_v9  ;;  %v4425_v29 = vld [vmem:[#allocation11_spill] sm:$0xff]  ;;  %v4426_v9 = vld [vmem:[#allocation14_spill] sm:$0xff]  ;;  %v1263_v49 = vmul.f32 %v2949_v22, %v3461_v18 }
 0x277   :  { %1406 = vrot.lane.b32.xlu0 %v1258_v52, %s1964_s3  ;;  %v3473_v52 = vmul.f32 %v3325_v37, %v3095_v34  ;;  %v3493_v34 = vmul.f32 %v3325_v37, %v3111_v57  ;;  %v3499_v4 = vmul.f32 %v2947_v20, %v4425_v29  ;;  %v3503_v28 = vmul.f32 %v2947_v20, %v4426_v9  ;;  %v4430_v29 = vld [vmem:[#allocation18_spill] sm:$0xff] }
 0x278   :  { %v3511_v57 = vmul.f32 %v3325_v37, %v2953_v54  ;;  %v3523_v9 = vmul.f32 %v3325_v37, %v3235_v11  ;;  %v3529_v54 = vmul.f32 %v2947_v20, %v4430_v29  ;;  %v4432_v11 = vld [vmem:[#allocation27_spill] sm:$0xff] }
 0x27a   :  { %1412 = vrot.lane.b32.xlu1 %v1261_v13, %s1964_s3  ;;  %4427 = vst [vmem:[#allocation15_spill] sm:$0xff] %v3511_v57  ;;  %v3519_v13 = vmul.f32 %v3325_v37, %v3239_v59  ;;  %4429 = vst [vmem:[#allocation14_spill] sm:$0xff] %v3523_v9  ;;  %v4431_v57 = vld [vmem:[#allocation21_spill] sm:$0xff]  ;;  %v1265_v59 = vmul.f32 %v2949_v22, %v3503_v28  ;;  %v1266_v9 = vmul.f32 %v2949_v22, %v3529_v54 }
 0x27b   :  { %1410 = vrot.lane.b32.xlu0 %v1260_v53, %s1964_s3  ;;  %v3515_v53 = vmul.f32 %v3325_v37, %v3119_v17  ;;  %v3533_v17 = vmul.f32 %v2947_v20, %v4431_v57 }
 0x27c   :  { %4428 = vst [vmem:[#allocation11_spill] sm:$0xff] %v3519_v13  ;;  %v1264_v13 = vmul.f32 %v2949_v22, %v3499_v4 }
 0x27d   :  { %v1267_v57 = vmul.f32 %v2949_v22, %v3533_v17 }
 0x27e   :  { %1416 = vrot.lane.b32.xlu1 %v1263_v49, %s1964_s3  ;;  %v4433_v49 = vld [vmem:[#allocation19_spill] sm:$0xff] }
 0x27f   :  { %1414 = vrot.lane.b32.xlu0 %v1262_v10, %s1964_s3  ;;  %v3543_v10 = vmul.f32 %v2947_v20, %v4432_v11  ;;  %v3547_v29 = vmul.f32 %v2947_v20, %v4433_v49  ;;  %v4434_v20 = vld [vmem:[#allocation25_spill] sm:$0xff] }
 0x280   :  { %v4447_v11 = vld [vmem:[#allocation29_spill] sm:$0xff] }
 0x281   :  { %v1112_v49 = vmul.f32 %v3325_v37, %v4447_v11 }
 0x282   :  { %1420 = vrot.lane.b32.xlu1 %v1265_v59, %s1964_s3  ;;  %v1268_v59 = vmul.f32 %v2949_v22, %v3543_v10 }
 0x283   :  { %1418 = vrot.lane.b32.xlu0 %v1264_v13, %s1964_s3  ;;  %v1269_v13 = vmul.f32 %v2949_v22, %v3547_v29  ;;  %v4435_v22 = vld [vmem:[#allocation24_spill] sm:$0xff] }
 0x286   :  { %1424 = vrot.lane.b32.xlu1 %v1267_v57, %s1964_s3 }
 0x287   :  { %1422 = vrot.lane.b32.xlu0 %v1266_v9, %s1964_s3  ;;  %v4446_v9 = vld [vmem:[#allocation40_spill] sm:$0xff] }
 0x28a   :  { %1428 = vrot.lane.b32.xlu1 %v1269_v13, %s1964_s3 }
 0x28b   :  { %1426 = vrot.lane.b32.xlu0 %v1268_v59, %s1964_s3  ;;  %v1047_v59 = vld [vmem:[%s4236_s1 + $0x18] sm:$0xff] }
 0x28e   :  { %1432 = vrot.lane.b32.xlu1 %v3133_v32, %s1964_s3  ;;  %v4436_v32 = vld [vmem:[#allocation22_spill] sm:$0xff] }
 0x28f   :  { %1430 = vrot.lane.b32.xlu0 %v3137_v48, %s1964_s3  ;;  %v4441_v48 = vld [vmem:[#allocation37_spill] sm:$0xff] }
 0x292   :  { %1436 = vrot.lane.b32.xlu1 %v3141_v40, %s1964_s3  ;;  %v4442_v40 = vld [vmem:[#allocation38_spill] sm:$0xff] }
 0x293   :  { %1434 = vrot.lane.b32.xlu0 %v3145_v36, %s1964_s3  ;;  %v4443_v36 = vld [vmem:[#allocation39_spill] sm:$0xff] }
 0x296   :  { %1440 = vrot.lane.b32.xlu1 %v3149_v25, %s1964_s3  ;;  %v4444_v25 = vld [vmem:[#allocation32_spill] sm:$0xff] }
 0x297   :  { %1438 = vrot.lane.b32.xlu0 %v3153_v50, %s1964_s3  ;;  %v1111_v50 = vmul.f32 %v3325_v37, %v4444_v25 }
 0x29a   :  { %1444 = vrot.lane.b32.xlu1 %v3157_v30, %s1964_s3  ;;  %v4445_v30 = vld [vmem:[#allocation23_spill] sm:$0xff] }
 0x29b   :  { %1442 = vrot.lane.b32.xlu0 %v3161_v39, %s1964_s3  ;;  %v1109_v39 = vmul.f32 %v3325_v37, %v4445_v30 }
 0x29e   :  { %1448 = vrot.lane.b32.xlu1 %v3165_v27, %s1964_s3  ;;  %v1046_v27 = vld [vmem:[%s4236_s1 + $0x10] sm:$0xff] }
 0x29f   :  { %1446 = vrot.lane.b32.xlu0 %v3169_v23, %s1964_s3  ;;  %v4437_v23 = vld [vmem:[#allocation33_spill] sm:$0xff]  ;;  %v1175_v57 = vadd.f32 %v1111_v50, %v1046_v27  ;;  %v1049_v27 = vld [vmem:[%s4236_s1 + $0x28] sm:$0xff] }
 0x2a2   :  { %1452 = vrot.lane.b32.xlu1 %v3175_v5, %s1964_s3  ;;  %v4438_v5 = vld [vmem:[#allocation34_spill] sm:$0xff] }
 0x2a3   :  { %1450 = vrot.lane.b32.xlu0 %v3179_v24, %s1964_s3  ;;  %v4439_v24 = vld [vmem:[#allocation35_spill] sm:$0xff] }
 0x2a6   :  { %1456 = vrot.lane.b32.xlu1 %v3183_v31, %s1964_s3  ;;  %v4440_v31 = vld [vmem:[#allocation36_spill] sm:$0xff] }
 0x2a7   :  { %1454 = vrot.lane.b32.xlu0 %v4434_v20, %s1964_s3  ;;  %v4448_v20 = vld [vmem:[#allocation28_spill] sm:$0xff] }
 0x2aa   :  { %1460 = vrot.lane.b32.xlu1 %v4435_v22, %s1964_s3  ;;  %v1110_v22 = vmul.f32 %v3325_v37, %v4448_v20 }
 0x2ab   :  { %1458 = vrot.lane.b32.xlu0 %v4436_v32, %s1964_s3  ;;  %v3630_v32 = vstv %s1798_s25 }
 0x2ae   :  { %1464 = vrot.lane.b32.xlu1 %v4437_v23, %s1964_s3 }
 0x2af   :  { %1462 = vrot.lane.b32.xlu0 %v4438_v5, %s1964_s3 }
 0x2b2   :  { %1468 = vrot.lane.b32.xlu1 %v4439_v24, %s1964_s3 }
 0x2b3   :  { %1466 = vrot.lane.b32.xlu0 %v4440_v31, %s1964_s3 }
 0x2b6   :  { %1472 = vrot.lane.b32.xlu1 %v4441_v48, %s1964_s3  ;;  %v4449_v48 = vld [vmem:[#allocation43_spill] sm:$0xff] }
 0x2b7   :  { %1470 = vrot.lane.b32.xlu0 %v3219_v21, %s1964_s3  ;;  %v1044_v21 = vld [vmem:[%s4236_s1] sm:$0xff] }
 0x2b8   :  { %v1173_v13 = vadd.f32 %v1109_v39, %v1044_v21  ;;  %v4451_v21 = vld [vmem:[#allocation30_spill] sm:$0xff] }
 0x2ba   :  { %1476 = vrot.lane.b32.xlu1 %v4442_v40, %s1964_s3  ;;  %v1176_v40 = vadd.f32 %v1112_v49, %v1047_v59  ;;  %v1048_v49 = vld [vmem:[%s4236_s1 + $0x20] sm:$0xff]  ;;  %v4452_v59 = vld [vmem:[#allocation44_spill] sm:$0xff] }
 0x2bb   :  { %1474 = vrot.lane.b32.xlu0 %v4443_v36, %s1964_s3  ;;  %v4450_v36 = vld [vmem:[#allocation31_spill] sm:$0xff] }
 0x2bc   :  { %v1114_v25 = vmul.f32 %v3325_v37, %v4450_v36 }
 0x2be   :  { %1480 = vrot.lane.b32.xlu1 %v3231_v6, %s1964_s3  ;;  %v1045_v6 = vld [vmem:[%s4236_s1 + $0x8] sm:$0xff]  ;;  %v1178_v20 = vadd.f32 %v1114_v25, %v1049_v27 }
 0x2bf   :  { %1478 = vrot.lane.b32.xlu0 %v4446_v9, %s1964_s3  ;;  %v1371_v23 = vpop.permute.xlu1 %1370  ;;  %v1174_v39 = vadd.f32 %v1110_v22, %v1045_v6  ;;  %v1113_v9 = vmul.f32 %v3325_v37, %v4451_v21  ;;  %v4453_v22 = vld [vmem:[#allocation13_spill] sm:$0xff]  ;;  %v4456_v21 = vld [vmem:[#allocation20_spill] sm:$0xff] }
 0x2c0   :  { %v1367_v5 = vpop.permute.xlu0 %1366  ;;  %v1560_v24 = vadd.f32 %v1371_v23, %v1175_v57  ;;  %v1116_v23 = vmul.f32 %v3325_v37, %v4453_v22  ;;  %v1052_v22 = vld [vmem:[%s4236_s1 + $0x40] sm:$0xff] }
 0x2c1   :  { %v1558_v31 = vadd.f32 %v1367_v5, %v1173_v13 }
 0x2c2   :  { %1484 = vrot.lane.b32.xlu1 %v3257_v14, %s1964_s3  ;;  %v1625_v50 = vmul.f32 %v3630_v32, %v1560_v24  ;;  %v1177_v24 = vadd.f32 %v1113_v9, %v1048_v49  ;;  %v1118_v9 = vmul.f32 %v3325_v37, %v4456_v21 }
 0x2c3   :  { %1482 = vrot.lane.b32.xlu0 %v4449_v48, %s1964_s3  ;;  %v1623_v30 = vmul.f32 %v3630_v32, %v1558_v31  ;;  %v1373_v14 = vpop.permute.xlu1 %1372  ;;  %v1051_v31 = vld [vmem:[%s4236_s1 + $0x38] sm:$0xff]  ;;  %v4454_v48 = vld [vmem:[#allocation17_spill] sm:$0xff] }
 0x2c4   :  { %v1369_v11 = vpop.permute.xlu0 %1368  ;;  %1690 = vst.msk [vmem:[%s4239_s4 + $0x10] sm:$0xff] %vm1687_vm3, %v1625_v50  ;;  %v1561_v57 = vadd.f32 %v1373_v14, %v1176_v40  ;;  %v1115_v40 = vmul.f32 %v3325_v37, %v4454_v48  ;;  %v1180_v27 = vadd.f32 %v1116_v23, %v1051_v31  ;;  %v4459_v31 = vld [vmem:[#allocation41_spill] sm:$0xff] }
 0x2c5   :  { %1688 = vst.msk [vmem:[%s4239_s4] sm:$0xff] %vm1687_vm3, %v1623_v30  ;;  %v1559_v13 = vadd.f32 %v1369_v11, %v1174_v39  ;;  %v4455_v39 = vld [vmem:[#allocation45_spill] sm:$0xff]  ;;  %v1119_v48 = vmul.f32 %v3325_v37, %v4459_v31 }
 0x2c6   :  { %1488 = vrot.lane.b32.xlu1 %v4452_v59, %s1964_s3  ;;  %v1626_v5 = vmul.f32 %v3630_v32, %v1561_v57  ;;  %v4457_v57 = vld [vmem:[#allocation16_spill] sm:$0xff] }
 0x2c7   :  { %1486 = vrot.lane.b32.xlu0 %v3273_v55, %s1964_s3  ;;  %v1624_v6 = vmul.f32 %v3630_v32, %v1559_v13  ;;  %v1377_v36 = vpop.permute.xlu1 %1376  ;;  %v1050_v55 = vld [vmem:[%s4236_s1 + $0x30] sm:$0xff]  ;;  %v1117_v13 = vmul.f32 %v3325_v37, %v4457_v57 }
 0x2c8   :  { %v1375_v50 = vpop.permute.xlu0 %1374  ;;  %1691 = vst.msk [vmem:[%s4239_s4 + $0x18] sm:$0xff] %vm1687_vm3, %v1626_v5  ;;  %v1563_v25 = vadd.f32 %v1377_v36, %v1178_v20  ;;  %v1179_v49 = vadd.f32 %v1115_v40, %v1050_v55 }
 0x2c9   :  { %1689 = vst.msk [vmem:[%s4239_s4 + $0x8] sm:$0xff] %vm1687_vm3, %v1624_v6  ;;  %v1562_v30 = vadd.f32 %v1375_v50, %v1177_v24  ;;  %v4458_v6 = vld [vmem:[#allocation42_spill] sm:$0xff]  ;;  %v1181_v55 = vadd.f32 %v1117_v13, %v1052_v22 }
 0x2ca   :  { %1492 = vrot.lane.b32.xlu1 %v3279_v33, %s1964_s3  ;;  %v1628_v14 = vmul.f32 %v3630_v32, %v1563_v25  ;;  %v1053_v33 = vld [vmem:[%s4236_s1 + $0x48] sm:$0xff]  ;;  %v1120_v24 = vmul.f32 %v3325_v37, %v4458_v6 }
 0x2cb   :  { %1490 = vrot.lane.b32.xlu0 %v4455_v39, %s1964_s3  ;;  %v1627_v11 = vmul.f32 %v3630_v32, %v1562_v30  ;;  %v1381_v59 = vpop.permute.xlu1 %1380  ;;  %v1182_v50 = vadd.f32 %v1118_v9, %v1053_v33  ;;  %v1055_v39 = vld [vmem:[%s4236_s1 + $0x58] sm:$0xff]  ;;  %v1057_v22 = vld [vmem:[%s4236_s1 + $0x68] sm:$0xff] }
 0x2cc   :  { %v1379_v20 = vpop.permute.xlu0 %1378  ;;  %1693 = vst.msk [vmem:[%s4239_s4 + $0x28] sm:$0xff] %vm1687_vm3, %v1628_v14  ;;  %v1565_v23 = vadd.f32 %v1381_v59, %v1180_v27  ;;  %v1054_v27 = vld [vmem:[%s4236_s1 + $0x50] sm:$0xff] }
 0x2cd   :  { %1692 = vst.msk [vmem:[%s4239_s4 + $0x20] sm:$0xff] %vm1687_vm3, %v1627_v11  ;;  %v1564_v5 = vadd.f32 %v1379_v20, %v1179_v49  ;;  %v4460_v14 = vld [vmem:[#allocation47_spill] sm:$0xff]  ;;  %v4461_v49 = vld [vmem:[#allocation46_spill] sm:$0xff]  ;;  %v1184_v20 = vadd.f32 %v1120_v24, %v1055_v39  ;;  %v1183_v33 = vadd.f32 %v1119_v48, %v1054_v27 }
 0x2ce   :  { %v1630_v40 = vmul.f32 %v3630_v32, %v1565_v23  ;;  %v1122_v11 = vmul.f32 %v3325_v37, %v4460_v14  ;;  %v1121_v57 = vmul.f32 %v3325_v37, %v4461_v49  ;;  %v1056_v23 = vld [vmem:[%s4236_s1 + $0x60] sm:$0xff]  ;;  %v1058_v14 = vld [vmem:[%s4236_s1 + $0x70] sm:$0xff] }
 0x2cf   :  { %v1629_v36 = vmul.f32 %v3630_v32, %v1564_v5 }
 0x2d0   :  { %v1385_v25 = vpop.permute.xlu1 %1384  ;;  %1695 = vst.msk [vmem:[%s4239_s4 + $0x38] sm:$0xff] %vm1687_vm3, %v1630_v40  ;;  %v1186_v48 = vadd.f32 %v1122_v11, %v1057_v22  ;;  %v1185_v40 = vadd.f32 %v1121_v57, %v1056_v23  ;;  %v1126_v57 = vmul.f32 %v3325_v37, %v3319_v35 }
 0x2d1   :  { %v1383_v30 = vpop.permute.xlu0 %1382  ;;  %1694 = vst.msk [vmem:[%s4239_s4 + $0x30] sm:$0xff] %vm1687_vm3, %v1629_v36  ;;  %v1567_v21 = vadd.f32 %v1385_v25, %v1182_v50 }
 0x2d2   :  { %v1566_v9 = vadd.f32 %v1383_v30, %v1181_v55  ;;  %v4462_v55 = vld [vmem:[#allocation49_spill] sm:$0xff]  ;;  %v4463_v30 = vld [vmem:[#allocation48_spill] sm:$0xff] }
 0x2d3   :  { %v1632_v13 = vmul.f32 %v3630_v32, %v1567_v21  ;;  %v1124_v25 = vmul.f32 %v3325_v37, %v4462_v55  ;;  %v1123_v39 = vmul.f32 %v3325_v37, %v4463_v30 }
 0x2d4   :  { %v1631_v59 = vmul.f32 %v3630_v32, %v1566_v9  ;;  %v1389_v5 = vpop.permute.xlu1 %1388  ;;  %v1059_v9 = vld [vmem:[%s4236_s1 + $0x78] sm:$0xff] }
 0x2d5   :  { %v1387_v6 = vpop.permute.xlu0 %1386  ;;  %1697 = vst.msk [vmem:[%s4239_s4 + $0x48] sm:$0xff] %vm1687_vm3, %v1632_v13  ;;  %v1569_v24 = vadd.f32 %v1389_v5, %v1184_v20  ;;  %v1125_v13 = vmul.f32 %v3325_v37, %v3315_v1  ;;  %v1187_v22 = vadd.f32 %v1123_v39, %v1058_v14  ;;  %v1063_v39 = vld [vmem:[%s4236_s1 + $0x98] sm:$0xff] }
 0x2d6   :  { %1696 = vst.msk [vmem:[%s4239_s4 + $0x40] sm:$0xff] %vm1687_vm3, %v1631_v59  ;;  %v1568_v31 = vadd.f32 %v1387_v6, %v1183_v33  ;;  %v1188_v33 = vadd.f32 %v1124_v25, %v1059_v9  ;;  %v1061_v6 = vld [vmem:[%s4236_s1 + $0x88] sm:$0xff]  ;;  %v1129_v9 = vmul.f32 %v3325_v37, %v3369_v44 }
 0x2d7   :  { %v1634_v36 = vmul.f32 %v3630_v32, %v1569_v24  ;;  %v1060_v24 = vld [vmem:[%s4236_s1 + $0x80] sm:$0xff] }
 0x2d8   :  { %v1633_v50 = vmul.f32 %v3630_v32, %v1568_v31  ;;  %v1393_v27 = vpop.permute.xlu1 %1392  ;;  %v1128_v31 = vmul.f32 %v3325_v37, %v3335_v15  ;;  %v1189_v55 = vadd.f32 %v1125_v13, %v1060_v24  ;;  %v1065_v13 = vld [vmem:[%s4236_s1 + $0xa8] sm:$0xff]  ;;  %v1132_v24 = vmul.f32 %v3325_v37, %v3415_v43 }
 0x2d9   :  { %v1391_v21 = vpop.permute.xlu0 %1390  ;;  %1699 = vst.msk [vmem:[%s4239_s4 + $0x58] sm:$0xff] %vm1687_vm3, %v1634_v36  ;;  %v1571_v11 = vadd.f32 %v1393_v27, %v1186_v48  ;;  %v1127_v48 = vmul.f32 %v3325_v37, %v3331_v12  ;;  %v1062_v27 = vld [vmem:[%s4236_s1 + $0x90] sm:$0xff] }
 0x2da   :  { %1698 = vst.msk [vmem:[%s4239_s4 + $0x50] sm:$0xff] %vm1687_vm3, %v1633_v50  ;;  %v1570_v49 = vadd.f32 %v1391_v21, %v1185_v40  ;;  %v1190_v50 = vadd.f32 %v1126_v57, %v1061_v6  ;;  %v1130_v21 = vmul.f32 %v3325_v37, %v3373_v41 }
 0x2db   :  { %v1636_v59 = vmul.f32 %v3630_v32, %v1571_v11  ;;  %v1191_v57 = vadd.f32 %v1127_v48, %v1062_v27  ;;  %v1067_v48 = vld [vmem:[%s4236_s1 + $0xb8] sm:$0xff] }
 0x2dc   :  { %v1635_v20 = vmul.f32 %v3630_v32, %v1570_v49  ;;  %v1397_v23 = vpop.permute.xlu1 %1396  ;;  %v1192_v49 = vadd.f32 %v1128_v31, %v1063_v39 }
 0x2dd   :  { %v1395_v5 = vpop.permute.xlu0 %1394  ;;  %1701 = vst.msk [vmem:[%s4239_s4 + $0x68] sm:$0xff] %vm1687_vm3, %v1636_v59  ;;  %v1573_v1 = vadd.f32 %v1397_v23, %v1188_v33  ;;  %v1064_v59 = vld [vmem:[%s4236_s1 + $0xa0] sm:$0xff] }
 0x2de   :  { %1700 = vst.msk [vmem:[%s4239_s4 + $0x60] sm:$0xff] %vm1687_vm3, %v1635_v20  ;;  %v1572_v35 = vadd.f32 %v1395_v5, %v1187_v22  ;;  %v1194_v22 = vadd.f32 %v1130_v21, %v1065_v13  ;;  %v1193_v23 = vadd.f32 %v1129_v9, %v1064_v59  ;;  %v1068_v21 = vld [vmem:[%s4236_s1 + $0xc0] sm:$0xff]  ;;  %v1136_v9 = vmul.f32 %v3325_v37, %v3503_v28 }
 0x2df   :  { %v1638_v40 = vmul.f32 %v3630_v32, %v1573_v1  ;;  %v1131_v1 = vmul.f32 %v3325_v37, %v3411_v26 }
 0x2e0   :  { %v1637_v36 = vmul.f32 %v3630_v32, %v1572_v35  ;;  %v1401_v25 = vpop.permute.xlu1 %1400 }
 0x2e1   :  { %v1399_v30 = vpop.permute.xlu0 %1398  ;;  %1703 = vst.msk [vmem:[%s4239_s4 + $0x78] sm:$0xff] %vm1687_vm3, %v1638_v40  ;;  %v1575_v12 = vadd.f32 %v1401_v25, %v1190_v50  ;;  %v1066_v40 = vld [vmem:[%s4236_s1 + $0xb0] sm:$0xff]  ;;  %v1133_v50 = vmul.f32 %v3325_v37, %v3457_v58 }
 0x2e2   :  { %1702 = vst.msk [vmem:[%s4239_s4 + $0x70] sm:$0xff] %vm1687_vm3, %v1637_v36  ;;  %v1574_v15 = vadd.f32 %v1399_v30, %v1189_v55  ;;  %v1134_v36 = vmul.f32 %v3325_v37, %v3461_v18  ;;  %v1196_v30 = vadd.f32 %v1132_v24, %v1067_v48  ;;  %v1195_v39 = vadd.f32 %v1131_v1, %v1066_v40  ;;  %v1073_v1 = vld [vmem:[%s4236_s1 + $0xe8] sm:$0xff] }
 0x2e3   :  { %v1640_v14 = vmul.f32 %v3630_v32, %v1575_v12  ;;  %v1197_v13 = vadd.f32 %v1133_v50, %v1068_v21  ;;  %v1140_v50 = vmul.f32 %v3325_v37, %v3547_v29 }
 0x2e4   :  { %v1639_v11 = vmul.f32 %v3630_v32, %v1574_v15  ;;  %v1405_v20 = vpop.permute.xlu1 %1404  ;;  %v1069_v15 = vld [vmem:[%s4236_s1 + $0xc8] sm:$0xff] }
 0x2e5   :  { %v1403_v33 = vpop.permute.xlu0 %1402  ;;  %1705 = vst.msk [vmem:[%s4239_s4 + $0x88] sm:$0xff] %vm1687_vm3, %v1640_v14  ;;  %v1577_v44 = vadd.f32 %v1405_v20, %v1192_v49  ;;  %v1135_v14 = vmul.f32 %v3325_v37, %v3499_v4 }
 0x2e6   :  { %1704 = vst.msk [vmem:[%s4239_s4 + $0x80] sm:$0xff] %vm1687_vm3, %v1639_v11  ;;  %v1576_v41 = vadd.f32 %v1403_v33, %v1191_v57  ;;  %v1198_v57 = vadd.f32 %v1134_v36, %v1069_v15  ;;  %v1071_v33 = vld [vmem:[%s4236_s1 + $0xd8] sm:$0xff] }
 0x2e7   :  { %v1642_v5 = vmul.f32 %v3630_v32, %v1577_v44  ;;  %v1070_v44 = vld [vmem:[%s4236_s1 + $0xd0] sm:$0xff] }
 0x2e8   :  { %v1641_v6 = vmul.f32 %v3630_v32, %v1576_v41  ;;  %v1409_v35 = vpop.permute.xlu1 %1408  ;;  %v1138_v41 = vmul.f32 %v3325_v37, %v3533_v17  ;;  %v1199_v24 = vadd.f32 %v1135_v14, %v1070_v44  ;;  %v1076_v14 = vld [vmem:[%s4236_s1 + $0x100] sm:$0xff] }
 0x2e9   :  { %v1407_v31 = vpop.permute.xlu0 %1406  ;;  %1707 = vst.msk [vmem:[%s4239_s4 + $0x98] sm:$0xff] %vm1687_vm3, %v1642_v5  ;;  %v1579_v26 = vadd.f32 %v1409_v35, %v1194_v22  ;;  %v1137_v22 = vmul.f32 %v3325_v37, %v3529_v54  ;;  %v1072_v35 = vld [vmem:[%s4236_s1 + $0xe0] sm:$0xff] }
 0x2ea   :  { %1706 = vst.msk [vmem:[%s4239_s4 + $0x90] sm:$0xff] %vm1687_vm3, %v1641_v6  ;;  %v1578_v43 = vadd.f32 %v1407_v31, %v1193_v23  ;;  %v1200_v6 = vadd.f32 %v1136_v9, %v1071_v33  ;;  %v1202_v40 = vadd.f32 %v1138_v41, %v1073_v1  ;;  %v1077_v9 = vld [vmem:[%s4236_s1 + $0x108] sm:$0xff] }
 0x2eb   :  { %v1644_v55 = vmul.f32 %v3630_v32, %v1579_v26  ;;  %v1201_v26 = vadd.f32 %v1137_v22, %v1072_v35  ;;  %v1081_v35 = vld [vmem:[%s4236_s1 + $0x128] sm:$0xff] }
 0x2ec   :  { %v1643_v25 = vmul.f32 %v3630_v32, %v1578_v43  ;;  %v1413_v27 = vpop.permute.xlu1 %1412 }
 0x2ed   :  { %v1411_v12 = vpop.permute.xlu0 %1410  ;;  %1709 = vst.msk [vmem:[%s4239_s4 + $0xa8] sm:$0xff] %vm1687_vm3, %v1644_v55  ;;  %v1581_v58 = vadd.f32 %v1413_v27, %v1196_v30  ;;  %v1139_v55 = vmul.f32 %v3325_v37, %v3543_v10  ;;  %v1074_v27 = vld [vmem:[%s4236_s1 + $0xf0] sm:$0xff] }
 0x2ee   :  { %1708 = vst.msk [vmem:[%s4239_s4 + $0xa0] sm:$0xff] %vm1687_vm3, %v1643_v25  ;;  %v1580_v18 = vadd.f32 %v1411_v12, %v1195_v39  ;;  %v1075_v39 = vld [vmem:[%s4236_s1 + $0xf8] sm:$0xff] }
 0x2ef   :  { %v1646_v11 = vmul.f32 %v3630_v32, %v1581_v58  ;;  %v1204_v15 = vadd.f32 %v1140_v50, %v1075_v39  ;;  %v1203_v21 = vadd.f32 %v1139_v55, %v1074_v27  ;;  %v1083_v55 = vld [vmem:[%s4236_s1 + $0x138] sm:$0xff] }
 0x2f0   :  { %v1645_v49 = vmul.f32 %v3630_v32, %v1580_v18  ;;  %v1417_v59 = vpop.permute.xlu1 %1416 }
 0x2f1   :  { %v1415_v20 = vpop.permute.xlu0 %1414  ;;  %1711 = vst.msk [vmem:[%s4239_s4 + $0xb8] sm:$0xff] %vm1687_vm3, %v1646_v11  ;;  %v1583_v4 = vadd.f32 %v1417_v59, %v1198_v57  ;;  %v1206_v59 = vadd.f32 %v3343_v3, %v1077_v9 }
 0x2f2   :  { %1710 = vst.msk [vmem:[%s4239_s4 + $0xb0] sm:$0xff] %vm1687_vm3, %v1645_v49  ;;  %v1582_v28 = vadd.f32 %v1415_v20, %v1197_v13  ;;  %v1205_v20 = vadd.f32 %v3347_v63, %v1076_v14  ;;  %v4466_v14 = vld [vmem:[#allocation6_spill] sm:$0xff] }
 0x2f3   :  { %v1648_v23 = vmul.f32 %v3630_v32, %v1583_v4  ;;  %v1079_v4 = vld [vmem:[%s4236_s1 + $0x118] sm:$0xff] }
 0x2f4   :  { %v1647_v5 = vmul.f32 %v3630_v32, %v1582_v28  ;;  %v1421_v31 = vpop.permute.xlu1 %1420  ;;  %v1078_v28 = vld [vmem:[%s4236_s1 + $0x110] sm:$0xff] }
 0x2f5   :  { %v1419_v48 = vpop.permute.xlu0 %1418  ;;  %1713 = vst.msk [vmem:[%s4239_s4 + $0xc8] sm:$0xff] %vm1687_vm3, %v1648_v23  ;;  %v1585_v54 = vadd.f32 %v1421_v31, %v1200_v6  ;;  %v4464_v23 = vld [vmem:[#allocation26_spill] sm:$0xff]  ;;  %v1207_v6 = vadd.f32 %v3355_v19, %v1078_v28  ;;  %v1080_v31 = vld [vmem:[%s4236_s1 + $0x120] sm:$0xff]  ;;  %v4467_v28 = vld [vmem:[#allocation8_spill] sm:$0xff] }
 0x2f6   :  { %1712 = vst.msk [vmem:[%s4239_s4 + $0xc0] sm:$0xff] %vm1687_vm3, %v1647_v5  ;;  %v1584_v17 = vadd.f32 %v1419_v48, %v1199_v24  ;;  %v1208_v5 = vadd.f32 %v4464_v23, %v1079_v4  ;;  %v1088_v23 = vld [vmem:[%s4236_s1 + $0x160] sm:$0xff] }
 0x2f7   :  { %v1650_v43 = vmul.f32 %v3630_v32, %v1585_v54 }
 0x2f8   :  { %v1649_v36 = vmul.f32 %v3630_v32, %v1584_v17  ;;  %v1425_v25 = vpop.permute.xlu1 %1424 }
 0x2f9   :  { %v1423_v30 = vpop.permute.xlu0 %1422  ;;  %1715 = vst.msk [vmem:[%s4239_s4 + $0xd8] sm:$0xff] %vm1687_vm3, %v1650_v43  ;;  %v1587_v37 = vadd.f32 %v1425_v25, %v1202_v40  ;;  %v4465_v40 = vld [vmem:[#allocation5_spill] sm:$0xff]  ;;  %v1209_v43 = vadd.f32 %v3363_v46, %v1080_v31  ;;  %v1082_v25 = vld [vmem:[%s4236_s1 + $0x130] sm:$0xff] }
 0x2fa   :  { %1714 = vst.msk [vmem:[%s4239_s4 + $0xd0] sm:$0xff] %vm1687_vm3, %v1649_v36  ;;  %v1586_v10 = vadd.f32 %v1423_v30, %v1201_v26  ;;  %v1210_v26 = vadd.f32 %v4465_v40, %v1081_v35  ;;  %v1217_v35 = vadd.f32 %v3423_v61, %v1088_v23 }
 0x2fb   :  { %v1652_v29 = vmul.f32 %v3630_v32, %v1587_v37  ;;  %v1212_v37 = vadd.f32 %v3381_v56, %v1083_v55  ;;  %v1093_v55 = vld [vmem:[%s4236_s1 + $0x188] sm:$0xff] }
 0x2fc   :  { %v1651_v12 = vmul.f32 %v3630_v32, %v1586_v10  ;;  %v1429_v58 = vpop.permute.xlu1 %1428  ;;  %v1211_v10 = vadd.f32 %v3385_v62, %v1082_v25  ;;  %v1092_v25 = vld [vmem:[%s4236_s1 + $0x180] sm:$0xff] }
 0x2fd   :  { %v1427_v18 = vpop.permute.xlu0 %1426  ;;  %1717 = vst.msk [vmem:[%s4239_s4 + $0xe8] sm:$0xff] %vm1687_vm3, %v1652_v29  ;;  %v1589_v11 = vadd.f32 %v1429_v58, %v1204_v15  ;;  %v1085_v15 = vld [vmem:[%s4236_s1 + $0x148] sm:$0xff] }
 0x2fe   :  { %1716 = vst.msk [vmem:[%s4239_s4 + $0xe0] sm:$0xff] %vm1687_vm3, %v1651_v12  ;;  %v1588_v49 = vadd.f32 %v1427_v18, %v1203_v21  ;;  %v1084_v21 = vld [vmem:[%s4236_s1 + $0x140] sm:$0xff]  ;;  %v1214_v9 = vadd.f32 %v3389_v60, %v1085_v15  ;;  %v1094_v15 = vld [vmem:[%s4236_s1 + $0x190] sm:$0xff] }
 0x2ff   :  { %v1654_v57 = vmul.f32 %v3630_v32, %v1589_v11  ;;  %v1213_v11 = vadd.f32 %v4466_v14, %v1084_v21 }
 0x300   :  { %v1653_v13 = vmul.f32 %v3630_v32, %v1588_v49  ;;  %v1433_v33 = vpop.permute.xlu1 %1432 }
 0x301   :  { %v1431_v44 = vpop.permute.xlu0 %1430  ;;  %1719 = vst.msk [vmem:[%s4239_s4 + $0xf8] sm:$0xff] %vm1687_vm3, %v1654_v57  ;;  %v1591_v3 = vadd.f32 %v1433_v33, %v1206_v59  ;;  %v1086_v59 = vld [vmem:[%s4236_s1 + $0x150] sm:$0xff] }
 0x302   :  { %1718 = vst.msk [vmem:[%s4239_s4 + $0xf0] sm:$0xff] %vm1687_vm3, %v1653_v13  ;;  %v1590_v63 = vadd.f32 %v1431_v44, %v1205_v20  ;;  %v1087_v13 = vld [vmem:[%s4236_s1 + $0x158] sm:$0xff] }
 0x303   :  { %v1656_v41 = vmul.f32 %v3630_v32, %v1591_v3  ;;  %v1216_v4 = vadd.f32 %v3397_v42, %v1087_v13  ;;  %v1215_v3 = vadd.f32 %v4467_v28, %v1086_v59  ;;  %v1099_v28 = vld [vmem:[%s4236_s1 + $0x1b8] sm:$0xff] }
 0x304   :  { %v1655_v22 = vmul.f32 %v3630_v32, %v1590_v63  ;;  %v1437_v24 = vpop.permute.xlu1 %1436 }
 0x305   :  { %v1435_v1 = vpop.permute.xlu0 %1434  ;;  %1721 = vst.msk [vmem:[%s4239_s4 + $0x108] sm:$0xff] %vm1687_vm3, %v1656_v41  ;;  %v1593_v19 = vadd.f32 %v1437_v24, %v1208_v5 }
 0x306   :  { %1720 = vst.msk [vmem:[%s4239_s4 + $0x100] sm:$0xff] %vm1687_vm3, %v1655_v22  ;;  %v1592_v48 = vadd.f32 %v1435_v1, %v1207_v6  ;;  %v1089_v22 = vld [vmem:[%s4236_s1 + $0x168] sm:$0xff] }
 0x307   :  { %v1658_v54 = vmul.f32 %v3630_v32, %v1593_v19  ;;  %v1218_v1 = vadd.f32 %v3405_v51, %v1089_v22  ;;  %v1228_v22 = vadd.f32 %v3473_v52, %v1099_v28 }
 0x308   :  { %v1657_v17 = vmul.f32 %v3630_v32, %v1592_v48  ;;  %v1441_v36 = vpop.permute.xlu1 %1440  ;;  %v1091_v48 = vld [vmem:[%s4236_s1 + $0x178] sm:$0xff] }
 0x309   :  { %v1439_v50 = vpop.permute.xlu0 %1438  ;;  %1723 = vst.msk [vmem:[%s4239_s4 + $0x118] sm:$0xff] %vm1687_vm3, %v1658_v54  ;;  %v1595_v46 = vadd.f32 %v1441_v36, %v1210_v26  ;;  %v1090_v54 = vld [vmem:[%s4236_s1 + $0x170] sm:$0xff]  ;;  %v1220_v26 = vadd.f32 %v3427_v8, %v1091_v48 }
 0x30a   :  { %1722 = vst.msk [vmem:[%s4239_s4 + $0x110] sm:$0xff] %vm1687_vm3, %v1657_v17  ;;  %v1594_v30 = vadd.f32 %v1439_v50, %v1209_v43  ;;  %v1219_v43 = vadd.f32 %v3431_v38, %v1090_v54 }
 0x30b   :  { %v1660_v39 = vmul.f32 %v3630_v32, %v1595_v46 }
 0x30c   :  { %v1659_v27 = vmul.f32 %v3630_v32, %v1594_v30  ;;  %v1445_v29 = vpop.permute.xlu1 %1444 }
 0x30d   :  { %v1443_v12 = vpop.permute.xlu0 %1442  ;;  %1725 = vst.msk [vmem:[%s4239_s4 + $0x128] sm:$0xff] %vm1687_vm3, %v1660_v39  ;;  %v1597_v56 = vadd.f32 %v1445_v29, %v1212_v37  ;;  %v1222_v39 = vadd.f32 %v3435_v7, %v1093_v55 }
 0x30e   :  { %1724 = vst.msk [vmem:[%s4239_s4 + $0x120] sm:$0xff] %vm1687_vm3, %v1659_v27  ;;  %v1596_v62 = vadd.f32 %v1443_v12, %v1211_v10  ;;  %v4468_v27 = vld [vmem:[#allocation10_spill] sm:$0xff]  ;;  %v1095_v12 = vld [vmem:[%s4236_s1 + $0x198] sm:$0xff] }
 0x30f   :  { %v1662_v58 = vmul.f32 %v3630_v32, %v1597_v56  ;;  %v1221_v37 = vadd.f32 %v4468_v27, %v1092_v25 }
 0x310   :  { %v1661_v18 = vmul.f32 %v3630_v32, %v1596_v62  ;;  %v1449_v49 = vpop.permute.xlu1 %1448 }
 0x311   :  { %v1447_v57 = vpop.permute.xlu0 %1446  ;;  %1727 = vst.msk [vmem:[%s4239_s4 + $0x138] sm:$0xff] %vm1687_vm3, %v1662_v58  ;;  %v1599_v60 = vadd.f32 %v1449_v49, %v1214_v9  ;;  %v1224_v58 = vadd.f32 %v3443_v47, %v1095_v12  ;;  %v1097_v49 = vld [vmem:[%s4236_s1 + $0x1a8] sm:$0xff] }
 0x312   :  { %1726 = vst.msk [vmem:[%s4239_s4 + $0x130] sm:$0xff] %vm1687_vm3, %v1661_v18  ;;  %v1598_v20 = vadd.f32 %v1447_v57, %v1213_v11  ;;  %v4469_v18 = vld [vmem:[#allocation7_spill] sm:$0xff]  ;;  %v1096_v57 = vld [vmem:[%s4236_s1 + $0x1a0] sm:$0xff] }
 0x313   :  { %v1664_v33 = vmul.f32 %v3630_v32, %v1599_v60  ;;  %v1223_v9 = vadd.f32 %v4469_v18, %v1094_v15  ;;  %v4473_v18 = vld [vmem:[#allocation11_spill] sm:$0xff] }
 0x314   :  { %v1663_v44 = vmul.f32 %v3630_v32, %v1598_v20  ;;  %v1453_v63 = vpop.permute.xlu1 %1452  ;;  %v1226_v20 = vadd.f32 %v3451_v2, %v1097_v49 }
 0x315   :  { %v1451_v41 = vpop.permute.xlu0 %1450  ;;  %1729 = vst.msk [vmem:[%s4239_s4 + $0x148] sm:$0xff] %vm1687_vm3, %v1664_v33  ;;  %v1601_v42 = vadd.f32 %v1453_v63, %v1216_v4  ;;  %v1225_v33 = vadd.f32 %v3469_v16, %v1096_v57 }
 0x316   :  { %1728 = vst.msk [vmem:[%s4239_s4 + $0x140] sm:$0xff] %vm1687_vm3, %v1663_v44  ;;  %v1600_v5 = vadd.f32 %v1451_v41, %v1215_v3  ;;  %v1098_v3 = vld [vmem:[%s4236_s1 + $0x1b0] sm:$0xff] }
 0x317   :  { %v1666_v6 = vmul.f32 %v3630_v32, %v1601_v42  ;;  %v1227_v23 = vadd.f32 %v3477_v45, %v1098_v3 }
 0x318   :  { %v1665_v24 = vmul.f32 %v3630_v32, %v1600_v5  ;;  %v1457_v31 = vpop.permute.xlu1 %1456 }
 0x319   :  { %v1455_v19 = vpop.permute.xlu0 %1454  ;;  %1731 = vst.msk [vmem:[%s4239_s4 + $0x158] sm:$0xff] %vm1687_vm3, %v1666_v6  ;;  %v1603_v51 = vadd.f32 %v1457_v31, %v1218_v1  ;;  %v1101_v6 = vld [vmem:[%s4236_s1 + $0x1c8] sm:$0xff]  ;;  %v4470_v31 = vld [vmem:[#allocation9_spill] sm:$0xff] }
 0x31a   :  { %1730 = vst.msk [vmem:[%s4239_s4 + $0x150] sm:$0xff] %vm1687_vm3, %v1665_v24  ;;  %v1602_v61 = vadd.f32 %v1455_v19, %v1217_v35  ;;  %v1100_v24 = vld [vmem:[%s4236_s1 + $0x1c0] sm:$0xff]  ;;  %v1230_v19 = vadd.f32 %v4470_v31, %v1101_v6 }
 0x31b   :  { %v1668_v17 = vmul.f32 %v3630_v32, %v1603_v51  ;;  %v1229_v48 = vadd.f32 %v3485_v0, %v1100_v24 }
 0x31c   :  { %v1667_v40 = vmul.f32 %v3630_v32, %v1602_v61  ;;  %v1461_v36 = vpop.permute.xlu1 %1460  ;;  %v1103_v61 = vld [vmem:[%s4236_s1 + $0x1d8] sm:$0xff] }
 0x31d   :  { %v1459_v50 = vpop.permute.xlu0 %1458  ;;  %1733 = vst.msk [vmem:[%s4239_s4 + $0x168] sm:$0xff] %vm1687_vm3, %v1668_v17  ;;  %v1605_v8 = vadd.f32 %v1461_v36, %v1220_v26  ;;  %v1102_v17 = vld [vmem:[%s4236_s1 + $0x1d0] sm:$0xff]  ;;  %v4471_v36 = vld [vmem:[#allocation12_spill] sm:$0xff] }
 0x31e   :  { %1732 = vst.msk [vmem:[%s4239_s4 + $0x160] sm:$0xff] %vm1687_vm3, %v1667_v40  ;;  %v1604_v38 = vadd.f32 %v1459_v50, %v1219_v43  ;;  %v1232_v50 = vadd.f32 %v4471_v36, %v1103_v61  ;;  %v1231_v55 = vadd.f32 %v3493_v34, %v1102_v17 }
 0x31f   :  { %v1670_v46 = vmul.f32 %v3630_v32, %v1605_v8 }
 0x320   :  { %v1669_v30 = vmul.f32 %v3630_v32, %v1604_v38  ;;  %v1465_v10 = vpop.permute.xlu1 %1464  ;;  %v1105_v38 = vld [vmem:[%s4236_s1 + $0x1e8] sm:$0xff] }
 0x321   :  { %v1463_v29 = vpop.permute.xlu0 %1462  ;;  %1735 = vst.msk [vmem:[%s4239_s4 + $0x178] sm:$0xff] %vm1687_vm3, %v1670_v46  ;;  %v1607_v7 = vadd.f32 %v1465_v10, %v1222_v39  ;;  %v1104_v46 = vld [vmem:[%s4236_s1 + $0x1e0] sm:$0xff] }
 0x322   :  { %1734 = vst.msk [vmem:[%s4239_s4 + $0x170] sm:$0xff] %vm1687_vm3, %v1669_v30  ;;  %v1606_v21 = vadd.f32 %v1463_v29, %v1221_v37  ;;  %v4472_v37 = vld [vmem:[#allocation15_spill] sm:$0xff]  ;;  %v1233_v29 = vadd.f32 %v3515_v53, %v1104_v46 }
 0x323   :  { %v1672_v56 = vmul.f32 %v3630_v32, %v1607_v7  ;;  %v1234_v10 = vadd.f32 %v4472_v37, %v1105_v38  ;;  %v1107_v7 = vld [vmem:[%s4236_s1 + $0x1f8] sm:$0xff] }
 0x324   :  { %v1671_v62 = vmul.f32 %v3630_v32, %v1606_v21  ;;  %v1469_v14 = vpop.permute.xlu1 %1468  ;;  %v1106_v21 = vld [vmem:[%s4236_s1 + $0x1f0] sm:$0xff] }
 0x325   :  { %v1467_v11 = vpop.permute.xlu0 %1466  ;;  %1737 = vst.msk [vmem:[%s4239_s4 + $0x188] sm:$0xff] %vm1687_vm3, %v1672_v56  ;;  %v1609_v47 = vadd.f32 %v1469_v14, %v1224_v58  ;;  %v4474_v14 = vld [vmem:[#allocation14_spill] sm:$0xff] }
 0x326   :  { %1736 = vst.msk [vmem:[%s4239_s4 + $0x180] sm:$0xff] %vm1687_vm3, %v1671_v62  ;;  %v1608_v13 = vadd.f32 %v1467_v11, %v1223_v9  ;;  %v1236_v9 = vadd.f32 %v4473_v18, %v1107_v7  ;;  %v1235_v11 = vadd.f32 %v4474_v14, %v1106_v21 }
 0x327   :  { %v1674_v59 = vmul.f32 %v3630_v32, %v1609_v47 }
 0x328   :  { %v1673_v60 = vmul.f32 %v3630_v32, %v1608_v13  ;;  %v1473_v44 = vpop.permute.xlu1 %1472 }
 0x329   :  { %v1471_v4 = vpop.permute.xlu0 %1470  ;;  %1739 = vst.msk [vmem:[%s4239_s4 + $0x198] sm:$0xff] %vm1687_vm3, %v1674_v59  ;;  %v1611_v2 = vadd.f32 %v1473_v44, %v1226_v20 }
 0x32a   :  { %1738 = vst.msk [vmem:[%s4239_s4 + $0x190] sm:$0xff] %vm1687_vm3, %v1673_v60  ;;  %v1610_v16 = vadd.f32 %v1471_v4, %v1225_v33 }
 0x32b   :  { %v1676_v63 = vmul.f32 %v3630_v32, %v1611_v2 }
 0x32c   :  { %v1675_v41 = vmul.f32 %v3630_v32, %v1610_v16  ;;  %v1477_v42 = vpop.permute.xlu1 %1476 }
 0x32d   :  { %v1475_v5 = vpop.permute.xlu0 %1474  ;;  %1741 = vst.msk [vmem:[%s4239_s4 + $0x1a8] sm:$0xff] %vm1687_vm3, %v1676_v63  ;;  %v1613_v52 = vadd.f32 %v1477_v42, %v1228_v22 }
 0x32e   :  { %1740 = vst.msk [vmem:[%s4239_s4 + $0x1a0] sm:$0xff] %vm1687_vm3, %v1675_v41  ;;  %v1612_v45 = vadd.f32 %v1475_v5, %v1227_v23 }
 0x32f   :  { %v1678_v1 = vmul.f32 %v3630_v32, %v1613_v52 }
 0x330   :  { %v1677_v35 = vmul.f32 %v3630_v32, %v1612_v45  ;;  %v1481_v54 = vpop.permute.xlu1 %1480 }
 0x331   :  { %v1479_v51 = vpop.permute.xlu0 %1478  ;;  %1743 = vst.msk [vmem:[%s4239_s4 + $0x1b8] sm:$0xff] %vm1687_vm3, %v1678_v1  ;;  %v1615_v0 = vadd.f32 %v1481_v54, %v1230_v19 }
 0x332   :  { %1742 = vst.msk [vmem:[%s4239_s4 + $0x1b0] sm:$0xff] %vm1687_vm3, %v1677_v35  ;;  %v1614_v40 = vadd.f32 %v1479_v51, %v1229_v48 }
 0x333   :  { %v1680_v26 = vmul.f32 %v3630_v32, %v1615_v0 }
 0x334   :  { %v1679_v43 = vmul.f32 %v3630_v32, %v1614_v40  ;;  %v1485_v25 = vpop.permute.xlu1 %1484 }
 0x335   :  { %v1483_v8 = vpop.permute.xlu0 %1482  ;;  %1745 = vst.msk [vmem:[%s4239_s4 + $0x1c8] sm:$0xff] %vm1687_vm3, %v1680_v26  ;;  %v1617_v34 = vadd.f32 %v1485_v25, %v1232_v50 }
 0x336   :  { %1744 = vst.msk [vmem:[%s4239_s4 + $0x1c0] sm:$0xff] %vm1687_vm3, %v1679_v43  ;;  %v1616_v30 = vadd.f32 %v1483_v8, %v1231_v55 }
 0x337   :  { %v1682_v39 = vmul.f32 %v3630_v32, %v1617_v34 }
 0x338   :  { %v1681_v27 = vmul.f32 %v3630_v32, %v1616_v30  ;;  %v1489_v12 = vpop.permute.xlu1 %1488 }
 0x339   :  { %v1487_v15 = vpop.permute.xlu0 %1486  ;;  %1747 = vst.msk [vmem:[%s4239_s4 + $0x1d8] sm:$0xff] %vm1687_vm3, %v1682_v39  ;;  %v1619_v53 = vadd.f32 %v1489_v12, %v1234_v10 }
 0x33a   :  { %1746 = vst.msk [vmem:[%s4239_s4 + $0x1d0] sm:$0xff] %vm1687_vm3, %v1681_v27  ;;  %v1618_v56 = vadd.f32 %v1487_v15, %v1233_v29 }
 0x33b   :  { %v1684_v62 = vmul.f32 %v3630_v32, %v1619_v53 }
 0x33c   :  { %v1683_v58 = vmul.f32 %v3630_v32, %v1618_v56  ;;  %v1493_v49 = vpop.permute.xlu1 %1492 }
 0x33d   :  { %v1491_v57 = vpop.permute.xlu0 %1490  ;;  %1749 = vst.msk [vmem:[%s4239_s4 + $0x1e8] sm:$0xff] %vm1687_vm3, %v1684_v62  ;;  %v1621_v47 = vadd.f32 %v1493_v49, %v1236_v9 }
 0x33e   :  { %1748 = vst.msk [vmem:[%s4239_s4 + $0x1e0] sm:$0xff] %vm1687_vm3, %v1683_v58  ;;  %v1620_v13 = vadd.f32 %v1491_v57, %v1235_v11 }
 0x33f   :  { %v1686_v59 = vmul.f32 %v3630_v32, %v1621_v47 }
 0x340   :  { %v1685_v60 = vmul.f32 %v3630_v32, %v1620_v13 }
 0x341   :  { %1751 = vst.msk [vmem:[%s4239_s4 + $0x1f8] sm:$0xff] %vm1687_vm3, %v1686_v59 }
 0x342   :  { %1750 = vst.msk [vmem:[%s4239_s4 + $0x1f0] sm:$0xff] %vm1687_vm3, %v1685_v60 }
 0x343   :  { %1756 = vsyncpa [#allocation3], 1 }

</bundles_post_ra>
